<compile_context>
chip_gen: v7x
topology: tpu7x:2x2x1
jax: 0.10.0
libtpu: 0.0.40
codegen_flags: <defaults>
</compile_context>

<pallas_src>
import jax
import jax.numpy as jnp
from jax import lax
from jax.experimental import pallas as pl
from jax.experimental.pallas import tpu as pltpu


BT = 8  # batch tile = sublane width; raise in multiples of 8 for large-batch serving


# ----------------------------------------------------------------------------
# Fused kernel: composed conv + bias + relu + 2x2 maxpool + fc1 + fc2
# ----------------------------------------------------------------------------
def fused_kernel(x_ref, tw_ref, tb_ref, w1_ref, b1_ref, w2_ref, b2_ref, o_ref):
    # x_ref : (28, BT, 28) f32   H on outer dim, batch on sublanes, W on lanes
    # tw_ref: (5, 28, 1536) bf16 Toeplitz conv weight per ky; col = parity*768 + xh*64 + c
    # tb_ref: (1, 1536) f32      composed conv bias tiled over (parity, xh)
    # w1_ref: (12, 768, 128) bf16 fc1 weight per pooled row hh; row index = xh*64 + c
    # b1_ref: (1, 128) f32
    # w2_ref: (128, 128) bf16    fc2 weight, outputs zero-padded 62 -> 128 (lane-dense)
    # b2_ref: (1, 128) f32
    # o_ref : (BT, 128) f32
    bt = x_ref.shape[1]
    x = x_ref[...]                                                 # (28, BT, 28)

    # --- composed 5x5 conv (1 -> 64) as 5 accumulating MXU matmuls over width ---
    def conv_lhs(ky):
        # rows ordered (y, b); contraction dim K = input width (28)
        return x[ky:ky + 24].reshape(24 * bt, 28).astype(jnp.bfloat16)

    acc = jnp.dot(conv_lhs(0), tw_ref[0], preferred_element_type=jnp.float32)
    for ky in range(1, 5):
        acc = acc + jnp.dot(conv_lhs(ky), tw_ref[ky],
                            preferred_element_type=jnp.float32)    # (24*BT, 1536)

    h = jnp.maximum(acc.reshape(24, bt, 1536) + tb_ref[...], 0.0)  # bias + ReLU (f32, VPU)

    # --- 2x2 maxpool, W direction: even/odd output columns live in aligned halves ---
    xp = jnp.maximum(h[:, :, 0:768], h[:, :, 768:1536])            # (24, BT, 768)

    # --- 2x2 maxpool (H direction) fused with flatten + fc1 (one pooled row / dot) ---
    # TODO(synk): dropout1/dropout2 are identity in eval mode; training-mode RNG
    # masking (pltpu.prng_*) is not implemented.
    def fc1_row(hh):
        row = jnp.maximum(xp[2 * hh], xp[2 * hh + 1])              # (BT, 768)
        return jnp.dot(row.astype(jnp.bfloat16), w1_ref[hh],
                       preferred_element_type=jnp.float32)         # (BT, 128)

    z = fc1_row(0)
    for hh in range(1, 12):
        z = z + fc1_row(hh)
    z = z + b1_ref[...]                                            # fc1 bias (no relu)

    # --- fc2 (output padded to 128 lanes -> unmasked, lane-dense store) ---
    o_ref[...] = jnp.dot(z.astype(jnp.bfloat16), w2_ref[...],
                         preferred_element_type=jnp.float32) + b2_ref[...]


# ----------------------------------------------------------------------------
# One-time parameter preparation (hoisted out of the forward pass)
# ----------------------------------------------------------------------------
def prep_params(params):
    c1w, c1b, c2w, c2b, f1w, f1b, f2w, f2b = params

    # Compose conv1 and conv2 (no nonlinearity between them) into one exact 5x5 conv.
    w_eff = jnp.zeros((5, 5, 64), jnp.float32)                     # (ky, kx, cout)
    for ky1 in range(3):
        for kx1 in range(3):
            # sum_c1 conv1_w[c1, 0, ky1, kx1] * conv2_w[c2, c1, ky2, kx2]
            contrib = jnp.einsum('c,dckl->kld', c1w[:, 0, ky1, kx1], c2w)
            w_eff = w_eff.at[ky1:ky1 + 3, kx1:kx1 + 3, :].add(contrib)
    b_eff = jnp.einsum('c,dckl->d', c1b, c2w) + c2b                # (64,)

    # Toeplitz (im2col over width) form so the conv runs on the MXU:
    #   tw[ky, xi, parity*768 + xh*64 + c] = w_eff[ky, xi - (2*xh + parity), c]
    # Splitting output columns by x-parity makes the W-direction pool partners
    # aligned 768-lane halves (no lane shuffles in the kernel).
    t = jnp.zeros((5, 28, 2, 12, 64), jnp.float32)
    for xo in range(24):
        par, xh = xo % 2, xo // 2
        t = t.at[:, xo:xo + 5, par, xh, :].set(w_eff)
    tw = t.reshape(5, 28, 1536).astype(jnp.bfloat16)
    tb = jnp.tile(b_eff, 24).reshape(1, 1536)                      # bias depends only on c

    # fc1: permute weight columns from PyTorch's CHW flatten order to the kernel's
    # per-pooled-row layout (row index = xh*64 + c).
    w1p = (f1w.reshape(128, 64, 12, 12)                            # (out, c, hh, xh)
               .transpose(2, 3, 1, 0)                              # (hh, xh, c, out)
               .reshape(12, 768, 128)
               .astype(jnp.bfloat16))
    b1p = f1b.reshape(1, 128).astype(jnp.float32)

    # fc2: zero-pad outputs 62 -> 128 so the kernel's store is lane-dense.
    w2p = jnp.zeros((128, 128), jnp.float32).at[:, :62].set(f2w.T).astype(jnp.bfloat16)
    b2p = jnp.zeros((1, 128), jnp.float32).at[0, :62].set(f2b)
    return tw, tb, w1p, b1p, w2p, b2p


# ----------------------------------------------------------------------------
# Forward wrapper
# ----------------------------------------------------------------------------
def femnist_cnn_forward(x_nchw, prepped):
    tw, tb, w1p, b1p, w2p, b2p = prepped
    B = x_nchw.shape[0]
    bp = ((B + BT - 1) // BT) * BT                                 # pad batch to tile

    x = x_nchw.reshape(B, 28, 28)                                  # single input channel
    if bp != B:
        x = jnp.concatenate([x, jnp.zeros((bp - B, 28, 28), x.dtype)], axis=0)
    x_t = jnp.transpose(x, (1, 0, 2))                              # (28, Bp, 28)

    out = pl.pallas_call(
        fused_kernel,
        out_shape=jax.ShapeDtypeStruct((bp, 128), jnp.float32),
        grid_spec=pltpu.PrefetchScalarGridSpec(
            num_scalar_prefetch=0,
            grid=(bp // BT,),
            in_specs=[
                pl.BlockSpec((28, BT, 28), lambda i: (0, i, 0)),
                # weights/biases: constant index maps -> resident in VMEM, no re-DMA
                pl.BlockSpec((5, 28, 1536), lambda i: (0, 0, 0)),
                pl.BlockSpec((1, 1536), lambda i: (0, 0)),
                pl.BlockSpec((12, 768, 128), lambda i: (0, 0, 0)),
                pl.BlockSpec((1, 128), lambda i: (0, 0)),
                pl.BlockSpec((128, 128), lambda i: (0, 0)),
                pl.BlockSpec((1, 128), lambda i: (0, 0)),
            ],
            out_specs=pl.BlockSpec((BT, 128), lambda i: (i, 0)),
        ),
        compiler_params=pltpu.CompilerParams(
            dimension_semantics=("parallel",),        # splits batch tiles across TCs on v7x
            vmem_limit_bytes=32 * 1024 * 1024,        # ~8 MiB used; fits v5e/v6e/v7x budgets
        ),
    )(x_t, tw, tb, w1p, b1p, w2p, b2p)
    return out[:B, :62]


# ----------------------------------------------------------------------------
# Pure-JAX reference (exact PyTorch eval-mode semantics) for validation.
# ----------------------------------------------------------------------------
def reference_forward(x_nchw, params):
    c1w, c1b, c2w, c2b, f1w, f1b, f2w, f2b = params
    dn = ("NCHW", "OIHW", "NCHW")
    h = lax.conv_general_dilated(x_nchw, c1w, (1, 1), "VALID", dimension_numbers=dn)
    h = h + c1b[None, :, None, None]
    h = lax.conv_general_dilated(h, c2w, (1, 1), "VALID", dimension_numbers=dn)
    h = h + c2b[None, :, None, None]
    h = jnp.maximum(h, 0.0)
    h = lax.reduce_window(h, -jnp.inf, lax.max, (1, 1, 2, 2), (1, 1, 2, 2), "VALID")
    h = h.reshape(h.shape[0], -1)                                  # CHW flatten, like torch
    h = h @ f1w.T + f1b
    h = h @ f2w.T + f2b
    return h


if __name__ == "__main__":
    key = jax.random.PRNGKey(0)
    ks = jax.random.split(key, 9)
    scale = 0.05
    params = (
        jax.random.normal(ks[0], (32, 1, 3, 3), jnp.float32) * scale,    # conv1.weight
        jax.random.normal(ks[1], (32,), jnp.float32) * scale,            # conv1.bias
        jax.random.normal(ks[2], (64, 32, 3, 3), jnp.float32) * scale,   # conv2.weight
        jax.random.normal(ks[3], (64,), jnp.float32) * scale,            # conv2.bias
        jax.random.normal(ks[4], (128, 9216), jnp.float32) * scale,      # fc1.weight
        jax.random.normal(ks[5], (128,), jnp.float32) * scale,           # fc1.bias
        jax.random.normal(ks[6], (62, 128), jnp.float32) * scale,        # fc2.weight
        jax.random.normal(ks[7], (62,), jnp.float32) * scale,            # fc2.bias
    )
    # 28x28 input is required by fc1 (64 * 12 * 12 = 9216); batch kept small.
    x = jax.random.normal(ks[8], (2, 1, 28, 28), jnp.float32)

    prepped = prep_params(params)                                  # one-time weight prep
    out = jax.jit(femnist_cnn_forward)(x, prepped)
    out = jax.block_until_ready(out)

    ref = jax.block_until_ready(reference_forward(x, params))
    err = float(jnp.max(jnp.abs(out - ref)))
    assert out.shape == (2, 62), out.shape
    # bf16 MXU operands with f32 accumulation -> relaxed tolerance vs the f32 reference
    assert jnp.allclose(out, ref, rtol=1e-2, atol=1e-2), err
    print("KERNEL_OK")
</pallas_src>

<mosaic_0001>
module attributes {stable_mosaic.version = 11 : i64} {
  func.func @fused_kernel(%arg0: i32, %arg1: memref<28x8x28xf32, #tpu.memory_space<vmem>>, %arg2: memref<5x28x1536xbf16, #tpu.memory_space<vmem>>, %arg3: memref<1x1536xf32, #tpu.memory_space<vmem>>, %arg4: memref<12x768x128xbf16, #tpu.memory_space<vmem>>, %arg5: memref<1x128xf32, #tpu.memory_space<vmem>>, %arg6: memref<128x128xbf16, #tpu.memory_space<vmem>>, %arg7: memref<1x128xf32, #tpu.memory_space<vmem>>, %arg8: memref<8x128xf32, #tpu.memory_space<vmem>>) attributes {dimension_semantics = [#tpu.dimension_semantics<parallel>], iteration_bounds = array<i64: 1>, scalar_prefetch = 0 : i64, scratch_operands = 0 : i64, tpu.core_type = #tpu.core_type<tc>, window_params = [{transform_indices = @transform_0, window_bounds = array<i64: 28, 8, 28>}, {pipeline_mode = #tpu.pipeline_mode<synchronous>, transform_indices = @transform_1, window_bounds = array<i64: 5, 28, 1536>}, {pipeline_mode = #tpu.pipeline_mode<synchronous>, transform_indices = @transform_2, window_bounds = array<i64: 1, 1536>}, {pipeline_mode = #tpu.pipeline_mode<synchronous>, transform_indices = @transform_3, window_bounds = array<i64: 12, 768, 128>}, {pipeline_mode = #tpu.pipeline_mode<synchronous>, transform_indices = @transform_4, window_bounds = array<i64: 1, 128>}, {pipeline_mode = #tpu.pipeline_mode<synchronous>, transform_indices = @transform_5, window_bounds = array<i64: 128, 128>}, {pipeline_mode = #tpu.pipeline_mode<synchronous>, transform_indices = @transform_6, window_bounds = array<i64: 1, 128>}, {transform_indices = @transform_7, window_bounds = array<i64: 8, 128>}]} {
    %c0 = arith.constant 0 : index
    %c0_0 = arith.constant 0 : index
    %c0_1 = arith.constant 0 : index
    %0 = vector.load %arg1[%c0, %c0_0, %c0_1] : memref<28x8x28xf32, #tpu.memory_space<vmem>>, vector<28x8x28xf32>
    %1 = vector.extract_strided_slice %0 {offsets = [0, 0, 0], sizes = [24, 8, 28], strides = [1, 1, 1]} : vector<28x8x28xf32> to vector<24x8x28xf32>
    %2 = vector.shape_cast %1 : vector<24x8x28xf32> to vector<192x28xf32>
    %3 = arith.truncf %2 : vector<192x28xf32> to vector<192x28xbf16>
    %c0_2 = arith.constant 0 : index
    %c0_3 = arith.constant 0 : index
    %c0_4 = arith.constant 0 : index
    %4 = vector.load %arg2[%c0_2, %c0_3, %c0_4] : memref<5x28x1536xbf16, #tpu.memory_space<vmem>>, vector<1x28x1536xbf16>
    %5 = vector.shape_cast %4 : vector<1x28x1536xbf16> to vector<28x1536xbf16>
    %cst = arith.constant dense<0.000000e+00> : vector<192x1536xf32>
    %6 = tpu.matmul %3, %5, %cst {dimension_numbers = #tpu.dot_dimension_numbers<[1], [0], [0], [1], [0, 0, 1, 1], [], []>} : vector<192x28xbf16>, vector<28x1536xbf16>, vector<192x1536xf32> -> vector<192x1536xf32>
    %7 = vector.extract_strided_slice %0 {offsets = [1, 0, 0], sizes = [24, 8, 28], strides = [1, 1, 1]} : vector<28x8x28xf32> to vector<24x8x28xf32>
    %8 = vector.shape_cast %7 : vector<24x8x28xf32> to vector<192x28xf32>
    %9 = arith.truncf %8 : vector<192x28xf32> to vector<192x28xbf16>
    %c1 = arith.constant 1 : index
    %c0_5 = arith.constant 0 : index
    %c0_6 = arith.constant 0 : index
    %10 = vector.load %arg2[%c1, %c0_5, %c0_6] : memref<5x28x1536xbf16, #tpu.memory_space<vmem>>, vector<1x28x1536xbf16>
    %11 = vector.shape_cast %10 : vector<1x28x1536xbf16> to vector<28x1536xbf16>
    %cst_7 = arith.constant dense<0.000000e+00> : vector<192x1536xf32>
    %12 = tpu.matmul %9, %11, %cst_7 {dimension_numbers = #tpu.dot_dimension_numbers<[1], [0], [0], [1], [0, 0, 1, 1], [], []>} : vector<192x28xbf16>, vector<28x1536xbf16>, vector<192x1536xf32> -> vector<192x1536xf32>
    %13 = arith.addf %6, %12 : vector<192x1536xf32>
    %14 = vector.extract_strided_slice %0 {offsets = [2, 0, 0], sizes = [24, 8, 28], strides = [1, 1, 1]} : vector<28x8x28xf32> to vector<24x8x28xf32>
    %15 = vector.shape_cast %14 : vector<24x8x28xf32> to vector<192x28xf32>
    %16 = arith.truncf %15 : vector<192x28xf32> to vector<192x28xbf16>
    %c2 = arith.constant 2 : index
    %c0_8 = arith.constant 0 : index
    %c0_9 = arith.constant 0 : index
    %17 = vector.load %arg2[%c2, %c0_8, %c0_9] : memref<5x28x1536xbf16, #tpu.memory_space<vmem>>, vector<1x28x1536xbf16>
    %18 = vector.shape_cast %17 : vector<1x28x1536xbf16> to vector<28x1536xbf16>
    %cst_10 = arith.constant dense<0.000000e+00> : vector<192x1536xf32>
    %19 = tpu.matmul %16, %18, %cst_10 {dimension_numbers = #tpu.dot_dimension_numbers<[1], [0], [0], [1], [0, 0, 1, 1], [], []>} : vector<192x28xbf16>, vector<28x1536xbf16>, vector<192x1536xf32> -> vector<192x1536xf32>
    %20 = arith.addf %13, %19 : vector<192x1536xf32>
    %21 = vector.extract_strided_slice %0 {offsets = [3, 0, 0], sizes = [24, 8, 28], strides = [1, 1, 1]} : vector<28x8x28xf32> to vector<24x8x28xf32>
    %22 = vector.shape_cast %21 : vector<24x8x28xf32> to vector<192x28xf32>
    %23 = arith.truncf %22 : vector<192x28xf32> to vector<192x28xbf16>
    %c3 = arith.constant 3 : index
    %c0_11 = arith.constant 0 : index
    %c0_12 = arith.constant 0 : index
    %24 = vector.load %arg2[%c3, %c0_11, %c0_12] : memref<5x28x1536xbf16, #tpu.memory_space<vmem>>, vector<1x28x1536xbf16>
    %25 = vector.shape_cast %24 : vector<1x28x1536xbf16> to vector<28x1536xbf16>
    %cst_13 = arith.constant dense<0.000000e+00> : vector<192x1536xf32>
    %26 = tpu.matmul %23, %25, %cst_13 {dimension_numbers = #tpu.dot_dimension_numbers<[1], [0], [0], [1], [0, 0, 1, 1], [], []>} : vector<192x28xbf16>, vector<28x1536xbf16>, vector<192x1536xf32> -> vector<192x1536xf32>
    %27 = arith.addf %20, %26 : vector<192x1536xf32>
    %28 = vector.extract_strided_slice %0 {offsets = [4, 0, 0], sizes = [24, 8, 28], strides = [1, 1, 1]} : vector<28x8x28xf32> to vector<24x8x28xf32>
    %29 = vector.shape_cast %28 : vector<24x8x28xf32> to vector<192x28xf32>
    %30 = arith.truncf %29 : vector<192x28xf32> to vector<192x28xbf16>
    %c4 = arith.constant 4 : index
    %c0_14 = arith.constant 0 : index
    %c0_15 = arith.constant 0 : index
    %31 = vector.load %arg2[%c4, %c0_14, %c0_15] : memref<5x28x1536xbf16, #tpu.memory_space<vmem>>, vector<1x28x1536xbf16>
    %32 = vector.shape_cast %31 : vector<1x28x1536xbf16> to vector<28x1536xbf16>
    %cst_16 = arith.constant dense<0.000000e+00> : vector<192x1536xf32>
    %33 = tpu.matmul %30, %32, %cst_16 {dimension_numbers = #tpu.dot_dimension_numbers<[1], [0], [0], [1], [0, 0, 1, 1], [], []>} : vector<192x28xbf16>, vector<28x1536xbf16>, vector<192x1536xf32> -> vector<192x1536xf32>
    %34 = arith.addf %27, %33 : vector<192x1536xf32>
    %35 = vector.shape_cast %34 : vector<192x1536xf32> to vector<24x8x1536xf32>
    %c0_17 = arith.constant 0 : index
    %c0_18 = arith.constant 0 : index
    %36 = vector.load %arg3[%c0_17, %c0_18] : memref<1x1536xf32, #tpu.memory_space<vmem>>, vector<1x1536xf32>
    %37 = vector.shape_cast %36 : vector<1x1536xf32> to vector<1x1x1536xf32>
    %38 = vector.broadcast %37 : vector<1x1x1536xf32> to vector<24x8x1536xf32>
    %39 = arith.addf %35, %38 : vector<24x8x1536xf32>
    %cst_19 = arith.constant 0.000000e+00 : f32
    %40 = vector.broadcast %cst_19 : f32 to vector<24x8x1536xf32>
    %41 = arith.maximumf %39, %40 : vector<24x8x1536xf32>
    %42 = vector.extract_strided_slice %41 {offsets = [0, 0, 0], sizes = [24, 8, 768], strides = [1, 1, 1]} : vector<24x8x1536xf32> to vector<24x8x768xf32>
    %43 = vector.extract_strided_slice %41 {offsets = [0, 0, 768], sizes = [24, 8, 768], strides = [1, 1, 1]} : vector<24x8x1536xf32> to vector<24x8x768xf32>
    %44 = arith.maximumf %42, %43 : vector<24x8x768xf32>
    %45 = vector.extract_strided_slice %44 {offsets = [0, 0, 0], sizes = [1, 8, 768], strides = [1, 1, 1]} : vector<24x8x768xf32> to vector<1x8x768xf32>
    %46 = vector.shape_cast %45 : vector<1x8x768xf32> to vector<8x768xf32>
    %47 = vector.extract_strided_slice %44 {offsets = [1, 0, 0], sizes = [1, 8, 768], strides = [1, 1, 1]} : vector<24x8x768xf32> to vector<1x8x768xf32>
    %48 = vector.shape_cast %47 : vector<1x8x768xf32> to vector<8x768xf32>
    %49 = arith.maximumf %46, %48 : vector<8x768xf32>
    %50 = arith.truncf %49 : vector<8x768xf32> to vector<8x768xbf16>
    %c0_20 = arith.constant 0 : index
    %c0_21 = arith.constant 0 : index
    %c0_22 = arith.constant 0 : index
    %51 = vector.load %arg4[%c0_20, %c0_21, %c0_22] : memref<12x768x128xbf16, #tpu.memory_space<vmem>>, vector<1x768x128xbf16>
    %52 = vector.shape_cast %51 : vector<1x768x128xbf16> to vector<768x128xbf16>
    %cst_23 = arith.constant dense<0.000000e+00> : vector<8x128xf32>
    %53 = tpu.matmul %50, %52, %cst_23 {dimension_numbers = #tpu.dot_dimension_numbers<[1], [0], [0], [1], [0, 0, 1, 1], [], []>} : vector<8x768xbf16>, vector<768x128xbf16>, vector<8x128xf32> -> vector<8x128xf32>
    %54 = vector.extract_strided_slice %44 {offsets = [2, 0, 0], sizes = [1, 8, 768], strides = [1, 1, 1]} : vector<24x8x768xf32> to vector<1x8x768xf32>
    %55 = vector.shape_cast %54 : vector<1x8x768xf32> to vector<8x768xf32>
    %56 = vector.extract_strided_slice %44 {offsets = [3, 0, 0], sizes = [1, 8, 768], strides = [1, 1, 1]} : vector<24x8x768xf32> to vector<1x8x768xf32>
    %57 = vector.shape_cast %56 : vector<1x8x768xf32> to vector<8x768xf32>
    %58 = arith.maximumf %55, %57 : vector<8x768xf32>
    %59 = arith.truncf %58 : vector<8x768xf32> to vector<8x768xbf16>
    %c1_24 = arith.constant 1 : index
    %c0_25 = arith.constant 0 : index
    %c0_26 = arith.constant 0 : index
    %60 = vector.load %arg4[%c1_24, %c0_25, %c0_26] : memref<12x768x128xbf16, #tpu.memory_space<vmem>>, vector<1x768x128xbf16>
    %61 = vector.shape_cast %60 : vector<1x768x128xbf16> to vector<768x128xbf16>
    %cst_27 = arith.constant dense<0.000000e+00> : vector<8x128xf32>
    %62 = tpu.matmul %59, %61, %cst_27 {dimension_numbers = #tpu.dot_dimension_numbers<[1], [0], [0], [1], [0, 0, 1, 1], [], []>} : vector<8x768xbf16>, vector<768x128xbf16>, vector<8x128xf32> -> vector<8x128xf32>
    %63 = arith.addf %53, %62 : vector<8x128xf32>
    %64 = vector.extract_strided_slice %44 {offsets = [4, 0, 0], sizes = [1, 8, 768], strides = [1, 1, 1]} : vector<24x8x768xf32> to vector<1x8x768xf32>
    %65 = vector.shape_cast %64 : vector<1x8x768xf32> to vector<8x768xf32>
    %66 = vector.extract_strided_slice %44 {offsets = [5, 0, 0], sizes = [1, 8, 768], strides = [1, 1, 1]} : vector<24x8x768xf32> to vector<1x8x768xf32>
    %67 = vector.shape_cast %66 : vector<1x8x768xf32> to vector<8x768xf32>
    %68 = arith.maximumf %65, %67 : vector<8x768xf32>
    %69 = arith.truncf %68 : vector<8x768xf32> to vector<8x768xbf16>
    %c2_28 = arith.constant 2 : index
    %c0_29 = arith.constant 0 : index
    %c0_30 = arith.constant 0 : index
    %70 = vector.load %arg4[%c2_28, %c0_29, %c0_30] : memref<12x768x128xbf16, #tpu.memory_space<vmem>>, vector<1x768x128xbf16>
    %71 = vector.shape_cast %70 : vector<1x768x128xbf16> to vector<768x128xbf16>
    %cst_31 = arith.constant dense<0.000000e+00> : vector<8x128xf32>
    %72 = tpu.matmul %69, %71, %cst_31 {dimension_numbers = #tpu.dot_dimension_numbers<[1], [0], [0], [1], [0, 0, 1, 1], [], []>} : vector<8x768xbf16>, vector<768x128xbf16>, vector<8x128xf32> -> vector<8x128xf32>
    %73 = arith.addf %63, %72 : vector<8x128xf32>
    %74 = vector.extract_strided_slice %44 {offsets = [6, 0, 0], sizes = [1, 8, 768], strides = [1, 1, 1]} : vector<24x8x768xf32> to vector<1x8x768xf32>
    %75 = vector.shape_cast %74 : vector<1x8x768xf32> to vector<8x768xf32>
    %76 = vector.extract_strided_slice %44 {offsets = [7, 0, 0], sizes = [1, 8, 768], strides = [1, 1, 1]} : vector<24x8x768xf32> to vector<1x8x768xf32>
    %77 = vector.shape_cast %76 : vector<1x8x768xf32> to vector<8x768xf32>
    %78 = arith.maximumf %75, %77 : vector<8x768xf32>
    %79 = arith.truncf %78 : vector<8x768xf32> to vector<8x768xbf16>
    %c3_32 = arith.constant 3 : index
    %c0_33 = arith.constant 0 : index
    %c0_34 = arith.constant 0 : index
    %80 = vector.load %arg4[%c3_32, %c0_33, %c0_34] : memref<12x768x128xbf16, #tpu.memory_space<vmem>>, vector<1x768x128xbf16>
    %81 = vector.shape_cast %80 : vector<1x768x128xbf16> to vector<768x128xbf16>
    %cst_35 = arith.constant dense<0.000000e+00> : vector<8x128xf32>
    %82 = tpu.matmul %79, %81, %cst_35 {dimension_numbers = #tpu.dot_dimension_numbers<[1], [0], [0], [1], [0, 0, 1, 1], [], []>} : vector<8x768xbf16>, vector<768x128xbf16>, vector<8x128xf32> -> vector<8x128xf32>
    %83 = arith.addf %73, %82 : vector<8x128xf32>
    %84 = vector.extract_strided_slice %44 {offsets = [8, 0, 0], sizes = [1, 8, 768], strides = [1, 1, 1]} : vector<24x8x768xf32> to vector<1x8x768xf32>
    %85 = vector.shape_cast %84 : vector<1x8x768xf32> to vector<8x768xf32>
    %86 = vector.extract_strided_slice %44 {offsets = [9, 0, 0], sizes = [1, 8, 768], strides = [1, 1, 1]} : vector<24x8x768xf32> to vector<1x8x768xf32>
    %87 = vector.shape_cast %86 : vector<1x8x768xf32> to vector<8x768xf32>
    %88 = arith.maximumf %85, %87 : vector<8x768xf32>
    %89 = arith.truncf %88 : vector<8x768xf32> to vector<8x768xbf16>
    %c4_36 = arith.constant 4 : index
    %c0_37 = arith.constant 0 : index
    %c0_38 = arith.constant 0 : index
    %90 = vector.load %arg4[%c4_36, %c0_37, %c0_38] : memref<12x768x128xbf16, #tpu.memory_space<vmem>>, vector<1x768x128xbf16>
    %91 = vector.shape_cast %90 : vector<1x768x128xbf16> to vector<768x128xbf16>
    %cst_39 = arith.constant dense<0.000000e+00> : vector<8x128xf32>
    %92 = tpu.matmul %89, %91, %cst_39 {dimension_numbers = #tpu.dot_dimension_numbers<[1], [0], [0], [1], [0, 0, 1, 1], [], []>} : vector<8x768xbf16>, vector<768x128xbf16>, vector<8x128xf32> -> vector<8x128xf32>
    %93 = arith.addf %83, %92 : vector<8x128xf32>
    %94 = vector.extract_strided_slice %44 {offsets = [10, 0, 0], sizes = [1, 8, 768], strides = [1, 1, 1]} : vector<24x8x768xf32> to vector<1x8x768xf32>
    %95 = vector.shape_cast %94 : vector<1x8x768xf32> to vector<8x768xf32>
    %96 = vector.extract_strided_slice %44 {offsets = [11, 0, 0], sizes = [1, 8, 768], strides = [1, 1, 1]} : vector<24x8x768xf32> to vector<1x8x768xf32>
    %97 = vector.shape_cast %96 : vector<1x8x768xf32> to vector<8x768xf32>
    %98 = arith.maximumf %95, %97 : vector<8x768xf32>
    %99 = arith.truncf %98 : vector<8x768xf32> to vector<8x768xbf16>
    %c5 = arith.constant 5 : index
    %c0_40 = arith.constant 0 : index
    %c0_41 = arith.constant 0 : index
    %100 = vector.load %arg4[%c5, %c0_40, %c0_41] : memref<12x768x128xbf16, #tpu.memory_space<vmem>>, vector<1x768x128xbf16>
    %101 = vector.shape_cast %100 : vector<1x768x128xbf16> to vector<768x128xbf16>
    %cst_42 = arith.constant dense<0.000000e+00> : vector<8x128xf32>
    %102 = tpu.matmul %99, %101, %cst_42 {dimension_numbers = #tpu.dot_dimension_numbers<[1], [0], [0], [1], [0, 0, 1, 1], [], []>} : vector<8x768xbf16>, vector<768x128xbf16>, vector<8x128xf32> -> vector<8x128xf32>
    %103 = arith.addf %93, %102 : vector<8x128xf32>
    %104 = vector.extract_strided_slice %44 {offsets = [12, 0, 0], sizes = [1, 8, 768], strides = [1, 1, 1]} : vector<24x8x768xf32> to vector<1x8x768xf32>
    %105 = vector.shape_cast %104 : vector<1x8x768xf32> to vector<8x768xf32>
    %106 = vector.extract_strided_slice %44 {offsets = [13, 0, 0], sizes = [1, 8, 768], strides = [1, 1, 1]} : vector<24x8x768xf32> to vector<1x8x768xf32>
    %107 = vector.shape_cast %106 : vector<1x8x768xf32> to vector<8x768xf32>
    %108 = arith.maximumf %105, %107 : vector<8x768xf32>
    %109 = arith.truncf %108 : vector<8x768xf32> to vector<8x768xbf16>
    %c6 = arith.constant 6 : index
    %c0_43 = arith.constant 0 : index
    %c0_44 = arith.constant 0 : index
    %110 = vector.load %arg4[%c6, %c0_43, %c0_44] : memref<12x768x128xbf16, #tpu.memory_space<vmem>>, vector<1x768x128xbf16>
    %111 = vector.shape_cast %110 : vector<1x768x128xbf16> to vector<768x128xbf16>
    %cst_45 = arith.constant dense<0.000000e+00> : vector<8x128xf32>
    %112 = tpu.matmul %109, %111, %cst_45 {dimension_numbers = #tpu.dot_dimension_numbers<[1], [0], [0], [1], [0, 0, 1, 1], [], []>} : vector<8x768xbf16>, vector<768x128xbf16>, vector<8x128xf32> -> vector<8x128xf32>
    %113 = arith.addf %103, %112 : vector<8x128xf32>
    %114 = vector.extract_strided_slice %44 {offsets = [14, 0, 0], sizes = [1, 8, 768], strides = [1, 1, 1]} : vector<24x8x768xf32> to vector<1x8x768xf32>
    %115 = vector.shape_cast %114 : vector<1x8x768xf32> to vector<8x768xf32>
    %116 = vector.extract_strided_slice %44 {offsets = [15, 0, 0], sizes = [1, 8, 768], strides = [1, 1, 1]} : vector<24x8x768xf32> to vector<1x8x768xf32>
    %117 = vector.shape_cast %116 : vector<1x8x768xf32> to vector<8x768xf32>
    %118 = arith.maximumf %115, %117 : vector<8x768xf32>
    %119 = arith.truncf %118 : vector<8x768xf32> to vector<8x768xbf16>
    %c7 = arith.constant 7 : index
    %c0_46 = arith.constant 0 : index
    %c0_47 = arith.constant 0 : index
    %120 = vector.load %arg4[%c7, %c0_46, %c0_47] : memref<12x768x128xbf16, #tpu.memory_space<vmem>>, vector<1x768x128xbf16>
    %121 = vector.shape_cast %120 : vector<1x768x128xbf16> to vector<768x128xbf16>
    %cst_48 = arith.constant dense<0.000000e+00> : vector<8x128xf32>
    %122 = tpu.matmul %119, %121, %cst_48 {dimension_numbers = #tpu.dot_dimension_numbers<[1], [0], [0], [1], [0, 0, 1, 1], [], []>} : vector<8x768xbf16>, vector<768x128xbf16>, vector<8x128xf32> -> vector<8x128xf32>
    %123 = arith.addf %113, %122 : vector<8x128xf32>
    %124 = vector.extract_strided_slice %44 {offsets = [16, 0, 0], sizes = [1, 8, 768], strides = [1, 1, 1]} : vector<24x8x768xf32> to vector<1x8x768xf32>
    %125 = vector.shape_cast %124 : vector<1x8x768xf32> to vector<8x768xf32>
    %126 = vector.extract_strided_slice %44 {offsets = [17, 0, 0], sizes = [1, 8, 768], strides = [1, 1, 1]} : vector<24x8x768xf32> to vector<1x8x768xf32>
    %127 = vector.shape_cast %126 : vector<1x8x768xf32> to vector<8x768xf32>
    %128 = arith.maximumf %125, %127 : vector<8x768xf32>
    %129 = arith.truncf %128 : vector<8x768xf32> to vector<8x768xbf16>
    %c8 = arith.constant 8 : index
    %c0_49 = arith.constant 0 : index
    %c0_50 = arith.constant 0 : index
    %130 = vector.load %arg4[%c8, %c0_49, %c0_50] : memref<12x768x128xbf16, #tpu.memory_space<vmem>>, vector<1x768x128xbf16>
    %131 = vector.shape_cast %130 : vector<1x768x128xbf16> to vector<768x128xbf16>
    %cst_51 = arith.constant dense<0.000000e+00> : vector<8x128xf32>
    %132 = tpu.matmul %129, %131, %cst_51 {dimension_numbers = #tpu.dot_dimension_numbers<[1], [0], [0], [1], [0, 0, 1, 1], [], []>} : vector<8x768xbf16>, vector<768x128xbf16>, vector<8x128xf32> -> vector<8x128xf32>
    %133 = arith.addf %123, %132 : vector<8x128xf32>
    %134 = vector.extract_strided_slice %44 {offsets = [18, 0, 0], sizes = [1, 8, 768], strides = [1, 1, 1]} : vector<24x8x768xf32> to vector<1x8x768xf32>
    %135 = vector.shape_cast %134 : vector<1x8x768xf32> to vector<8x768xf32>
    %136 = vector.extract_strided_slice %44 {offsets = [19, 0, 0], sizes = [1, 8, 768], strides = [1, 1, 1]} : vector<24x8x768xf32> to vector<1x8x768xf32>
    %137 = vector.shape_cast %136 : vector<1x8x768xf32> to vector<8x768xf32>
    %138 = arith.maximumf %135, %137 : vector<8x768xf32>
    %139 = arith.truncf %138 : vector<8x768xf32> to vector<8x768xbf16>
    %c9 = arith.constant 9 : index
    %c0_52 = arith.constant 0 : index
    %c0_53 = arith.constant 0 : index
    %140 = vector.load %arg4[%c9, %c0_52, %c0_53] : memref<12x768x128xbf16, #tpu.memory_space<vmem>>, vector<1x768x128xbf16>
    %141 = vector.shape_cast %140 : vector<1x768x128xbf16> to vector<768x128xbf16>
    %cst_54 = arith.constant dense<0.000000e+00> : vector<8x128xf32>
    %142 = tpu.matmul %139, %141, %cst_54 {dimension_numbers = #tpu.dot_dimension_numbers<[1], [0], [0], [1], [0, 0, 1, 1], [], []>} : vector<8x768xbf16>, vector<768x128xbf16>, vector<8x128xf32> -> vector<8x128xf32>
    %143 = arith.addf %133, %142 : vector<8x128xf32>
    %144 = vector.extract_strided_slice %44 {offsets = [20, 0, 0], sizes = [1, 8, 768], strides = [1, 1, 1]} : vector<24x8x768xf32> to vector<1x8x768xf32>
    %145 = vector.shape_cast %144 : vector<1x8x768xf32> to vector<8x768xf32>
    %146 = vector.extract_strided_slice %44 {offsets = [21, 0, 0], sizes = [1, 8, 768], strides = [1, 1, 1]} : vector<24x8x768xf32> to vector<1x8x768xf32>
    %147 = vector.shape_cast %146 : vector<1x8x768xf32> to vector<8x768xf32>
    %148 = arith.maximumf %145, %147 : vector<8x768xf32>
    %149 = arith.truncf %148 : vector<8x768xf32> to vector<8x768xbf16>
    %c10 = arith.constant 10 : index
    %c0_55 = arith.constant 0 : index
    %c0_56 = arith.constant 0 : index
    %150 = vector.load %arg4[%c10, %c0_55, %c0_56] : memref<12x768x128xbf16, #tpu.memory_space<vmem>>, vector<1x768x128xbf16>
    %151 = vector.shape_cast %150 : vector<1x768x128xbf16> to vector<768x128xbf16>
    %cst_57 = arith.constant dense<0.000000e+00> : vector<8x128xf32>
    %152 = tpu.matmul %149, %151, %cst_57 {dimension_numbers = #tpu.dot_dimension_numbers<[1], [0], [0], [1], [0, 0, 1, 1], [], []>} : vector<8x768xbf16>, vector<768x128xbf16>, vector<8x128xf32> -> vector<8x128xf32>
    %153 = arith.addf %143, %152 : vector<8x128xf32>
    %154 = vector.extract_strided_slice %44 {offsets = [22, 0, 0], sizes = [1, 8, 768], strides = [1, 1, 1]} : vector<24x8x768xf32> to vector<1x8x768xf32>
    %155 = vector.shape_cast %154 : vector<1x8x768xf32> to vector<8x768xf32>
    %156 = vector.extract_strided_slice %44 {offsets = [23, 0, 0], sizes = [1, 8, 768], strides = [1, 1, 1]} : vector<24x8x768xf32> to vector<1x8x768xf32>
    %157 = vector.shape_cast %156 : vector<1x8x768xf32> to vector<8x768xf32>
    %158 = arith.maximumf %155, %157 : vector<8x768xf32>
    %159 = arith.truncf %158 : vector<8x768xf32> to vector<8x768xbf16>
    %c11 = arith.constant 11 : index
    %c0_58 = arith.constant 0 : index
    %c0_59 = arith.constant 0 : index
    %160 = vector.load %arg4[%c11, %c0_58, %c0_59] : memref<12x768x128xbf16, #tpu.memory_space<vmem>>, vector<1x768x128xbf16>
    %161 = vector.shape_cast %160 : vector<1x768x128xbf16> to vector<768x128xbf16>
    %cst_60 = arith.constant dense<0.000000e+00> : vector<8x128xf32>
    %162 = tpu.matmul %159, %161, %cst_60 {dimension_numbers = #tpu.dot_dimension_numbers<[1], [0], [0], [1], [0, 0, 1, 1], [], []>} : vector<8x768xbf16>, vector<768x128xbf16>, vector<8x128xf32> -> vector<8x128xf32>
    %163 = arith.addf %153, %162 : vector<8x128xf32>
    %c0_61 = arith.constant 0 : index
    %c0_62 = arith.constant 0 : index
    %164 = vector.load %arg5[%c0_61, %c0_62] : memref<1x128xf32, #tpu.memory_space<vmem>>, vector<1x128xf32>
    %165 = vector.broadcast %164 : vector<1x128xf32> to vector<8x128xf32>
    %166 = arith.addf %163, %165 : vector<8x128xf32>
    %167 = arith.truncf %166 : vector<8x128xf32> to vector<8x128xbf16>
    %c0_63 = arith.constant 0 : index
    %c0_64 = arith.constant 0 : index
    %168 = vector.load %arg6[%c0_63, %c0_64] : memref<128x128xbf16, #tpu.memory_space<vmem>>, vector<128x128xbf16>
    %cst_65 = arith.constant dense<0.000000e+00> : vector<8x128xf32>
    %169 = tpu.matmul %167, %168, %cst_65 {dimension_numbers = #tpu.dot_dimension_numbers<[1], [0], [0], [1], [0, 0, 1, 1], [], []>} : vector<8x128xbf16>, vector<128x128xbf16>, vector<8x128xf32> -> vector<8x128xf32>
    %c0_66 = arith.constant 0 : index
    %c0_67 = arith.constant 0 : index
    %170 = vector.load %arg7[%c0_66, %c0_67] : memref<1x128xf32, #tpu.memory_space<vmem>>, vector<1x128xf32>
    %171 = vector.broadcast %170 : vector<1x128xf32> to vector<8x128xf32>
    %172 = arith.addf %169, %171 : vector<8x128xf32>
    %c0_68 = arith.constant 0 : index
    %c0_69 = arith.constant 0 : index
    %173 = vector.load %arg8[%c0_68, %c0_69] : memref<8x128xf32, #tpu.memory_space<vmem>>, vector<8x128xf32>
    tpu.vector_store %arg8[%c0_68, %c0_69], %172 {strides = array<i32>} : memref<8x128xf32, #tpu.memory_space<vmem>>, vector<8x128xf32>,
    return
  }
  func.func @transform_0(%arg0: i32) -> (i32, i32, i32) {
    %c0_i32 = arith.constant 0 : i32
    %c0_i32_0 = arith.constant 0 : i32
    %c0_i32_1 = arith.constant 0 : i32
    return %c0_i32, %arg0, %c0_i32_0 : i32, i32, i32
  }
  func.func @transform_1(%arg0: i32) -> (i32, i32, i32) {
    %c0_i32 = arith.constant 0 : i32
    %c0_i32_0 = arith.constant 0 : i32
    %c0_i32_1 = arith.constant 0 : i32
    %c0_i32_2 = arith.constant 0 : i32
    return %c0_i32, %c0_i32_0, %c0_i32_1 : i32, i32, i32
  }
  func.func @transform_2(%arg0: i32) -> (i32, i32) {
    %c0_i32 = arith.constant 0 : i32
    %c0_i32_0 = arith.constant 0 : i32
    %c0_i32_1 = arith.constant 0 : i32
    return %c0_i32, %c0_i32_0 : i32, i32
  }
  func.func @transform_3(%arg0: i32) -> (i32, i32, i32) {
    %c0_i32 = arith.constant 0 : i32
    %c0_i32_0 = arith.constant 0 : i32
    %c0_i32_1 = arith.constant 0 : i32
    %c0_i32_2 = arith.constant 0 : i32
    return %c0_i32, %c0_i32_0, %c0_i32_1 : i32, i32, i32
  }
  func.func @transform_4(%arg0: i32) -> (i32, i32) {
    %c0_i32 = arith.constant 0 : i32
    %c0_i32_0 = arith.constant 0 : i32
    %c0_i32_1 = arith.constant 0 : i32
    return %c0_i32, %c0_i32_0 : i32, i32
  }
  func.func @transform_5(%arg0: i32) -> (i32, i32) {
    %c0_i32 = arith.constant 0 : i32
    %c0_i32_0 = arith.constant 0 : i32
    %c0_i32_1 = arith.constant 0 : i32
    return %c0_i32, %c0_i32_0 : i32, i32
  }
  func.func @transform_6(%arg0: i32) -> (i32, i32) {
    %c0_i32 = arith.constant 0 : i32
    %c0_i32_0 = arith.constant 0 : i32
    %c0_i32_1 = arith.constant 0 : i32
    return %c0_i32, %c0_i32_0 : i32, i32
  }
  func.func @transform_7(%arg0: i32) -> (i32, i32) {
    %c0_i32 = arith.constant 0 : i32
    %c0_i32_0 = arith.constant 0 : i32
    return %arg0, %c0_i32 : i32, i32
  }
}

</mosaic_0001>

<bundles_post_ra>
// kernel: femnist_cnn_forward.1
= control target key start
LH: loop header
LB: loop body
LE: loop exit
PB: predicated region body
PF: predicated region fallthrough
CT: control target
= control target key end

     0   :  { %12 = vsyncpa [#allocation3], 0  ;;  %s20891_s0 = inlined_call_operand.vmem [shape: f32[28,8,28], index: 0, kind: input, shape index: {}]   ;;  %s20892_s1 = inlined_call_operand.hbm [shape: bf16[5,28,1536], index: 1, kind: input, shape index: {}]   ;;  %s20893_s2 = inlined_call_operand.hbm [shape: f32[1,1536], index: 2, kind: input, shape index: {}]   ;;  %s20894_s3 = inlined_call_operand.hbm [shape: bf16[12,768,128], index: 3, kind: input, shape index: {}]   ;;  %s20895_s4 = inlined_call_operand.hbm [shape: f32[1,128], index: 4, kind: input, shape index: {}]   ;;  %s20896_s5 = inlined_call_operand.hbm [shape: bf16[128,128], index: 5, kind: input, shape index: {}]   ;;  %s20897_s6 = inlined_call_operand.hbm [shape: f32[1,128], index: 6, kind: input, shape index: {}]   ;;  %s20898_s7 = inlined_call_operand.vmem [shape: f32[8,128], index: 7, kind: output, shape index: {}]  }
   0x1   :  { %13 = vsyncpa [#allocation5], 0 }
   0x2   :  { %14 = vsyncpa [#allocation8], 0 }
   0x3   :  { %15 = vsyncpa [#allocation11], 0  ;;  %s17657_s24 = smov [#allocation4]   ;;  %s17658_s26 = smov [#allocation7]  }
   0x4   :  { %s36_s25 = sshll.u32 %s17657_s24, 4  ;;  %s58_s27 = sshll.u32 %s17658_s26, 4  ;;  %s37_s25 = int_to_ptr.vmem [resolvable:$true] %s36_s25  ;;  %s59_s27 = int_to_ptr.vmem [resolvable:$true] %s58_s27 }
   0x5   :  { %s17517_s30 = scalar_lea.hbm %s20893_s2, 192 }
   0x6   :  { %p17518_p0 = scmp.ne.s32.totalorder %s20893_s2, %s17517_s30  ;;  %p17521_p1 = scmp.lt.u32.totalorder %s17517_s30, %s20893_s2 }
   0x8   :  { %p17523_p2 = pnand %p17521_p1, %p17518_p0 }
   0xa   :  { %17526 = shalt.err (!%p17523_p2)
}
   0xb   :  { %s17527_s12 = scalar_lea.vmem %s37_s25, 192  ;;  %p17532_p4 = scmp.lt.s32.totalorder %s37_s25, %s37_s25 }
   0xc   :  { %p17528_p3 = scmp.ne.s32.totalorder %s37_s25, %s17527_s12  ;;  %p17533_p5 = scmp.lt.s32.totalorder %s17527_s12, %s17527_s12 }
   0xe   :  { %p17534_p6 = por %p17533_p5, %p17532_p4 }
  0x10   :  { %p17535_p7 = pnand %p17534_p6, %p17528_p3 }
  0x12   :  { %17538 = shalt.err (!%p17535_p7)
}
  0x13   :  { %39 = dma.hbm_to_vmem [thread:$0]  %s20893_s2, 192, %s37_s25, [#allocation5]  }
  0x14   :  { %s17539_s17 = scalar_lea.hbm %s20895_s4, 16 }
  0x15   :  { %p17540_p8 = scmp.ne.s32.totalorder %s20895_s4, %s17539_s17  ;;  %p17543_p9 = scmp.lt.u32.totalorder %s17539_s17, %s20895_s4 }
  0x17   :  { %p17545_p10 = pnand %p17543_p9, %p17540_p8 }
  0x19   :  { %17548 = shalt.err (!%p17545_p10)
}
  0x1a   :  { %s17549_s22 = scalar_lea.vmem %s59_s27, 16  ;;  %s17553_s23 = scalar_lea.vmem %s59_s27, 32 }
  0x1b   :  { %p17550_p11 = scmp.ne.s32.totalorder %s59_s27, %s17549_s22  ;;  %p17554_p12 = scmp.lt.s32.totalorder %s59_s27, %s59_s27 }
  0x1c   :  { %p17555_p13 = scmp.lt.s32.totalorder %s17553_s23, %s17549_s22 }
  0x1e   :  { %p17556_p0 = por %p17555_p13, %p17554_p12 }
  0x20   :  { %p17557_p1 = pnand %p17556_p0, %p17550_p11 }
  0x22   :  { %17560 = shalt.err (!%p17557_p1)
}
  0x23   :  { %61 = dma.hbm_to_vmem [thread:$0]  %s20895_s4, 16, %s59_s27, [#allocation8]  }
  0x24   :  { %s17659_s25 = smov [#allocation2]   ;;  %s17561_s30 = scalar_lea.hbm %s20892_s1, 15360 }
  0x25   :  { %s23_s26 = sshll.u32 %s17659_s25, 4  ;;  %p17562_p2 = scmp.ne.s32.totalorder %s20892_s1, %s17561_s30  ;;  %s24_s26 = int_to_ptr.vmem [resolvable:$true] %s23_s26 }
  0x26   :  { %p17565_p3 = scmp.lt.u32.totalorder %s17561_s30, %s20892_s1 }
  0x28   :  { %p17567_p4 = pnand %p17565_p3, %p17562_p2 }
  0x2a   :  { %17570 = shalt.err (!%p17567_p4)
}
  0x2b   :  { %s17571_s12 = scalar_lea.vmem %s24_s26, 15360  ;;  %p17576_p6 = scmp.lt.s32.totalorder %s24_s26, %s24_s26 }
  0x2c   :  { %p17572_p5 = scmp.ne.s32.totalorder %s24_s26, %s17571_s12  ;;  %p17577_p7 = scmp.lt.s32.totalorder %s17571_s12, %s17571_s12 }
  0x2e   :  { %p17578_p8 = por %p17577_p7, %p17576_p6 }
  0x30   :  { %p17579_p9 = pnand %p17578_p8, %p17572_p5 }
  0x32   :  { %17582 = shalt.err (!%p17579_p9)
}
  0x33   :  { %s17660_s4 = smov 768   ;;  %s17661_s27 = smov 48  }
  0x34   :  { %29 = dma.hbm_to_vmem [thread:$0]  %s20892_s1, 15360, %s24_s26, [#allocation3], %s17660_s4, %s17660_s4, %s17661_s27  }
  0x35   :  { %s17662_s15 = smov [#allocation6]   ;;  %s17583_s19 = scalar_lea.hbm %s20894_s3, 73728 }
  0x36   :  { %s45_s16 = sshll.u32 %s17662_s15, 4  ;;  %p17584_p10 = scmp.ne.s32.totalorder %s20894_s3, %s17583_s19  ;;  %s46_s16 = int_to_ptr.vmem [resolvable:$true] %s45_s16 }
  0x37   :  { %p17587_p11 = scmp.lt.u32.totalorder %s17583_s19, %s20894_s3 }
  0x39   :  { %p17589_p12 = pnand %p17587_p11, %p17584_p10 }
  0x3b   :  { %17592 = shalt.err (!%p17589_p12)
}
  0x3c   :  { %s17593_s2 = scalar_lea.vmem %s46_s16, 73728  ;;  %p17598_p0 = scmp.lt.s32.totalorder %s46_s16, %s46_s16 }
  0x3d   :  { %p17594_p13 = scmp.ne.s32.totalorder %s46_s16, %s17593_s2  ;;  %p17599_p1 = scmp.lt.s32.totalorder %s17593_s2, %s17593_s2 }
  0x3f   :  { %p17600_p2 = por %p17599_p1, %p17598_p0 }
  0x41   :  { %p17601_p3 = pnand %p17600_p2, %p17594_p13 }
  0x43   :  { %17604 = shalt.err (!%p17601_p3)
}
  0x44   :  { %s17663_s1 = smov 64   ;;  %s17664_s24 = smov 4  }
  0x45   :  { %51 = dma.hbm_to_vmem [thread:$0]  %s20894_s3, 73728, %s46_s16, [#allocation5], %s17663_s1, %s17663_s1, %s17664_s24  }
  0x46   :  { %s17665_s28 = smov [#allocation9]   ;;  %s17666_s30 = smov [#allocation10]  }
  0x47   :  { %s67_s29 = sshll.u32 %s17665_s28, 4  ;;  %s80_s8 = sshll.u32 %s17666_s30, 4  ;;  %s68_s29 = int_to_ptr.vmem [resolvable:$true] %s67_s29  ;;  %s81_s8 = int_to_ptr.vmem [resolvable:$true] %s80_s8 }
  0x48   :  { %s17605_s11 = scalar_lea.hbm %s20896_s5, 1024 }
  0x49   :  { %p17606_p4 = scmp.ne.s32.totalorder %s20896_s5, %s17605_s11  ;;  %p17609_p5 = scmp.lt.u32.totalorder %s17605_s11, %s20896_s5 }
  0x4b   :  { %p17611_p6 = pnand %p17609_p5, %p17606_p4 }
  0x4d   :  { %17614 = shalt.err (!%p17611_p6)
}
  0x4e   :  { %s17615_s3 = scalar_lea.vmem %s68_s29, 1024  ;;  %p17620_p8 = scmp.lt.s32.totalorder %s68_s29, %s68_s29 }
  0x4f   :  { %p17616_p7 = scmp.ne.s32.totalorder %s68_s29, %s17615_s3  ;;  %p17621_p9 = scmp.lt.s32.totalorder %s17615_s3, %s17615_s3 }
  0x51   :  { %p17622_p10 = por %p17621_p9, %p17620_p8 }
  0x53   :  { %p17623_p11 = pnand %p17622_p10, %p17616_p7 }
  0x55   :  { %17626 = shalt.err (!%p17623_p11)
}
  0x56   :  { %73 = dma.hbm_to_vmem [thread:$0]  %s20896_s5, 1024, %s68_s29, [#allocation8], %s17663_s1, %s17663_s1, %s17664_s24  }
  0x57   :  { %s17627_s18 = scalar_lea.hbm %s20897_s6, 16 }
  0x58   :  { %p17628_p12 = scmp.ne.s32.totalorder %s20897_s6, %s17627_s18  ;;  %p17631_p13 = scmp.lt.u32.totalorder %s17627_s18, %s20897_s6 }
  0x5a   :  { %p17633_p0 = pnand %p17631_p13, %p17628_p12 }
  0x5c   :  { %17636 = shalt.err (!%p17633_p0)
}
  0x5d   :  { %s17637_s23 = scalar_lea.vmem %s81_s8, 16  ;;  %s17641_s2 = scalar_lea.vmem %s81_s8, 32 }
  0x5e   :  { %p17638_p1 = scmp.ne.s32.totalorder %s81_s8, %s17637_s23  ;;  %p17642_p2 = scmp.lt.s32.totalorder %s81_s8, %s81_s8 }
  0x5f   :  { %p17643_p3 = scmp.lt.s32.totalorder %s17641_s2, %s17637_s23 }
  0x61   :  { %p17644_p4 = por %p17643_p3, %p17642_p2 }
  0x63   :  { %p17645_p5 = pnand %p17644_p4, %p17638_p1 }
  0x65   :  { %17648 = shalt.err (!%p17645_p5)
}
  0x66   :  { %83 = dma.hbm_to_vmem [thread:$0]  %s20897_s6, 16, %s81_s8, [#allocation11]  }
  0x67   :  { %17649 = dma.done.wait [#allocation3], 15360  }
  0x68   :  { %17650 = vsyncadd [#allocation3], 4294951936 }
  0x69   :  { %17651 = dma.done.wait [#allocation5], 73920  }
  0x6a   :  { %17652 = vsyncadd [#allocation5], 4294893376 }
  0x6b   :  { %17653 = dma.done.wait [#allocation8], 1040  }
  0x6c   :  { %17654 = vsyncadd [#allocation8], 4294966256 }
  0x6d   :  { %17655 = dma.done.wait [#allocation11], 16  }
  0x6e   :  { %17656 = vsyncadd [#allocation11], 4294967280  ;;  %v20899_v0 = vmov 0   ;;  %v16751_v1 = vld [vmem:[#allocation2 + $0xc4] ss:$48 sps:$4 sm:$0xff]   ;;  %vm349_vm0 = vcmask 1045504  }
  0x6f   :  { %418 = vmatprep.mubr.bf16.mxu0 %v20899_v0  ;;  %518 = vmatprep.mubr.bf16.mxu1 %v20899_v0  ;;  %v16753_v2 = vld [vmem:[#allocation2 + $0xc0] ss:$48 sps:$4 sm:$0xff]   ;;  %v16754_v3 = vld [vmem:[#allocation2 + $0x124] ss:$48 sps:$4 sm:$0x3f]   ;;  %v104_v5 = vld [vmem:[%s20891_s0 + $0x8] sm:$0xff] }
  0x70   :  { %386 = vmatprep.subr.bf16.mxu0 %v16751_v1  ;;  %15582 = vmatprep.subr.bf16.mxu1 %v16751_v1  ;;  %v16756_v4 = vld [vmem:[#allocation2 + $0x120] ss:$48 sps:$4 sm:$0x3f]   ;;  %v106_v7 = vld [vmem:[%s20891_s0 + $0x18] sm:$0xff]  ;;  %v17802_v10 = vld [vmem:[%s20891_s0 + $0x28] sm:$0xff]  ;;  %vm312_vm1 = vcmask 228352  }
  0x71   :  { %387 = vmatpush1.bf16.msra.mxu0 %v16753_v2  ;;  %15584 = vmatpush1.bf16.msra.mxu1 %v16753_v2  ;;  %v105_v6 = vld [vmem:[%s20891_s0 + $0x10] sm:$0xff]  ;;  %v351_v8 = vsel %vm349_vm0, %v16756_v4, 0  ;;  %v107_v9 = vld [vmem:[%s20891_s0 + $0x20] sm:$0xff]  ;;  %v17814_v13 = vld [vmem:[%s20891_s0 + $0x38] sm:$0xff]  ;;  %vm17669_vm2 = vmmov 0  }
  0x72   :  { %13689 = vmatprep.subr.msk.bf16.mxu0 %vm349_vm0, %v16754_v3  ;;  %15583 = vmatprep.subr.msk.bf16.mxu1 %vm349_vm0, %v16754_v3  ;;  %v17807_v11 = vld [vmem:[%s20891_s0 + $0x30] sm:$0xff]  ;;  %v17809_v12 = vpack.c.bf16 %v106_v7, %v105_v6  ;;  %v17819_v14 = vld [vmem:[%s20891_s0 + $0x40] sm:$0xff]  ;;  %v17824_v15 = vld [vmem:[%s20891_s0 + $0x48] sm:$0xff]  ;;  %v17827_v16 = vpack.c.bf16 %v17802_v10, %v107_v9  ;;  %v17852_v22 = vpack.c.bf16 %v105_v6, %v104_v5 }
  0x73   :  { %v17832_v17 = vld [vmem:[%s20891_s0 + $0x50] sm:$0xff]  ;;  %v17837_v18 = vld [vmem:[%s20891_s0 + $0x58] sm:$0xff]  ;;  %v17842_v19 = vld [vmem:[%s20891_s0 + $0x60] sm:$0xff]  ;;  %v17846_v20 = vpack.c.bf16 %v17814_v13, %v17807_v11  ;;  %v17850_v21 = vpack.c.bf16 %v17824_v15, %v17819_v14  ;;  %v17938_v47 = vpack.c.bf16 %v107_v9, %v106_v7  ;;  %v17954_v57 = vpack.c.bf16 %v17807_v11, %v17802_v10 }
  0x74   :  { %v17857_v23 = vld [vmem:[%s20891_s0 + $0x68] sm:$0xff]  ;;  %v17862_v24 = vld [vmem:[%s20891_s0 + $0x70] sm:$0xff]  ;;  %v17867_v25 = vld [vmem:[%s20891_s0 + $0x78] sm:$0xff]  ;;  %v17871_v26 = vpack.c.bf16 %v17837_v18, %v17832_v17  ;;  %v17964_v62 = vpack.c.bf16 %v17819_v14, %v17814_v13  ;;  %v17976_v1 = vpack.c.bf16 %v17832_v17, %v17824_v15  ;;  %v17986_v2 = vpack.c.bf16 %v17842_v19, %v17837_v18 }
  0x75   :  { %389 = vmatpush1.bf16.msra.mxu0 %v351_v8  ;;  %15585 = vmatpush1.bf16.msra.mxu1 %v351_v8  ;;  %v17876_v27 = vld [vmem:[%s20891_s0 + $0x80] sm:$0xff]  ;;  %v17881_v28 = vld [vmem:[%s20891_s0 + $0x88] sm:$0xff]  ;;  %v17886_v29 = vld [vmem:[%s20891_s0 + $0x90] sm:$0xff]  ;;  %v17890_v30 = vpack.c.bf16 %v17857_v23, %v17842_v19  ;;  %v17894_v31 = vpack.c.bf16 %v17867_v25, %v17862_v24  ;;  %v17996_v3 = vpack.c.bf16 %v17862_v24, %v17857_v23 }
  0x76   :  { %v17899_v32 = vld [vmem:[%s20891_s0 + $0x98] sm:$0xff]  ;;  %v17904_v33 = vld [vmem:[%s20891_s0 + $0xa0] sm:$0xff]  ;;  %v124_v34 = vld [vmem:[%s20891_s0 + $0xa8] sm:$0xff]  ;;  %v17911_v35 = vpack.c.bf16 %v17881_v28, %v17876_v27  ;;  %v18007_v6 = vpack.c.bf16 %v17876_v27, %v17867_v25  ;;  %v18017_v7 = vpack.c.bf16 %v17886_v29, %v17881_v28 }
  0x77   :  { %v125_v36 = vld [vmem:[%s20891_s0 + $0xb0] sm:$0xff]  ;;  %v126_v37 = vld [vmem:[%s20891_s0 + $0xb8] sm:$0xff]  ;;  %v17921_v38 = vpack.c.bf16 %v17899_v32, %v17886_v29  ;;  %v17924_v39 = vpack.c.bf16 %v124_v34, %v17904_v33  ;;  %v127_v42 = vld [vmem:[%s20891_s0 + $0xc0] sm:$0xff]  ;;  %v18027_v8 = vpack.c.bf16 %v17904_v33, %v17899_v32 }
  0x78   :  { %13690 = vmatmul.mubr.msk.bf16.vlgmr.msra.gmra.mrb[0].mxu0 %vm312_vm1, %v17852_v22  ;;  %v17928_v40 = vpack.c.bf16 %v126_v37, %v125_v36  ;;  %v17930_v41 = vpack.c.bf16 %v125_v36, %v124_v34  ;;  %v16757_v43 = vld [vmem:[#allocation2 + $0xc8] ss:$48 sps:$4 sm:$0xff]   ;;  %v16759_v44 = vld [vmem:[#allocation2 + $0xcc] ss:$48 sps:$4 sm:$0xff]   ;;  %v16760_v45 = vld [vmem:[#allocation2 + $0xd0] ss:$48 sps:$4 sm:$0xff]   ;;  %v17942_v51 = vpack.c.bf16 %v127_v42, %v126_v37 }
  0x79   :  { %428 = vmatprep.mubr.bf16.mxu0 %v20899_v0  ;;  %v16762_v46 = vld [vmem:[#allocation2 + $0xd4] ss:$48 sps:$4 sm:$0xff]   ;;  %539 = vmatprep.subr.bf16.mxu1 %v16759_v44  ;;  %v16763_v48 = vld [vmem:[#allocation2 + $0x12c] ss:$48 sps:$4 sm:$0x3f]  }
  0x7a   :  { %13700 = vmatmul.mubr.msk.bf16.vlgmr.msra.gmra.mrb[0].mxu1 %vm312_vm1, %v17930_v41  ;;  %692 = vmatprep.subr.bf16.mxu0 %v16762_v46  ;;  %v16765_v49 = vld [vmem:[#allocation2 + $0x128] ss:$48 sps:$4 sm:$0x3f]   ;;  %v16768_v50 = vld [vmem:[#allocation2 + $0xdc] ss:$48 sps:$4 sm:$0xff]  }
  0x7b   :  { %528 = vmatprep.mubr.bf16.mxu1 %v20899_v0  ;;  %540 = vmatpush1.bf16.msra.mxu1 %v16757_v43  ;;  %v357_v52 = vsel %vm349_vm0, %v16765_v49, 0  ;;  %v16769_v53 = vld [vmem:[#allocation2 + $0x134] ss:$48 sps:$4 sm:$0x3f]   ;;  %v16766_v58 = vld [vmem:[#allocation2 + $0xd8] ss:$48 sps:$4 sm:$0xff]  }
  0x7c   :  { %693 = vmatpush1.bf16.msra.mxu0 %v16760_v45  ;;  %13702 = vmatprep.subr.msk.bf16.mxu1 %vm349_vm0, %v16763_v48  ;;  %v16771_v54 = vld [vmem:[#allocation2 + $0x130] ss:$48 sps:$4 sm:$0x3f]   ;;  %v16777_v56 = vld [vmem:[#allocation2 + $0xe4] ss:$48 sps:$4 sm:$0xff]  }
  0x7d   :  { %13715 = vmatprep.subr.msk.bf16.mxu0 %vm349_vm0, %v16769_v53  ;;  %v363_v55 = vsel %vm349_vm0, %v16771_v54, 0  ;;  %v16772_v59 = vld [vmem:[#allocation2 + $0x13c] ss:$48 sps:$4 sm:$0x3f]   ;;  %v16775_v9 = vld [vmem:[#allocation2 + $0xe0] ss:$48 sps:$4 sm:$0xff]  }
  0x7e   :  { %v16774_v60 = vld [vmem:[#allocation2 + $0x138] ss:$48 sps:$4 sm:$0x3f]   ;;  %v16780_v61 = vld [vmem:[#allocation2 + $0xec] ss:$48 sps:$4 sm:$0xff]  }
  0x7f   :  { %542 = vmatpush1.bf16.msra.mxu1 %v357_v52  ;;  %v369_v63 = vsel %vm349_vm0, %v16774_v60, 0  ;;  %v16783_v4 = vld [vmem:[#allocation2 + $0x140] ss:$48 sps:$4 sm:$0x3f]   ;;  %v16789_v11 = vld [vmem:[#allocation2 + $0x4] ss:$48 sps:$4 sm:$0xff]  }
  0x80   :  { %13691 = vmatmul.mubr.msk.bf16.gmra.mrb[4].mxu0 %vm312_vm1, %v17938_v47  ;;  %845 = vmatprep.subr.bf16.mxu1 %v16768_v50  ;;  %v375_v5 = vsel %vm349_vm0, %v16783_v4, 0  ;;  %v16781_v10 = vld [vmem:[#allocation2 + $0x144] ss:$48 sps:$4 sm:$0x3f]   ;;  %v16778_v15 = vld [vmem:[#allocation2 + $0xe8] ss:$48 sps:$4 sm:$0xff]  }
  0x81   :  { %438 = vmatprep.mubr.bf16.mxu0 %v20899_v0  ;;  %695 = vmatpush1.bf16.msra.mxu0 %v363_v55  ;;  %v16786_v13 = vld [vmem:[#allocation2 + $0x148] ss:$48 sps:$4 sm:$0x3f]   ;;  %v16784_v17 = vld [vmem:[#allocation2 + $0x14c] ss:$48 sps:$4 sm:$0x3f]  }
  0x82   :  { %13701 = vmatmul.mubr.msk.bf16.gmra.mrb[4].mxu1 %vm312_vm1, %v17942_v51  ;;  %998 = vmatprep.subr.bf16.mxu0 %v16777_v56  ;;  %v381_v14 = vsel %vm349_vm0, %v16786_v13, 0  ;;  %v16792_v18 = vld [vmem:[#allocation2 + $0xc] ss:$48 sps:$4 sm:$0xff]   ;;  %v16795_v19 = vld [vmem:[#allocation2 + $0x60] ss:$48 sps:$4 sm:$0x3f]  }
  0x83   :  { %571 = vmatprep.mubr.bf16.mxu1 %v20899_v0  ;;  %v1449_v23 = vsel %vm349_vm0, %v16795_v19, 0  ;;  %v16787_v24 = vld [vmem:[#allocation2] ss:$48 sps:$4 sm:$0xff]   ;;  %v16793_v25 = vld [vmem:[#allocation2 + $0x64] ss:$48 sps:$4 sm:$0x3f]  }
  0x84   :  { %v16801_v27 = vld [vmem:[#allocation2 + $0x14] ss:$48 sps:$4 sm:$0xff]   ;;  %v16798_v28 = vld [vmem:[#allocation2 + $0x68] ss:$48 sps:$4 sm:$0x3f]  }
  0x85   :  { %v1455_v29 = vsel %vm349_vm0, %v16798_v28, 0  ;;  %v16790_v32 = vld [vmem:[#allocation2 + $0x8] ss:$48 sps:$4 sm:$0xff]   ;;  %v16796_v33 = vld [vmem:[#allocation2 + $0x6c] ss:$48 sps:$4 sm:$0x3f]  }
  0x86   :  { %v16804_v34 = vld [vmem:[#allocation2 + $0x1c] ss:$48 sps:$4 sm:$0xff]   ;;  %v16807_v48 = vld [vmem:[#allocation2 + $0x70] ss:$48 sps:$4 sm:$0x3f]  }
  0x87   :  { %v1461_v49 = vsel %vm349_vm0, %v16807_v48, 0  ;;  %v103_v50 = vld [vmem:[%s20891_s0] sm:$0xff]  ;;  %v17515_v53 = vld [vmem:[%s20891_s0 + $0x8] sm:$0xff] }
  0x88   :  { %13692 = vmatmul.mubr.msk.bf16.gmra.mrb[8].mxu0 %vm312_vm1, %v17954_v57  ;;  %v16799_v52 = vld [vmem:[#allocation2 + $0x10] ss:$48 sps:$4 sm:$0xff]   ;;  %v18210_v54 = vpack.c.bf16 %v17515_v53, %v103_v50  ;;  %v16805_v55 = vld [vmem:[#allocation2 + $0x74] ss:$48 sps:$4 sm:$0x3f]  }
  0x89   :  { %448 = vmatprep.mubr.bf16.mxu0 %v20899_v0  ;;  %v16813_v56 = vld [vmem:[#allocation2 + $0x24] ss:$48 sps:$4 sm:$0xff]   ;;  %v16802_v60 = vld [vmem:[#allocation2 + $0x18] ss:$48 sps:$4 sm:$0xff]   ;;  %v16823_v19 = vld [vmem:[#allocation2 + $0x180] ss:$48 sps:$4 sm:$0xff]  }
  0x8a   :  { %13703 = vmatmul.mubr.msk.bf16.vlgmr.msra.gmra.mrb[8].mxu1 %vm312_vm1, %v17852_v22  ;;  %v16819_v4 = vld [vmem:[#allocation2 + $0x80] ss:$48 sps:$4 sm:$0x3f]   ;;  %v16822_v13 = vld [vmem:[#allocation2 + $0x88] ss:$48 sps:$4 sm:$0x3f]  }
  0x8b   :  { %846 = vmatpush1.bf16.msra.mxu1 %v16766_v58  ;;  %581 = vmatprep.mubr.bf16.mxu1 %v20899_v0  ;;  %v16810_v58 = vld [vmem:[#allocation2 + $0x78] ss:$48 sps:$4 sm:$0x3f]   ;;  %v16835_v48 = vld [vmem:[#allocation2 + $0x190] ss:$48 sps:$4 sm:$0xff]  }
  0x8c   :  { %13728 = vmatprep.subr.msk.bf16.mxu1 %vm349_vm0, %v16772_v59  ;;  %v1467_v59 = vsel %vm349_vm0, %v16810_v58, 0  ;;  %v16826_v28 = vld [vmem:[#allocation2 + $0x188] ss:$48 sps:$4 sm:$0xff]   ;;  %v16843_v50 = vld [vmem:[#allocation2 + $0x1f0] ss:$48 sps:$4 sm:$0x3f]  }
  0x8d   :  { %v16849_v53 = vld [vmem:[#allocation2 + $0x1a4] ss:$48 sps:$4 sm:$0xff]  }
  0x8f   :  { %848 = vmatpush1.bf16.msra.mxu1 %v369_v63  ;;  %v16816_v63 = vld [vmem:[#allocation2 + $0x2c] ss:$48 sps:$4 sm:$0xff]  }
  0x90   :  { %13693 = vmatmul.mubr.msk.bf16.gmra.mrb[12].mxu0 %vm312_vm1, %v17964_v62  ;;  %1151 = vmatprep.subr.bf16.mxu1 %v16780_v61  ;;  %v16808_v61 = vld [vmem:[#allocation2 + $0x7c] ss:$48 sps:$4 sm:$0x3f]  }
  0x91   :  { %458 = vmatprep.mubr.bf16.mxu0 %v20899_v0 }
  0x92   :  { %13704 = vmatmul.mubr.msk.bf16.gmra.mrb[12].mxu1 %vm312_vm1, %v17938_v47 }
  0x93   :  { %591 = vmatprep.mubr.bf16.mxu1 %v20899_v0 }
  0x98   :  { %13694 = vmatmul.mubr.msk.bf16.gmra.mrb[16].mxu0 %vm312_vm1, %v17976_v1 }
  0x99   :  { %468 = vmatprep.mubr.bf16.mxu0 %v20899_v0 }
  0x9a   :  { %13705 = vmatmul.mubr.msk.bf16.gmra.mrb[16].mxu1 %vm312_vm1, %v17954_v57 }
  0x9b   :  { %601 = vmatprep.mubr.bf16.mxu1 %v20899_v0 }
  0xa0   :  { %13695 = vmatmul.mubr.msk.bf16.gmra.mrb[20].mxu0 %vm312_vm1, %v17986_v2 }
  0xa1   :  { %478 = vmatprep.mubr.bf16.mxu0 %v20899_v0 }
  0xa2   :  { %13706 = vmatmul.mubr.msk.bf16.gmra.mrb[20].mxu1 %vm312_vm1, %v17964_v62 }
  0xa3   :  { %611 = vmatprep.mubr.bf16.mxu1 %v20899_v0 }
  0xa8   :  { %13696 = vmatmul.mubr.msk.bf16.gmra.mrb[24].mxu0 %vm312_vm1, %v17996_v3 }
  0xa9   :  { %488 = vmatprep.mubr.bf16.mxu0 %v20899_v0 }
  0xaa   :  { %13707 = vmatmul.mubr.msk.bf16.gmra.mrb[24].mxu1 %vm312_vm1, %v17976_v1 }
  0xab   :  { %621 = vmatprep.mubr.bf16.mxu1 %v20899_v0 }
  0xb0   :  { %13697 = vmatmul.mubr.msk.bf16.gmra.mrb[28].mxu0 %vm312_vm1, %v18007_v6 }
  0xb1   :  { %498 = vmatprep.mubr.bf16.mxu0 %v20899_v0 }
  0xb2   :  { %13708 = vmatmul.mubr.msk.bf16.gmra.mrb[28].mxu1 %vm312_vm1, %v17986_v2 }
  0xb3   :  { %631 = vmatprep.mubr.bf16.mxu1 %v20899_v0 }
  0xb8   :  { %13698 = vmatmul.mubr.msk.bf16.gmra.mrb[32].mxu0 %vm312_vm1, %v18017_v7 }
  0xb9   :  { %508 = vmatprep.mubr.bf16.mxu0 %v20899_v0 }
  0xba   :  { %13709 = vmatmul.mubr.msk.bf16.gmra.mrb[32].mxu1 %vm312_vm1, %v17996_v3 }
  0xbb   :  { %641 = vmatprep.mubr.bf16.mxu1 %v20899_v0 }
  0xc0   :  { %13699 = vmatmul.mubr.msk.bf16.gmra.mrb[36].mxu0 %vm312_vm1, %v18027_v8 }
  0xc1   :  { %724 = vmatprep.mubr.bf16.mxu0 %v20899_v0 }
  0xc2   :  { %13710 = vmatmul.mubr.msk.bf16.gmra.mrb[36].mxu1 %vm312_vm1, %v18007_v6 }
  0xc3   :  { %651 = vmatprep.mubr.bf16.mxu1 %v20899_v0 }
  0xc8   :  { %13716 = vmatmul.mubr.msk.bf16.vlgmr.msra.gmra.mrb[40].mxu0 %vm312_vm1, %v17852_v22 }
  0xc9   :  { %999 = vmatpush1.bf16.msra.mxu0 %v16775_v9  ;;  %734 = vmatprep.mubr.bf16.mxu0 %v20899_v0  ;;  %v16811_v9 = vld [vmem:[#allocation2 + $0x20] ss:$48 sps:$4 sm:$0xff]  }
  0xca   :  { %13741 = vmatprep.subr.msk.bf16.mxu0 %vm349_vm0, %v16781_v10  ;;  %13711 = vmatmul.mubr.msk.bf16.gmra.mrb[40].mxu1 %vm312_vm1, %v18017_v7  ;;  %v16817_v10 = vld [vmem:[#allocation2 + $0x84] ss:$48 sps:$4 sm:$0x3f]  }
  0xcb   :  { %661 = vmatprep.mubr.bf16.mxu1 %v20899_v0 }
  0xcd   :  { %1001 = vmatpush1.bf16.msra.mxu0 %v375_v5  ;;  %v1473_v5 = vsel %vm349_vm0, %v16819_v4, 0  ;;  %v16847_v4 = vld [vmem:[#allocation2 + $0x1a0] ss:$48 sps:$4 sm:$0xff]  }
  0xce   :  { %1484 = vmatprep.subr.bf16.mxu0 %v16789_v11  ;;  %v16825_v11 = vld [vmem:[#allocation2 + $0x184] ss:$48 sps:$4 sm:$0xff]  }
  0xd0   :  { %13717 = vmatmul.mubr.msk.bf16.gmra.mrb[44].mxu0 %vm312_vm1, %v17938_v47 }
  0xd1   :  { %744 = vmatprep.mubr.bf16.mxu0 %v20899_v0 }
  0xd2   :  { %13712 = vmatmul.mubr.msk.bf16.gmra.mrb[44].mxu1 %vm312_vm1, %v18027_v8 }
  0xd3   :  { %671 = vmatprep.mubr.bf16.mxu1 %v20899_v0 }
  0xd8   :  { %13718 = vmatmul.mubr.msk.bf16.gmra.mrb[48].mxu0 %vm312_vm1, %v17954_v57 }
  0xd9   :  { %754 = vmatprep.mubr.bf16.mxu0 %v20899_v0 }
  0xda   :  { %13713 = vmatmul.mubr.msk.bf16.gmra.mrb[48].mxu1 %vm312_vm1, %v17930_v41 }
  0xdb   :  { %681 = vmatprep.mubr.bf16.mxu1 %v20899_v0 }
  0xe0   :  { %13719 = vmatmul.mubr.msk.bf16.gmra.mrb[52].mxu0 %vm312_vm1, %v17964_v62 }
  0xe1   :  { %764 = vmatprep.mubr.bf16.mxu0 %v20899_v0 }
  0xe2   :  { %13714 = vmatmul.mubr.msk.bf16.gmra.mrb[52].mxu1 %vm312_vm1, %v17942_v51 }
  0xe3   :  { %877 = vmatprep.mubr.bf16.mxu1 %v20899_v0 }
  0xe8   :  { %13720 = vmatmul.mubr.msk.bf16.gmra.mrb[56].mxu0 %vm312_vm1, %v17976_v1 }
  0xe9   :  { %774 = vmatprep.mubr.bf16.mxu0 %v20899_v0 }
  0xea   :  { %13729 = vmatmul.mubr.msk.bf16.vlgmr.msra.gmra.mrb[56].mxu1 %vm312_vm1, %v17852_v22 }
  0xeb   :  { %1152 = vmatpush1.bf16.msra.mxu1 %v16778_v15  ;;  %887 = vmatprep.mubr.bf16.mxu1 %v20899_v0  ;;  %v16814_v15 = vld [vmem:[#allocation2 + $0x28] ss:$48 sps:$4 sm:$0xff]  }
  0xec   :  { %13754 = vmatprep.subr.msk.bf16.mxu1 %vm349_vm0, %v16784_v17  ;;  %v16820_v17 = vld [vmem:[#allocation2 + $0x8c] ss:$48 sps:$4 sm:$0x3f]  }
  0xef   :  { %1154 = vmatpush1.bf16.msra.mxu1 %v381_v14  ;;  %v1479_v14 = vsel %vm349_vm0, %v16822_v13, 0  ;;  %v16850_v13 = vld [vmem:[#allocation2 + $0x1a8] ss:$48 sps:$4 sm:$0xff]  }
  0xf0   :  { %13721 = vmatmul.mubr.msk.bf16.gmra.mrb[60].mxu0 %vm312_vm1, %v17986_v2  ;;  %1637 = vmatprep.subr.bf16.mxu1 %v16792_v18  ;;  %v16828_v18 = vld [vmem:[#allocation2 + $0x18c] ss:$48 sps:$4 sm:$0xff]  }
  0xf1   :  { %784 = vmatprep.mubr.bf16.mxu0 %v20899_v0 }
  0xf2   :  { %13730 = vmatmul.mubr.msk.bf16.gmra.mrb[60].mxu1 %vm312_vm1, %v17938_v47 }
  0xf3   :  { %897 = vmatprep.mubr.bf16.mxu1 %v20899_v0 }
  0xf8   :  { %13722 = vmatmul.mubr.msk.bf16.gmra.mrb[64].mxu0 %vm312_vm1, %v17996_v3 }
  0xf9   :  { %794 = vmatprep.mubr.bf16.mxu0 %v20899_v0 }
  0xfa   :  { %13731 = vmatmul.mubr.msk.bf16.gmra.mrb[64].mxu1 %vm312_vm1, %v17954_v57 }
  0xfb   :  { %907 = vmatprep.mubr.bf16.mxu1 %v20899_v0 }
 0x100   :  { %13723 = vmatmul.mubr.msk.bf16.gmra.mrb[68].mxu0 %vm312_vm1, %v18007_v6 }
 0x101   :  { %804 = vmatprep.mubr.bf16.mxu0 %v20899_v0 }
 0x102   :  { %13732 = vmatmul.mubr.msk.bf16.gmra.mrb[68].mxu1 %vm312_vm1, %v17964_v62 }
 0x103   :  { %917 = vmatprep.mubr.bf16.mxu1 %v20899_v0 }
 0x108   :  { %13724 = vmatmul.mubr.msk.bf16.gmra.mrb[72].mxu0 %vm312_vm1, %v18017_v7 }
 0x109   :  { %814 = vmatprep.mubr.bf16.mxu0 %v20899_v0 }
 0x10a   :  { %13733 = vmatmul.mubr.msk.bf16.gmra.mrb[72].mxu1 %vm312_vm1, %v17976_v1 }
 0x10b   :  { %927 = vmatprep.mubr.bf16.mxu1 %v20899_v0 }
 0x110   :  { %13725 = vmatmul.mubr.msk.bf16.gmra.mrb[76].mxu0 %vm312_vm1, %v18027_v8 }
 0x111   :  { %824 = vmatprep.mubr.bf16.mxu0 %v20899_v0 }
 0x112   :  { %13734 = vmatmul.mubr.msk.bf16.gmra.mrb[76].mxu1 %vm312_vm1, %v17986_v2 }
 0x113   :  { %937 = vmatprep.mubr.bf16.mxu1 %v20899_v0 }
 0x118   :  { %13726 = vmatmul.mubr.msk.bf16.gmra.mrb[80].mxu0 %vm312_vm1, %v17930_v41 }
 0x119   :  { %834 = vmatprep.mubr.bf16.mxu0 %v20899_v0 }
 0x11a   :  { %13735 = vmatmul.mubr.msk.bf16.gmra.mrb[80].mxu1 %vm312_vm1, %v17996_v3 }
 0x11b   :  { %947 = vmatprep.mubr.bf16.mxu1 %v20899_v0 }
 0x120   :  { %13727 = vmatmul.mubr.msk.bf16.gmra.mrb[84].mxu0 %vm312_vm1, %v17942_v51 }
 0x121   :  { %1030 = vmatprep.mubr.bf16.mxu0 %v20899_v0 }
 0x122   :  { %13736 = vmatmul.mubr.msk.bf16.gmra.mrb[84].mxu1 %vm312_vm1, %v18007_v6 }
 0x123   :  { %957 = vmatprep.mubr.bf16.mxu1 %v20899_v0 }
 0x128   :  { %13742 = vmatmul.mubr.msk.bf16.vlgmr.msra.gmra.mrb[88].mxu0 %vm312_vm1, %v17852_v22 }
 0x129   :  { %1485 = vmatpush1.bf16.msra.mxu0 %v16787_v24  ;;  %1040 = vmatprep.mubr.bf16.mxu0 %v20899_v0  ;;  %v16831_v24 = vld [vmem:[#allocation2 + $0x1e0] ss:$48 sps:$4 sm:$0x3f]  }
 0x12a   :  { %13791 = vmatprep.subr.msk.bf16.mxu0 %vm349_vm0, %v16793_v25  ;;  %13737 = vmatmul.mubr.msk.bf16.gmra.mrb[88].mxu1 %vm312_vm1, %v18017_v7  ;;  %v2540_v25 = vsel %vm349_vm0, %v16831_v24, 0  ;;  %v16867_v24 = vld [vmem:[#allocation2 + $0x2a0] ss:$48 sps:$4 sm:$0x3f]  }
 0x12b   :  { %967 = vmatprep.mubr.bf16.mxu1 %v20899_v0 }
 0x12d   :  { %1487 = vmatpush1.bf16.msra.mxu0 %v1449_v23  ;;  %v16829_v23 = vld [vmem:[#allocation2 + $0x1e4] ss:$48 sps:$4 sm:$0x3f]  }
 0x12e   :  { %1790 = vmatprep.subr.bf16.mxu0 %v16801_v27  ;;  %v16837_v27 = vld [vmem:[#allocation2 + $0x194] ss:$48 sps:$4 sm:$0xff]  }
 0x130   :  { %13743 = vmatmul.mubr.msk.bf16.gmra.mrb[92].mxu0 %vm312_vm1, %v17938_v47 }
 0x131   :  { %1050 = vmatprep.mubr.bf16.mxu0 %v20899_v0 }
 0x132   :  { %13738 = vmatmul.mubr.msk.bf16.gmra.mrb[92].mxu1 %vm312_vm1, %v18027_v8 }
 0x133   :  { %977 = vmatprep.mubr.bf16.mxu1 %v20899_v0 }
 0x138   :  { %13744 = vmatmul.mubr.msk.bf16.gmra.mrb[96].mxu0 %vm312_vm1, %v17954_v57 }
 0x139   :  { %1060 = vmatprep.mubr.bf16.mxu0 %v20899_v0 }
 0x13a   :  { %13739 = vmatmul.mubr.msk.bf16.gmra.mrb[96].mxu1 %vm312_vm1, %v17930_v41 }
 0x13b   :  { %987 = vmatprep.mubr.bf16.mxu1 %v20899_v0 }
 0x140   :  { %13745 = vmatmul.mubr.msk.bf16.gmra.mrb[100].mxu0 %vm312_vm1, %v17964_v62 }
 0x141   :  { %1070 = vmatprep.mubr.bf16.mxu0 %v20899_v0 }
 0x142   :  { %13740 = vmatmul.mubr.msk.bf16.gmra.mrb[100].mxu1 %vm312_vm1, %v17942_v51 }
 0x143   :  { %1183 = vmatprep.mubr.bf16.mxu1 %v20899_v0 }
 0x148   :  { %13746 = vmatmul.mubr.msk.bf16.gmra.mrb[104].mxu0 %vm312_vm1, %v17976_v1 }
 0x149   :  { %1080 = vmatprep.mubr.bf16.mxu0 %v20899_v0 }
 0x14a   :  { %13755 = vmatmul.mubr.msk.bf16.vlgmr.msra.gmra.mrb[104].mxu1 %vm312_vm1, %v17852_v22 }
 0x14b   :  { %1638 = vmatpush1.bf16.msra.mxu1 %v16790_v32  ;;  %1193 = vmatprep.mubr.bf16.mxu1 %v20899_v0  ;;  %v16834_v32 = vld [vmem:[#allocation2 + $0x1e8] ss:$48 sps:$4 sm:$0x3f]  }
 0x14c   :  { %13804 = vmatprep.subr.msk.bf16.mxu1 %vm349_vm0, %v16796_v33  ;;  %v2546_v33 = vsel %vm349_vm0, %v16834_v32, 0  ;;  %v16870_v32 = vld [vmem:[#allocation2 + $0x2a8] ss:$48 sps:$4 sm:$0x3f]  }
 0x14d   :  { %v18145_v36 = vpop.f32.mrb[0].mxu1 }
 0x14e   :  { %v18147_v37 = vpop.f32.mrb[1].mxu1 }
 0x14f   :  { %v18149_v42 = vpop.f32.mrb[2].mxu1  ;;  %1640 = vmatpush1.bf16.msra.mxu1 %v1455_v29  ;;  %v16832_v29 = vld [vmem:[#allocation2 + $0x1ec] ss:$48 sps:$4 sm:$0x3f]  }
 0x150   :  { %13747 = vmatmul.mubr.msk.bf16.gmra.mrb[108].mxu0 %vm312_vm1, %v17986_v2  ;;  %v18153_v43 = vpop.f32.mrb[3].mxu1  ;;  %1943 = vmatprep.subr.bf16.mxu1 %v16804_v34  ;;  %v16840_v34 = vld [vmem:[#allocation2 + $0x19c] ss:$48 sps:$4 sm:$0xff]  }
 0x151   :  { %1090 = vmatprep.mubr.bf16.mxu0 %v20899_v0 }
 0x152   :  { %13756 = vmatmul.mubr.msk.bf16.gmra.mrb[108].mxu1 %vm312_vm1, %v17938_v47 }
 0x153   :  { %1203 = vmatprep.mubr.bf16.mxu1 %v20899_v0 }
 0x155   :  { %v18159_v22 = vpop.f32.mrb[4].mxu1 }
 0x156   :  { %v18161_v44 = vpop.f32.mrb[5].mxu1 }
 0x157   :  { %v18163_v45 = vpop.f32.mrb[6].mxu1 }
 0x158   :  { %13748 = vmatmul.mubr.msk.bf16.gmra.mrb[112].mxu0 %vm312_vm1, %v17996_v3  ;;  %v18167_v46 = vpop.f32.mrb[7].mxu1 }
 0x159   :  { %1100 = vmatprep.mubr.bf16.mxu0 %v20899_v0 }
 0x15a   :  { %13757 = vmatmul.mubr.msk.bf16.gmra.mrb[112].mxu1 %vm312_vm1, %v17954_v57 }
 0x15b   :  { %1213 = vmatprep.mubr.bf16.mxu1 %v20899_v0 }
 0x160   :  { %13749 = vmatmul.mubr.msk.bf16.gmra.mrb[116].mxu0 %vm312_vm1, %v18007_v6 }
 0x161   :  { %1110 = vmatprep.mubr.bf16.mxu0 %v20899_v0 }
 0x162   :  { %13758 = vmatmul.mubr.msk.bf16.gmra.mrb[116].mxu1 %vm312_vm1, %v17964_v62 }
 0x163   :  { %1223 = vmatprep.mubr.bf16.mxu1 %v20899_v0 }
 0x168   :  { %13750 = vmatmul.mubr.msk.bf16.gmra.mrb[120].mxu0 %vm312_vm1, %v18017_v7 }
 0x169   :  { %1120 = vmatprep.mubr.bf16.mxu0 %v20899_v0 }
 0x16a   :  { %13759 = vmatmul.mubr.msk.bf16.gmra.mrb[120].mxu1 %vm312_vm1, %v17976_v1 }
 0x16b   :  { %1233 = vmatprep.mubr.bf16.mxu1 %v20899_v0 }
 0x170   :  { %13751 = vmatmul.mubr.msk.bf16.gmra.mrb[124].mxu0 %vm312_vm1, %v18027_v8 }
 0x171   :  { %1130 = vmatprep.mubr.bf16.mxu0 %v20899_v0 }
 0x172   :  { %13760 = vmatmul.mubr.msk.bf16.gmra.mrb[124].mxu1 %vm312_vm1, %v17986_v2 }
 0x173   :  { %1243 = vmatprep.mubr.bf16.mxu1 %v20899_v0 }
 0x178   :  { %13752 = vmatmul.mubr.msk.bf16.gmra.mrb[128].mxu0 %vm312_vm1, %v17930_v41 }
 0x179   :  { %1140 = vmatprep.mubr.bf16.mxu0 %v20899_v0 }
 0x17a   :  { %13761 = vmatmul.mubr.msk.bf16.gmra.mrb[128].mxu1 %vm312_vm1, %v17996_v3 }
 0x17b   :  { %1253 = vmatprep.mubr.bf16.mxu1 %v20899_v0 }
 0x180   :  { %13753 = vmatmul.mubr.msk.bf16.gmra.mrb[132].mxu0 %vm312_vm1, %v17942_v51 }
 0x181   :  { %1516 = vmatprep.mubr.bf16.mxu0 %v20899_v0 }
 0x182   :  { %13762 = vmatmul.mubr.msk.bf16.gmra.mrb[132].mxu1 %vm312_vm1, %v18007_v6 }
 0x183   :  { %1263 = vmatprep.mubr.bf16.mxu1 %v20899_v0 }
 0x188   :  { %13792 = vmatmul.mubr.msk.bf16.vlgmr.msra.gmra.mrb[0].mxu0 %vm312_vm1, %v18210_v54 }
 0x189   :  { %1791 = vmatpush1.bf16.msra.mxu0 %v16799_v52  ;;  %1526 = vmatprep.mubr.bf16.mxu0 %v20899_v0  ;;  %v2552_v52 = vsel %vm349_vm0, %v16843_v50, 0 }
 0x18a   :  { %13817 = vmatprep.subr.msk.bf16.mxu0 %vm349_vm0, %v16805_v55  ;;  %13763 = vmatmul.mubr.msk.bf16.gmra.mrb[136].mxu1 %vm312_vm1, %v18017_v7  ;;  %v16844_v55 = vld [vmem:[#allocation2 + $0x1fc] ss:$48 sps:$4 sm:$0x3f]  }
 0x18b   :  { %1273 = vmatprep.mubr.bf16.mxu1 %v20899_v0 }
 0x18d   :  { %1793 = vmatpush1.bf16.msra.mxu0 %v1461_v49  ;;  %v16841_v49 = vld [vmem:[#allocation2 + $0x1f4] ss:$48 sps:$4 sm:$0x3f]  }
 0x18e   :  { %2096 = vmatprep.subr.bf16.mxu0 %v16813_v56  ;;  %v16846_v56 = vld [vmem:[#allocation2 + $0x1f8] ss:$48 sps:$4 sm:$0x3f]  }
 0x18f   :  { %v2558_v58 = vsel %vm349_vm0, %v16846_v56, 0 }
 0x190   :  { %13793 = vmatmul.mubr.msk.bf16.gmra.mrb[4].mxu0 %vm312_vm1, %v17809_v12 }
 0x191   :  { %1536 = vmatprep.mubr.bf16.mxu0 %v20899_v0 }
 0x192   :  { %13764 = vmatmul.mubr.msk.bf16.gmra.mrb[140].mxu1 %vm312_vm1, %v18027_v8 }
 0x193   :  { %1283 = vmatprep.mubr.bf16.mxu1 %v20899_v0 }
 0x198   :  { %13794 = vmatmul.mubr.msk.bf16.gmra.mrb[8].mxu0 %vm312_vm1, %v17827_v16 }
 0x199   :  { %1546 = vmatprep.mubr.bf16.mxu0 %v20899_v0 }
 0x19a   :  { %13765 = vmatmul.mubr.msk.bf16.gmra.mrb[144].mxu1 %vm312_vm1, %v17930_v41 }
 0x19b   :  { %1293 = vmatprep.mubr.bf16.mxu1 %v20899_v0 }
 0x1a0   :  { %13795 = vmatmul.mubr.msk.bf16.gmra.mrb[12].mxu0 %vm312_vm1, %v17846_v20 }
 0x1a1   :  { %1556 = vmatprep.mubr.bf16.mxu0 %v20899_v0 }
 0x1a2   :  { %13766 = vmatmul.mubr.msk.bf16.gmra.mrb[148].mxu1 %vm312_vm1, %v17942_v51 }
 0x1a3   :  { %1669 = vmatprep.mubr.bf16.mxu1 %v20899_v0 }
 0x1a8   :  { %13796 = vmatmul.mubr.msk.bf16.gmra.mrb[16].mxu0 %vm312_vm1, %v17850_v21 }
 0x1a9   :  { %1566 = vmatprep.mubr.bf16.mxu0 %v20899_v0 }
 0x1aa   :  { %13805 = vmatmul.mubr.msk.bf16.vlgmr.msra.gmra.mrb[8].mxu1 %vm312_vm1, %v18210_v54 }
 0x1ab   :  { %1944 = vmatpush1.bf16.msra.mxu1 %v16802_v60  ;;  %1679 = vmatprep.mubr.bf16.mxu1 %v20899_v0  ;;  %v18508_v60 = vld [vmem:[%s20891_s0 + $0xc8] sm:$0xff] }
 0x1ac   :  { %13830 = vmatprep.subr.msk.bf16.mxu1 %vm349_vm0, %v16808_v61  ;;  %v17516_v61 = vld [vmem:[%s20891_s0 + $0xc0] sm:$0xff] }
 0x1af   :  { %1946 = vmatpush1.bf16.msra.mxu1 %v1467_v59  ;;  %v16852_v59 = vld [vmem:[#allocation2 + $0x1ac] ss:$48 sps:$4 sm:$0xff]  }
 0x1b0   :  { %13797 = vmatmul.mubr.msk.bf16.gmra.mrb[20].mxu0 %vm312_vm1, %v17871_v26  ;;  %2249 = vmatprep.subr.bf16.mxu1 %v16816_v63  ;;  %v18517_v63 = vpack.c.bf16 %v18508_v60, %v17516_v61 }
 0x1b1   :  { %1576 = vmatprep.mubr.bf16.mxu0 %v20899_v0 }
 0x1b2   :  { %13806 = vmatmul.mubr.msk.bf16.gmra.mrb[12].mxu1 %vm312_vm1, %v17809_v12 }
 0x1b3   :  { %1689 = vmatprep.mubr.bf16.mxu1 %v20899_v0 }
 0x1b8   :  { %13798 = vmatmul.mubr.msk.bf16.gmra.mrb[24].mxu0 %vm312_vm1, %v17890_v30 }
 0x1b9   :  { %1586 = vmatprep.mubr.bf16.mxu0 %v20899_v0 }
 0x1ba   :  { %13807 = vmatmul.mubr.msk.bf16.gmra.mrb[16].mxu1 %vm312_vm1, %v17827_v16 }
 0x1bb   :  { %1699 = vmatprep.mubr.bf16.mxu1 %v20899_v0 }
 0x1c0   :  { %13799 = vmatmul.mubr.msk.bf16.gmra.mrb[28].mxu0 %vm312_vm1, %v17894_v31 }
 0x1c1   :  { %1596 = vmatprep.mubr.bf16.mxu0 %v20899_v0 }
 0x1c2   :  { %13808 = vmatmul.mubr.msk.bf16.gmra.mrb[20].mxu1 %vm312_vm1, %v17846_v20 }
 0x1c3   :  { %1709 = vmatprep.mubr.bf16.mxu1 %v20899_v0 }
 0x1c8   :  { %13800 = vmatmul.mubr.msk.bf16.gmra.mrb[32].mxu0 %vm312_vm1, %v17911_v35 }
 0x1c9   :  { %1606 = vmatprep.mubr.bf16.mxu0 %v20899_v0 }
 0x1ca   :  { %13809 = vmatmul.mubr.msk.bf16.gmra.mrb[24].mxu1 %vm312_vm1, %v17850_v21 }
 0x1cb   :  { %1719 = vmatprep.mubr.bf16.mxu1 %v20899_v0 }
 0x1d0   :  { %13801 = vmatmul.mubr.msk.bf16.gmra.mrb[36].mxu0 %vm312_vm1, %v17921_v38 }
 0x1d1   :  { %1616 = vmatprep.mubr.bf16.mxu0 %v20899_v0 }
 0x1d2   :  { %13810 = vmatmul.mubr.msk.bf16.gmra.mrb[28].mxu1 %vm312_vm1, %v17871_v26 }
 0x1d3   :  { %1729 = vmatprep.mubr.bf16.mxu1 %v20899_v0 }
 0x1d8   :  { %13802 = vmatmul.mubr.msk.bf16.gmra.mrb[136].mxu0 %vm312_vm1, %v17924_v39 }
 0x1d9   :  { %1626 = vmatprep.mubr.bf16.mxu0 %v20899_v0 }
 0x1da   :  { %13811 = vmatmul.mubr.msk.bf16.gmra.mrb[32].mxu1 %vm312_vm1, %v17890_v30 }
 0x1db   :  { %1739 = vmatprep.mubr.bf16.mxu1 %v20899_v0 }
 0x1e0   :  { %13803 = vmatmul.mubr.msk.bf16.gmra.mrb[140].mxu0 %vm312_vm1, %v17928_v40 }
 0x1e1   :  { %1822 = vmatprep.mubr.bf16.mxu0 %v20899_v0 }
 0x1e2   :  { %13812 = vmatmul.mubr.msk.bf16.gmra.mrb[36].mxu1 %vm312_vm1, %v17894_v31 }
 0x1e3   :  { %1749 = vmatprep.mubr.bf16.mxu1 %v20899_v0 }
 0x1e8   :  { %13818 = vmatmul.mubr.msk.bf16.vlgmr.msra.gmra.mrb[40].mxu0 %vm312_vm1, %v18210_v54 }
 0x1e9   :  { %2097 = vmatpush1.bf16.msra.mxu0 %v16811_v9  ;;  %1832 = vmatprep.mubr.bf16.mxu0 %v20899_v0  ;;  %v16855_v9 = vld [vmem:[#allocation2 + $0x200] ss:$48 sps:$4 sm:$0x3f]  }
 0x1ea   :  { %13843 = vmatprep.subr.msk.bf16.mxu0 %vm349_vm0, %v16817_v10  ;;  %13813 = vmatmul.mubr.msk.bf16.gmra.mrb[40].mxu1 %vm312_vm1, %v17911_v35  ;;  %v2564_v10 = vsel %vm349_vm0, %v16855_v9, 0  ;;  %v16891_v9 = vld [vmem:[#allocation2 + $0x2c0] ss:$48 sps:$4 sm:$0x3f]  }
 0x1eb   :  { %1759 = vmatprep.mubr.bf16.mxu1 %v20899_v0 }
 0x1ed   :  { %2099 = vmatpush1.bf16.msra.mxu0 %v1473_v5  ;;  %v16853_v5 = vld [vmem:[#allocation2 + $0x204] ss:$48 sps:$4 sm:$0x3f]  }
 0x1ee   :  { %2575 = vmatprep.subr.bf16.mxu0 %v16825_v11  ;;  %v16861_v11 = vld [vmem:[#allocation2 + $0x244] ss:$48 sps:$4 sm:$0xff]  }
 0x1f0   :  { %13819 = vmatmul.mubr.msk.bf16.gmra.mrb[44].mxu0 %vm312_vm1, %v17809_v12 }
 0x1f1   :  { %1842 = vmatprep.mubr.bf16.mxu0 %v20899_v0 }
 0x1f2   :  { %13814 = vmatmul.mubr.msk.bf16.gmra.mrb[44].mxu1 %vm312_vm1, %v17921_v38 }
 0x1f3   :  { %1769 = vmatprep.mubr.bf16.mxu1 %v20899_v0 }
 0x1f8   :  { %13820 = vmatmul.mubr.msk.bf16.gmra.mrb[48].mxu0 %vm312_vm1, %v17827_v16 }
 0x1f9   :  { %1852 = vmatprep.mubr.bf16.mxu0 %v20899_v0 }
 0x1fa   :  { %13815 = vmatmul.mubr.msk.bf16.gmra.mrb[48].mxu1 %vm312_vm1, %v17924_v39 }
 0x1fb   :  { %1779 = vmatprep.mubr.bf16.mxu1 %v20899_v0 }
 0x200   :  { %13821 = vmatmul.mubr.msk.bf16.gmra.mrb[52].mxu0 %vm312_vm1, %v17846_v20 }
 0x201   :  { %1862 = vmatprep.mubr.bf16.mxu0 %v20899_v0 }
 0x202   :  { %13816 = vmatmul.mubr.msk.bf16.gmra.mrb[52].mxu1 %vm312_vm1, %v17928_v40 }
 0x203   :  { %1975 = vmatprep.mubr.bf16.mxu1 %v20899_v0 }
 0x208   :  { %13822 = vmatmul.mubr.msk.bf16.gmra.mrb[56].mxu0 %vm312_vm1, %v17850_v21 }
 0x209   :  { %1872 = vmatprep.mubr.bf16.mxu0 %v20899_v0 }
 0x20a   :  { %13831 = vmatmul.mubr.msk.bf16.vlgmr.msra.gmra.mrb[56].mxu1 %vm312_vm1, %v18210_v54 }
 0x20b   :  { %2250 = vmatpush1.bf16.msra.mxu1 %v16814_v15  ;;  %1985 = vmatprep.mubr.bf16.mxu1 %v20899_v0  ;;  %v16858_v15 = vld [vmem:[#allocation2 + $0x208] ss:$48 sps:$4 sm:$0x3f]  }
 0x20c   :  { %13856 = vmatprep.subr.msk.bf16.mxu1 %vm349_vm0, %v16820_v17  ;;  %v2570_v17 = vsel %vm349_vm0, %v16858_v15, 0 }
 0x20f   :  { %2252 = vmatpush1.bf16.msra.mxu1 %v1479_v14  ;;  %v16856_v14 = vld [vmem:[#allocation2 + $0x20c] ss:$48 sps:$4 sm:$0x3f]  }
 0x210   :  { %13823 = vmatmul.mubr.msk.bf16.gmra.mrb[60].mxu0 %vm312_vm1, %v17871_v26  ;;  %2728 = vmatprep.subr.bf16.mxu1 %v16828_v18  ;;  %v16864_v18 = vld [vmem:[#allocation2 + $0x24c] ss:$48 sps:$4 sm:$0xff]  }
 0x211   :  { %1882 = vmatprep.mubr.bf16.mxu0 %v20899_v0 }
 0x212   :  { %13832 = vmatmul.mubr.msk.bf16.gmra.mrb[60].mxu1 %vm312_vm1, %v17809_v12 }
 0x213   :  { %1995 = vmatprep.mubr.bf16.mxu1 %v20899_v0 }
 0x218   :  { %13824 = vmatmul.mubr.msk.bf16.gmra.mrb[64].mxu0 %vm312_vm1, %v17890_v30 }
 0x219   :  { %1892 = vmatprep.mubr.bf16.mxu0 %v20899_v0 }
 0x21a   :  { %13833 = vmatmul.mubr.msk.bf16.gmra.mrb[64].mxu1 %vm312_vm1, %v17827_v16 }
 0x21b   :  { %2005 = vmatprep.mubr.bf16.mxu1 %v20899_v0 }
 0x220   :  { %13825 = vmatmul.mubr.msk.bf16.gmra.mrb[68].mxu0 %vm312_vm1, %v17894_v31 }
 0x221   :  { %1902 = vmatprep.mubr.bf16.mxu0 %v20899_v0 }
 0x222   :  { %13834 = vmatmul.mubr.msk.bf16.gmra.mrb[68].mxu1 %vm312_vm1, %v17846_v20 }
 0x223   :  { %2015 = vmatprep.mubr.bf16.mxu1 %v20899_v0 }
 0x228   :  { %13826 = vmatmul.mubr.msk.bf16.gmra.mrb[72].mxu0 %vm312_vm1, %v17911_v35 }
 0x229   :  { %1912 = vmatprep.mubr.bf16.mxu0 %v20899_v0 }
 0x22a   :  { %13835 = vmatmul.mubr.msk.bf16.gmra.mrb[72].mxu1 %vm312_vm1, %v17850_v21 }
 0x22b   :  { %2025 = vmatprep.mubr.bf16.mxu1 %v20899_v0 }
 0x230   :  { %13827 = vmatmul.mubr.msk.bf16.gmra.mrb[76].mxu0 %vm312_vm1, %v17921_v38 }
 0x231   :  { %1922 = vmatprep.mubr.bf16.mxu0 %v20899_v0 }
 0x232   :  { %13836 = vmatmul.mubr.msk.bf16.gmra.mrb[76].mxu1 %vm312_vm1, %v17871_v26 }
 0x233   :  { %2035 = vmatprep.mubr.bf16.mxu1 %v20899_v0 }
 0x238   :  { %13828 = vmatmul.mubr.msk.bf16.gmra.mrb[80].mxu0 %vm312_vm1, %v17924_v39 }
 0x239   :  { %1932 = vmatprep.mubr.bf16.mxu0 %v20899_v0 }
 0x23a   :  { %13837 = vmatmul.mubr.msk.bf16.gmra.mrb[80].mxu1 %vm312_vm1, %v17890_v30 }
 0x23b   :  { %2045 = vmatprep.mubr.bf16.mxu1 %v20899_v0 }
 0x240   :  { %13829 = vmatmul.mubr.msk.bf16.gmra.mrb[84].mxu0 %vm312_vm1, %v17928_v40 }
 0x241   :  { %2128 = vmatprep.mubr.bf16.mxu0 %v20899_v0 }
 0x242   :  { %13838 = vmatmul.mubr.msk.bf16.gmra.mrb[84].mxu1 %vm312_vm1, %v17894_v31 }
 0x243   :  { %2055 = vmatprep.mubr.bf16.mxu1 %v20899_v0 }
 0x248   :  { %13844 = vmatmul.mubr.msk.bf16.vlgmr.msra.gmra.mrb[88].mxu0 %vm312_vm1, %v18210_v54 }
 0x249   :  { %2576 = vmatpush1.bf16.msra.mxu0 %v16823_v19  ;;  %2138 = vmatprep.mubr.bf16.mxu0 %v20899_v0  ;;  %v16859_v19 = vld [vmem:[#allocation2 + $0x240] ss:$48 sps:$4 sm:$0xff]  }
 0x24a   :  { %13893 = vmatprep.subr.msk.bf16.mxu0 %vm349_vm0, %v16829_v23  ;;  %13839 = vmatmul.mubr.msk.bf16.gmra.mrb[88].mxu1 %vm312_vm1, %v17911_v35  ;;  %v16865_v23 = vld [vmem:[#allocation2 + $0x2a4] ss:$48 sps:$4 sm:$0x3f]  }
 0x24b   :  { %2065 = vmatprep.mubr.bf16.mxu1 %v20899_v0 }
 0x24d   :  { %2578 = vmatpush1.bf16.msra.mxu0 %v2540_v25  ;;  %v3919_v25 = vsel %vm349_vm0, %v16867_v24, 0 }
 0x24e   :  { %2881 = vmatprep.subr.bf16.mxu0 %v16837_v27  ;;  %v16873_v27 = vld [vmem:[#allocation2 + $0x254] ss:$48 sps:$4 sm:$0xff]  }
 0x250   :  { %13845 = vmatmul.mubr.msk.bf16.gmra.mrb[92].mxu0 %vm312_vm1, %v17809_v12 }
 0x251   :  { %2148 = vmatprep.mubr.bf16.mxu0 %v20899_v0 }
 0x252   :  { %13840 = vmatmul.mubr.msk.bf16.gmra.mrb[92].mxu1 %vm312_vm1, %v17921_v38 }
 0x253   :  { %2075 = vmatprep.mubr.bf16.mxu1 %v20899_v0 }
 0x258   :  { %13846 = vmatmul.mubr.msk.bf16.gmra.mrb[96].mxu0 %vm312_vm1, %v17827_v16 }
 0x259   :  { %2158 = vmatprep.mubr.bf16.mxu0 %v20899_v0 }
 0x25a   :  { %13841 = vmatmul.mubr.msk.bf16.gmra.mrb[96].mxu1 %vm312_vm1, %v17924_v39 }
 0x25b   :  { %2085 = vmatprep.mubr.bf16.mxu1 %v20899_v0 }
 0x260   :  { %13847 = vmatmul.mubr.msk.bf16.gmra.mrb[100].mxu0 %vm312_vm1, %v17846_v20 }
 0x261   :  { %2168 = vmatprep.mubr.bf16.mxu0 %v20899_v0 }
 0x262   :  { %13842 = vmatmul.mubr.msk.bf16.gmra.mrb[100].mxu1 %vm312_vm1, %v17928_v40 }
 0x263   :  { %2281 = vmatprep.mubr.bf16.mxu1 %v20899_v0 }
 0x268   :  { %13848 = vmatmul.mubr.msk.bf16.gmra.mrb[104].mxu0 %vm312_vm1, %v17850_v21 }
 0x269   :  { %2178 = vmatprep.mubr.bf16.mxu0 %v20899_v0 }
 0x26a   :  { %13857 = vmatmul.mubr.msk.bf16.vlgmr.msra.gmra.mrb[104].mxu1 %vm312_vm1, %v18210_v54  ;;  %v16838_v54 = vld [vmem:[#allocation2 + $0x198] ss:$48 sps:$4 sm:$0xff]  }
 0x26b   :  { %2729 = vmatpush1.bf16.msra.mxu1 %v16826_v28  ;;  %2291 = vmatprep.mubr.bf16.mxu1 %v20899_v0  ;;  %v16862_v28 = vld [vmem:[#allocation2 + $0x248] ss:$48 sps:$4 sm:$0xff]  }
 0x26c   :  { %13906 = vmatprep.subr.msk.bf16.mxu1 %vm349_vm0, %v16832_v29  ;;  %v16868_v29 = vld [vmem:[#allocation2 + $0x2ac] ss:$48 sps:$4 sm:$0x3f]  }
 0x26f   :  { %2731 = vmatpush1.bf16.msra.mxu1 %v2546_v33  ;;  %v3925_v33 = vsel %vm349_vm0, %v16870_v32, 0 }
 0x270   :  { %13849 = vmatmul.mubr.msk.bf16.gmra.mrb[108].mxu0 %vm312_vm1, %v17871_v26  ;;  %3034 = vmatprep.subr.bf16.mxu1 %v16840_v34  ;;  %v16876_v34 = vld [vmem:[#allocation2 + $0x25c] ss:$48 sps:$4 sm:$0xff]  }
 0x271   :  { %2188 = vmatprep.mubr.bf16.mxu0 %v20899_v0 }
 0x272   :  { %13858 = vmatmul.mubr.msk.bf16.gmra.mrb[108].mxu1 %vm312_vm1, %v17809_v12 }
 0x273   :  { %2301 = vmatprep.mubr.bf16.mxu1 %v20899_v0 }
 0x278   :  { %13850 = vmatmul.mubr.msk.bf16.gmra.mrb[112].mxu0 %vm312_vm1, %v17890_v30 }
 0x279   :  { %2198 = vmatprep.mubr.bf16.mxu0 %v20899_v0 }
 0x27a   :  { %13859 = vmatmul.mubr.msk.bf16.gmra.mrb[112].mxu1 %vm312_vm1, %v17827_v16 }
 0x27b   :  { %2311 = vmatprep.mubr.bf16.mxu1 %v20899_v0 }
 0x280   :  { %13851 = vmatmul.mubr.msk.bf16.gmra.mrb[116].mxu0 %vm312_vm1, %v17894_v31 }
 0x281   :  { %2208 = vmatprep.mubr.bf16.mxu0 %v20899_v0 }
 0x282   :  { %13860 = vmatmul.mubr.msk.bf16.gmra.mrb[116].mxu1 %vm312_vm1, %v17846_v20 }
 0x283   :  { %2321 = vmatprep.mubr.bf16.mxu1 %v20899_v0 }
 0x288   :  { %13852 = vmatmul.mubr.msk.bf16.gmra.mrb[120].mxu0 %vm312_vm1, %v17911_v35 }
 0x289   :  { %2218 = vmatprep.mubr.bf16.mxu0 %v20899_v0 }
 0x28a   :  { %13861 = vmatmul.mubr.msk.bf16.gmra.mrb[120].mxu1 %vm312_vm1, %v17850_v21 }
 0x28b   :  { %2331 = vmatprep.mubr.bf16.mxu1 %v20899_v0 }
 0x290   :  { %13853 = vmatmul.mubr.msk.bf16.gmra.mrb[124].mxu0 %vm312_vm1, %v17921_v38 }
 0x291   :  { %2228 = vmatprep.mubr.bf16.mxu0 %v20899_v0 }
 0x292   :  { %13862 = vmatmul.mubr.msk.bf16.gmra.mrb[124].mxu1 %vm312_vm1, %v17871_v26 }
 0x293   :  { %2341 = vmatprep.mubr.bf16.mxu1 %v20899_v0 }
 0x298   :  { %13854 = vmatmul.mubr.msk.bf16.gmra.mrb[128].mxu0 %vm312_vm1, %v17924_v39 }
 0x299   :  { %2238 = vmatprep.mubr.bf16.mxu0 %v20899_v0 }
 0x29a   :  { %13863 = vmatmul.mubr.msk.bf16.gmra.mrb[128].mxu1 %vm312_vm1, %v17890_v30 }
 0x29b   :  { %2351 = vmatprep.mubr.bf16.mxu1 %v20899_v0 }
 0x2a0   :  { %13855 = vmatmul.mubr.msk.bf16.gmra.mrb[132].mxu0 %vm312_vm1, %v17928_v40 }
 0x2a1   :  { %2607 = vmatprep.mubr.bf16.mxu0 %v20899_v0 }
 0x2a2   :  { %13864 = vmatmul.mubr.msk.bf16.gmra.mrb[132].mxu1 %vm312_vm1, %v17894_v31 }
 0x2a3   :  { %2361 = vmatprep.mubr.bf16.mxu1 %v20899_v0 }
 0x2a8   :  { %13894 = vmatmul.mubr.msk.bf16.vlgmr.msra.gmra.mrb[0].mxu0 %vm312_vm1, %v17809_v12 }
 0x2a9   :  { %2882 = vmatpush1.bf16.msra.mxu0 %v16835_v48  ;;  %2617 = vmatprep.mubr.bf16.mxu0 %v20899_v0  ;;  %v16877_v48 = vld [vmem:[#allocation2 + $0x2b4] ss:$48 sps:$4 sm:$0x3f]  }
 0x2aa   :  { %13919 = vmatprep.subr.msk.bf16.mxu0 %vm349_vm0, %v16841_v49  ;;  %13865 = vmatmul.mubr.msk.bf16.gmra.mrb[136].mxu1 %vm312_vm1, %v17911_v35  ;;  %v16879_v49 = vld [vmem:[#allocation2 + $0x2b0] ss:$48 sps:$4 sm:$0x3f]  }
 0x2ab   :  { %2371 = vmatprep.mubr.bf16.mxu1 %v20899_v0  ;;  %v3931_v50 = vsel %vm349_vm0, %v16879_v49, 0  ;;  %v16927_v49 = vld [vmem:[#allocation2 + $0x380] ss:$48 sps:$4 sm:$0x3f]  }
 0x2ad   :  { %2884 = vmatpush1.bf16.msra.mxu0 %v2552_v52  ;;  %v16885_v52 = vld [vmem:[#allocation2 + $0x264] ss:$48 sps:$4 sm:$0xff]  }
 0x2ae   :  { %3187 = vmatprep.subr.bf16.mxu0 %v16849_v53  ;;  %v16874_v53 = vld [vmem:[#allocation2 + $0x258] ss:$48 sps:$4 sm:$0xff]  }
 0x2b0   :  { %13895 = vmatmul.mubr.msk.bf16.gmra.mrb[4].mxu0 %vm312_vm1, %v17827_v16 }
 0x2b1   :  { %2627 = vmatprep.mubr.bf16.mxu0 %v20899_v0 }
 0x2b2   :  { %13866 = vmatmul.mubr.msk.bf16.gmra.mrb[140].mxu1 %vm312_vm1, %v17921_v38 }
 0x2b3   :  { %2381 = vmatprep.mubr.bf16.mxu1 %v20899_v0 }
 0x2b8   :  { %13896 = vmatmul.mubr.msk.bf16.gmra.mrb[8].mxu0 %vm312_vm1, %v17846_v20 }
 0x2b9   :  { %2637 = vmatprep.mubr.bf16.mxu0 %v20899_v0 }
 0x2ba   :  { %13867 = vmatmul.mubr.msk.bf16.gmra.mrb[144].mxu1 %vm312_vm1, %v17924_v39 }
 0x2bb   :  { %2391 = vmatprep.mubr.bf16.mxu1 %v20899_v0 }
 0x2c0   :  { %13897 = vmatmul.mubr.msk.bf16.gmra.mrb[12].mxu0 %vm312_vm1, %v17850_v21 }
 0x2c1   :  { %2647 = vmatprep.mubr.bf16.mxu0 %v20899_v0 }
 0x2c2   :  { %13868 = vmatmul.mubr.msk.bf16.gmra.mrb[148].mxu1 %vm312_vm1, %v17928_v40 }
 0x2c3   :  { %2760 = vmatprep.mubr.bf16.mxu1 %v20899_v0 }
 0x2c8   :  { %13898 = vmatmul.mubr.msk.bf16.gmra.mrb[16].mxu0 %vm312_vm1, %v17871_v26 }
 0x2c9   :  { %2657 = vmatprep.mubr.bf16.mxu0 %v20899_v0 }
 0x2ca   :  { %13907 = vmatmul.mubr.msk.bf16.vlgmr.msra.gmra.mrb[8].mxu1 %vm312_vm1, %v17809_v12 }
 0x2cb   :  { %3035 = vmatpush1.bf16.msra.mxu1 %v16838_v54  ;;  %2770 = vmatprep.mubr.bf16.mxu1 %v20899_v0  ;;  %v16880_v54 = vld [vmem:[#allocation2 + $0x2bc] ss:$48 sps:$4 sm:$0x3f]  }
 0x2cc   :  { %13932 = vmatprep.subr.msk.bf16.mxu1 %vm349_vm0, %v16844_v55  ;;  %v16882_v55 = vld [vmem:[#allocation2 + $0x2b8] ss:$48 sps:$4 sm:$0x3f]  }
 0x2cd   :  { %v3937_v56 = vsel %vm349_vm0, %v16882_v55, 0 }
 0x2cf   :  { %3037 = vmatpush1.bf16.msra.mxu1 %v2558_v58  ;;  %v16888_v58 = vld [vmem:[#allocation2 + $0x26c] ss:$48 sps:$4 sm:$0xff]  }
 0x2d0   :  { %13899 = vmatmul.mubr.msk.bf16.gmra.mrb[20].mxu0 %vm312_vm1, %v17890_v30  ;;  %3340 = vmatprep.subr.bf16.mxu1 %v16852_v59  ;;  %v18748_v59 = vld [vmem:[%s20891_s0 + $0xd0] sm:$0xff] }
 0x2d1   :  { %2667 = vmatprep.mubr.bf16.mxu0 %v20899_v0  ;;  %v18755_v61 = vpack.c.bf16 %v18748_v59, %v18508_v60  ;;  %v3943_v60 = vsel %vm349_vm0, %v16891_v9, 0  ;;  %v16937_v9 = vld [vmem:[#allocation6 + $0x1d0] sm:$0xff]  }
 0x2d2   :  { %13908 = vmatmul.mubr.msk.bf16.gmra.mrb[12].mxu1 %vm312_vm1, %v17827_v16 }
 0x2d3   :  { %2780 = vmatprep.mubr.bf16.mxu1 %v20899_v0 }
 0x2d8   :  { %13900 = vmatmul.mubr.msk.bf16.gmra.mrb[24].mxu0 %vm312_vm1, %v17894_v31 }
 0x2d9   :  { %2677 = vmatprep.mubr.bf16.mxu0 %v20899_v0 }
 0x2da   :  { %13909 = vmatmul.mubr.msk.bf16.gmra.mrb[16].mxu1 %vm312_vm1, %v17846_v20 }
 0x2db   :  { %2790 = vmatprep.mubr.bf16.mxu1 %v20899_v0 }
 0x2e0   :  { %13901 = vmatmul.mubr.msk.bf16.gmra.mrb[28].mxu0 %vm312_vm1, %v17911_v35 }
 0x2e1   :  { %2687 = vmatprep.mubr.bf16.mxu0 %v20899_v0 }
 0x2e2   :  { %13910 = vmatmul.mubr.msk.bf16.gmra.mrb[20].mxu1 %vm312_vm1, %v17850_v21 }
 0x2e3   :  { %2800 = vmatprep.mubr.bf16.mxu1 %v20899_v0 }
 0x2e8   :  { %13902 = vmatmul.mubr.msk.bf16.gmra.mrb[32].mxu0 %vm312_vm1, %v17921_v38 }
 0x2e9   :  { %2697 = vmatprep.mubr.bf16.mxu0 %v20899_v0 }
 0x2ea   :  { %13911 = vmatmul.mubr.msk.bf16.gmra.mrb[24].mxu1 %vm312_vm1, %v17871_v26 }
 0x2eb   :  { %2810 = vmatprep.mubr.bf16.mxu1 %v20899_v0 }
 0x2f0   :  { %13903 = vmatmul.mubr.msk.bf16.gmra.mrb[36].mxu0 %vm312_vm1, %v17924_v39 }
 0x2f1   :  { %2707 = vmatprep.mubr.bf16.mxu0 %v20899_v0 }
 0x2f2   :  { %13912 = vmatmul.mubr.msk.bf16.gmra.mrb[28].mxu1 %vm312_vm1, %v17890_v30 }
 0x2f3   :  { %2820 = vmatprep.mubr.bf16.mxu1 %v20899_v0 }
 0x2f8   :  { %13904 = vmatmul.mubr.msk.bf16.gmra.mrb[136].mxu0 %vm312_vm1, %v17928_v40 }
 0x2f9   :  { %2717 = vmatprep.mubr.bf16.mxu0 %v20899_v0 }
 0x2fa   :  { %13913 = vmatmul.mubr.msk.bf16.gmra.mrb[32].mxu1 %vm312_vm1, %v17894_v31 }
 0x2fb   :  { %2830 = vmatprep.mubr.bf16.mxu1 %v20899_v0 }
 0x300   :  { %13905 = vmatmul.mubr.msk.bf16.gmra.mrb[140].mxu0 %vm312_vm1, %v18517_v63 }
 0x301   :  { %2913 = vmatprep.mubr.bf16.mxu0 %v20899_v0 }
 0x302   :  { %13914 = vmatmul.mubr.msk.bf16.gmra.mrb[36].mxu1 %vm312_vm1, %v17911_v35 }
 0x303   :  { %2840 = vmatprep.mubr.bf16.mxu1 %v20899_v0 }
 0x308   :  { %13920 = vmatmul.mubr.msk.bf16.vlgmr.msra.gmra.mrb[40].mxu0 %vm312_vm1, %v17809_v12 }
 0x309   :  { %3188 = vmatpush1.bf16.msra.mxu0 %v16847_v4  ;;  %2923 = vmatprep.mubr.bf16.mxu0 %v20899_v0  ;;  %v16883_v4 = vld [vmem:[#allocation2 + $0x260] ss:$48 sps:$4 sm:$0xff]  }
 0x30a   :  { %13945 = vmatprep.subr.msk.bf16.mxu0 %vm349_vm0, %v16853_v5  ;;  %13915 = vmatmul.mubr.msk.bf16.gmra.mrb[40].mxu1 %vm312_vm1, %v17921_v38  ;;  %v16889_v5 = vld [vmem:[#allocation2 + $0x2c4] ss:$48 sps:$4 sm:$0x3f]  }
 0x30b   :  { %2850 = vmatprep.mubr.bf16.mxu1 %v20899_v0 }
 0x30d   :  { %3190 = vmatpush1.bf16.msra.mxu0 %v2564_v10  ;;  %v16897_v10 = vld [vmem:[#allocation2 + $0x304] ss:$48 sps:$4 sm:$0xff]  }
 0x30e   :  { %3954 = vmatprep.subr.bf16.mxu0 %v16861_v11  ;;  %v16886_v11 = vld [vmem:[#allocation2 + $0x268] ss:$48 sps:$4 sm:$0xff]  }
 0x310   :  { %13921 = vmatmul.mubr.msk.bf16.gmra.mrb[44].mxu0 %vm312_vm1, %v17827_v16 }
 0x311   :  { %2933 = vmatprep.mubr.bf16.mxu0 %v20899_v0 }
 0x312   :  { %13916 = vmatmul.mubr.msk.bf16.gmra.mrb[44].mxu1 %vm312_vm1, %v17924_v39 }
 0x313   :  { %2860 = vmatprep.mubr.bf16.mxu1 %v20899_v0 }
 0x318   :  { %13922 = vmatmul.mubr.msk.bf16.gmra.mrb[48].mxu0 %vm312_vm1, %v17846_v20 }
 0x319   :  { %2943 = vmatprep.mubr.bf16.mxu0 %v20899_v0 }
 0x31a   :  { %13917 = vmatmul.mubr.msk.bf16.gmra.mrb[48].mxu1 %vm312_vm1, %v17928_v40 }
 0x31b   :  { %2870 = vmatprep.mubr.bf16.mxu1 %v20899_v0 }
 0x320   :  { %13923 = vmatmul.mubr.msk.bf16.gmra.mrb[52].mxu0 %vm312_vm1, %v17850_v21 }
 0x321   :  { %2953 = vmatprep.mubr.bf16.mxu0 %v20899_v0 }
 0x322   :  { %13918 = vmatmul.mubr.msk.bf16.gmra.mrb[52].mxu1 %vm312_vm1, %v18517_v63 }
 0x323   :  { %3066 = vmatprep.mubr.bf16.mxu1 %v20899_v0 }
 0x328   :  { %13924 = vmatmul.mubr.msk.bf16.gmra.mrb[56].mxu0 %vm312_vm1, %v17871_v26 }
 0x329   :  { %2963 = vmatprep.mubr.bf16.mxu0 %v20899_v0 }
 0x32a   :  { %13933 = vmatmul.mubr.msk.bf16.vlgmr.msra.gmra.mrb[56].mxu1 %vm312_vm1, %v17809_v12 }
 0x32b   :  { %3341 = vmatpush1.bf16.msra.mxu1 %v16850_v13  ;;  %3076 = vmatprep.mubr.bf16.mxu1 %v20899_v0  ;;  %v16892_v13 = vld [vmem:[#allocation2 + $0x2cc] ss:$48 sps:$4 sm:$0x3f]  }
 0x32c   :  { %13958 = vmatprep.subr.msk.bf16.mxu1 %vm349_vm0, %v16856_v14  ;;  %v16894_v14 = vld [vmem:[#allocation2 + $0x2c8] ss:$48 sps:$4 sm:$0x3f]  }
 0x32d   :  { %v3949_v15 = vsel %vm349_vm0, %v16894_v14, 0  ;;  %v16939_v14 = vld [vmem:[#allocation6 + $0x1d8] sm:$0xff]  }
 0x32f   :  { %3343 = vmatpush1.bf16.msra.mxu1 %v2570_v17  ;;  %v16900_v17 = vld [vmem:[#allocation2 + $0x30c] ss:$48 sps:$4 sm:$0xff]  }
 0x330   :  { %13925 = vmatmul.mubr.msk.bf16.gmra.mrb[60].mxu0 %vm312_vm1, %v17890_v30  ;;  %4107 = vmatprep.subr.bf16.mxu1 %v16864_v18  ;;  %v16895_v18 = vld [vmem:[#allocation2 + $0x300] ss:$48 sps:$4 sm:$0xff]  }
 0x331   :  { %2973 = vmatprep.mubr.bf16.mxu0 %v20899_v0 }
 0x332   :  { %13934 = vmatmul.mubr.msk.bf16.gmra.mrb[60].mxu1 %vm312_vm1, %v17827_v16 }
 0x333   :  { %3086 = vmatprep.mubr.bf16.mxu1 %v20899_v0 }
 0x338   :  { %13926 = vmatmul.mubr.msk.bf16.gmra.mrb[64].mxu0 %vm312_vm1, %v17894_v31 }
 0x339   :  { %2983 = vmatprep.mubr.bf16.mxu0 %v20899_v0 }
 0x33a   :  { %13935 = vmatmul.mubr.msk.bf16.gmra.mrb[64].mxu1 %vm312_vm1, %v17846_v20 }
 0x33b   :  { %3096 = vmatprep.mubr.bf16.mxu1 %v20899_v0 }
 0x340   :  { %13927 = vmatmul.mubr.msk.bf16.gmra.mrb[68].mxu0 %vm312_vm1, %v17911_v35 }
 0x341   :  { %2993 = vmatprep.mubr.bf16.mxu0 %v20899_v0 }
 0x342   :  { %13936 = vmatmul.mubr.msk.bf16.gmra.mrb[68].mxu1 %vm312_vm1, %v17850_v21 }
 0x343   :  { %3106 = vmatprep.mubr.bf16.mxu1 %v20899_v0 }
 0x348   :  { %13928 = vmatmul.mubr.msk.bf16.gmra.mrb[72].mxu0 %vm312_vm1, %v17921_v38 }
 0x349   :  { %3003 = vmatprep.mubr.bf16.mxu0 %v20899_v0 }
 0x34a   :  { %13937 = vmatmul.mubr.msk.bf16.gmra.mrb[72].mxu1 %vm312_vm1, %v17871_v26 }
 0x34b   :  { %3116 = vmatprep.mubr.bf16.mxu1 %v20899_v0 }
 0x350   :  { %13929 = vmatmul.mubr.msk.bf16.gmra.mrb[76].mxu0 %vm312_vm1, %v17924_v39 }
 0x351   :  { %3013 = vmatprep.mubr.bf16.mxu0 %v20899_v0 }
 0x352   :  { %13938 = vmatmul.mubr.msk.bf16.gmra.mrb[76].mxu1 %vm312_vm1, %v17890_v30 }
 0x353   :  { %3126 = vmatprep.mubr.bf16.mxu1 %v20899_v0 }
 0x358   :  { %13930 = vmatmul.mubr.msk.bf16.gmra.mrb[80].mxu0 %vm312_vm1, %v17928_v40 }
 0x359   :  { %3023 = vmatprep.mubr.bf16.mxu0 %v20899_v0 }
 0x35a   :  { %13939 = vmatmul.mubr.msk.bf16.gmra.mrb[80].mxu1 %vm312_vm1, %v17894_v31 }
 0x35b   :  { %3136 = vmatprep.mubr.bf16.mxu1 %v20899_v0 }
 0x360   :  { %13931 = vmatmul.mubr.msk.bf16.gmra.mrb[84].mxu0 %vm312_vm1, %v18517_v63 }
 0x361   :  { %3219 = vmatprep.mubr.bf16.mxu0 %v20899_v0 }
 0x362   :  { %13940 = vmatmul.mubr.msk.bf16.gmra.mrb[84].mxu1 %vm312_vm1, %v17911_v35 }
 0x363   :  { %3146 = vmatprep.mubr.bf16.mxu1 %v20899_v0 }
 0x368   :  { %13946 = vmatmul.mubr.msk.bf16.vlgmr.msra.gmra.mrb[88].mxu0 %vm312_vm1, %v17809_v12 }
 0x369   :  { %3955 = vmatpush1.bf16.msra.mxu0 %v16859_v19  ;;  %3229 = vmatprep.mubr.bf16.mxu0 %v20899_v0  ;;  %v16901_v19 = vld [vmem:[#allocation2 + $0x364] ss:$48 sps:$4 sm:$0x3f]  }
 0x36a   :  { %13995 = vmatprep.subr.msk.bf16.mxu0 %vm349_vm0, %v16865_v23  ;;  %13941 = vmatmul.mubr.msk.bf16.gmra.mrb[88].mxu1 %vm312_vm1, %v17921_v38  ;;  %v16903_v23 = vld [vmem:[#allocation2 + $0x360] ss:$48 sps:$4 sm:$0x3f]  }
 0x36b   :  { %3156 = vmatprep.mubr.bf16.mxu1 %v20899_v0  ;;  %v5298_v24 = vsel %vm349_vm0, %v16903_v23, 0  ;;  %v16944_v23 = vld [vmem:[#allocation6 + $0x1a0] sm:$0xff]  }
 0x36d   :  { %3957 = vmatpush1.bf16.msra.mxu0 %v3919_v25  ;;  %v16909_v25 = vld [vmem:[#allocation2 + $0x314] ss:$48 sps:$4 sm:$0xff]  }
 0x36e   :  { %4260 = vmatprep.subr.bf16.mxu0 %v16873_v27  ;;  %v16898_v27 = vld [vmem:[#allocation2 + $0x308] ss:$48 sps:$4 sm:$0xff]  }
 0x370   :  { %13947 = vmatmul.mubr.msk.bf16.gmra.mrb[92].mxu0 %vm312_vm1, %v17827_v16 }
 0x371   :  { %3239 = vmatprep.mubr.bf16.mxu0 %v20899_v0 }
 0x372   :  { %13942 = vmatmul.mubr.msk.bf16.gmra.mrb[92].mxu1 %vm312_vm1, %v17924_v39 }
 0x373   :  { %3166 = vmatprep.mubr.bf16.mxu1 %v20899_v0 }
 0x378   :  { %13948 = vmatmul.mubr.msk.bf16.gmra.mrb[96].mxu0 %vm312_vm1, %v17846_v20 }
 0x379   :  { %3249 = vmatprep.mubr.bf16.mxu0 %v20899_v0 }
 0x37a   :  { %13943 = vmatmul.mubr.msk.bf16.gmra.mrb[96].mxu1 %vm312_vm1, %v17928_v40 }
 0x37b   :  { %3176 = vmatprep.mubr.bf16.mxu1 %v20899_v0 }
 0x380   :  { %13949 = vmatmul.mubr.msk.bf16.gmra.mrb[100].mxu0 %vm312_vm1, %v17850_v21 }
 0x381   :  { %3259 = vmatprep.mubr.bf16.mxu0 %v20899_v0 }
 0x382   :  { %13944 = vmatmul.mubr.msk.bf16.gmra.mrb[100].mxu1 %vm312_vm1, %v18517_v63 }
 0x383   :  { %3372 = vmatprep.mubr.bf16.mxu1 %v20899_v0 }
 0x388   :  { %13950 = vmatmul.mubr.msk.bf16.gmra.mrb[104].mxu0 %vm312_vm1, %v17871_v26 }
 0x389   :  { %3269 = vmatprep.mubr.bf16.mxu0 %v20899_v0 }
 0x38a   :  { %13959 = vmatmul.mubr.msk.bf16.vlgmr.msra.gmra.mrb[104].mxu1 %vm312_vm1, %v17809_v12  ;;  %v16871_v12 = vld [vmem:[#allocation2 + $0x250] ss:$48 sps:$4 sm:$0xff]  }
 0x38b   :  { %4108 = vmatpush1.bf16.msra.mxu1 %v16862_v28  ;;  %3382 = vmatprep.mubr.bf16.mxu1 %v20899_v0  ;;  %v16904_v28 = vld [vmem:[#allocation2 + $0x36c] ss:$48 sps:$4 sm:$0x3f]  }
 0x38c   :  { %14008 = vmatprep.subr.msk.bf16.mxu1 %vm349_vm0, %v16868_v29  ;;  %v16906_v29 = vld [vmem:[#allocation2 + $0x368] ss:$48 sps:$4 sm:$0x3f]  }
 0x38d   :  { %v5304_v32 = vsel %vm349_vm0, %v16906_v29, 0  ;;  %v16946_v29 = vld [vmem:[#allocation6 + $0x1a8] sm:$0xff]  }
 0x38f   :  { %4110 = vmatpush1.bf16.msra.mxu1 %v3925_v33  ;;  %v16912_v33 = vld [vmem:[#allocation2 + $0x31c] ss:$48 sps:$4 sm:$0xff]  }
 0x390   :  { %13951 = vmatmul.mubr.msk.bf16.gmra.mrb[108].mxu0 %vm312_vm1, %v17890_v30  ;;  %4413 = vmatprep.subr.bf16.mxu1 %v16876_v34 }
 0x391   :  { %3279 = vmatprep.mubr.bf16.mxu0 %v20899_v0 }
 0x392   :  { %13960 = vmatmul.mubr.msk.bf16.gmra.mrb[108].mxu1 %vm312_vm1, %v17827_v16 }
 0x393   :  { %3392 = vmatprep.mubr.bf16.mxu1 %v20899_v0 }
 0x398   :  { %13952 = vmatmul.mubr.msk.bf16.gmra.mrb[112].mxu0 %vm312_vm1, %v17894_v31 }
 0x399   :  { %3289 = vmatprep.mubr.bf16.mxu0 %v20899_v0 }
 0x39a   :  { %13961 = vmatmul.mubr.msk.bf16.gmra.mrb[112].mxu1 %vm312_vm1, %v17846_v20 }
 0x39b   :  { %3402 = vmatprep.mubr.bf16.mxu1 %v20899_v0 }
 0x3a0   :  { %13953 = vmatmul.mubr.msk.bf16.gmra.mrb[116].mxu0 %vm312_vm1, %v17911_v35 }
 0x3a1   :  { %3299 = vmatprep.mubr.bf16.mxu0 %v20899_v0 }
 0x3a2   :  { %13962 = vmatmul.mubr.msk.bf16.gmra.mrb[116].mxu1 %vm312_vm1, %v17850_v21 }
 0x3a3   :  { %3412 = vmatprep.mubr.bf16.mxu1 %v20899_v0 }
 0x3a8   :  { %13954 = vmatmul.mubr.msk.bf16.gmra.mrb[120].mxu0 %vm312_vm1, %v17921_v38 }
 0x3a9   :  { %3309 = vmatprep.mubr.bf16.mxu0 %v20899_v0 }
 0x3aa   :  { %13963 = vmatmul.mubr.msk.bf16.gmra.mrb[120].mxu1 %vm312_vm1, %v17871_v26 }
 0x3ab   :  { %3422 = vmatprep.mubr.bf16.mxu1 %v20899_v0 }
 0x3b0   :  { %13955 = vmatmul.mubr.msk.bf16.gmra.mrb[124].mxu0 %vm312_vm1, %v17924_v39 }
 0x3b1   :  { %3319 = vmatprep.mubr.bf16.mxu0 %v20899_v0 }
 0x3b2   :  { %13964 = vmatmul.mubr.msk.bf16.gmra.mrb[124].mxu1 %vm312_vm1, %v17890_v30 }
 0x3b3   :  { %3432 = vmatprep.mubr.bf16.mxu1 %v20899_v0 }
 0x3b8   :  { %13956 = vmatmul.mubr.msk.bf16.gmra.mrb[128].mxu0 %vm312_vm1, %v17928_v40 }
 0x3b9   :  { %3329 = vmatprep.mubr.bf16.mxu0 %v20899_v0 }
 0x3ba   :  { %13965 = vmatmul.mubr.msk.bf16.gmra.mrb[128].mxu1 %vm312_vm1, %v17894_v31 }
 0x3bb   :  { %3442 = vmatprep.mubr.bf16.mxu1 %v20899_v0 }
 0x3c0   :  { %13957 = vmatmul.mubr.msk.bf16.gmra.mrb[132].mxu0 %vm312_vm1, %v18517_v63 }
 0x3c1   :  { %3986 = vmatprep.mubr.bf16.mxu0 %v20899_v0 }
 0x3c2   :  { %13966 = vmatmul.mubr.msk.bf16.gmra.mrb[132].mxu1 %vm312_vm1, %v17911_v35 }
 0x3c3   :  { %3452 = vmatprep.mubr.bf16.mxu1 %v20899_v0 }
 0x3c8   :  { %13996 = vmatmul.mubr.msk.bf16.vlgmr.msra.gmra.mrb[0].mxu0 %vm312_vm1, %v17938_v47 }
 0x3c9   :  { %4261 = vmatpush1.bf16.msra.mxu0 %v16871_v12  ;;  %3996 = vmatprep.mubr.bf16.mxu0 %v20899_v0  ;;  %v16919_v12 = vld [vmem:[#allocation2 + $0x320] ss:$48 sps:$4 sm:$0xff]  }
 0x3ca   :  { %14021 = vmatprep.subr.msk.bf16.mxu0 %vm349_vm0, %v16877_v48  ;;  %13967 = vmatmul.mubr.msk.bf16.gmra.mrb[136].mxu1 %vm312_vm1, %v17921_v38  ;;  %v16925_v48 = vld [vmem:[#allocation2 + $0x384] ss:$48 sps:$4 sm:$0x3f]  }
 0x3cb   :  { %3462 = vmatprep.mubr.bf16.mxu1 %v20899_v0 }
 0x3cd   :  { %4263 = vmatpush1.bf16.msra.mxu0 %v3931_v50  ;;  %v5322_v50 = vsel %vm349_vm0, %v16927_v49, 0 }
 0x3ce   :  { %4566 = vmatprep.subr.bf16.mxu0 %v16885_v52  ;;  %v16922_v52 = vld [vmem:[#allocation2 + $0x328] ss:$48 sps:$4 sm:$0xff]  }
 0x3d0   :  { %13997 = vmatmul.mubr.msk.bf16.gmra.mrb[4].mxu0 %vm312_vm1, %v17954_v57 }
 0x3d1   :  { %4006 = vmatprep.mubr.bf16.mxu0 %v20899_v0 }
 0x3d2   :  { %13968 = vmatmul.mubr.msk.bf16.gmra.mrb[140].mxu1 %vm312_vm1, %v17924_v39 }
 0x3d3   :  { %3472 = vmatprep.mubr.bf16.mxu1 %v20899_v0 }
 0x3d8   :  { %13998 = vmatmul.mubr.msk.bf16.gmra.mrb[8].mxu0 %vm312_vm1, %v17964_v62 }
 0x3d9   :  { %4016 = vmatprep.mubr.bf16.mxu0 %v20899_v0 }
 0x3da   :  { %13969 = vmatmul.mubr.msk.bf16.gmra.mrb[144].mxu1 %vm312_vm1, %v17928_v40 }
 0x3db   :  { %3482 = vmatprep.mubr.bf16.mxu1 %v20899_v0 }
 0x3e0   :  { %13999 = vmatmul.mubr.msk.bf16.gmra.mrb[12].mxu0 %vm312_vm1, %v17976_v1 }
 0x3e1   :  { %4026 = vmatprep.mubr.bf16.mxu0 %v20899_v0 }
 0x3e2   :  { %13970 = vmatmul.mubr.msk.bf16.gmra.mrb[148].mxu1 %vm312_vm1, %v18517_v63 }
 0x3e3   :  { %4139 = vmatprep.mubr.bf16.mxu1 %v20899_v0 }
 0x3e8   :  { %14000 = vmatmul.mubr.msk.bf16.gmra.mrb[16].mxu0 %vm312_vm1, %v17986_v2 }
 0x3e9   :  { %4036 = vmatprep.mubr.bf16.mxu0 %v20899_v0 }
 0x3ea   :  { %14009 = vmatmul.mubr.msk.bf16.vlgmr.msra.gmra.mrb[8].mxu1 %vm312_vm1, %v17938_v47 }
 0x3eb   :  { %4414 = vmatpush1.bf16.msra.mxu1 %v16874_v53  ;;  %4149 = vmatprep.mubr.bf16.mxu1 %v20899_v0  ;;  %v16928_v53 = vld [vmem:[#allocation2 + $0x38c] ss:$48 sps:$4 sm:$0x3f]  }
 0x3ec   :  { %14034 = vmatprep.subr.msk.bf16.mxu1 %vm349_vm0, %v16880_v54  ;;  %v16930_v54 = vld [vmem:[#allocation2 + $0x388] ss:$48 sps:$4 sm:$0x3f]  }
 0x3ed   :  { %v5328_v55 = vsel %vm349_vm0, %v16930_v54, 0 }
 0x3ef   :  { %4416 = vmatpush1.bf16.msra.mxu1 %v3937_v56  ;;  %v16931_v56 = vld [vmem:[#allocation6 + $0x1c0] sm:$0xff]  }
 0x3f0   :  { %14001 = vmatmul.mubr.msk.bf16.gmra.mrb[20].mxu0 %vm312_vm1, %v17996_v3  ;;  %4719 = vmatprep.subr.bf16.mxu1 %v16888_v58  ;;  %v16932_v58 = vld [vmem:[#allocation6 + $0x180] sm:$0xff]  }
 0x3f1   :  { %4046 = vmatprep.mubr.bf16.mxu0 %v20899_v0 }
 0x3f2   :  { %14010 = vmatmul.mubr.msk.bf16.gmra.mrb[12].mxu1 %vm312_vm1, %v17954_v57 }
 0x3f3   :  { %4159 = vmatprep.mubr.bf16.mxu1 %v20899_v0 }
 0x3f8   :  { %14002 = vmatmul.mubr.msk.bf16.gmra.mrb[24].mxu0 %vm312_vm1, %v18007_v6 }
 0x3f9   :  { %4056 = vmatprep.mubr.bf16.mxu0 %v20899_v0 }
 0x3fa   :  { %14011 = vmatmul.mubr.msk.bf16.gmra.mrb[16].mxu1 %vm312_vm1, %v17964_v62 }
 0x3fb   :  { %4169 = vmatprep.mubr.bf16.mxu1 %v20899_v0 }
 0x400   :  { %14003 = vmatmul.mubr.msk.bf16.gmra.mrb[28].mxu0 %vm312_vm1, %v18017_v7 }
 0x401   :  { %4066 = vmatprep.mubr.bf16.mxu0 %v20899_v0 }
 0x402   :  { %14012 = vmatmul.mubr.msk.bf16.gmra.mrb[20].mxu1 %vm312_vm1, %v17976_v1 }
 0x403   :  { %4179 = vmatprep.mubr.bf16.mxu1 %v20899_v0 }
 0x408   :  { %14004 = vmatmul.mubr.msk.bf16.gmra.mrb[32].mxu0 %vm312_vm1, %v18027_v8 }
 0x409   :  { %4076 = vmatprep.mubr.bf16.mxu0 %v20899_v0 }
 0x40a   :  { %14013 = vmatmul.mubr.msk.bf16.gmra.mrb[24].mxu1 %vm312_vm1, %v17986_v2 }
 0x40b   :  { %4189 = vmatprep.mubr.bf16.mxu1 %v20899_v0 }
 0x410   :  { %14005 = vmatmul.mubr.msk.bf16.gmra.mrb[36].mxu0 %vm312_vm1, %v17930_v41 }
 0x411   :  { %4086 = vmatprep.mubr.bf16.mxu0 %v20899_v0 }
 0x412   :  { %14014 = vmatmul.mubr.msk.bf16.gmra.mrb[28].mxu1 %vm312_vm1, %v17996_v3 }
 0x413   :  { %4199 = vmatprep.mubr.bf16.mxu1 %v20899_v0 }
 0x418   :  { %14006 = vmatmul.mubr.msk.bf16.gmra.mrb[136].mxu0 %vm312_vm1, %v17942_v51 }
 0x419   :  { %4096 = vmatprep.mubr.bf16.mxu0 %v20899_v0 }
 0x41a   :  { %14015 = vmatmul.mubr.msk.bf16.gmra.mrb[32].mxu1 %vm312_vm1, %v18007_v6 }
 0x41b   :  { %4209 = vmatprep.mubr.bf16.mxu1 %v20899_v0 }
 0x420   :  { %14007 = vmatmul.mubr.msk.bf16.gmra.mrb[140].mxu0 %vm312_vm1, %v18755_v61 }
 0x421   :  { %4292 = vmatprep.mubr.bf16.mxu0 %v20899_v0 }
 0x422   :  { %14016 = vmatmul.mubr.msk.bf16.gmra.mrb[36].mxu1 %vm312_vm1, %v18017_v7 }
 0x423   :  { %4219 = vmatprep.mubr.bf16.mxu1 %v20899_v0 }
 0x428   :  { %14022 = vmatmul.mubr.msk.bf16.vlgmr.msra.gmra.mrb[40].mxu0 %vm312_vm1, %v17938_v47 }
 0x429   :  { %4567 = vmatpush1.bf16.msra.mxu0 %v16883_v4  ;;  %4302 = vmatprep.mubr.bf16.mxu0 %v20899_v0  ;;  %v16933_v4 = vld [vmem:[#allocation6 + $0x240] sm:$0xff]  }
 0x42a   :  { %14047 = vmatprep.subr.msk.bf16.mxu0 %vm349_vm0, %v16889_v5  ;;  %14017 = vmatmul.mubr.msk.bf16.gmra.mrb[40].mxu1 %vm312_vm1, %v18027_v8 }
 0x42b   :  { %4229 = vmatprep.mubr.bf16.mxu1 %v20899_v0 }
 0x42d   :  { %4569 = vmatpush1.bf16.msra.mxu0 %v3943_v60 }
 0x42e   :  { %5333 = vmatprep.subr.bf16.mxu0 %v16897_v10  ;;  %v16938_v10 = vld [vmem:[#allocation6 + $0x190] sm:$0xff]  }
 0x430   :  { %14023 = vmatmul.mubr.msk.bf16.gmra.mrb[44].mxu0 %vm312_vm1, %v17954_v57 }
 0x431   :  { %4312 = vmatprep.mubr.bf16.mxu0 %v20899_v0 }
 0x432   :  { %14018 = vmatmul.mubr.msk.bf16.gmra.mrb[44].mxu1 %vm312_vm1, %v17930_v41 }
 0x433   :  { %4239 = vmatprep.mubr.bf16.mxu1 %v20899_v0 }
 0x438   :  { %14024 = vmatmul.mubr.msk.bf16.gmra.mrb[48].mxu0 %vm312_vm1, %v17964_v62 }
 0x439   :  { %4322 = vmatprep.mubr.bf16.mxu0 %v20899_v0 }
 0x43a   :  { %14019 = vmatmul.mubr.msk.bf16.gmra.mrb[48].mxu1 %vm312_vm1, %v17942_v51 }
 0x43b   :  { %4249 = vmatprep.mubr.bf16.mxu1 %v20899_v0 }
 0x440   :  { %14025 = vmatmul.mubr.msk.bf16.gmra.mrb[52].mxu0 %vm312_vm1, %v17976_v1 }
 0x441   :  { %4332 = vmatprep.mubr.bf16.mxu0 %v20899_v0 }
 0x442   :  { %14020 = vmatmul.mubr.msk.bf16.gmra.mrb[52].mxu1 %vm312_vm1, %v18755_v61 }
 0x443   :  { %4445 = vmatprep.mubr.bf16.mxu1 %v20899_v0 }
 0x448   :  { %14026 = vmatmul.mubr.msk.bf16.gmra.mrb[56].mxu0 %vm312_vm1, %v17986_v2 }
 0x449   :  { %4342 = vmatprep.mubr.bf16.mxu0 %v20899_v0 }
 0x44a   :  { %14035 = vmatmul.mubr.msk.bf16.vlgmr.msra.gmra.mrb[56].mxu1 %vm312_vm1, %v17938_v47 }
 0x44b   :  { %4720 = vmatpush1.bf16.msra.mxu1 %v16886_v11  ;;  %4455 = vmatprep.mubr.bf16.mxu1 %v20899_v0 }
 0x44c   :  { %14060 = vmatprep.subr.msk.bf16.mxu1 %vm349_vm0, %v16892_v13 }
 0x44f   :  { %4722 = vmatpush1.bf16.msra.mxu1 %v3949_v15  ;;  %v16940_v15 = vld [vmem:[#allocation6 + $0x198] sm:$0xff]  }
 0x450   :  { %14027 = vmatmul.mubr.msk.bf16.gmra.mrb[60].mxu0 %vm312_vm1, %v17996_v3  ;;  %5486 = vmatprep.subr.bf16.mxu1 %v16900_v17 }
 0x451   :  { %4352 = vmatprep.mubr.bf16.mxu0 %v20899_v0 }
 0x452   :  { %14036 = vmatmul.mubr.msk.bf16.gmra.mrb[60].mxu1 %vm312_vm1, %v17954_v57 }
 0x453   :  { %4465 = vmatprep.mubr.bf16.mxu1 %v20899_v0 }
 0x458   :  { %14028 = vmatmul.mubr.msk.bf16.gmra.mrb[64].mxu0 %vm312_vm1, %v18007_v6 }
 0x459   :  { %4362 = vmatprep.mubr.bf16.mxu0 %v20899_v0 }
 0x45a   :  { %14037 = vmatmul.mubr.msk.bf16.gmra.mrb[64].mxu1 %vm312_vm1, %v17964_v62 }
 0x45b   :  { %4475 = vmatprep.mubr.bf16.mxu1 %v20899_v0 }
 0x460   :  { %14029 = vmatmul.mubr.msk.bf16.gmra.mrb[68].mxu0 %vm312_vm1, %v18017_v7 }
 0x461   :  { %4372 = vmatprep.mubr.bf16.mxu0 %v20899_v0 }
 0x462   :  { %14038 = vmatmul.mubr.msk.bf16.gmra.mrb[68].mxu1 %vm312_vm1, %v17976_v1 }
 0x463   :  { %4485 = vmatprep.mubr.bf16.mxu1 %v20899_v0 }
 0x468   :  { %14030 = vmatmul.mubr.msk.bf16.gmra.mrb[72].mxu0 %vm312_vm1, %v18027_v8 }
 0x469   :  { %4382 = vmatprep.mubr.bf16.mxu0 %v20899_v0 }
 0x46a   :  { %14039 = vmatmul.mubr.msk.bf16.gmra.mrb[72].mxu1 %vm312_vm1, %v17986_v2 }
 0x46b   :  { %4495 = vmatprep.mubr.bf16.mxu1 %v20899_v0 }
 0x470   :  { %14031 = vmatmul.mubr.msk.bf16.gmra.mrb[76].mxu0 %vm312_vm1, %v17930_v41 }
 0x471   :  { %4392 = vmatprep.mubr.bf16.mxu0 %v20899_v0 }
 0x472   :  { %14040 = vmatmul.mubr.msk.bf16.gmra.mrb[76].mxu1 %vm312_vm1, %v17996_v3 }
 0x473   :  { %4505 = vmatprep.mubr.bf16.mxu1 %v20899_v0 }
 0x478   :  { %14032 = vmatmul.mubr.msk.bf16.gmra.mrb[80].mxu0 %vm312_vm1, %v17942_v51 }
 0x479   :  { %4402 = vmatprep.mubr.bf16.mxu0 %v20899_v0 }
 0x47a   :  { %14041 = vmatmul.mubr.msk.bf16.gmra.mrb[80].mxu1 %vm312_vm1, %v18007_v6 }
 0x47b   :  { %4515 = vmatprep.mubr.bf16.mxu1 %v20899_v0 }
 0x480   :  { %14033 = vmatmul.mubr.msk.bf16.gmra.mrb[84].mxu0 %vm312_vm1, %v18755_v61 }
 0x481   :  { %4598 = vmatprep.mubr.bf16.mxu0 %v20899_v0 }
 0x482   :  { %14042 = vmatmul.mubr.msk.bf16.gmra.mrb[84].mxu1 %vm312_vm1, %v18017_v7 }
 0x483   :  { %4525 = vmatprep.mubr.bf16.mxu1 %v20899_v0 }
 0x488   :  { %14048 = vmatmul.mubr.msk.bf16.vlgmr.msra.gmra.mrb[88].mxu0 %vm312_vm1, %v17938_v47 }
 0x489   :  { %5334 = vmatpush1.bf16.msra.mxu0 %v16895_v18  ;;  %4608 = vmatprep.mubr.bf16.mxu0 %v20899_v0  ;;  %v16943_v18 = vld [vmem:[#allocation6 + $0x1e0] sm:$0xff]  }
 0x48a   :  { %14097 = vmatprep.subr.msk.bf16.mxu0 %vm349_vm0, %v16901_v19  ;;  %14043 = vmatmul.mubr.msk.bf16.gmra.mrb[88].mxu1 %vm312_vm1, %v18027_v8 }
 0x48b   :  { %4535 = vmatprep.mubr.bf16.mxu1 %v20899_v0 }
 0x48d   :  { %5336 = vmatpush1.bf16.msra.mxu0 %v5298_v24 }
 0x48e   :  { %5639 = vmatprep.subr.bf16.mxu0 %v16909_v25 }
 0x490   :  { %14049 = vmatmul.mubr.msk.bf16.gmra.mrb[92].mxu0 %vm312_vm1, %v17954_v57 }
 0x491   :  { %4618 = vmatprep.mubr.bf16.mxu0 %v20899_v0 }
 0x492   :  { %14044 = vmatmul.mubr.msk.bf16.gmra.mrb[92].mxu1 %vm312_vm1, %v17930_v41 }
 0x493   :  { %4545 = vmatprep.mubr.bf16.mxu1 %v20899_v0 }
 0x498   :  { %14050 = vmatmul.mubr.msk.bf16.gmra.mrb[96].mxu0 %vm312_vm1, %v17964_v62 }
 0x499   :  { %4628 = vmatprep.mubr.bf16.mxu0 %v20899_v0 }
 0x49a   :  { %14045 = vmatmul.mubr.msk.bf16.gmra.mrb[96].mxu1 %vm312_vm1, %v17942_v51 }
 0x49b   :  { %4555 = vmatprep.mubr.bf16.mxu1 %v20899_v0 }
 0x4a0   :  { %14051 = vmatmul.mubr.msk.bf16.gmra.mrb[100].mxu0 %vm312_vm1, %v17976_v1 }
 0x4a1   :  { %4638 = vmatprep.mubr.bf16.mxu0 %v20899_v0 }
 0x4a2   :  { %14046 = vmatmul.mubr.msk.bf16.gmra.mrb[100].mxu1 %vm312_vm1, %v18755_v61 }
 0x4a3   :  { %4751 = vmatprep.mubr.bf16.mxu1 %v20899_v0 }
 0x4a8   :  { %14052 = vmatmul.mubr.msk.bf16.gmra.mrb[104].mxu0 %vm312_vm1, %v17986_v2 }
 0x4a9   :  { %4648 = vmatprep.mubr.bf16.mxu0 %v20899_v0 }
 0x4aa   :  { %14061 = vmatmul.mubr.msk.bf16.vlgmr.msra.gmra.mrb[104].mxu1 %vm312_vm1, %v17938_v47  ;;  %v16907_v47 = vld [vmem:[#allocation2 + $0x310] ss:$48 sps:$4 sm:$0xff]  }
 0x4ab   :  { %5487 = vmatpush1.bf16.msra.mxu1 %v16898_v27  ;;  %4761 = vmatprep.mubr.bf16.mxu1 %v20899_v0  ;;  %v16945_v27 = vld [vmem:[#allocation6 + $0x1e8] sm:$0xff]  }
 0x4ac   :  { %14110 = vmatprep.subr.msk.bf16.mxu1 %vm349_vm0, %v16904_v28  ;;  %v16934_v28 = vld [vmem:[#allocation6 + $0x200] sm:$0xff]  }
 0x4af   :  { %5489 = vmatpush1.bf16.msra.mxu1 %v5304_v32  ;;  %v16941_v32 = vld [vmem:[#allocation6 + $0x248] sm:$0xff]  }
 0x4b0   :  { %14053 = vmatmul.mubr.msk.bf16.gmra.mrb[108].mxu0 %vm312_vm1, %v17996_v3  ;;  %5792 = vmatprep.subr.bf16.mxu1 %v16912_v33 }
 0x4b1   :  { %4658 = vmatprep.mubr.bf16.mxu0 %v20899_v0 }
 0x4b2   :  { %14062 = vmatmul.mubr.msk.bf16.gmra.mrb[108].mxu1 %vm312_vm1, %v17954_v57  ;;  %v16913_v57 = vld [vmem:[#allocation2 + $0x374] ss:$48 sps:$4 sm:$0x3f]  }
 0x4b3   :  { %4771 = vmatprep.mubr.bf16.mxu1 %v20899_v0 }
 0x4b8   :  { %14054 = vmatmul.mubr.msk.bf16.gmra.mrb[112].mxu0 %vm312_vm1, %v18007_v6 }
 0x4b9   :  { %4668 = vmatprep.mubr.bf16.mxu0 %v20899_v0 }
 0x4ba   :  { %14063 = vmatmul.mubr.msk.bf16.gmra.mrb[112].mxu1 %vm312_vm1, %v17964_v62  ;;  %v16915_v62 = vld [vmem:[#allocation2 + $0x370] ss:$48 sps:$4 sm:$0x3f]  }
 0x4bb   :  { %4781 = vmatprep.mubr.bf16.mxu1 %v20899_v0 }
 0x4c0   :  { %14055 = vmatmul.mubr.msk.bf16.gmra.mrb[116].mxu0 %vm312_vm1, %v18017_v7 }
 0x4c1   :  { %4678 = vmatprep.mubr.bf16.mxu0 %v20899_v0 }
 0x4c2   :  { %14064 = vmatmul.mubr.msk.bf16.gmra.mrb[116].mxu1 %vm312_vm1, %v17976_v1  ;;  %v5310_v1 = vsel %vm349_vm0, %v16915_v62, 0  ;;  %v16942_v62 = vld [vmem:[#allocation6 + $0x208] sm:$0xff]  }
 0x4c3   :  { %4791 = vmatprep.mubr.bf16.mxu1 %v20899_v0 }
 0x4c8   :  { %14056 = vmatmul.mubr.msk.bf16.gmra.mrb[120].mxu0 %vm312_vm1, %v18027_v8 }
 0x4c9   :  { %4688 = vmatprep.mubr.bf16.mxu0 %v20899_v0 }
 0x4ca   :  { %14065 = vmatmul.mubr.msk.bf16.gmra.mrb[120].mxu1 %vm312_vm1, %v17986_v2  ;;  %v16921_v2 = vld [vmem:[#allocation2 + $0x324] ss:$48 sps:$4 sm:$0xff]  }
 0x4cb   :  { %4801 = vmatprep.mubr.bf16.mxu1 %v20899_v0 }
 0x4d0   :  { %14057 = vmatmul.mubr.msk.bf16.gmra.mrb[124].mxu0 %vm312_vm1, %v17930_v41 }
 0x4d1   :  { %4698 = vmatprep.mubr.bf16.mxu0 %v20899_v0 }
 0x4d2   :  { %14066 = vmatmul.mubr.msk.bf16.gmra.mrb[124].mxu1 %vm312_vm1, %v17996_v3  ;;  %v16916_v3 = vld [vmem:[#allocation2 + $0x37c] ss:$48 sps:$4 sm:$0x3f]  }
 0x4d3   :  { %4811 = vmatprep.mubr.bf16.mxu1 %v20899_v0 }
 0x4d8   :  { %14058 = vmatmul.mubr.msk.bf16.gmra.mrb[128].mxu0 %vm312_vm1, %v17942_v51 }
 0x4d9   :  { %4708 = vmatprep.mubr.bf16.mxu0 %v20899_v0 }
 0x4da   :  { %14067 = vmatmul.mubr.msk.bf16.gmra.mrb[128].mxu1 %vm312_vm1, %v18007_v6 }
 0x4db   :  { %4821 = vmatprep.mubr.bf16.mxu1 %v20899_v0 }
 0x4e0   :  { %14059 = vmatmul.mubr.msk.bf16.gmra.mrb[132].mxu0 %vm312_vm1, %v18755_v61 }
 0x4e1   :  { %5365 = vmatprep.mubr.bf16.mxu0 %v20899_v0 }
 0x4e2   :  { %14068 = vmatmul.mubr.msk.bf16.gmra.mrb[132].mxu1 %vm312_vm1, %v18017_v7  ;;  %v16924_v7 = vld [vmem:[#allocation2 + $0x32c] ss:$48 sps:$4 sm:$0xff]  }
 0x4e3   :  { %4831 = vmatprep.mubr.bf16.mxu1 %v20899_v0 }
 0x4e8   :  { %14098 = vmatmul.mubr.msk.bf16.vlgmr.msra.gmra.mrb[0].mxu0 %vm312_vm1, %v17827_v16 }
 0x4e9   :  { %5640 = vmatpush1.bf16.msra.mxu0 %v16907_v47  ;;  %5375 = vmatprep.mubr.bf16.mxu0 %v20899_v0  ;;  %v16947_v47 = vld [vmem:[#allocation6 + $0x1f0] sm:$0xff]  }
 0x4ea   :  { %14123 = vmatprep.subr.msk.bf16.mxu0 %vm349_vm0, %v16913_v57  ;;  %14069 = vmatmul.mubr.msk.bf16.gmra.mrb[136].mxu1 %vm312_vm1, %v18027_v8  ;;  %v130_v8 = vld [vmem:[%s20891_s0 + $0xd8] sm:$0xff] }
 0x4eb   :  { %4841 = vmatprep.mubr.bf16.mxu1 %v20899_v0  ;;  %v18989_v34 = vpack.c.bf16 %v130_v8, %v18748_v59  ;;  %v16935_v59 = vld [vmem:[#allocation6 + $0x1c8] sm:$0xff]  }
 0x4ed   :  { %5642 = vmatpush1.bf16.msra.mxu0 %v5310_v1  ;;  %v16948_v1 = vld [vmem:[#allocation6 + $0x1b0] sm:$0xff]  }
 0x4ee   :  { %5945 = vmatprep.subr.bf16.mxu0 %v16921_v2 }
 0x4f0   :  { %14099 = vmatmul.mubr.msk.bf16.gmra.mrb[4].mxu0 %vm312_vm1, %v17846_v20 }
 0x4f1   :  { %5385 = vmatprep.mubr.bf16.mxu0 %v20899_v0 }
 0x4f2   :  { %14070 = vmatmul.mubr.msk.bf16.gmra.mrb[140].mxu1 %vm312_vm1, %v17930_v41  ;;  %v16910_v41 = vld [vmem:[#allocation2 + $0x318] ss:$48 sps:$4 sm:$0xff]  }
 0x4f3   :  { %4851 = vmatprep.mubr.bf16.mxu1 %v20899_v0 }
 0x4f8   :  { %14100 = vmatmul.mubr.msk.bf16.gmra.mrb[8].mxu0 %vm312_vm1, %v17850_v21 }
 0x4f9   :  { %5395 = vmatprep.mubr.bf16.mxu0 %v20899_v0 }
 0x4fa   :  { %14071 = vmatmul.mubr.msk.bf16.gmra.mrb[144].mxu1 %vm312_vm1, %v17942_v51  ;;  %v16918_v51 = vld [vmem:[#allocation2 + $0x378] ss:$48 sps:$4 sm:$0x3f]  }
 0x4fb   :  { %4861 = vmatprep.mubr.bf16.mxu1 %v20899_v0  ;;  %v5316_v6 = vsel %vm349_vm0, %v16918_v51, 0 }
 0x500   :  { %14101 = vmatmul.mubr.msk.bf16.gmra.mrb[12].mxu0 %vm312_vm1, %v17871_v26 }
 0x501   :  { %5405 = vmatprep.mubr.bf16.mxu0 %v20899_v0 }
 0x502   :  { %14072 = vmatmul.mubr.msk.bf16.gmra.mrb[148].mxu1 %vm312_vm1, %v18755_v61  ;;  %v16936_v61 = vld [vmem:[#allocation6 + $0x188] sm:$0xff]  }
 0x503   :  { %5518 = vmatprep.mubr.bf16.mxu1 %v20899_v0 }
 0x508   :  { %14102 = vmatmul.mubr.msk.bf16.gmra.mrb[16].mxu0 %vm312_vm1, %v17890_v30 }
 0x509   :  { %5415 = vmatprep.mubr.bf16.mxu0 %v20899_v0 }
 0x50a   :  { %14111 = vmatmul.mubr.msk.bf16.vlgmr.msra.gmra.mrb[8].mxu1 %vm312_vm1, %v17827_v16 }
 0x50b   :  { %5793 = vmatpush1.bf16.msra.mxu1 %v16910_v41  ;;  %5528 = vmatprep.mubr.bf16.mxu1 %v20899_v0 }
 0x50c   :  { %14136 = vmatprep.subr.msk.bf16.mxu1 %vm349_vm0, %v16916_v3  ;;  %v16951_v3 = vld [vmem:[#allocation6 + $0x1f8] sm:$0xff]  }
 0x50f   :  { %5795 = vmatpush1.bf16.msra.mxu1 %v5316_v6 }
 0x510   :  { %14103 = vmatmul.mubr.msk.bf16.gmra.mrb[20].mxu0 %vm312_vm1, %v17894_v31  ;;  %6098 = vmatprep.subr.bf16.mxu1 %v16924_v7  ;;  %v16949_v7 = vld [vmem:[#allocation6 + $0x250] sm:$0xff]  }
 0x511   :  { %5425 = vmatprep.mubr.bf16.mxu0 %v20899_v0 }
 0x512   :  { %14112 = vmatmul.mubr.msk.bf16.gmra.mrb[12].mxu1 %vm312_vm1, %v17846_v20 }
 0x513   :  { %5538 = vmatprep.mubr.bf16.mxu1 %v20899_v0 }
 0x518   :  { %14104 = vmatmul.mubr.msk.bf16.gmra.mrb[24].mxu0 %vm312_vm1, %v17911_v35 }
 0x519   :  { %5435 = vmatprep.mubr.bf16.mxu0 %v20899_v0 }
 0x51a   :  { %14113 = vmatmul.mubr.msk.bf16.gmra.mrb[16].mxu1 %vm312_vm1, %v17850_v21 }
 0x51b   :  { %5548 = vmatprep.mubr.bf16.mxu1 %v20899_v0 }
 0x520   :  { %14105 = vmatmul.mubr.msk.bf16.gmra.mrb[28].mxu0 %vm312_vm1, %v17921_v38 }
 0x521   :  { %5445 = vmatprep.mubr.bf16.mxu0 %v20899_v0 }
 0x522   :  { %14114 = vmatmul.mubr.msk.bf16.gmra.mrb[20].mxu1 %vm312_vm1, %v17871_v26 }
 0x523   :  { %5558 = vmatprep.mubr.bf16.mxu1 %v20899_v0 }
 0x528   :  { %14106 = vmatmul.mubr.msk.bf16.gmra.mrb[32].mxu0 %vm312_vm1, %v17924_v39 }
 0x529   :  { %5455 = vmatprep.mubr.bf16.mxu0 %v20899_v0 }
 0x52a   :  { %14115 = vmatmul.mubr.msk.bf16.gmra.mrb[24].mxu1 %vm312_vm1, %v17890_v30 }
 0x52b   :  { %5568 = vmatprep.mubr.bf16.mxu1 %v20899_v0 }
 0x530   :  { %14107 = vmatmul.mubr.msk.bf16.gmra.mrb[36].mxu0 %vm312_vm1, %v17928_v40 }
 0x531   :  { %5465 = vmatprep.mubr.bf16.mxu0 %v20899_v0 }
 0x532   :  { %14116 = vmatmul.mubr.msk.bf16.gmra.mrb[28].mxu1 %vm312_vm1, %v17894_v31 }
 0x533   :  { %5578 = vmatprep.mubr.bf16.mxu1 %v20899_v0 }
 0x538   :  { %14108 = vmatmul.mubr.msk.bf16.gmra.mrb[136].mxu0 %vm312_vm1, %v18517_v63 }
 0x539   :  { %5475 = vmatprep.mubr.bf16.mxu0 %v20899_v0 }
 0x53a   :  { %14117 = vmatmul.mubr.msk.bf16.gmra.mrb[32].mxu1 %vm312_vm1, %v17911_v35 }
 0x53b   :  { %5588 = vmatprep.mubr.bf16.mxu1 %v20899_v0 }
 0x540   :  { %14109 = vmatmul.mubr.msk.bf16.gmra.mrb[140].mxu0 %vm312_vm1, %v18989_v34 }
 0x541   :  { %5671 = vmatprep.mubr.bf16.mxu0 %v20899_v0 }
 0x542   :  { %14118 = vmatmul.mubr.msk.bf16.gmra.mrb[36].mxu1 %vm312_vm1, %v17921_v38 }
 0x543   :  { %5598 = vmatprep.mubr.bf16.mxu1 %v20899_v0 }
 0x548   :  { %14124 = vmatmul.mubr.msk.bf16.vlgmr.msra.gmra.mrb[40].mxu0 %vm312_vm1, %v17827_v16 }
 0x549   :  { %5946 = vmatpush1.bf16.msra.mxu0 %v16919_v12  ;;  %5681 = vmatprep.mubr.bf16.mxu0 %v20899_v0 }
 0x54a   :  { %14149 = vmatprep.subr.msk.bf16.mxu0 %vm349_vm0, %v16925_v48  ;;  %14119 = vmatmul.mubr.msk.bf16.gmra.mrb[40].mxu1 %vm312_vm1, %v17924_v39  ;;  %v16950_v48 = vld [vmem:[#allocation6 + $0x210] sm:$0xff]  }
 0x54b   :  { %5608 = vmatprep.mubr.bf16.mxu1 %v20899_v0 }
 0x54d   :  { %5948 = vmatpush1.bf16.msra.mxu0 %v5322_v50 }
 0x54e   :  { %14761 = vmatprep.subr.bf16.mxu0 %v16931_v56  ;;  %v16953_v56 = vld [vmem:[#allocation6 + $0x258] sm:$0xff]  }
 0x550   :  { %14125 = vmatmul.mubr.msk.bf16.gmra.mrb[44].mxu0 %vm312_vm1, %v17846_v20 }
 0x551   :  { %5691 = vmatprep.mubr.bf16.mxu0 %v20899_v0 }
 0x552   :  { %14120 = vmatmul.mubr.msk.bf16.gmra.mrb[44].mxu1 %vm312_vm1, %v17928_v40 }
 0x553   :  { %5618 = vmatprep.mubr.bf16.mxu1 %v20899_v0 }
 0x558   :  { %14126 = vmatmul.mubr.msk.bf16.gmra.mrb[48].mxu0 %vm312_vm1, %v17850_v21 }
 0x559   :  { %5701 = vmatprep.mubr.bf16.mxu0 %v20899_v0 }
 0x55a   :  { %14121 = vmatmul.mubr.msk.bf16.gmra.mrb[48].mxu1 %vm312_vm1, %v18517_v63 }
 0x55b   :  { %5628 = vmatprep.mubr.bf16.mxu1 %v20899_v0 }
 0x560   :  { %14127 = vmatmul.mubr.msk.bf16.gmra.mrb[52].mxu0 %vm312_vm1, %v17871_v26 }
 0x561   :  { %5711 = vmatprep.mubr.bf16.mxu0 %v20899_v0 }
 0x562   :  { %14122 = vmatmul.mubr.msk.bf16.gmra.mrb[52].mxu1 %vm312_vm1, %v18989_v34 }
 0x563   :  { %5824 = vmatprep.mubr.bf16.mxu1 %v20899_v0 }
 0x568   :  { %14128 = vmatmul.mubr.msk.bf16.gmra.mrb[56].mxu0 %vm312_vm1, %v17890_v30 }
 0x569   :  { %5721 = vmatprep.mubr.bf16.mxu0 %v20899_v0 }
 0x56a   :  { %14137 = vmatmul.mubr.msk.bf16.vlgmr.msra.gmra.mrb[56].mxu1 %vm312_vm1, %v17827_v16 }
 0x56b   :  { %6099 = vmatpush1.bf16.msra.mxu1 %v16922_v52  ;;  %5834 = vmatprep.mubr.bf16.mxu1 %v20899_v0 }
 0x56c   :  { %14162 = vmatprep.subr.msk.bf16.mxu1 %vm349_vm0, %v16928_v53 }
 0x56f   :  { %6101 = vmatpush1.bf16.msra.mxu1 %v5328_v55 }
 0x570   :  { %14129 = vmatmul.mubr.msk.bf16.gmra.mrb[60].mxu0 %vm312_vm1, %v17894_v31  ;;  %14783 = vmatprep.subr.bf16.mxu1 %v16933_v4 }
 0x571   :  { %5731 = vmatprep.mubr.bf16.mxu0 %v20899_v0 }
 0x572   :  { %14138 = vmatmul.mubr.msk.bf16.gmra.mrb[60].mxu1 %vm312_vm1, %v17846_v20 }
 0x573   :  { %5844 = vmatprep.mubr.bf16.mxu1 %v20899_v0 }
 0x578   :  { %14130 = vmatmul.mubr.msk.bf16.gmra.mrb[64].mxu0 %vm312_vm1, %v17911_v35 }
 0x579   :  { %5741 = vmatprep.mubr.bf16.mxu0 %v20899_v0 }
 0x57a   :  { %14139 = vmatmul.mubr.msk.bf16.gmra.mrb[64].mxu1 %vm312_vm1, %v17850_v21 }
 0x57b   :  { %5854 = vmatprep.mubr.bf16.mxu1 %v20899_v0 }
 0x580   :  { %14131 = vmatmul.mubr.msk.bf16.gmra.mrb[68].mxu0 %vm312_vm1, %v17921_v38 }
 0x581   :  { %5751 = vmatprep.mubr.bf16.mxu0 %v20899_v0 }
 0x582   :  { %14140 = vmatmul.mubr.msk.bf16.gmra.mrb[68].mxu1 %vm312_vm1, %v17871_v26 }
 0x583   :  { %5864 = vmatprep.mubr.bf16.mxu1 %v20899_v0 }
 0x588   :  { %14132 = vmatmul.mubr.msk.bf16.gmra.mrb[72].mxu0 %vm312_vm1, %v17924_v39 }
 0x589   :  { %5761 = vmatprep.mubr.bf16.mxu0 %v20899_v0 }
 0x58a   :  { %14141 = vmatmul.mubr.msk.bf16.gmra.mrb[72].mxu1 %vm312_vm1, %v17890_v30 }
 0x58b   :  { %5874 = vmatprep.mubr.bf16.mxu1 %v20899_v0 }
 0x590   :  { %14133 = vmatmul.mubr.msk.bf16.gmra.mrb[76].mxu0 %vm312_vm1, %v17928_v40 }
 0x591   :  { %5771 = vmatprep.mubr.bf16.mxu0 %v20899_v0 }
 0x592   :  { %14142 = vmatmul.mubr.msk.bf16.gmra.mrb[76].mxu1 %vm312_vm1, %v17894_v31 }
 0x593   :  { %5884 = vmatprep.mubr.bf16.mxu1 %v20899_v0 }
 0x598   :  { %14134 = vmatmul.mubr.msk.bf16.gmra.mrb[80].mxu0 %vm312_vm1, %v18517_v63 }
 0x599   :  { %5781 = vmatprep.mubr.bf16.mxu0 %v20899_v0 }
 0x59a   :  { %14143 = vmatmul.mubr.msk.bf16.gmra.mrb[80].mxu1 %vm312_vm1, %v17911_v35 }
 0x59b   :  { %5894 = vmatprep.mubr.bf16.mxu1 %v20899_v0 }
 0x5a0   :  { %14135 = vmatmul.mubr.msk.bf16.gmra.mrb[84].mxu0 %vm312_vm1, %v18989_v34 }
 0x5a1   :  { %5977 = vmatprep.mubr.bf16.mxu0 %v20899_v0 }
 0x5a2   :  { %14144 = vmatmul.mubr.msk.bf16.gmra.mrb[84].mxu1 %vm312_vm1, %v17921_v38 }
 0x5a3   :  { %5904 = vmatprep.mubr.bf16.mxu1 %v20899_v0 }
 0x5a8   :  { %14150 = vmatmul.mubr.msk.bf16.vlgmr.msra.gmra.mrb[88].mxu0 %vm312_vm1, %v17827_v16 }
 0x5a9   :  { %5987 = vmatprep.mubr.bf16.mxu0 %v20899_v0  ;;  %14762 = vmatpush3.bf16.msra.mxu0 %v16932_v58  ;;  %v16954_v58 = vld [vmem:[#allocation6 + $0x218] sm:$0xff]  }
 0x5aa   :  { %14145 = vmatmul.mubr.msk.bf16.gmra.mrb[88].mxu1 %vm312_vm1, %v17924_v39  ;;  %14763 = vmatprep.subr.bf16.mxu0 %v16935_v59 }
 0x5ab   :  { %5914 = vmatprep.mubr.bf16.mxu1 %v20899_v0 }
 0x5ad   :  { %14764 = vmatpush3.bf16.msra.mxu0 %v16936_v61 }
 0x5ae   :  { %14765 = vmatprep.subr.bf16.mxu0 %v16937_v9 }
 0x5b0   :  { %14151 = vmatmul.mubr.msk.bf16.gmra.mrb[92].mxu0 %vm312_vm1, %v17846_v20 }
 0x5b1   :  { %5997 = vmatprep.mubr.bf16.mxu0 %v20899_v0  ;;  %14766 = vmatpush3.bf16.msra.mxu0 %v16938_v10 }
 0x5b2   :  { %14146 = vmatmul.mubr.msk.bf16.gmra.mrb[92].mxu1 %vm312_vm1, %v17928_v40  ;;  %14767 = vmatprep.subr.bf16.mxu0 %v16939_v14 }
 0x5b3   :  { %5924 = vmatprep.mubr.bf16.mxu1 %v20899_v0 }
 0x5b5   :  { %14768 = vmatpush3.bf16.msra.mxu0 %v16940_v15 }
 0x5b6   :  { %14769 = vmatprep.subr.bf16.mxu0 %v16943_v18 }
 0x5b8   :  { %14152 = vmatmul.mubr.msk.bf16.gmra.mrb[96].mxu0 %vm312_vm1, %v17850_v21 }
 0x5b9   :  { %6007 = vmatprep.mubr.bf16.mxu0 %v20899_v0  ;;  %14770 = vmatpush3.bf16.msra.mxu0 %v16944_v23 }
 0x5ba   :  { %14147 = vmatmul.mubr.msk.bf16.gmra.mrb[96].mxu1 %vm312_vm1, %v18517_v63  ;;  %14771 = vmatprep.subr.bf16.mxu0 %v16945_v27  ;;  %v16955_v27 = vld [vmem:[#allocation6 + $0x260] sm:$0xff]  }
 0x5bb   :  { %v19090_v5 = vpop.f32.mrb[0].mxu0  ;;  %5934 = vmatprep.mubr.bf16.mxu1 %v20899_v0 }
 0x5bc   :  { %v19092_v60 = vpop.f32.mrb[1].mxu0 }
 0x5bd   :  { %v19095_v11 = vpop.f32.mrb[2].mxu0  ;;  %14772 = vmatpush3.bf16.msra.mxu0 %v16946_v29 }
 0x5be   :  { %v19097_v13 = vpop.f32.mrb[3].mxu0  ;;  %14773 = vmatprep.subr.bf16.mxu0 %v16947_v47 }
 0x5c0   :  { %14153 = vmatmul.mubr.msk.bf16.gmra.mrb[100].mxu0 %vm312_vm1, %v17871_v26 }
 0x5c1   :  { %6017 = vmatprep.mubr.bf16.mxu0 %v20899_v0  ;;  %14774 = vmatpush3.bf16.msra.mxu0 %v16948_v1  ;;  %v16956_v1 = vld [vmem:[#allocation6 + $0x220] sm:$0xff]  }
 0x5c2   :  { %14148 = vmatmul.mubr.msk.bf16.gmra.mrb[100].mxu1 %vm312_vm1, %v18989_v34  ;;  %14775 = vmatprep.subr.bf16.mxu0 %v16951_v3 }
 0x5c3   :  { %v19104_v17 = vpop.f32.mrb[4].mxu0  ;;  %6130 = vmatprep.mubr.bf16.mxu1 %v20899_v0 }
 0x5c4   :  { %v19106_v19 = vpop.f32.mrb[5].mxu0 }
 0x5c5   :  { %v19109_v24 = vpop.f32.mrb[6].mxu0 }
 0x5c6   :  { %v19111_v25 = vpop.f32.mrb[7].mxu0 }
 0x5c8   :  { %14154 = vmatmul.mubr.msk.bf16.gmra.mrb[104].mxu0 %vm312_vm1, %v17890_v30 }
 0x5c9   :  { %6027 = vmatprep.mubr.bf16.mxu0 %v20899_v0 }
 0x5ca   :  { %14163 = vmatmul.mubr.msk.bf16.vlgmr.msra.gmra.mrb[104].mxu1 %vm312_vm1, %v17827_v16  ;;  %v16952_v16 = vld [vmem:[#allocation6 + $0x1b8] sm:$0xff]  }
 0x5cb   :  { %v19118_v33 = vpop.f32.mrb[8].mxu0  ;;  %6140 = vmatprep.mubr.bf16.mxu1 %v20899_v0  ;;  %14784 = vmatpush3.bf16.msra.mxu1 %v16934_v28 }
 0x5cc   :  { %v19120_v57 = vpop.f32.mrb[9].mxu0  ;;  %14785 = vmatprep.subr.bf16.mxu1 %v16941_v32  ;;  %14776 = vmatpush3.bf16.msra.mxu0 %v16952_v16 }
 0x5cd   :  { %v19123_v2 = vpop.f32.mrb[10].mxu0 }
 0x5ce   :  { %v19125_v41 = vpop.f32.mrb[11].mxu0 }
 0x5cf   :  { %14786 = vmatpush3.bf16.msra.mxu1 %v16942_v62 }
 0x5d0   :  { %14155 = vmatmul.mubr.msk.bf16.gmra.mrb[108].mxu0 %vm312_vm1, %v17894_v31  ;;  %14787 = vmatprep.subr.bf16.mxu1 %v16949_v7 }
 0x5d1   :  { %6037 = vmatprep.mubr.bf16.mxu0 %v20899_v0 }
 0x5d2   :  { %14164 = vmatmul.mubr.msk.bf16.gmra.mrb[108].mxu1 %vm312_vm1, %v17846_v20 }
 0x5d3   :  { %v19132_v51 = vpop.f32.mrb[12].mxu0  ;;  %6150 = vmatprep.mubr.bf16.mxu1 %v20899_v0  ;;  %14788 = vmatpush3.bf16.msra.mxu1 %v16950_v48 }
 0x5d4   :  { %v19134_v6 = vpop.f32.mrb[13].mxu0  ;;  %14789 = vmatprep.subr.bf16.mxu1 %v16953_v56 }
 0x5d5   :  { %v19137_v8 = vpop.f32.mrb[14].mxu0 }
 0x5d6   :  { %v19139_v12 = vpop.f32.mrb[15].mxu0 }
 0x5d7   :  { %14790 = vmatpush3.bf16.msra.mxu1 %v16954_v58 }
 0x5d8   :  { %14156 = vmatmul.mubr.msk.bf16.gmra.mrb[112].mxu0 %vm312_vm1, %v17911_v35  ;;  %14791 = vmatprep.subr.bf16.mxu1 %v16955_v27 }
 0x5d9   :  { %6047 = vmatprep.mubr.bf16.mxu0 %v20899_v0 }
 0x5da   :  { %14165 = vmatmul.mubr.msk.bf16.gmra.mrb[112].mxu1 %vm312_vm1, %v17850_v21 }
 0x5db   :  { %v19146_v20 = vpop.f32.mrb[16].mxu0  ;;  %6160 = vmatprep.mubr.bf16.mxu1 %v20899_v0  ;;  %14792 = vmatpush3.bf16.msra.mxu1 %v16956_v1 }
 0x5dc   :  { %v19148_v49 = vpop.f32.mrb[17].mxu0 }
 0x5dd   :  { %v19151_v50 = vpop.f32.mrb[18].mxu0  ;;  %v19153_v52 = vpop.f32.mrb[8].mxu1 }
 0x5de   :  { %v19155_v53 = vpop.f32.mrb[19].mxu0  ;;  %v19157_v54 = vpop.f32.mrb[9].mxu1 }
 0x5df   :  { %v19159_v55 = vpop.f32.mrb[10].mxu1 }
 0x5e0   :  { %14157 = vmatmul.mubr.msk.bf16.gmra.mrb[116].mxu0 %vm312_vm1, %v17921_v38  ;;  %v19163_v21 = vpop.f32.mrb[11].mxu1 }
 0x5e1   :  { %6057 = vmatprep.mubr.bf16.mxu0 %v20899_v0 }
 0x5e2   :  { %14166 = vmatmul.mubr.msk.bf16.gmra.mrb[116].mxu1 %vm312_vm1, %v17871_v26 }
 0x5e3   :  { %v19168_v59 = vpop.f32.mrb[20].mxu0  ;;  %6170 = vmatprep.mubr.bf16.mxu1 %v20899_v0 }
 0x5e4   :  { %v19170_v61 = vpop.f32.mrb[21].mxu0 }
 0x5e5   :  { %v19173_v4 = vpop.f32.mrb[22].mxu0  ;;  %v19175_v9 = vpop.f32.mrb[12].mxu1 }
 0x5e6   :  { %v19177_v10 = vpop.f32.mrb[23].mxu0  ;;  %v19179_v14 = vpop.f32.mrb[13].mxu1 }
 0x5e7   :  { %v19181_v15 = vpop.f32.mrb[14].mxu1 }
 0x5e8   :  { %14158 = vmatmul.mubr.msk.bf16.gmra.mrb[120].mxu0 %vm312_vm1, %v17924_v39  ;;  %v19185_v26 = vpop.f32.mrb[15].mxu1 }
 0x5e9   :  { %6067 = vmatprep.mubr.bf16.mxu0 %v20899_v0 }
 0x5ea   :  { %14167 = vmatmul.mubr.msk.bf16.gmra.mrb[120].mxu1 %vm312_vm1, %v17890_v30 }
 0x5eb   :  { %v19190_v18 = vpop.f32.mrb[24].mxu0  ;;  %6180 = vmatprep.mubr.bf16.mxu1 %v20899_v0 }
 0x5ec   :  { %v19192_v23 = vpop.f32.mrb[25].mxu0 }
 0x5ed   :  { %v19195_v28 = vpop.f32.mrb[26].mxu0  ;;  %v19197_v29 = vpop.f32.mrb[16].mxu1 }
 0x5ee   :  { %v19199_v32 = vpop.f32.mrb[27].mxu0  ;;  %v19201_v47 = vpop.f32.mrb[17].mxu1 }
 0x5ef   :  { %v19203_v62 = vpop.f32.mrb[18].mxu1 }
 0x5f0   :  { %14159 = vmatmul.mubr.msk.bf16.gmra.mrb[124].mxu0 %vm312_vm1, %v17928_v40  ;;  %v19207_v30 = vpop.f32.mrb[19].mxu1 }
 0x5f1   :  { %6077 = vmatprep.mubr.bf16.mxu0 %v20899_v0 }
 0x5f2   :  { %14168 = vmatmul.mubr.msk.bf16.gmra.mrb[124].mxu1 %vm312_vm1, %v17894_v31 }
 0x5f3   :  { %v19212_v3 = vpop.f32.mrb[28].mxu0  ;;  %6190 = vmatprep.mubr.bf16.mxu1 %v20899_v0 }
 0x5f4   :  { %20964 = vst [vmem:[#allocation16_spill] sm:$0xff] %v19212_v3  ;;  %v19214_v16 = vpop.f32.mrb[29].mxu0  ;;  %v16958_v3 = vld [vmem:[#allocation6 + $0x228] sm:$0xff]  }
 0x5f5   :  { %20965 = vst [vmem:[#allocation17_spill] sm:$0xff] %v19214_v16  ;;  %v19217_v7 = vpop.f32.mrb[30].mxu0  ;;  %v19219_v48 = vpop.f32.mrb[20].mxu1  ;;  %v16957_v16 = vld [vmem:[#allocation6 + $0x268] sm:$0xff]  }
 0x5f6   :  { %20966 = vst [vmem:[#allocation18_spill] sm:$0xff] %v19217_v7  ;;  %20967 = vst [vmem:[#allocation19_spill] sm:$0xff] %v19219_v48  ;;  %v19221_v56 = vpop.f32.mrb[31].mxu0  ;;  %v19223_v58 = vpop.f32.mrb[21].mxu1  ;;  %14793 = vmatprep.subr.bf16.mxu1 %v16957_v16 }
 0x5f7   :  { %20968 = vst [vmem:[#allocation20_spill] sm:$0xff] %v19221_v56  ;;  %20969 = vst [vmem:[#allocation21_spill] sm:$0xff] %v19223_v58  ;;  %v19225_v27 = vpop.f32.mrb[22].mxu1  ;;  %14794 = vmatpush3.bf16.msra.mxu1 %v16958_v3 }
 0x5f8   :  { %20970 = vst [vmem:[#allocation22_spill] sm:$0xff] %v19225_v27  ;;  %14160 = vmatmul.mubr.msk.bf16.gmra.mrb[128].mxu0 %vm312_vm1, %v18517_v63  ;;  %v19229_v31 = vpop.f32.mrb[23].mxu1 }
 0x5f9   :  { %20971 = vst [vmem:[#allocation23_spill] sm:$0xff] %v19229_v31  ;;  %6087 = vmatprep.mubr.bf16.mxu0 %v20899_v0 }
 0x5fa   :  { %14169 = vmatmul.mubr.msk.bf16.gmra.mrb[128].mxu1 %vm312_vm1, %v17911_v35 }
 0x5fb   :  { %v19234_v1 = vpop.f32.mrb[32].mxu0  ;;  %6200 = vmatprep.mubr.bf16.mxu1 %v20899_v0 }
 0x5fc   :  { %v19236_v56 = vpop.f32.mrb[33].mxu0 }
 0x5fd   :  { %20972 = vst [vmem:[#allocation24_spill] sm:$0xff] %v19236_v56  ;;  %v19239_v27 = vpop.f32.mrb[34].mxu0  ;;  %v19241_v58 = vpop.f32.mrb[24].mxu1 }
 0x5fe   :  { %20973 = vst [vmem:[#allocation25_spill] sm:$0xff] %v19239_v27  ;;  %20974 = vst [vmem:[#allocation26_spill] sm:$0xff] %v19241_v58  ;;  %v19243_v31 = vpop.f32.mrb[35].mxu0  ;;  %v19245_v48 = vpop.f32.mrb[25].mxu1  ;;  %v16959_v58 = vld [vmem:[#allocation6 + $0x270] sm:$0xff]  }
 0x5ff   :  { %20975 = vst [vmem:[#allocation27_spill] sm:$0xff] %v19243_v31  ;;  %20976 = vst [vmem:[#allocation28_spill] sm:$0xff] %v19245_v48  ;;  %v19247_v7 = vpop.f32.mrb[26].mxu1  ;;  %14795 = vmatprep.subr.bf16.mxu1 %v16959_v58 }
 0x600   :  { %20977 = vst [vmem:[#allocation29_spill] sm:$0xff] %v19247_v7  ;;  %14161 = vmatmul.mubr.msk.bf16.gmra.mrb[132].mxu0 %vm312_vm1, %v18989_v34  ;;  %v19251_v35 = vpop.f32.mrb[27].mxu1 }
 0x601   :  { %20978 = vst [vmem:[#allocation30_spill] sm:$0xff] %v19251_v35 }
 0x602   :  { %14170 = vmatmul.mubr.msk.bf16.gmra.mrb[132].mxu1 %vm312_vm1, %v17921_v38  ;;  %v16960_v38 = vld [vmem:[#allocation6 + $0x230] sm:$0xff]  }
 0x603   :  { %v19255_v16 = vpop.f32.mrb[36].mxu0  ;;  %6210 = vmatprep.mubr.bf16.mxu1 %v20899_v0  ;;  %14796 = vmatpush3.bf16.msra.mxu1 %v16960_v38 }
 0x604   :  { %20979 = vst [vmem:[#allocation31_spill] sm:$0xff] %v19255_v16  ;;  %v19257_v3 = vpop.f32.mrb[37].mxu0  ;;  %v20988_v16 = vmov 0  }
 0x605   :  { %20980 = vst [vmem:[#allocation32_spill] sm:$0xff] %v19257_v3  ;;  %v19260_v31 = vpop.f32.mrb[38].mxu0  ;;  %v19262_v48 = vpop.f32.mrb[28].mxu1 }
 0x606   :  { %20981 = vst [vmem:[#allocation33_spill] sm:$0xff] %v19260_v31  ;;  %20982 = vst [vmem:[#allocation34_spill] sm:$0xff] %v19262_v48  ;;  %v19264_v7 = vpop.f32.mrb[39].mxu0  ;;  %v19266_v27 = vpop.f32.mrb[29].mxu1 }
 0x607   :  { %20983 = vst [vmem:[#allocation35_spill] sm:$0xff] %v19264_v7  ;;  %20984 = vst [vmem:[#allocation36_spill] sm:$0xff] %v19266_v27  ;;  %v19268_v35 = vpop.f32.mrb[30].mxu1 }
 0x608   :  { %20985 = vst [vmem:[#allocation37_spill] sm:$0xff] %v19268_v35  ;;  %v19270_v56 = vpop.f32.mrb[31].mxu1 }
 0x609   :  { %20986 = vst [vmem:[#allocation38_spill] sm:$0xff] %v19270_v56 }
 0x60a   :  { %14171 = vmatmul.mubr.msk.bf16.gmra.mrb[136].mxu1 %vm312_vm1, %v17924_v39 }
 0x60b   :  { %v5467_v3 = vpop.f32.mrb[136].mxu0  ;;  %6220 = vmatprep.mubr.bf16.mxu1 %v20988_v16 }
 0x60c   :  { %v19275_v0 = vadd.f32 %v5467_v3, %v18145_v36  ;;  %v5469_v31 = vpop.f32.mrb[137].mxu0  ;;  %v16961_v36 = vld [vmem:[#allocation6 + $0x278] sm:$0xff]  }
 0x60d   :  { %v19279_v58 = vadd.f32 %v5469_v31, %v18147_v37  ;;  %v5471_v27 = vpop.f32.mrb[138].mxu0  ;;  %v19281_v7 = vpop.f32.mrb[32].mxu1  ;;  %14797 = vmatprep.subr.bf16.mxu1 %v16961_v36 }
 0x60e   :  { %20987 = vst [vmem:[#allocation39_spill] sm:$0xff] %v19275_v0  ;;  %v19284_v56 = vadd.f32 %v5471_v27, %v18149_v42  ;;  %v5473_v35 = vpop.f32.mrb[139].mxu0  ;;  %v19286_v48 = vpop.f32.mrb[33].mxu1  ;;  %v16962_v0 = vld [vmem:[#allocation6 + $0x238] sm:$0xff]   ;;  %v16963_v42 = vld [vmem:[#allocation6 + $0x2c0] sm:$0xff]  }
 0x60f   :  { %v19289_v39 = vadd.f32 %v5473_v35, %v18153_v43  ;;  %v19291_v3 = vpop.f32.mrb[34].mxu1  ;;  %14798 = vmatpush3.bf16.msra.mxu1 %v16962_v0  ;;  %v16964_v27 = vld [vmem:[#allocation6 + $0x40] sm:$0xff]   ;;  %14805 = vmatprep.subr.bf16.mxu0 %v16963_v42 }
 0x610   :  { %20989 = vst [vmem:[#allocation40_spill] sm:$0xff] %v19284_v56  ;;  %v19293_v38 = vpop.f32.mrb[35].mxu1  ;;  %14827 = vmatprep.subr.bf16.mxu1 %v16964_v27 }
 0x611   :  { %20990 = vst [vmem:[#allocation41_spill] sm:$0xff] %v19289_v39  ;;  %20991 = vst [vmem:[#allocation42_spill] sm:$0xff] %v19293_v38 }
 0x612   :  { %14172 = vmatmul.mubr.msk.bf16.gmra.mrb[140].mxu1 %vm312_vm1, %v17928_v40 }
 0x613   :  { %v5477_v37 = vpop.f32.mrb[140].mxu0  ;;  %6230 = vmatprep.mubr.bf16.mxu1 %v20988_v16 }
 0x614   :  { %v19298_v31 = vadd.f32 %v5477_v37, %v18159_v22  ;;  %v5479_v56 = vpop.f32.mrb[141].mxu0  ;;  %v6543_v37 = vlaneseq }
 0x615   :  { %v19302_v43 = vadd.f32 %v5479_v56, %v18161_v44  ;;  %v5481_v35 = vpop.f32.mrb[142].mxu0  ;;  %v19304_v36 = vpop.f32.mrb[36].mxu1 }
 0x616   :  { %20992 = vst [vmem:[#allocation43_spill] sm:$0xff] %v19298_v31  ;;  %v19307_v0 = vadd.f32 %v5481_v35, %v18163_v45  ;;  %v5483_v40 = vpop.f32.mrb[143].mxu0  ;;  %v19309_v38 = vpop.f32.mrb[37].mxu1  ;;  %v19322_v56 = vshrl.u32 %v6543_v37, 7 }
 0x617   :  { %20993 = vst [vmem:[#allocation44_spill] sm:$0xff] %v19302_v43  ;;  %20995 = vst [vmem:[#allocation46_spill] sm:$0xff] %v19309_v38  ;;  %v19312_v22 = vadd.f32 %v5483_v40, %v18167_v46  ;;  %v19314_v31 = vpop.f32.mrb[38].mxu1 }
 0x618   :  { %20994 = vst [vmem:[#allocation45_spill] sm:$0xff] %v19307_v0  ;;  %20997 = vst [vmem:[#allocation48_spill] sm:$0xff] %v19314_v31  ;;  %v19316_v39 = vpop.f32.mrb[39].mxu1  ;;  %v20901_v40 = vsub.s32 0, %v19322_v56  ;;  %v20902_v37 = vsub.s32 1, %v19322_v56  ;;  %v21016_v31 = vsub.s32 3, %v19322_v56 }
 0x619   :  { %20996 = vst [vmem:[#allocation47_spill] sm:$0xff] %v19312_v22  ;;  %20998 = vst [vmem:[#allocation49_spill] sm:$0xff] %v19316_v39 }
 0x61a   :  { %14173 = vmatmul.mubr.msk.bf16.gmra.mrb[144].mxu1 %vm312_vm1, %v18517_v63  ;;  %v6539_v63 = vld [vmem:[#allocation4] sm:$0xff] }
 0x61b   :  { %v19320_v44 = vpop.f32.mrb[40].mxu0  ;;  %6240 = vmatprep.mubr.bf16.mxu1 %v20988_v16 }
 0x61c   :  { %20999 = vst [vmem:[#allocation50_spill] sm:$0xff] %v19320_v44  ;;  %v19324_v45 = vpop.f32.mrb[41].mxu0 }
 0x61d   :  { %21000 = vst [vmem:[#allocation51_spill] sm:$0xff] %v19324_v45  ;;  %v19327_v42 = vpop.f32.mrb[42].mxu0  ;;  %v19329_v46 = vpop.f32.mrb[40].mxu1 }
 0x61e   :  { %21001 = vst [vmem:[#allocation52_spill] sm:$0xff] %v19327_v42  ;;  %21002 = vst [vmem:[#allocation53_spill] sm:$0xff] %v19329_v46  ;;  %v19331_v27 = vpop.f32.mrb[43].mxu0  ;;  %v19333_v35 = vpop.f32.mrb[41].mxu1  ;;  %v19347_v46 = vrot.slane %v6539_v63, %v20901_v40  ;;  %v6565_v40 = vsub.s32 5, %v19322_v56 }
 0x61f   :  { %21003 = vst [vmem:[#allocation54_spill] sm:$0xff] %v19331_v27  ;;  %21004 = vst [vmem:[#allocation55_spill] sm:$0xff] %v19333_v35  ;;  %v19336_v39 = vpop.f32.mrb[42].mxu1 }
 0x620   :  { %21005 = vst [vmem:[#allocation56_spill] sm:$0xff] %v19336_v39  ;;  %v19339_v44 = vpop.f32.mrb[43].mxu1  ;;  %v19354_v39 = vrot.slane %v6539_v63, %v20902_v37  ;;  %v19369_v35 = vadd.f32 %v19347_v46, %v19090_v5  ;;  %v21013_v37 = vsub.s32 2, %v19322_v56 }
 0x621   :  { %21006 = vst [vmem:[#allocation57_spill] sm:$0xff] %v19339_v44  ;;  %v6569_v44 = vsub.s32 6, %v19322_v56 }
 0x622   :  { %14174 = vmatmul.mubr.msk.bf16.gmra.mrb[148].mxu1 %vm312_vm1, %v18989_v34  ;;  %v19388_v5 = vadd.f32 %v19354_v39, %v19097_v13  ;;  %v19407_v13 = vrot.slane %v6539_v63, %v21016_v31  ;;  %v19426_v31 = vadd.f32 %v19354_v39, %v19120_v57  ;;  %v19470_v57 = vadd.f32 %v19347_v46, %v19137_v8 }
 0x623   :  { %v19343_v16 = vpop.f32.mrb[44].mxu0  ;;  %v19492_v8 = vadd.f32 %v19347_v46, %v19151_v50  ;;  %v19529_v50 = vadd.f32 %v19347_v46, %v19173_v4 }
 0x624   :  { %21007 = vst [vmem:[#allocation58_spill] sm:$0xff] %v19343_v16  ;;  %v19350_v27 = vpop.f32.mrb[45].mxu0  ;;  %v6561_v16 = vsub.s32 4, %v19322_v56 }
 0x625   :  { %21008 = vst [vmem:[#allocation59_spill] sm:$0xff] %v19350_v27  ;;  %v19356_v42 = vpop.f32.mrb[46].mxu0  ;;  %v19359_v45 = vpop.f32.mrb[44].mxu1  ;;  %v19373_v27 = vrot.slane %v6539_v63, %v21013_v37  ;;  %v6573_v37 = vsub.s32 7, %v19322_v56 }
 0x626   :  { %21009 = vst [vmem:[#allocation60_spill] sm:$0xff] %v19356_v42  ;;  %21010 = vst [vmem:[#allocation61_spill] sm:$0xff] %v19359_v45  ;;  %v19361_v34 = vpop.f32.mrb[47].mxu0  ;;  %v19365_v22 = vpop.f32.mrb[45].mxu1  ;;  %v19384_v45 = vadd.f32 %v19347_v46, %v19095_v11  ;;  %v19403_v11 = vadd.f32 %v19347_v46, %v19109_v24  ;;  %v19417_v0 = vrot.slane %v6539_v63, %v6561_v16 }
 0x627   :  { %21011 = vst [vmem:[#allocation62_spill] sm:$0xff] %v19361_v34  ;;  %21012 = vst [vmem:[#allocation63_spill] sm:$0xff] %v19365_v22  ;;  %v19375_v42 = vpop.f32.mrb[46].mxu1  ;;  %v19380_v34 = vadd.f32 %v19354_v39, %v19092_v60  ;;  %v19399_v60 = vadd.f32 %v19354_v39, %v19106_v19  ;;  %v19419_v19 = vrot.slane %v6539_v63, %v6565_v40 }
 0x628   :  { %21014 = vst [vmem:[#allocation64_spill] sm:$0xff] %v19375_v42  ;;  %v19390_v22 = vpop.f32.mrb[47].mxu1  ;;  %v19395_v42 = vadd.f32 %v19347_v46, %v19104_v17  ;;  %v19415_v17 = vadd.f32 %v19347_v46, %v19118_v33  ;;  %21017 = vst [vmem:[#allocation66_spill] sm:$0xff] %v19417_v0  ;;  %v19434_v33 = vrot.slane %v6539_v63, %v6569_v44 }
 0x629   :  { %21015 = vst [vmem:[#allocation65_spill] sm:$0xff] %v19390_v22  ;;  %v19411_v22 = vadd.f32 %v19354_v39, %v19111_v25  ;;  %21018 = vst [vmem:[#allocation67_spill] sm:$0xff] %v19419_v19  ;;  %v19430_v25 = vadd.f32 %v19347_v46, %v19123_v2  ;;  %v19441_v24 = vrot.slane %v6539_v63, %v6573_v37 }
 0x62a   :  { %v19448_v44 = vadd.f32 %v19354_v39, %v19125_v41  ;;  %v19458_v63 = vadd.f32 %v19347_v46, %v19132_v51  ;;  %v19462_v37 = vadd.f32 %v19354_v39, %v19134_v6  ;;  %v19474_v40 = vadd.f32 %v19354_v39, %v19139_v12 }
 0x62b   :  { %v19421_v38 = vpop.f32.mrb[48].mxu0  ;;  %v19480_v6 = vadd.f32 %v19347_v46, %v19146_v20  ;;  %v19488_v0 = vadd.f32 %v19354_v39, %v19148_v49  ;;  %v19499_v20 = vadd.f32 %v19407_v13, %v19157_v54  ;;  %v19507_v49 = vadd.f32 %v19354_v39, %v19155_v53 }
 0x62c   :  { %21019 = vst [vmem:[#allocation68_spill] sm:$0xff] %v19421_v38  ;;  %v19432_v43 = vpop.f32.mrb[49].mxu0  ;;  %v19484_v38 = vadd.f32 %v19373_v27, %v19153_v52  ;;  %v19503_v52 = vadd.f32 %v19373_v27, %v19159_v55  ;;  %v19517_v54 = vadd.f32 %v19347_v46, %v19168_v59  ;;  %v19525_v53 = vadd.f32 %v19354_v39, %v19170_v61 }
 0x62d   :  { %21020 = vst [vmem:[#allocation69_spill] sm:$0xff] %v19432_v43  ;;  %v19439_v19 = vpop.f32.mrb[50].mxu0  ;;  %v19450_v43 = vpop.f32.mrb[48].mxu1  ;;  %21027 = vst [vmem:[#allocation76_spill] sm:$0xff] %v19499_v20  ;;  %v19544_v4 = vadd.f32 %v19373_v27, %v19175_v9  ;;  %v19558_v61 = vadd.f32 %v19354_v39, %v19177_v10  ;;  %v19570_v59 = vadd.f32 %v19407_v13, %v19185_v26  ;;  %v21045_v9 = vld [vmem:[#allocation16_spill] sm:$0xff] }
 0x62e   :  { %21021 = vst [vmem:[#allocation70_spill] sm:$0xff] %v19450_v43  ;;  %v19452_v16 = vpop.f32.mrb[51].mxu0  ;;  %v19464_v2 = vpop.f32.mrb[49].mxu1  ;;  %21025 = vst [vmem:[#allocation74_spill] sm:$0xff] %v19484_v38  ;;  %v19576_v10 = vadd.f32 %v19347_v46, %v19190_v18  ;;  %v19580_v55 = vadd.f32 %v19373_v27, %v19197_v29  ;;  %v19584_v43 = vadd.f32 %v19354_v39, %v19192_v23 }
 0x62f   :  { %21022 = vst [vmem:[#allocation71_spill] sm:$0xff] %v19452_v16  ;;  %21023 = vst [vmem:[#allocation72_spill] sm:$0xff] %v19464_v2  ;;  %v19476_v51 = vpop.f32.mrb[50].mxu1  ;;  %v19595_v18 = vadd.f32 %v19407_v13, %v19201_v47  ;;  %v19599_v29 = vadd.f32 %v19373_v27, %v19203_v62  ;;  %v19603_v23 = vadd.f32 %v19354_v39, %v19199_v32  ;;  %v21048_v32 = vld [vmem:[#allocation17_spill] sm:$0xff]  ;;  %v21057_v62 = vld [vmem:[#allocation20_spill] sm:$0xff] }
 0x630   :  { %21024 = vst [vmem:[#allocation73_spill] sm:$0xff] %v19476_v51  ;;  %v19494_v12 = vpop.f32.mrb[51].mxu1  ;;  %21028 = vst [vmem:[#allocation77_spill] sm:$0xff] %v19503_v52  ;;  %v19566_v52 = vadd.f32 %v19373_v27, %v19181_v15  ;;  %v19588_v15 = vadd.f32 %v19347_v46, %v19195_v28  ;;  %v19613_v47 = vadd.f32 %v19347_v46, %v21045_v9 }
 0x631   :  { %21026 = vst [vmem:[#allocation75_spill] sm:$0xff] %v19494_v12  ;;  %v19513_v12 = vadd.f32 %v19407_v13, %v19163_v21  ;;  %21033 = vst [vmem:[#allocation82_spill] sm:$0xff] %v19544_v4  ;;  %v19621_v38 = vadd.f32 %v19354_v39, %v21048_v32 }
 0x632   :  { %21037 = vst [vmem:[#allocation86_spill] sm:$0xff] %v19566_v52  ;;  %21038 = vst [vmem:[#allocation87_spill] sm:$0xff] %v19570_v59 }
 0x633   :  { %21029 = vst [vmem:[#allocation78_spill] sm:$0xff] %v19513_v12  ;;  %v19519_v41 = vpop.f32.mrb[52].mxu0  ;;  %21040 = vst [vmem:[#allocation89_spill] sm:$0xff] %v19580_v55  ;;  %v21050_v12 = vld [vmem:[#allocation18_spill] sm:$0xff]  ;;  %v19648_v55 = vadd.f32 %v19354_v39, %v21057_v62  ;;  %v21063_v62 = vld [vmem:[#allocation23_spill] sm:$0xff] }
 0x634   :  { %21030 = vst [vmem:[#allocation79_spill] sm:$0xff] %v19519_v41  ;;  %v19531_v21 = vpop.f32.mrb[53].mxu0  ;;  %v19554_v41 = vadd.f32 %v19407_v13, %v19179_v14  ;;  %21042 = vst [vmem:[#allocation91_spill] sm:$0xff] %v19595_v18  ;;  %v19625_v28 = vadd.f32 %v19347_v46, %v21050_v12  ;;  %v21054_v12 = vld [vmem:[#allocation19_spill] sm:$0xff]  ;;  %v19670_v18 = vadd.f32 %v19347_v46, %v19234_v1  ;;  %v21076_v1 = vsub.s32 0, %v19322_v56 }
 0x635   :  { %21031 = vst [vmem:[#allocation80_spill] sm:$0xff] %v19531_v21  ;;  %v19537_v16 = vpop.f32.mrb[54].mxu0  ;;  %v19546_v21 = vpop.f32.mrb[52].mxu1  ;;  %21043 = vst [vmem:[#allocation92_spill] sm:$0xff] %v19599_v29  ;;  %v21059_v29 = vld [vmem:[#allocation21_spill] sm:$0xff] }
 0x636   :  { %21032 = vst [vmem:[#allocation81_spill] sm:$0xff] %v19537_v16  ;;  %v19548_v51 = vpop.f32.mrb[55].mxu0  ;;  %21035 = vst [vmem:[#allocation84_spill] sm:$0xff] %v19554_v41  ;;  %v19560_v2 = vpop.f32.mrb[53].mxu1 }
 0x637   :  { %21034 = vst [vmem:[#allocation83_spill] sm:$0xff] %v19548_v51  ;;  %21036 = vst [vmem:[#allocation85_spill] sm:$0xff] %v19560_v2  ;;  %v19572_v14 = vpop.f32.mrb[54].mxu1  ;;  %v19673_v2 = vld [vmem:[#allocation4 + $0x8] sm:$0xf] }
 0x638   :  { %21039 = vst [vmem:[#allocation88_spill] sm:$0xff] %v19572_v14  ;;  %v19590_v26 = vpop.f32.mrb[55].mxu1  ;;  %21046 = vst [vmem:[#allocation16_spill] sm:$0xff] %v19613_v47  ;;  %v19640_v14 = vadd.f32 %v19373_v27, %v21054_v12  ;;  %v19654_v12 = vadd.f32 %v19407_v13, %v21059_v29  ;;  %v21066_v47 = vld [vmem:[#allocation24_spill] sm:$0xff] }
 0x639   :  { %21041 = vst [vmem:[#allocation90_spill] sm:$0xff] %v19590_v26  ;;  %v19609_v26 = vadd.f32 %v19407_v13, %v19207_v30  ;;  %21049 = vst [vmem:[#allocation17_spill] sm:$0xff] %v19621_v38 }
 0x63a   :  { %21051 = vst [vmem:[#allocation18_spill] sm:$0xff] %v19625_v28  ;;  %21055 = vst [vmem:[#allocation19_spill] sm:$0xff] %v19640_v14  ;;  %v21070_v14 = vld [vmem:[#allocation25_spill] sm:$0xff] }
 0x63b   :  { %21044 = vst [vmem:[#allocation93_spill] sm:$0xff] %v19609_v26  ;;  %v19615_v4 = vpop.f32.mrb[56].mxu0  ;;  %21058 = vst [vmem:[#allocation20_spill] sm:$0xff] %v19648_v55  ;;  %v21061_v26 = vld [vmem:[#allocation22_spill] sm:$0xff] }
 0x63c   :  { %21047 = vst [vmem:[#allocation94_spill] sm:$0xff] %v19615_v4  ;;  %v19627_v30 = vpop.f32.mrb[57].mxu0  ;;  %21060 = vst [vmem:[#allocation21_spill] sm:$0xff] %v19654_v12  ;;  %v19660_v4 = vadd.f32 %v19373_v27, %v21061_v26 }
 0x63d   :  { %21052 = vst [vmem:[#allocation95_spill] sm:$0xff] %v19627_v30  ;;  %v19633_v52 = vpop.f32.mrb[58].mxu0  ;;  %v5826_v30 = vpop.f32.mrb[56].mxu1  ;;  %21065 = vst [vmem:[#allocation98_spill] sm:$0xff] %v19670_v18  ;;  %v21097_v18 = vld [vmem:[#allocation34_spill] sm:$0xff] }
 0x63e   :  { %21053 = vst [vmem:[#allocation96_spill] sm:$0xff] %v19633_v52  ;;  %v19642_v41 = vpop.f32.mrb[59].mxu0  ;;  %v6609_v20 = vadd.f32 %v19434_v33, %v5826_v30  ;;  %v5828_v32 = vpop.f32.mrb[57].mxu1  ;;  %21062 = vst [vmem:[#allocation22_spill] sm:$0xff] %v19660_v4  ;;  %v19664_v52 = vadd.f32 %v19407_v13, %v21063_v62  ;;  %v19678_v62 = vadd.f32 %v19354_v39, %v21066_v47  ;;  %v21091_v4 = vld [vmem:[#allocation31_spill] sm:$0xff] }
 0x63f   :  { %21056 = vst [vmem:[#allocation97_spill] sm:$0xff] %v19642_v41  ;;  %v6610_v41 = vadd.f32 %v19441_v24, %v5828_v32  ;;  %v5830_v9 = vpop.f32.mrb[58].mxu1 }
 0x640   :  { %21064 = vst [vmem:[#allocation23_spill] sm:$0xff] %v19664_v52  ;;  %v6897_v30 = vmax.f32 %v6609_v20, 0.0  ;;  %v6621_v59 = vadd.f32 %v19434_v33, %v5830_v9  ;;  %v5832_v38 = vpop.f32.mrb[59].mxu1  ;;  %21067 = vst [vmem:[#allocation24_spill] sm:$0xff] %v19678_v62  ;;  %v21068_v20 = vmax.f32 %v19369_v35, 0.0 }
 0x641   :  { %v6898_v32 = vmax.f32 %v6610_v41, 0.0  ;;  %v6622_v28 = vadd.f32 %v19441_v24, %v5832_v38  ;;  %v19687_v41 = vadd.f32 %v19347_v46, %v21070_v14  ;;  %v21072_v38 = vmax.f32 %v19380_v34, 0.0 }
 0x642   :  { %v7179_v9 = vmax.f32 %v21068_v20, %v6897_v30  ;;  %v6909_v51 = vmax.f32 %v6621_v59, 0.0  ;;  %v21074_v59 = vmax.f32 %v19384_v45, 0.0  ;;  %v19702_v14 = vrot.slane %v19673_v2, %v21076_v1  ;;  %v21087_v1 = vld [vmem:[#allocation29_spill] sm:$0xff] }
 0x643   :  { %v19682_v29 = vpop.f32.mrb[60].mxu0  ;;  %21071 = vst [vmem:[#allocation25_spill] sm:$0xff] %v19687_v41  ;;  %v7180_v16 = vmax.f32 %v21072_v38, %v6898_v32  ;;  %v6910_v26 = vmax.f32 %v6622_v28, 0.0  ;;  %v21077_v32 = vld [vmem:[#allocation26_spill] sm:$0xff]  ;;  %v21079_v38 = vmax.f32 %v19388_v5, 0.0  ;;  %v21081_v45 = vsub.s32 1, %v19322_v56 }
 0x644   :  { %21069 = vst [vmem:[#allocation99_spill] sm:$0xff] %v19682_v29  ;;  %v19691_v55 = vpop.f32.mrb[61].mxu0  ;;  %v7185_v30 = vmax.f32 %v21074_v59, %v6909_v51  ;;  %v19707_v28 = vadd.f32 %v19373_v27, %v21077_v32  ;;  %v21082_v59 = vld [vmem:[#allocation27_spill] sm:$0xff] }
 0x645   :  { %21073 = vst [vmem:[#allocation100_spill] sm:$0xff] %v19691_v55  ;;  %v19697_v20 = vpop.f32.mrb[62].mxu0  ;;  %v7186_v47 = vmax.f32 %v21079_v38, %v6910_v26  ;;  %v5836_v35 = vpop.f32.mrb[60].mxu1  ;;  %v19716_v51 = vrot.slane %v19673_v2, %v21081_v45  ;;  %v19721_v34 = vadd.f32 %v19354_v39, %v21082_v59  ;;  %v21084_v26 = vld [vmem:[#allocation28_spill] sm:$0xff]  ;;  %v19736_v59 = vadd.f32 %v19373_v27, %v21087_v1 }
 0x646   :  { %21075 = vst [vmem:[#allocation101_spill] sm:$0xff] %v19697_v20  ;;  %21078 = vst [vmem:[#allocation26_spill] sm:$0xff] %v19707_v28  ;;  %v19711_v55 = vpop.f32.mrb[63].mxu0  ;;  %v19723_v20 = vmax.f32 %v7179_v9, %v7185_v30  ;;  %v6633_v32 = vadd.f32 %v19434_v33, %v5836_v35  ;;  %v5838_v5 = vpop.f32.mrb[61].mxu1  ;;  %v19728_v38 = vadd.f32 %v19407_v13, %v21084_v26  ;;  %v21089_v9 = vld [vmem:[#allocation30_spill] sm:$0xff] }
 0x647   :  { %21080 = vst [vmem:[#allocation102_spill] sm:$0xff] %v19711_v55  ;;  %v6634_v45 = vadd.f32 %v19441_v24, %v5838_v5  ;;  %v5840_v52 = vpop.f32.mrb[62].mxu1  ;;  %v19732_v29 = vmax.f32 %v7180_v16, %v7186_v47  ;;  %21088 = vst [vmem:[#allocation29_spill] sm:$0xff] %v19736_v59  ;;  %v19740_v30 = vadd.f32 %v19407_v13, %v21089_v9  ;;  %v21092_v5 = vld [vmem:[#allocation32_spill] sm:$0xff] }
 0x648   :  { %21083 = vst [vmem:[#allocation27_spill] sm:$0xff] %v19723_v20  ;;  %21085 = vst [vmem:[#allocation28_spill] sm:$0xff] %v19728_v38  ;;  %v6921_v35 = vmax.f32 %v6633_v32, 0.0  ;;  %v6645_v20 = vadd.f32 %v19434_v33, %v5840_v52  ;;  %v5842_v26 = vpop.f32.mrb[63].mxu1  ;;  %v19745_v55 = vadd.f32 %v19347_v46, %v21091_v4  ;;  %v19749_v16 = vadd.f32 %v19354_v39, %v21092_v5  ;;  %v16967_v38 = vld [vmem:[#allocation6 + $0x2c8] sm:$0xff]  }
 0x649   :  { %21086 = vst [vmem:[#allocation103_spill] sm:$0xff] %v19732_v29  ;;  %21090 = vst [vmem:[#allocation30_spill] sm:$0xff] %v19740_v30  ;;  %v6922_v47 = vmax.f32 %v6634_v45, 0.0  ;;  %v6646_v1 = vadd.f32 %v19441_v24, %v5842_v26  ;;  %v21093_v29 = vld [vmem:[#allocation33_spill] sm:$0xff]  ;;  %v21095_v52 = vmax.f32 %v19395_v42, 0.0  ;;  %v19764_v5 = vadd.f32 %v19373_v27, %v21097_v18 }
 0x64a   :  { %v19755_v9 = vadd.f32 %v19347_v46, %v21093_v29  ;;  %v6933_v41 = vmax.f32 %v6645_v20, 0.0  ;;  %v21099_v45 = vmax.f32 %v19399_v60, 0.0  ;;  %v21103_v60 = vld [vmem:[#allocation35_spill] sm:$0xff]  ;;  %v21106_v20 = vld [vmem:[#allocation36_spill] sm:$0xff] }
 0x64b   :  { %v7191_v32 = vmax.f32 %v21095_v52, %v6921_v35  ;;  %v19759_v62 = vpop.f32.mrb[64].mxu0  ;;  %21098 = vst [vmem:[#allocation33_spill] sm:$0xff] %v19764_v5  ;;  %v6934_v12 = vmax.f32 %v6646_v1, 0.0  ;;  %v21101_v35 = vmax.f32 %v19403_v11, 0.0  ;;  %v21104_v1 = vmax.f32 %v19411_v22, 0.0 }
 0x64c   :  { %21094 = vst [vmem:[#allocation31_spill] sm:$0xff] %v19755_v9  ;;  %21096 = vst [vmem:[#allocation32_spill] sm:$0xff] %v19759_v62  ;;  %v7192_v26 = vmax.f32 %v21099_v45, %v6922_v47  ;;  %v19768_v28 = vpop.f32.mrb[65].mxu0  ;;  %v19781_v47 = vadd.f32 %v19354_v39, %v21103_v60  ;;  %v19789_v11 = vadd.f32 %v19407_v13, %v21106_v20  ;;  %v21107_v60 = vld [vmem:[#allocation37_spill] sm:$0xff] }
 0x64d   :  { %21100 = vst [vmem:[#allocation34_spill] sm:$0xff] %v19768_v28  ;;  %v7197_v52 = vmax.f32 %v21101_v35, %v6933_v41  ;;  %v19775_v4 = vpop.f32.mrb[66].mxu0  ;;  %v7198_v45 = vmax.f32 %v21104_v1, %v6934_v12  ;;  %v5846_v29 = vpop.f32.mrb[64].mxu1  ;;  %v19796_v28 = vadd.f32 %v19373_v27, %v21107_v60  ;;  %v21109_v41 = vld [vmem:[#allocation39_spill] sm:$0xff]  ;;  %v19810_v60 = vadd.f32 %v19373_v27, %v19281_v7 }
 0x64e   :  { %21102 = vst [vmem:[#allocation104_spill] sm:$0xff] %v19775_v4  ;;  %v19785_v42 = vpop.f32.mrb[67].mxu0  ;;  %v6657_v18 = vadd.f32 %v19434_v33, %v5846_v29  ;;  %v5848_v62 = vpop.f32.mrb[65].mxu1 }
 0x64f   :  { %21105 = vst [vmem:[#allocation35_spill] sm:$0xff] %v19785_v42  ;;  %v7431_v35 = vmax.f32 %v7191_v32, %v7197_v52  ;;  %v6658_v22 = vadd.f32 %v19441_v24, %v5848_v62  ;;  %v5850_v12 = vpop.f32.mrb[66].mxu1  ;;  %v7432_v1 = vmax.f32 %v7192_v26, %v7198_v45  ;;  %v21108_v42 = vld [vmem:[#allocation38_spill] sm:$0xff]  ;;  %v19805_v32 = vadd.f32 %v21109_v41, %v19347_v46  ;;  %v16965_v45 = vld [vmem:[#allocation6 + $0x280] sm:$0xff]  }
 0x650   :  { %v19801_v20 = vadd.f32 %v19407_v13, %v21108_v42  ;;  %v6945_v29 = vmax.f32 %v6657_v18, 0.0  ;;  %v6669_v52 = vadd.f32 %v19434_v33, %v5850_v12  ;;  %v5852_v4 = vpop.f32.mrb[67].mxu1  ;;  %21110 = vst [vmem:[#allocation36_spill] sm:$0xff] %v19810_v60  ;;  %v19815_v42 = vadd.f32 %v19279_v58, %v19354_v39  ;;  %v21182_v60 = vld [vmem:[#allocation63_spill] sm:$0xff] }
 0x651   :  { %v6946_v5 = vmax.f32 %v6658_v22, 0.0  ;;  %v6670_v62 = vadd.f32 %v19441_v24, %v5852_v4  ;;  %v7438_v26 = vpack.c.bf16 %v7432_v1, %v7432_v1  ;;  %v7437_v30 = vpack.c.bf16 %v7431_v35, %v7431_v35 }
 0x652   :  { %v21111_v41 = vmax.f32 %v19415_v17, 0.0  ;;  %v6957_v59 = vmax.f32 %v6669_v52, 0.0  ;;  %v19824_v22 = vadd.f32 %v19407_v13, %v19286_v48  ;;  %v21114_v4 = vmax.f32 %v19426_v31, 0.0 }
 0x653   :  { %v19819_v12 = vpop.f32.mrb[68].mxu0  ;;  %v6958_v9 = vmax.f32 %v6670_v62, 0.0  ;;  %7860 = vmatprep.mubr.bf16.mxu0 %v7438_v26  ;;  %v21116_v52 = vmax.f32 %v19430_v25, 0.0  ;;  %v21119_v26 = vmax.f32 %v19448_v44, 0.0  ;;  %v16969_v25 = vld [vmem:[#allocation6 + $0x288] sm:$0xff]  }
 0x654   :  { %v7203_v18 = vmax.f32 %v21111_v41, %v6945_v29  ;;  %21112 = vst [vmem:[#allocation37_spill] sm:$0xff] %v19819_v12  ;;  %21113 = vst [vmem:[#allocation38_spill] sm:$0xff] %v19824_v22  ;;  %v7204_v1 = vmax.f32 %v21114_v4, %v6946_v5  ;;  %v19828_v58 = vpop.f32.mrb[69].mxu0  ;;  %7861 = vmatmul.mubr.bf16.vlgmr.msra.gmra.mrb[144].mxu0 %v7437_v30  ;;  %v21118_v5 = vld [vmem:[#allocation40_spill] sm:$0xff]  ;;  %v19850_v30 = vadd.f32 %v19373_v27, %v19291_v3  ;;  %v16971_v29 = vld [vmem:[#allocation6 + $0x2d0] sm:$0xff]  }
 0x655   :  { %21115 = vst [vmem:[#allocation39_spill] sm:$0xff] %v19828_v58  ;;  %v7209_v41 = vmax.f32 %v21116_v52, %v6957_v59  ;;  %v19835_v7 = vpop.f32.mrb[70].mxu0  ;;  %v19841_v62 = vadd.f32 %v21118_v5, %v19347_v46  ;;  %v7210_v4 = vmax.f32 %v21119_v26, %v6958_v9  ;;  %v5856_v35 = vpop.f32.mrb[68].mxu1  ;;  %14806 = vmatpush3.bf16.msra.mxu0 %v16965_v45  ;;  %v21123_v9 = vld [vmem:[#allocation41_spill] sm:$0xff]  ;;  %v21125_v3 = vld [vmem:[#allocation42_spill] sm:$0xff] }
 0x656   :  { %21117 = vst [vmem:[#allocation105_spill] sm:$0xff] %v19835_v7  ;;  %v19845_v17 = vpop.f32.mrb[71].mxu0  ;;  %21121 = vst [vmem:[#allocation106_spill] sm:$0xff] %v19850_v30  ;;  %v6681_v31 = vadd.f32 %v19434_v33, %v5856_v35  ;;  %v5858_v5 = vpop.f32.mrb[69].mxu1  ;;  %14807 = vmatprep.subr.bf16.mxu0 %v16967_v38  ;;  %v19858_v26 = vadd.f32 %v21123_v9, %v19354_v39  ;;  %v21127_v35 = vld [vmem:[#allocation43_spill] sm:$0xff]  ;;  %v19874_v9 = vadd.f32 %v19373_v27, %v19304_v36 }
 0x657   :  { %21120 = vst [vmem:[#allocation40_spill] sm:$0xff] %v19845_v17  ;;  %v19852_v52 = vmax.f32 %v7203_v18, %v7209_v41  ;;  %v6682_v45 = vadd.f32 %v19441_v24, %v5858_v5  ;;  %v5860_v59 = vpop.f32.mrb[70].mxu1  ;;  %v19861_v48 = vmax.f32 %v7204_v1, %v7210_v4  ;;  %v19865_v18 = vadd.f32 %v19407_v13, %v21125_v3  ;;  %v21129_v5 = vld [vmem:[#allocation44_spill] sm:$0xff]  ;;  %v21130_v17 = vld [vmem:[#allocation46_spill] sm:$0xff] }
 0x658   :  { %v19869_v41 = vadd.f32 %v21127_v35, %v19347_v46  ;;  %v6969_v38 = vmax.f32 %v6681_v31, 0.0  ;;  %v6693_v44 = vadd.f32 %v19434_v33, %v5860_v59  ;;  %21128 = vst [vmem:[#allocation43_spill] sm:$0xff] %v19874_v9  ;;  %v19878_v1 = vadd.f32 %v21129_v5, %v19354_v39  ;;  %v16975_v5 = vld [vmem:[#allocation6 + $0x2d8] sm:$0xff]  }
 0x659   :  { %21122 = vst [vmem:[#allocation107_spill] sm:$0xff] %v19852_v52  ;;  %21124 = vst [vmem:[#allocation41_spill] sm:$0xff] %v19861_v48  ;;  %v5862_v52 = vpop.f32.mrb[71].mxu1  ;;  %v6970_v4 = vmax.f32 %v6682_v45, 0.0  ;;  %14808 = vmatpush3.bf16.msra.mxu0 %v16969_v25  ;;  %v16973_v48 = vld [vmem:[#allocation6 + $0x290] sm:$0xff]   ;;  %v19884_v31 = vadd.f32 %v19407_v13, %v21130_v17  ;;  %v21132_v59 = vmax.f32 %v19458_v63, 0.0 }
 0x65a   :  { %21126 = vst [vmem:[#allocation42_spill] sm:$0xff] %v19865_v18  ;;  %v6694_v3 = vadd.f32 %v19441_v24, %v5862_v52  ;;  %v6981_v36 = vmax.f32 %v6693_v44, 0.0  ;;  %14809 = vmatprep.subr.bf16.mxu0 %v16971_v29  ;;  %v21134_v52 = vld [vmem:[#allocation45_spill] sm:$0xff]  ;;  %v21135_v35 = vmax.f32 %v19462_v37, 0.0  ;;  %v21137_v29 = vmax.f32 %v19470_v57, 0.0  ;;  %v21139_v37 = vld [vmem:[#allocation48_spill] sm:$0xff] }
 0x65b   :  { %21131 = vst [vmem:[#allocation44_spill] sm:$0xff] %v19884_v31  ;;  %v7215_v7 = vmax.f32 %v21132_v59, %v6969_v38  ;;  %v19888_v58 = vpop.f32.mrb[72].mxu0  ;;  %v19893_v25 = vadd.f32 %v21134_v52, %v19347_v46  ;;  %v16977_v38 = vld [vmem:[#allocation6 + $0x298] sm:$0xff]   ;;  %v21153_v31 = vld [vmem:[#allocation53_spill] sm:$0xff] }
 0x65c   :  { %21133 = vst [vmem:[#allocation46_spill] sm:$0xff] %v19888_v58  ;;  %v7216_v12 = vmax.f32 %v21135_v35, %v6970_v4  ;;  %v6982_v22 = vmax.f32 %v6694_v3, 0.0  ;;  %v19897_v17 = vpop.f32.mrb[73].mxu0  ;;  %v7221_v59 = vmax.f32 %v21137_v29, %v6981_v36  ;;  %v19910_v4 = vadd.f32 %v19373_v27, %v21139_v37  ;;  %v21143_v36 = vld [vmem:[#allocation47_spill] sm:$0xff]  ;;  %v21152_v58 = vld [vmem:[#allocation52_spill] sm:$0xff] }
 0x65d   :  { %21136 = vst [vmem:[#allocation45_spill] sm:$0xff] %v19897_v17  ;;  %v19904_v45 = vpop.f32.mrb[74].mxu0  ;;  %v21141_v3 = vmax.f32 %v19474_v40, 0.0  ;;  %v5866_v63 = vpop.f32.mrb[72].mxu1  ;;  %14810 = vmatpush3.bf16.msra.mxu0 %v16973_v48  ;;  %v19919_v29 = vadd.f32 %v21143_v36, %v19354_v39  ;;  %v21148_v39 = vld [vmem:[#allocation50_spill] sm:$0xff] }
 0x65e   :  { %21138 = vst [vmem:[#allocation108_spill] sm:$0xff] %v19904_v45  ;;  %21140 = vst [vmem:[#allocation48_spill] sm:$0xff] %v19910_v4  ;;  %v19914_v44 = vpop.f32.mrb[75].mxu0  ;;  %v19921_v46 = vmax.f32 %v7215_v7, %v7221_v59  ;;  %v6705_v52 = vadd.f32 %v19434_v33, %v5866_v63  ;;  %v5868_v37 = vpop.f32.mrb[73].mxu1  ;;  %14811 = vmatprep.subr.bf16.mxu0 %v16975_v5  ;;  %v16979_v45 = vld [vmem:[#allocation6 + $0x2e0] sm:$0xff]   ;;  %v21149_v36 = vld [vmem:[#allocation66_spill] sm:$0xff] }
 0x65f   :  { %v7222_v35 = vmax.f32 %v21141_v3, %v6982_v22  ;;  %21142 = vst [vmem:[#allocation109_spill] sm:$0xff] %v19914_v44  ;;  %v21145_v22 = vld [vmem:[#allocation49_spill] sm:$0xff]  ;;  %v6706_v48 = vadd.f32 %v19441_v24, %v5868_v37  ;;  %v5870_v57 = vpop.f32.mrb[74].mxu1  ;;  %v19934_v7 = vadd.f32 %v21149_v36, %v21148_v39  ;;  %v21150_v59 = vld [vmem:[#allocation51_spill] sm:$0xff]  ;;  %v19944_v37 = vadd.f32 %v21149_v36, %v21152_v58  ;;  %v21157_v4 = vld [vmem:[#allocation54_spill] sm:$0xff] }
 0x660   :  { %21144 = vst [vmem:[#allocation47_spill] sm:$0xff] %v19921_v46  ;;  %v19927_v3 = vadd.f32 %v19407_v13, %v21145_v22  ;;  %v21151_v63 = vld [vmem:[#allocation67_spill] sm:$0xff]  ;;  %v6993_v5 = vmax.f32 %v6705_v52, 0.0  ;;  %v6717_v40 = vadd.f32 %v19434_v33, %v5870_v57  ;;  %v5872_v17 = vpop.f32.mrb[75].mxu1  ;;  %v21155_v52 = vmax.f32 %v19480_v6, 0.0  ;;  %v16983_v58 = vld [vmem:[#allocation6 + $0x2e8] sm:$0xff]  }
 0x661   :  { %v19930_v44 = vmax.f32 %v7216_v12, %v7222_v35  ;;  %v19938_v46 = vadd.f32 %v21151_v63, %v21150_v59  ;;  %v6994_v12 = vmax.f32 %v6706_v48, 0.0  ;;  %v6718_v35 = vadd.f32 %v19441_v24, %v5872_v17  ;;  %14812 = vmatpush3.bf16.msra.mxu0 %v16977_v38  ;;  %v16981_v39 = vld [vmem:[#allocation6 + $0x2a0] sm:$0xff]  }
 0x662   :  { %21146 = vst [vmem:[#allocation49_spill] sm:$0xff] %v19927_v3  ;;  %v19950_v59 = vadd.f32 %v19373_v27, %v21153_v31  ;;  %v7227_v57 = vmax.f32 %v21155_v52, %v6993_v5  ;;  %v7005_v9 = vmax.f32 %v6717_v40, 0.0  ;;  %14813 = vmatprep.subr.bf16.mxu0 %v16979_v45  ;;  %v19959_v17 = vadd.f32 %v21151_v63, %v21157_v4 }
 0x663   :  { %21147 = vst [vmem:[#allocation110_spill] sm:$0xff] %v19930_v44  ;;  %v19954_v22 = vpop.f32.mrb[76].mxu0  ;;  %v21158_v38 = vmax.f32 %v19488_v0, 0.0  ;;  %v7006_v18 = vmax.f32 %v6718_v35, 0.0  ;;  %v21160_v5 = vmax.f32 %v19492_v8, 0.0  ;;  %v21162_v48 = vsub.s32 2, %v19322_v56 }
 0x664   :  { %21154 = vst [vmem:[#allocation50_spill] sm:$0xff] %v19950_v59  ;;  %21156 = vst [vmem:[#allocation66_spill] sm:$0xff] %v19954_v22  ;;  %v19963_v31 = vpop.f32.mrb[77].mxu0  ;;  %v21163_v22 = vld [vmem:[#allocation55_spill] sm:$0xff]  ;;  %v21165_v35 = vmax.f32 %v19507_v49, 0.0  ;;  %v21167_v8 = vsub.s32 3, %v19322_v56 }
 0x665   :  { %v7228_v44 = vmax.f32 %v21158_v38, %v6994_v12  ;;  %21159 = vst [vmem:[#allocation51_spill] sm:$0xff] %v19963_v31  ;;  %v7233_v45 = vmax.f32 %v21160_v5, %v7005_v9  ;;  %v19969_v52 = vpop.f32.mrb[78].mxu0  ;;  %v19974_v4 = vrot.slane %v19673_v2, %v21162_v48  ;;  %v19978_v0 = vadd.f32 %v19407_v13, %v21163_v22  ;;  %v5876_v40 = vpop.f32.mrb[76].mxu1  ;;  %v16985_v48 = vld [vmem:[#allocation6 + $0x2a8] sm:$0xff]   ;;  %v21179_v59 = vld [vmem:[#allocation62_spill] sm:$0xff] }
 0x666   :  { %21161 = vst [vmem:[#allocation67_spill] sm:$0xff] %v19969_v52  ;;  %v7234_v38 = vmax.f32 %v21165_v35, %v7006_v18  ;;  %v19983_v6 = vpop.f32.mrb[79].mxu0  ;;  %v19988_v9 = vrot.slane %v19673_v2, %v21167_v8  ;;  %14814 = vmatpush3.bf16.msra.mxu0 %v16981_v39  ;;  %v21168_v52 = vld [vmem:[#allocation56_spill] sm:$0xff]  ;;  %v6729_v49 = vadd.f32 %v19434_v33, %v5876_v40  ;;  %v5878_v18 = vpop.f32.mrb[77].mxu1  ;;  %v16987_v35 = vld [vmem:[#allocation6 + $0x2f0] sm:$0xff]  }
 0x667   :  { %21164 = vst [vmem:[#allocation52_spill] sm:$0xff] %v19978_v0  ;;  %21166 = vst [vmem:[#allocation53_spill] sm:$0xff] %v19983_v6  ;;  %v19993_v22 = vadd.f32 %v19373_v27, %v21168_v52  ;;  %v19995_v12 = vmax.f32 %v7227_v57, %v7233_v45  ;;  %14815 = vmatprep.subr.bf16.mxu0 %v16983_v58  ;;  %v21171_v6 = vld [vmem:[#allocation57_spill] sm:$0xff]  ;;  %v6730_v39 = vadd.f32 %v19441_v24, %v5878_v18  ;;  %v5880_v8 = vpop.f32.mrb[78].mxu1  ;;  %v21174_v52 = vld [vmem:[#allocation58_spill] sm:$0xff] }
 0x668   :  { %v20000_v56 = vadd.f32 %v19407_v13, %v21171_v6  ;;  %v20004_v5 = vmax.f32 %v7228_v44, %v7234_v38  ;;  %v20008_v57 = vadd.f32 %v21149_v36, %v21174_v52  ;;  %v21175_v45 = vld [vmem:[#allocation59_spill] sm:$0xff]  ;;  %v7017_v58 = vmax.f32 %v6729_v49, 0.0  ;;  %v5882_v6 = vpop.f32.mrb[79].mxu1  ;;  %v21176_v31 = vld [vmem:[#allocation61_spill] sm:$0xff]  ;;  %v21178_v18 = vld [vmem:[#allocation60_spill] sm:$0xff] }
 0x669   :  { %21169 = vst [vmem:[#allocation54_spill] sm:$0xff] %v19993_v22  ;;  %21170 = vst [vmem:[#allocation55_spill] sm:$0xff] %v19995_v12  ;;  %v20012_v40 = vadd.f32 %v21151_v63, %v21175_v45  ;;  %v6741_v12 = vadd.f32 %v19434_v33, %v5880_v8  ;;  %v20017_v2 = vadd.f32 %v19373_v27, %v21176_v31  ;;  %v7018_v38 = vmax.f32 %v6730_v39, 0.0 }
 0x66a   :  { %21172 = vst [vmem:[#allocation56_spill] sm:$0xff] %v20000_v56  ;;  %21173 = vst [vmem:[#allocation57_spill] sm:$0xff] %v20004_v5  ;;  %v20021_v44 = vadd.f32 %v21149_v36, %v21178_v18  ;;  %v6742_v52 = vadd.f32 %v19441_v24, %v5882_v6  ;;  %14816 = vmatpush3.bf16.msra.mxu0 %v16985_v48  ;;  %v16989_v5 = vld [vmem:[#allocation6 + $0x2b0] sm:$0xff]   ;;  %v20027_v49 = vadd.f32 %v21151_v63, %v21179_v59  ;;  %v16991_v18 = vld [vmem:[#allocation6 + $0x2f8] sm:$0xff]  }
 0x66b   :  { %21177 = vst [vmem:[#allocation58_spill] sm:$0xff] %v20017_v2  ;;  %v21180_v8 = vmax.f32 %v19517_v54, 0.0  ;;  %v7029_v31 = vmax.f32 %v6741_v12, 0.0  ;;  %v20031_v30 = vpop.f32.mrb[80].mxu0  ;;  %14817 = vmatprep.subr.bf16.mxu0 %v16987_v35  ;;  %v20036_v48 = vadd.f32 %v19407_v13, %v21182_v60  ;;  %v21184_v6 = vmax.f32 %v19525_v53, 0.0  ;;  %v21233_v2 = vld [vmem:[#allocation18_spill] sm:$0xff] }
 0x66c   :  { %21181 = vst [vmem:[#allocation59_spill] sm:$0xff] %v20031_v30  ;;  %v7030_v0 = vmax.f32 %v6742_v52, 0.0  ;;  %v20040_v59 = vpop.f32.mrb[81].mxu0  ;;  %v21186_v35 = vmax.f32 %v19529_v50, 0.0  ;;  %v21188_v30 = vld [vmem:[#allocation64_spill] sm:$0xff]  ;;  %v21190_v52 = vmax.f32 %v19558_v61, 0.0 }
 0x66d   :  { %v7239_v3 = vmax.f32 %v21180_v8, %v7017_v58  ;;  %21183 = vst [vmem:[#allocation61_spill] sm:$0xff] %v20036_v48  ;;  %v7240_v45 = vmax.f32 %v21184_v6, %v7018_v38  ;;  %21185 = vst [vmem:[#allocation60_spill] sm:$0xff] %v20040_v59  ;;  %v20047_v39 = vpop.f32.mrb[82].mxu0  ;;  %v20052_v53 = vadd.f32 %v19373_v27, %v21188_v30  ;;  %v5886_v54 = vpop.f32.mrb[80].mxu1  ;;  %v16993_v58 = vld [vmem:[#allocation6 + $0x2b8] sm:$0xff]   ;;  %v21192_v50 = vld [vmem:[#allocation65_spill] sm:$0xff] }
 0x66e   :  { %v7245_v8 = vmax.f32 %v21186_v35, %v7029_v31  ;;  %21187 = vst [vmem:[#allocation62_spill] sm:$0xff] %v20047_v39  ;;  %v7246_v6 = vmax.f32 %v21190_v52, %v7030_v0  ;;  %v20057_v12 = vpop.f32.mrb[83].mxu0  ;;  %14818 = vmatpush3.bf16.msra.mxu0 %v16989_v5  ;;  %v20061_v31 = vadd.f32 %v19407_v13, %v21192_v50  ;;  %v5888_v39 = vpop.f32.mrb[81].mxu1  ;;  %v16995_v38 = vld [vmem:[#allocation6 + $0xc0] sm:$0xff]   ;;  %v21197_v59 = vld [vmem:[#allocation69_spill] sm:$0xff]  ;;  %v21198_v35 = vld [vmem:[#allocation70_spill] sm:$0xff] }
 0x66f   :  { %21189 = vst [vmem:[#allocation63_spill] sm:$0xff] %v20052_v53  ;;  %21191 = vst [vmem:[#allocation64_spill] sm:$0xff] %v20057_v12  ;;  %v6753_v30 = vadd.f32 %v19434_v33, %v5886_v54  ;;  %14819 = vmatprep.subr.bf16.mxu0 %v16991_v18  ;;  %v21195_v0 = vld [vmem:[#allocation68_spill] sm:$0xff]  ;;  %v6754_v5 = vadd.f32 %v19441_v24, %v5888_v39  ;;  %v5890_v12 = vpop.f32.mrb[82].mxu1  ;;  %v20081_v54 = vadd.f32 %v21149_v36, %v19439_v19 }
 0x670   :  { %21193 = vst [vmem:[#allocation65_spill] sm:$0xff] %v20061_v31  ;;  %v20064_v60 = vmax.f32 %v7239_v3, %v7245_v8  ;;  %v20070_v52 = vadd.f32 %v21149_v36, %v21195_v0  ;;  %v20073_v50 = vmax.f32 %v7240_v45, %v7246_v6  ;;  %v20077_v3 = vadd.f32 %v21151_v63, %v21197_v59  ;;  %v5892_v61 = vpop.f32.mrb[83].mxu1  ;;  %v21204_v0 = vld [vmem:[#allocation72_spill] sm:$0xff] }
 0x671   :  { %v7041_v18 = vmax.f32 %v6753_v30, 0.0  ;;  %v6765_v8 = vadd.f32 %v19434_v33, %v5890_v12  ;;  %v20087_v39 = vadd.f32 %v19373_v27, %v21198_v35  ;;  %v7042_v45 = vmax.f32 %v6754_v5, 0.0  ;;  %v21206_v5 = vld [vmem:[#allocation73_spill] sm:$0xff]  ;;  %v21235_v56 = vld [vmem:[#allocation88_spill] sm:$0xff] }
 0x672   :  { %21194 = vst [vmem:[#allocation111_spill] sm:$0xff] %v20064_v60  ;;  %21196 = vst [vmem:[#allocation68_spill] sm:$0xff] %v20073_v50  ;;  %v6766_v6 = vadd.f32 %v19441_v24, %v5892_v61  ;;  %14820 = vmatpush3.bf16.msra.mxu0 %v16993_v58  ;;  %v21200_v60 = vld [vmem:[#allocation71_spill] sm:$0xff]  ;;  %v21202_v30 = vmax.f32 %v19576_v10, 0.0  ;;  %v20101_v35 = vadd.f32 %v19407_v13, %v21204_v0  ;;  %v21208_v61 = vmax.f32 %v19584_v43, 0.0 }
 0x673   :  { %21199 = vst [vmem:[#allocation69_spill] sm:$0xff] %v20087_v39  ;;  %v20093_v19 = vadd.f32 %v21151_v63, %v21200_v60  ;;  %v7053_v50 = vmax.f32 %v6765_v8, 0.0  ;;  %v20097_v48 = vpop.f32.mrb[84].mxu0  ;;  %14849 = vmatprep.subr.bf16.mxu0 %v16995_v38  ;;  %v20105_v58 = vadd.f32 %v19373_v27, %v21206_v5  ;;  %v21210_v8 = vmax.f32 %v19588_v15, 0.0 }
 0x674   :  { %v7251_v12 = vmax.f32 %v21202_v30, %v7041_v18  ;;  %21203 = vst [vmem:[#allocation71_spill] sm:$0xff] %v20097_v48  ;;  %21205 = vst [vmem:[#allocation72_spill] sm:$0xff] %v20101_v35  ;;  %v7252_v59 = vmax.f32 %v21208_v61, %v7042_v45  ;;  %v7054_v60 = vmax.f32 %v6766_v6, 0.0  ;;  %v20109_v31 = vpop.f32.mrb[85].mxu0  ;;  %v21212_v48 = vld [vmem:[#allocation75_spill] sm:$0xff]  ;;  %v21216_v61 = vmax.f32 %v19603_v23, 0.0 }
 0x675   :  { %21201 = vst [vmem:[#allocation70_spill] sm:$0xff] %v20093_v19  ;;  %21207 = vst [vmem:[#allocation73_spill] sm:$0xff] %v20105_v58  ;;  %v7257_v0 = vmax.f32 %v21210_v8, %v7053_v50  ;;  %v20116_v30 = vpop.f32.mrb[86].mxu0  ;;  %v20121_v43 = vadd.f32 %v19407_v13, %v21212_v48  ;;  %v21214_v45 = vld [vmem:[#allocation79_spill] sm:$0xff]  ;;  %v5896_v10 = vpop.f32.mrb[84].mxu1  ;;  %v21218_v50 = vld [vmem:[#allocation80_spill] sm:$0xff]  ;;  %v20146_v15 = vadd.f32 %v19373_v27, %v19546_v21 }
 0x676   :  { %21209 = vst [vmem:[#allocation112_spill] sm:$0xff] %v20109_v31  ;;  %21211 = vst [vmem:[#allocation113_spill] sm:$0xff] %v20116_v30  ;;  %v20125_v6 = vadd.f32 %v21149_v36, %v21214_v45  ;;  %v7258_v18 = vmax.f32 %v21216_v61, %v7054_v60  ;;  %v20129_v38 = vpop.f32.mrb[87].mxu0  ;;  %v20134_v8 = vadd.f32 %v21151_v63, %v21218_v50  ;;  %v5898_v30 = vpop.f32.mrb[85].mxu1  ;;  %v21223_v50 = vld [vmem:[#allocation81_spill] sm:$0xff] }
 0x677   :  { %21213 = vst [vmem:[#allocation75_spill] sm:$0xff] %v20121_v43  ;;  %21217 = vst [vmem:[#allocation114_spill] sm:$0xff] %v20129_v38  ;;  %v20136_v5 = vmax.f32 %v7251_v12, %v7257_v0  ;;  %v6777_v48 = vadd.f32 %v19434_v33, %v5896_v10  ;;  %v6778_v23 = vadd.f32 %v19441_v24, %v5898_v30  ;;  %v5900_v60 = vpop.f32.mrb[86].mxu1  ;;  %v21227_v38 = vld [vmem:[#allocation16_spill] sm:$0xff]  ;;  %v21231_v45 = vld [vmem:[#allocation17_spill] sm:$0xff] }
 0x678   :  { %21215 = vst [vmem:[#allocation79_spill] sm:$0xff] %v20125_v6  ;;  %21219 = vst [vmem:[#allocation80_spill] sm:$0xff] %v20134_v8  ;;  %v20142_v61 = vmax.f32 %v7252_v59, %v7258_v18  ;;  %v20150_v12 = vadd.f32 %v21149_v36, %v21223_v50  ;;  %v6789_v10 = vadd.f32 %v19434_v33, %v5900_v60  ;;  %v21228_v50 = vmax.f32 %v21227_v38, 0.0  ;;  %v21229_v60 = vld [vmem:[#allocation85_spill] sm:$0xff] }
 0x679   :  { %21220 = vst [vmem:[#allocation115_spill] sm:$0xff] %v20136_v5  ;;  %21222 = vst [vmem:[#allocation117_spill] sm:$0xff] %v20146_v15  ;;  %v7065_v0 = vmax.f32 %v6777_v48, 0.0  ;;  %v5902_v5 = vpop.f32.mrb[87].mxu1  ;;  %v7066_v30 = vmax.f32 %v6778_v23, 0.0  ;;  %v20165_v39 = vadd.f32 %v19407_v13, %v21229_v60  ;;  %v21232_v31 = vmax.f32 %v21231_v45, 0.0 }
 0x67a   :  { %21221 = vst [vmem:[#allocation116_spill] sm:$0xff] %v20142_v61  ;;  %21224 = vst [vmem:[#allocation81_spill] sm:$0xff] %v20150_v12  ;;  %v6790_v59 = vadd.f32 %v19441_v24, %v5902_v5  ;;  %v21225_v61 = vld [vmem:[#allocation83_spill] sm:$0xff]  ;;  %v7077_v48 = vmax.f32 %v6789_v10, 0.0  ;;  %v21234_v38 = vmax.f32 %v21233_v2, 0.0  ;;  %v20177_v60 = vadd.f32 %v19373_v27, %v21235_v56  ;;  %v21237_v45 = vld [vmem:[#allocation20_spill] sm:$0xff] }
 0x67b   :  { %v20159_v21 = vadd.f32 %v21151_v63, %v21225_v61  ;;  %v7263_v58 = vmax.f32 %v21228_v50, %v7065_v0  ;;  %v5979_v35 = vpop.f32.mrb[88].mxu0  ;;  %21230 = vst [vmem:[#allocation16_spill] sm:$0xff] %v20165_v39  ;;  %v7264_v23 = vmax.f32 %v21232_v31, %v7066_v30  ;;  %v21238_v31 = vmax.f32 %v21237_v45, 0.0  ;;  %v21240_v61 = vld [vmem:[#allocation74_spill] sm:$0xff]  ;;  %v21256_v39 = vld [vmem:[#allocation25_spill] sm:$0xff] }
 0x67c   :  { %v7078_v43 = vmax.f32 %v6790_v59, 0.0  ;;  %v6611_v5 = vadd.f32 %v19702_v14, %v5979_v35  ;;  %v5981_v18 = vpop.f32.mrb[89].mxu0  ;;  %v7269_v0 = vmax.f32 %v21234_v38, %v7077_v48  ;;  %21236 = vst [vmem:[#allocation85_spill] sm:$0xff] %v20177_v60  ;;  %v21241_v12 = vmax.f32 %v21240_v61, 0.0 }
 0x67d   :  { %21226 = vst [vmem:[#allocation83_spill] sm:$0xff] %v20159_v21  ;;  %v6612_v10 = vadd.f32 %v19716_v51, %v5981_v18  ;;  %v5983_v50 = vpop.f32.mrb[90].mxu0  ;;  %v5906_v59 = vpop.f32.mrb[88].mxu1 }
 0x67e   :  { %v7270_v30 = vmax.f32 %v21238_v31, %v7078_v43  ;;  %v6899_v35 = vmax.f32 %v6611_v5, 0.0  ;;  %v6623_v22 = vadd.f32 %v19702_v14, %v5983_v50  ;;  %v5985_v53 = vpop.f32.mrb[91].mxu0  ;;  %v20182_v15 = vmax.f32 %v7263_v58, %v7269_v0  ;;  %v5908_v48 = vpop.f32.mrb[89].mxu1  ;;  %v21243_v58 = vld [vmem:[#allocation76_spill] sm:$0xff] }
 0x67f   :  { %v6801_v2 = vadd.f32 %v19434_v33, %v5906_v59  ;;  %v6900_v38 = vmax.f32 %v6612_v10, 0.0  ;;  %v6624_v18 = vadd.f32 %v19716_v51, %v5985_v53  ;;  %v6802_v56 = vadd.f32 %v19441_v24, %v5908_v48  ;;  %v5910_v45 = vpop.f32.mrb[90].mxu1  ;;  %v21245_v53 = vld [vmem:[#allocation77_spill] sm:$0xff] }
 0x680   :  { %21239 = vst [vmem:[#allocation17_spill] sm:$0xff] %v20182_v15  ;;  %v7181_v27 = vmax.f32 %v21241_v12, %v6899_v35  ;;  %v6911_v43 = vmax.f32 %v6623_v22, 0.0  ;;  %v20189_v31 = vmax.f32 %v7264_v23, %v7270_v30  ;;  %v21244_v0 = vmax.f32 %v21243_v58, 0.0  ;;  %v5912_v10 = vpop.f32.mrb[91].mxu1  ;;  %v21247_v23 = vld [vmem:[#allocation90_spill] sm:$0xff] }
 0x681   :  { %v7089_v50 = vmax.f32 %v6801_v2, 0.0  ;;  %v6813_v59 = vadd.f32 %v19434_v33, %v5910_v45  ;;  %v7090_v8 = vmax.f32 %v6802_v56, 0.0  ;;  %v21246_v6 = vmax.f32 %v21245_v53, 0.0  ;;  %v21249_v2 = vld [vmem:[#allocation98_spill] sm:$0xff]  ;;  %v21251_v45 = vld [vmem:[#allocation24_spill] sm:$0xff] }
 0x682   :  { %21242 = vst [vmem:[#allocation18_spill] sm:$0xff] %v20189_v31  ;;  %v7182_v15 = vmax.f32 %v21244_v0, %v6900_v38  ;;  %v6814_v12 = vadd.f32 %v19441_v24, %v5912_v10  ;;  %v6912_v35 = vmax.f32 %v6624_v18, 0.0  ;;  %v20201_v30 = vadd.f32 %v19407_v13, %v21247_v23 }
 0x683   :  { %v7187_v61 = vmax.f32 %v21246_v6, %v6911_v43  ;;  %v21250_v48 = vmax.f32 %v21249_v2, 0.0  ;;  %v7101_v38 = vmax.f32 %v6813_v59, 0.0  ;;  %v5989_v0 = vpop.f32.mrb[92].mxu0  ;;  %v21252_v5 = vmax.f32 %v21251_v45, 0.0  ;;  %v21254_v43 = vld [vmem:[#allocation78_spill] sm:$0xff] }
 0x684   :  { %21248 = vst [vmem:[#allocation88_spill] sm:$0xff] %v20201_v30  ;;  %v7102_v6 = vmax.f32 %v6814_v12, 0.0  ;;  %v21255_v10 = vmax.f32 %v21254_v43, 0.0  ;;  %v5991_v53 = vpop.f32.mrb[93].mxu0  ;;  %v21257_v13 = vmax.f32 %v21256_v39, 0.0  ;;  %v6635_v2 = vadd.f32 %v19702_v14, %v5989_v0 }
 0x685   :  { %v7275_v58 = vmax.f32 %v21250_v48, %v7089_v50  ;;  %v7276_v56 = vmax.f32 %v21252_v5, %v7090_v8  ;;  %v20207_v31 = vmax.f32 %v7181_v27, %v7187_v61  ;;  %v6636_v50 = vadd.f32 %v19716_v51, %v5991_v53  ;;  %v5993_v59 = vpop.f32.mrb[94].mxu0  ;;  %v21258_v48 = vld [vmem:[#allocation94_spill] sm:$0xff]  ;;  %v5916_v61 = vpop.f32.mrb[92].mxu1 }
 0x686   :  { %v7188_v18 = vmax.f32 %v21255_v10, %v6912_v35  ;;  %v7281_v23 = vmax.f32 %v21257_v13, %v7101_v38  ;;  %v20218_v8 = vadd.f32 %v21149_v36, %v21258_v48  ;;  %v21260_v27 = vmax.f32 %v19721_v34, 0.0  ;;  %v5995_v35 = vpop.f32.mrb[95].mxu0  ;;  %v5918_v43 = vpop.f32.mrb[93].mxu1 }
 0x687   :  { %21253 = vst [vmem:[#allocation20_spill] sm:$0xff] %v20207_v31  ;;  %v6647_v12 = vadd.f32 %v19702_v14, %v5993_v59  ;;  %v6825_v38 = vadd.f32 %v19434_v33, %v5916_v61  ;;  %v6923_v0 = vmax.f32 %v6635_v2, 0.0  ;;  %v6924_v10 = vmax.f32 %v6636_v50, 0.0  ;;  %v5920_v48 = vpop.f32.mrb[94].mxu1  ;;  %v21265_v61 = vld [vmem:[#allocation84_spill] sm:$0xff] }
 0x688   :  { %21259 = vst [vmem:[#allocation74_spill] sm:$0xff] %v20218_v8  ;;  %v7282_v5 = vmax.f32 %v21260_v27, %v7102_v6  ;;  %v20223_v45 = vmax.f32 %v7182_v15, %v7188_v18  ;;  %v20225_v39 = vmax.f32 %v7275_v58, %v7281_v23  ;;  %v6826_v13 = vadd.f32 %v19441_v24, %v5918_v43  ;;  %v21262_v27 = vld [vmem:[#allocation95_spill] sm:$0xff]  ;;  %v21263_v58 = vld [vmem:[#allocation82_spill] sm:$0xff]  ;;  %v5922_v50 = vpop.f32.mrb[95].mxu1 }
 0x689   :  { %v6935_v34 = vmax.f32 %v6647_v12, 0.0  ;;  %v6648_v6 = vadd.f32 %v19716_v51, %v5995_v35  ;;  %v20233_v59 = vadd.f32 %v21151_v63, %v21262_v27  ;;  %v7113_v15 = vmax.f32 %v6825_v38, 0.0  ;;  %v21267_v43 = vld [vmem:[#allocation86_spill] sm:$0xff]  ;;  %v21282_v8 = vld [vmem:[#allocation91_spill] sm:$0xff] }
 0x68a   :  { %21261 = vst [vmem:[#allocation76_spill] sm:$0xff] %v20225_v39  ;;  %v21264_v18 = vmax.f32 %v21263_v58, 0.0  ;;  %v21266_v2 = vmax.f32 %v21265_v61, 0.0  ;;  %v7114_v39 = vmax.f32 %v6826_v13, 0.0  ;;  %v6837_v53 = vadd.f32 %v19434_v33, %v5920_v48 }
 0x68b   :  { %v21268_v30 = vmax.f32 %v21267_v43, 0.0  ;;  %v6838_v35 = vadd.f32 %v19441_v24, %v5922_v50  ;;  %v21269_v27 = vmax.f32 %v19745_v55, 0.0  ;;  %v6936_v31 = vmax.f32 %v6648_v6, 0.0  ;;  %v5999_v58 = vpop.f32.mrb[96].mxu0  ;;  %v21272_v43 = vld [vmem:[#allocation96_spill] sm:$0xff] }
 0x68c   :  { %v7193_v23 = vmax.f32 %v21264_v18, %v6923_v0  ;;  %v7194_v22 = vmax.f32 %v21266_v2, %v6924_v10  ;;  %v20246_v0 = vmax.f32 %v7276_v56, %v7282_v5  ;;  %v21271_v10 = vmax.f32 %v19749_v16, 0.0  ;;  %v6001_v2 = vpop.f32.mrb[97].mxu0  ;;  %v21275_v5 = vld [vmem:[#allocation31_spill] sm:$0xff] }
 0x68d   :  { %v7199_v12 = vmax.f32 %v21268_v30, %v6935_v34  ;;  %v7287_v38 = vmax.f32 %v21269_v27, %v7113_v15  ;;  %v7125_v13 = vmax.f32 %v6837_v53, 0.0  ;;  %v7126_v48 = vmax.f32 %v6838_v35, 0.0  ;;  %v21273_v34 = vld [vmem:[#allocation87_spill] sm:$0xff]  ;;  %v6003_v56 = vpop.f32.mrb[98].mxu0 }
 0x68e   :  { %21270 = vst [vmem:[#allocation77_spill] sm:$0xff] %v20246_v0  ;;  %v7288_v18 = vmax.f32 %v21271_v10, %v7114_v39  ;;  %v20252_v30 = vadd.f32 %v21149_v36, %v21272_v43  ;;  %v21274_v50 = vmax.f32 %v21273_v34, 0.0  ;;  %v6659_v55 = vadd.f32 %v19702_v14, %v5999_v58  ;;  %v6005_v35 = vpop.f32.mrb[99].mxu0  ;;  %v21278_v27 = vld [vmem:[#allocation103_spill] sm:$0xff] }
 0x68f   :  { %v7433_v61 = vmax.f32 %v7193_v23, %v7199_v12  ;;  %v6660_v6 = vadd.f32 %v19716_v51, %v6001_v2  ;;  %v21276_v15 = vmax.f32 %v21275_v5, 0.0  ;;  %v21277_v39 = vmax.f32 %v19781_v47, 0.0  ;;  %v5926_v23 = vpop.f32.mrb[96].mxu1 }
 0x690   :  { %v7200_v60 = vmax.f32 %v21274_v50, %v6936_v31  ;;  %v6671_v12 = vadd.f32 %v19702_v14, %v6003_v56  ;;  %v7330_v10 = vpack.c.bf16 %v21278_v27, %v21278_v27  ;;  %v6849_v31 = vadd.f32 %v19434_v33, %v5926_v23  ;;  %v5928_v58 = vpop.f32.mrb[97].mxu1  ;;  %v21280_v56 = vld [vmem:[#allocation89_spill] sm:$0xff] }
 0x691   :  { %v7293_v16 = vmax.f32 %v21276_v15, %v7125_v13  ;;  %v7294_v53 = vmax.f32 %v21277_v39, %v7126_v48  ;;  %v6947_v43 = vmax.f32 %v6659_v55, 0.0  ;;  %v6948_v34 = vmax.f32 %v6660_v6, 0.0  ;;  %v5930_v47 = vpop.f32.mrb[98].mxu1 }
 0x692   :  { %v6672_v2 = vadd.f32 %v19716_v51, %v6005_v35  ;;  %v6850_v13 = vadd.f32 %v19441_v24, %v5928_v58  ;;  %v6959_v48 = vmax.f32 %v6671_v12, 0.0  ;;  %v7434_v5 = vmax.f32 %v7194_v22, %v7200_v60  ;;  %v5932_v23 = vpop.f32.mrb[99].mxu1  ;;  %v21284_v35 = vld [vmem:[#allocation92_spill] sm:$0xff] }
 0x693   :  { %v20267_v50 = vmax.f32 %v7287_v38, %v7293_v16  ;;  %v7137_v15 = vmax.f32 %v6849_v31, 0.0  ;;  %v21281_v39 = vmax.f32 %v21280_v56, 0.0  ;;  %v21283_v27 = vmax.f32 %v21282_v8, 0.0 }
 0x694   :  { %v6861_v55 = vadd.f32 %v19434_v33, %v5930_v47  ;;  %v7439_v6 = vpack.c.bf16 %v7433_v61, %v7433_v61  ;;  %v7138_v19 = vmax.f32 %v6850_v13, 0.0  ;;  %v21285_v38 = vmax.f32 %v21284_v35, 0.0 }
 0x695   :  { %21279 = vst [vmem:[#allocation90_spill] sm:$0xff] %v20267_v50  ;;  %v7205_v0 = vmax.f32 %v21281_v39, %v6947_v43  ;;  %v7206_v21 = vmax.f32 %v21283_v27, %v6948_v34  ;;  %v6862_v58 = vadd.f32 %v19441_v24, %v5932_v23  ;;  %v21286_v12 = vmax.f32 %v19805_v32, 0.0  ;;  %v16966_v43 = vld [vmem:[#allocation6] sm:$0xff]   ;;  %v6009_v39 = vpop.f32.mrb[100].mxu0  ;;  %v21289_v32 = vld [vmem:[#allocation93_spill] sm:$0xff] }
 0x696   :  { %v7211_v16 = vmax.f32 %v21285_v38, %v6959_v48  ;;  %v7149_v22 = vmax.f32 %v6861_v55, 0.0  ;;  %v6960_v31 = vmax.f32 %v6672_v2, 0.0  ;;  %v7440_v56 = vpack.c.bf16 %v7434_v5, %v7434_v5  ;;  %v6011_v27 = vpop.f32.mrb[101].mxu0  ;;  %v16968_v48 = vld [vmem:[#allocation6 + $0x48] sm:$0xff]  }
 0x697   :  { %v7299_v60 = vmax.f32 %v21286_v12, %v7137_v15  ;;  %v21287_v8 = vmax.f32 %v19815_v42, 0.0  ;;  %v7150_v61 = vmax.f32 %v6862_v58, 0.0  ;;  %v6683_v13 = vadd.f32 %v19702_v14, %v6009_v39  ;;  %v6013_v5 = vpop.f32.mrb[102].mxu0  ;;  %v16970_v39 = vld [vmem:[#allocation6 + $0x8] sm:$0xff]  }
 0x698   :  { %v20282_v47 = vmax.f32 %v7205_v0, %v7211_v16  ;;  %v21288_v23 = vmax.f32 %v19841_v62, 0.0  ;;  %v21290_v15 = vmax.f32 %v21289_v32, 0.0  ;;  %7900 = vmatprep.mubr.bf16.mxu1 %v7440_v56  ;;  %v6684_v2 = vadd.f32 %v19716_v51, %v6011_v27  ;;  %v5936_v16 = vpop.f32.mrb[100].mxu1  ;;  %v6015_v12 = vpop.f32.mrb[103].mxu0  ;;  %v21297_v32 = vld [vmem:[#allocation21_spill] sm:$0xff] }
 0x699   :  { %v7300_v34 = vmax.f32 %v21287_v8, %v7138_v19  ;;  %v20290_v38 = vmax.f32 %v7288_v18, %v7294_v53  ;;  %v21292_v19 = vmax.f32 %v19858_v26, 0.0  ;;  %7901 = vmatmul.mubr.bf16.vlgmr.msra.gmra.mrb[152].mxu1 %v7439_v6  ;;  %v6971_v58 = vmax.f32 %v6683_v13, 0.0  ;;  %v5938_v56 = vpop.f32.mrb[101].mxu1  ;;  %v21294_v8 = vld [vmem:[#allocation19_spill] sm:$0xff] }
 0x69a   :  { %v7305_v35 = vmax.f32 %v21288_v23, %v7149_v22  ;;  %v7212_v55 = vmax.f32 %v21290_v15, %v6960_v31  ;;  %v6695_v62 = vadd.f32 %v19702_v14, %v6013_v5  ;;  %14828 = vmatpush3.bf16.msra.mxu1 %v16966_v43  ;;  %v6873_v31 = vadd.f32 %v19434_v33, %v5936_v16  ;;  %v5940_v13 = vpop.f32.mrb[102].mxu1  ;;  %v16972_v23 = vld [vmem:[#allocation6 + $0x50] sm:$0xff]  }
 0x69b   :  { %21291 = vst [vmem:[#allocation98_spill] sm:$0xff] %v20290_v38  ;;  %v7306_v0 = vmax.f32 %v21292_v19, %v7150_v61  ;;  %8268 = vmatprep.mubr.bf16.mxu1 %v7330_v10  ;;  %v6972_v18 = vmax.f32 %v6684_v2, 0.0  ;;  %v6696_v53 = vadd.f32 %v19716_v51, %v6015_v12  ;;  %v21295_v26 = vmax.f32 %v21294_v8, 0.0  ;;  %14829 = vmatprep.subr.bf16.mxu1 %v16968_v48  ;;  %v21296_v43 = vld [vmem:[#allocation97_spill] sm:$0xff]  ;;  %v5942_v19 = vpop.f32.mrb[103].mxu1 }
 0x69c   :  { %v20296_v22 = vmax.f32 %v7299_v60, %v7305_v35  ;;  %v6874_v6 = vadd.f32 %v19441_v24, %v5938_v56  ;;  %v6983_v27 = vmax.f32 %v6695_v62, 0.0  ;;  %v20303_v60 = vmax.f32 %v7206_v21, %v7212_v55  ;;  %v21301_v55 = vld [vmem:[#allocation99_spill] sm:$0xff]  ;;  %v21317_v21 = vld [vmem:[#allocation101_spill] sm:$0xff] }
 0x69d   :  { %v7217_v61 = vmax.f32 %v21295_v26, %v6971_v58  ;;  %v20307_v35 = vadd.f32 %v21151_v63, %v21296_v43  ;;  %v7161_v10 = vmax.f32 %v6873_v31, 0.0  ;;  %v21298_v15 = vmax.f32 %v21297_v32, 0.0  ;;  %v21299_v58 = vld [vmem:[#allocation22_spill] sm:$0xff] }
 0x69e   :  { %21293 = vst [vmem:[#allocation24_spill] sm:$0xff] %v20296_v22  ;;  %v6885_v5 = vadd.f32 %v19434_v33, %v5940_v13  ;;  %v7162_v16 = vmax.f32 %v6874_v6, 0.0  ;;  %v21300_v12 = vmax.f32 %v21299_v58, 0.0  ;;  %v6886_v48 = vadd.f32 %v19441_v24, %v5942_v19  ;;  %14830 = vmatpush3.bf16.msra.mxu1 %v16970_v39  ;;  %v16974_v33 = vld [vmem:[#allocation6 + $0x10] sm:$0xff]   ;;  %v6019_v13 = vpop.f32.mrb[104].mxu0  ;;  %v16976_v58 = vld [vmem:[#allocation6 + $0x58] sm:$0xff]  }
 0x69f   :  { %v7218_v2 = vmax.f32 %v21298_v15, %v6972_v18  ;;  %v6984_v62 = vmax.f32 %v6696_v53, 0.0  ;;  %v20318_v8 = vadd.f32 %v21149_v36, %v21301_v55  ;;  %v21302_v31 = vmax.f32 %v19869_v41, 0.0  ;;  %v21304_v53 = vld [vmem:[#allocation23_spill] sm:$0xff]  ;;  %14831 = vmatprep.subr.bf16.mxu1 %v16972_v23  ;;  %v6021_v19 = vpop.f32.mrb[105].mxu0 }
 0x6a0   :  { %v7223_v56 = vmax.f32 %v21300_v12, %v6983_v27  ;;  %v7173_v18 = vmax.f32 %v6885_v5, 0.0  ;;  %v21303_v6 = vmax.f32 %v19878_v1, 0.0  ;;  %v7174_v24 = vmax.f32 %v6886_v48, 0.0  ;;  %v6023_v5 = vpop.f32.mrb[106].mxu0 }
 0x6a1   :  { %v7311_v26 = vmax.f32 %v21302_v31, %v7161_v10  ;;  %v21305_v32 = vmax.f32 %v21304_v53, 0.0  ;;  %v21306_v12 = vmax.f32 %v19893_v25, 0.0  ;;  %v6707_v10 = vadd.f32 %v19702_v14, %v6019_v13  ;;  %v6025_v48 = vpop.f32.mrb[107].mxu0 }
 0x6a2   :  { %v7312_v43 = vmax.f32 %v21303_v6, %v7162_v16  ;;  %v20324_v27 = vmax.f32 %v7217_v61, %v7223_v56  ;;  %v6708_v39 = vadd.f32 %v19716_v51, %v6021_v19  ;;  %v20332_v55 = vmax.f32 %v7300_v34, %v7306_v0  ;;  %v6132_v56 = vpop.f32.mrb[104].mxu1  ;;  %14832 = vmatpush3.bf16.msra.mxu1 %v16974_v33  ;;  %v16978_v0 = vld [vmem:[#allocation6 + $0x18] sm:$0xff]   ;;  %v21310_v6 = vld [vmem:[#allocation100_spill] sm:$0xff] }
 0x6a3   :  { %v7224_v15 = vmax.f32 %v21305_v32, %v6984_v62  ;;  %v7317_v41 = vmax.f32 %v21306_v12, %v7173_v18  ;;  %v21308_v61 = vmax.f32 %v19919_v29, 0.0  ;;  %v6719_v23 = vadd.f32 %v19702_v14, %v6023_v5  ;;  %v6134_v34 = vpop.f32.mrb[105].mxu1  ;;  %14833 = vmatprep.subr.bf16.mxu1 %v16976_v58 }
 0x6a4   :  { %21307 = vst [vmem:[#allocation78_spill] sm:$0xff] %v20332_v55  ;;  %v6995_v31 = vmax.f32 %v6707_v10, 0.0  ;;  %v6613_v18 = vadd.f32 %v19974_v4, %v6132_v56  ;;  %v6996_v13 = vmax.f32 %v6708_v39, 0.0  ;;  %v20345_v53 = vadd.f32 %v21151_v63, %v21310_v6  ;;  %v6136_v32 = vpop.f32.mrb[106].mxu1  ;;  %v21313_v10 = vld [vmem:[#allocation28_spill] sm:$0xff]  ;;  %v21315_v6 = vld [vmem:[#allocation29_spill] sm:$0xff] }
 0x6a5   :  { %v7318_v16 = vmax.f32 %v21308_v61, %v7174_v24  ;;  %v20338_v62 = vmax.f32 %v7218_v2, %v7224_v15  ;;  %v20340_v25 = vmax.f32 %v7311_v26, %v7317_v41  ;;  %v6614_v29 = vadd.f32 %v19988_v9, %v6134_v34  ;;  %v16980_v26 = vld [vmem:[#allocation6 + $0x60] sm:$0xff]   ;;  %v21311_v15 = vld [vmem:[#allocation26_spill] sm:$0xff]  ;;  %v6138_v61 = vpop.f32.mrb[107].mxu1 }
 0x6a6   :  { %v7007_v24 = vmax.f32 %v6719_v23, 0.0  ;;  %v6720_v2 = vadd.f32 %v19716_v51, %v6025_v48  ;;  %v21312_v19 = vmax.f32 %v21311_v15, 0.0  ;;  %v6901_v41 = vmax.f32 %v6613_v18, 0.0  ;;  %14834 = vmatpush3.bf16.msra.mxu1 %v16978_v0  ;;  %v16982_v18 = vld [vmem:[#allocation6 + $0x20] sm:$0xff]  }
 0x6a7   :  { %21309 = vst [vmem:[#allocation25_spill] sm:$0xff] %v20340_v25  ;;  %v21314_v39 = vmax.f32 %v21313_v10, 0.0  ;;  %v6902_v56 = vmax.f32 %v6614_v29, 0.0  ;;  %v21316_v1 = vmax.f32 %v21315_v6, 0.0  ;;  %v6625_v23 = vadd.f32 %v19974_v4, %v6136_v32  ;;  %14835 = vmatprep.subr.bf16.mxu1 %v16980_v26  ;;  %v6142_v6 = vpop.f32.mrb[108].mxu1  ;;  %v17010_v25 = vld [vmem:[#allocation6 + $0x118] sm:$0xff]  }
 0x6a8   :  { %v7229_v12 = vmax.f32 %v21312_v19, %v6995_v31  ;;  %v7008_v58 = vmax.f32 %v6720_v2, 0.0  ;;  %v20359_v48 = vadd.f32 %v21149_v36, %v21317_v21  ;;  %v21318_v33 = vmax.f32 %v19934_v7, 0.0  ;;  %v21321_v2 = vld [vmem:[#allocation30_spill] sm:$0xff]  ;;  %v16984_v7 = vld [vmem:[#allocation6 + $0x68] sm:$0xff]  }
 0x6a9   :  { %v7230_v5 = vmax.f32 %v21314_v39, %v6996_v13  ;;  %v7235_v34 = vmax.f32 %v21316_v1, %v7007_v24  ;;  %v6626_v31 = vadd.f32 %v19988_v9, %v6138_v61  ;;  %v6029_v13 = vpop.f32.mrb[108].mxu0  ;;  %v20364_v19 = vmax.f32 %v7312_v43, %v7318_v16  ;;  %v21323_v61 = vld [vmem:[#allocation102_spill] sm:$0xff] }
 0x6aa   :  { %v7183_v15 = vmax.f32 %v21318_v33, %v6901_v41  ;;  %v21320_v29 = vmax.f32 %v19938_v46, 0.0  ;;  %v6913_v32 = vmax.f32 %v6625_v23, 0.0  ;;  %v21322_v10 = vmax.f32 %v21321_v2, 0.0  ;;  %v6031_v39 = vpop.f32.mrb[109].mxu0  ;;  %14836 = vmatpush3.bf16.msra.mxu1 %v16982_v18 }
 0x6ab   :  { %21319 = vst [vmem:[#allocation94_spill] sm:$0xff] %v20364_v19  ;;  %v20368_v24 = vmax.f32 %v7229_v12, %v7235_v34  ;;  %v6914_v41 = vmax.f32 %v6626_v31, 0.0  ;;  %v6731_v0 = vadd.f32 %v19702_v14, %v6029_v13  ;;  %v6732_v43 = vadd.f32 %v19716_v51, %v6031_v39  ;;  %v6033_v16 = vpop.f32.mrb[110].mxu0  ;;  %v16986_v39 = vld [vmem:[#allocation6 + $0x28] sm:$0xff]   ;;  %14837 = vmatprep.subr.bf16.mxu1 %v16984_v7 }
 0x6ac   :  { %v7184_v1 = vmax.f32 %v21320_v29, %v6902_v56  ;;  %v7236_v21 = vmax.f32 %v21322_v10, %v7008_v58  ;;  %v20377_v46 = vadd.f32 %v21151_v63, %v21323_v61  ;;  %v21324_v12 = vmax.f32 %v19944_v37, 0.0  ;;  %v6035_v34 = vpop.f32.mrb[111].mxu0  ;;  %v6144_v10 = vpop.f32.mrb[109].mxu1 }
 0x6ad   :  { %v6743_v26 = vadd.f32 %v19702_v14, %v6033_v16  ;;  %v21325_v58 = vmax.f32 %v19959_v17, 0.0  ;;  %v7019_v13 = vmax.f32 %v6731_v0, 0.0  ;;  %v6637_v29 = vadd.f32 %v19974_v4, %v6142_v6  ;;  %v21326_v16 = vld [vmem:[#allocation33_spill] sm:$0xff] }
 0x6ae   :  { %v7189_v56 = vmax.f32 %v21324_v12, %v6913_v32  ;;  %v20382_v23 = vmax.f32 %v7230_v5, %v7236_v21  ;;  %v7020_v2 = vmax.f32 %v6732_v43, 0.0  ;;  %v6638_v37 = vadd.f32 %v19988_v9, %v6144_v10  ;;  %v6146_v12 = vpop.f32.mrb[110].mxu1  ;;  %v16988_v21 = vld [vmem:[#allocation6 + $0x70] sm:$0xff]   ;;  %14838 = vmatpush3.bf16.msra.mxu1 %v16986_v39 }
 0x6af   :  { %v7190_v31 = vmax.f32 %v21325_v58, %v6914_v41  ;;  %v7031_v32 = vmax.f32 %v6743_v26, 0.0  ;;  %v6744_v5 = vadd.f32 %v19716_v51, %v6035_v34  ;;  %v21327_v17 = vmax.f32 %v21326_v16, 0.0  ;;  %v6148_v58 = vpop.f32.mrb[111].mxu1  ;;  %14839 = vmatprep.subr.bf16.mxu1 %v16988_v21 }
 0x6b0   :  { %v20387_v61 = vmax.f32 %v7183_v15, %v7189_v56  ;;  %v6925_v18 = vmax.f32 %v6637_v29, 0.0  ;;  %v21328_v0 = vmax.f32 %v19789_v11, 0.0  ;;  %v6649_v43 = vadd.f32 %v19974_v4, %v6146_v12  ;;  %v16990_v29 = vld [vmem:[#allocation6 + $0x30] sm:$0xff]   ;;  %v6039_v11 = vpop.f32.mrb[112].mxu0 }
 0x6b1   :  { %v7241_v41 = vmax.f32 %v21327_v17, %v7019_v13  ;;  %v6926_v56 = vmax.f32 %v6638_v37, 0.0  ;;  %v21329_v26 = vmax.f32 %v19796_v28, 0.0  ;;  %v7032_v7 = vmax.f32 %v6744_v5, 0.0  ;;  %v16992_v5 = vld [vmem:[#allocation6 + $0x78] sm:$0xff]  }
 0x6b2   :  { %v7242_v6 = vmax.f32 %v21328_v0, %v7020_v2  ;;  %v21330_v34 = vmax.f32 %v20008_v57, 0.0  ;;  %v6937_v42 = vmax.f32 %v6649_v43, 0.0  ;;  %v6650_v13 = vadd.f32 %v19988_v9, %v6148_v58  ;;  %v21335_v58 = vld [vmem:[#allocation32_spill] sm:$0xff]  ;;  %14840 = vmatpush3.bf16.msra.mxu1 %v16990_v29 }
 0x6b3   :  { %v7247_v10 = vmax.f32 %v21329_v26, %v7031_v32  ;;  %v20402_v2 = vmax.f32 %v7184_v1, %v7190_v31  ;;  %v21331_v12 = vmax.f32 %v20012_v40, 0.0  ;;  %v21332_v28 = vmax.f32 %v19801_v20, 0.0  ;;  %v6041_v32 = vpop.f32.mrb[113].mxu0  ;;  %14841 = vmatprep.subr.bf16.mxu1 %v16992_v5 }
 0x6b4   :  { %v7195_v33 = vmax.f32 %v21330_v34, %v6925_v18  ;;  %v6755_v57 = vadd.f32 %v19702_v14, %v6039_v11  ;;  %v21333_v18 = vld [vmem:[#allocation27_spill] sm:$0xff]  ;;  %v21334_v0 = vmax.f32 %v20021_v44, 0.0  ;;  %v6938_v31 = vmax.f32 %v6650_v13, 0.0  ;;  %v6043_v43 = vpop.f32.mrb[114].mxu0 }
 0x6b5   :  { %v7196_v16 = vmax.f32 %v21331_v12, %v6926_v56  ;;  %v20406_v17 = vmax.f32 %v7241_v41, %v7247_v10  ;;  %v7248_v37 = vmax.f32 %v21332_v28, %v7032_v7  ;;  %v7329_v39 = vpack.c.bf16 %v21333_v18, %v21333_v18  ;;  %v6152_v56 = vpop.f32.mrb[112].mxu1  ;;  %v6045_v10 = vpop.f32.mrb[115].mxu0  ;;  %v16994_v12 = vld [vmem:[#allocation6 + $0x38] sm:$0xff]   ;;  %v21337_v28 = vld [vmem:[#allocation36_spill] sm:$0xff] }
 0x6b6   :  { %v7201_v1 = vmax.f32 %v21334_v0, %v6937_v42  ;;  %v6756_v40 = vadd.f32 %v19716_v51, %v6041_v32  ;;  %v20419_v20 = vadd.f32 %v21149_v36, %v21335_v58  ;;  %v7043_v21 = vmax.f32 %v6755_v57, 0.0  ;;  %v6154_v11 = vpop.f32.mrb[113].mxu1  ;;  %14842 = vmatpush3.bf16.msra.mxu1 %v16994_v12 }
 0x6b7   :  { %v6767_v26 = vadd.f32 %v19702_v14, %v6043_v43  ;;  %v21336_v34 = vmax.f32 %v20027_v49, 0.0  ;;  %v6661_v42 = vadd.f32 %v19974_v4, %v6152_v56  ;;  %v21338_v32 = vmax.f32 %v21337_v28, 0.0  ;;  %v6156_v58 = vpop.f32.mrb[114].mxu1  ;;  %v21339_v49 = vld [vmem:[#allocation38_spill] sm:$0xff] }
 0x6b8   :  { %v7435_v7 = vmax.f32 %v7195_v33, %v7201_v1  ;;  %v7044_v13 = vmax.f32 %v6756_v40, 0.0  ;;  %v6662_v0 = vadd.f32 %v19988_v9, %v6154_v11  ;;  %v6768_v43 = vadd.f32 %v19716_v51, %v6045_v10  ;;  %v16996_v33 = vld [vmem:[#allocation6 + $0x140] sm:$0xff]   ;;  %v6158_v56 = vpop.f32.mrb[115].mxu1  ;;  %v21341_v28 = vld [vmem:[#allocation106_spill] sm:$0xff] }
 0x6b9   :  { %v7202_v44 = vmax.f32 %v21336_v34, %v6938_v31  ;;  %v7253_v18 = vmax.f32 %v21338_v32, %v7043_v21  ;;  %v7055_v57 = vmax.f32 %v6767_v26, 0.0  ;;  %v6949_v1 = vmax.f32 %v6661_v42, 0.0  ;;  %14871 = vmatprep.subr.bf16.mxu1 %v16996_v33  ;;  %8269 = vmatmul.mubr.bf16.vlgmr.msra.gmra.mrb[156].mxu1 %v7329_v39  ;;  %v6162_v33 = vpop.f32.mrb[116].mxu1 }
 0x6ba   :  { %v21340_v31 = vmax.f32 %v21339_v49, 0.0  ;;  %v6673_v40 = vadd.f32 %v19974_v4, %v6156_v58  ;;  %v7332_v34 = vpack.c.bf16 %v20223_v45, %v20223_v45  ;;  %v6950_v21 = vmax.f32 %v6662_v0, 0.0  ;;  %v16998_v49 = vld [vmem:[#allocation6 + $0x100] sm:$0xff]  }
 0x6bb   :  { %v21342_v11 = vmax.f32 %v21341_v28, 0.0  ;;  %v7056_v32 = vmax.f32 %v6768_v43, 0.0  ;;  %v6674_v5 = vadd.f32 %v19988_v9, %v6158_v56  ;;  %v21343_v10 = vmax.f32 %v20070_v52, 0.0  ;;  %v21345_v28 = vld [vmem:[#allocation42_spill] sm:$0xff]  ;;  %14872 = vmatpush3.bf16.msra.mxu1 %v16998_v49 }
 0x6bc   :  { %v20431_v29 = vmax.f32 %v21340_v31, %v7044_v13  ;;  %v6961_v41 = vmax.f32 %v6673_v40, 0.0  ;;  %v7436_v13 = vmax.f32 %v7196_v16, %v7202_v44  ;;  %v6049_v31 = vpop.f32.mrb[116].mxu0  ;;  %v20441_v58 = vmax.f32 %v7242_v6, %v7248_v37  ;;  %v16997_v16 = vld [vmem:[#allocation6 + $0x80] sm:$0xff]  }
 0x6bd   :  { %v7259_v26 = vmax.f32 %v21342_v11, %v7055_v57  ;;  %v7207_v42 = vmax.f32 %v21343_v10, %v6949_v1  ;;  %v21344_v15 = vmax.f32 %v20077_v3, 0.0  ;;  %v21346_v57 = vmax.f32 %v21345_v28, 0.0  ;;  %v6051_v56 = vpop.f32.mrb[117].mxu0  ;;  %v17002_v28 = vld [vmem:[#allocation6 + $0x108] sm:$0xff]  }
 0x6be   :  { %v6962_v11 = vmax.f32 %v6674_v5, 0.0  ;;  %v21347_v52 = vmax.f32 %v20081_v54, 0.0  ;;  %v7442_v12 = vpack.c.bf16 %v7436_v13, %v7436_v13  ;;  %v6779_v44 = vadd.f32 %v19702_v14, %v6049_v31  ;;  %v6053_v37 = vpop.f32.mrb[118].mxu0  ;;  %v16999_v54 = vld [vmem:[#allocation6 + $0xc8] sm:$0xff]   ;;  %v6164_v31 = vpop.f32.mrb[117].mxu1 }
 0x6bf   :  { %v7208_v45 = vmax.f32 %v21344_v15, %v6950_v21  ;;  %v20445_v0 = vmax.f32 %v7253_v18, %v7259_v26  ;;  %v7260_v43 = vmax.f32 %v21346_v57, %v7056_v32  ;;  %v6780_v6 = vadd.f32 %v19716_v51, %v6051_v56  ;;  %v21348_v15 = vld [vmem:[#allocation70_spill] sm:$0xff]  ;;  %v6055_v32 = vpop.f32.mrb[119].mxu0  ;;  %v6166_v57 = vpop.f32.mrb[118].mxu1 }
 0x6c0   :  { %v7213_v1 = vmax.f32 %v21347_v52, %v6961_v41  ;;  %v7441_v3 = vpack.c.bf16 %v7435_v7, %v7435_v7  ;;  %v21349_v18 = vmax.f32 %v21348_v15, 0.0  ;;  %v7334_v21 = vpack.c.bf16 %v20402_v2, %v20402_v2  ;;  %v17000_v41 = vld [vmem:[#allocation6 + $0x148] sm:$0xff]   ;;  %7940 = vmatprep.mubr.bf16.mxu0 %v7442_v12  ;;  %v17004_v56 = vld [vmem:[#allocation6 + $0x150] sm:$0xff]  }
 0x6c1   :  { %v6791_v26 = vadd.f32 %v19702_v14, %v6053_v37  ;;  %v7067_v10 = vmax.f32 %v6779_v44, 0.0  ;;  %v6685_v7 = vadd.f32 %v19974_v4, %v6162_v33  ;;  %v7068_v13 = vmax.f32 %v6780_v6, 0.0  ;;  %v21353_v37 = vld [vmem:[#allocation44_spill] sm:$0xff]  ;;  %14873 = vmatprep.subr.bf16.mxu1 %v17000_v41 }
 0x6c2   :  { %v7214_v40 = vmax.f32 %v21349_v18, %v6962_v11  ;;  %v20458_v5 = vmax.f32 %v7207_v42, %v7213_v1  ;;  %7941 = vmatmul.mubr.bf16.vlgmr.msra.gmra.mrb[148].mxu0 %v7441_v3  ;;  %8348 = vmatprep.mubr.bf16.mxu1 %v7334_v21  ;;  %v6686_v2 = vadd.f32 %v19988_v9, %v6164_v31  ;;  %v21350_v42 = vld [vmem:[#allocation34_spill] sm:$0xff]  ;;  %v21351_v1 = vld [vmem:[#allocation43_spill] sm:$0xff]  ;;  %v21354_v3 = vmax.f32 %v21353_v37, 0.0  ;;  %v6168_v18 = vpop.f32.mrb[119].mxu1  ;;  %v17001_v21 = vld [vmem:[#allocation6 + $0x88] sm:$0xff]  }
 0x6c3   :  { %v7079_v39 = vmax.f32 %v6791_v26, 0.0  ;;  %v6792_v11 = vadd.f32 %v19716_v51, %v6055_v32  ;;  %v20467_v49 = vadd.f32 %v21151_v63, %v21350_v42  ;;  %14850 = vmatpush3.bf16.msra.mxu0 %v16997_v16  ;;  %v21352_v12 = vmax.f32 %v21351_v1, 0.0  ;;  %8308 = vmatprep.mubr.bf16.mxu0 %v7332_v34  ;;  %v21355_v26 = vld [vmem:[#allocation48_spill] sm:$0xff]  ;;  %v17003_v16 = vld [vmem:[#allocation6 + $0xd0] sm:$0xff]  }
 0x6c4   :  { %v20463_v52 = vmax.f32 %v7208_v45, %v7214_v40  ;;  %v6973_v6 = vmax.f32 %v6685_v7, 0.0  ;;  %v7266_v15 = vmax.f32 %v21354_v3, %v7068_v13  ;;  %v6974_v33 = vmax.f32 %v6686_v2, 0.0  ;;  %14851 = vmatprep.subr.bf16.mxu0 %v16999_v54  ;;  %14874 = vmatpush3.bf16.msra.mxu1 %v17002_v28  ;;  %v17006_v13 = vld [vmem:[#allocation6 + $0x110] sm:$0xff]  }
 0x6c5   :  { %v7265_v44 = vmax.f32 %v21352_v12, %v7067_v10  ;;  %v21356_v32 = vmax.f32 %v21355_v26, 0.0  ;;  %v6697_v40 = vadd.f32 %v19974_v4, %v6166_v57  ;;  %v7080_v31 = vmax.f32 %v6792_v11, 0.0  ;;  %v21357_v10 = vld [vmem:[#allocation79_spill] sm:$0xff]  ;;  %v6059_v12 = vpop.f32.mrb[120].mxu0  ;;  %v21362_v11 = vld [vmem:[#allocation49_spill] sm:$0xff]  ;;  %14875 = vmatprep.subr.bf16.mxu1 %v17004_v56  ;;  %v6172_v56 = vpop.f32.mrb[120].mxu1 }
 0x6c6   :  { %v21358_v7 = vmax.f32 %v21357_v10, 0.0  ;;  %v6698_v1 = vadd.f32 %v19988_v9, %v6168_v18  ;;  %v20481_v2 = vmax.f32 %v20431_v29, %v7260_v43  ;;  %v21363_v3 = vmax.f32 %v21362_v11, 0.0  ;;  %v21364_v10 = vld [vmem:[#allocation104_spill] sm:$0xff]  ;;  %v17005_v29 = vld [vmem:[#allocation6 + $0x90] sm:$0xff]  }
 0x6c7   :  { %v7271_v45 = vmax.f32 %v21356_v32, %v7079_v39  ;;  %v21359_v39 = vld [vmem:[#allocation80_spill] sm:$0xff]  ;;  %v6985_v41 = vmax.f32 %v6697_v40, 0.0  ;;  %v6061_v32 = vpop.f32.mrb[121].mxu0  ;;  %v20491_v28 = vadd.f32 %v21149_v36, %v21364_v10  ;;  %14852 = vmatpush3.bf16.msra.mxu0 %v17001_v21  ;;  %v6803_v43 = vadd.f32 %v19702_v14, %v6059_v12  ;;  %v21365_v40 = vld [vmem:[#allocation81_spill] sm:$0xff]  ;;  %v21367_v21 = vld [vmem:[#allocation83_spill] sm:$0xff] }
 0x6c8   :  { %v7219_v34 = vmax.f32 %v21358_v7, %v6973_v6  ;;  %v21360_v37 = vmax.f32 %v21359_v39, 0.0  ;;  %v7272_v26 = vmax.f32 %v21363_v3, %v7080_v31  ;;  %v17008_v6 = vld [vmem:[#allocation6 + $0x158] sm:$0xff]   ;;  %v6986_v18 = vmax.f32 %v6698_v1, 0.0  ;;  %14853 = vmatprep.subr.bf16.mxu0 %v17003_v16  ;;  %14876 = vmatpush3.bf16.msra.mxu1 %v17006_v13 }
 0x6c9   :  { %v20485_v54 = vmax.f32 %v7265_v44, %v7271_v45  ;;  %v6063_v44 = vpop.f32.mrb[122].mxu0  ;;  %v21366_v7 = vmax.f32 %v21365_v40, 0.0  ;;  %v21368_v1 = vmax.f32 %v21367_v21, 0.0  ;;  %v7091_v12 = vmax.f32 %v6803_v43, 0.0  ;;  %v6174_v45 = vpop.f32.mrb[121].mxu1  ;;  %14877 = vmatprep.subr.bf16.mxu1 %v17008_v6  ;;  %v21371_v21 = vld [vmem:[#allocation52_spill] sm:$0xff] }
 0x6ca   :  { %v7220_v57 = vmax.f32 %v21360_v37, %v6974_v33  ;;  %v6804_v33 = vadd.f32 %v19716_v51, %v6061_v32  ;;  %v6815_v39 = vadd.f32 %v19702_v14, %v6063_v44  ;;  %v17007_v37 = vld [vmem:[#allocation6 + $0xd8] sm:$0xff]   ;;  %v6065_v11 = vpop.f32.mrb[123].mxu0  ;;  %v20499_v3 = vmax.f32 %v7266_v15, %v7272_v26  ;;  %v6176_v44 = vpop.f32.mrb[122].mxu1  ;;  %v17012_v26 = vld [vmem:[#allocation6 + $0x160] sm:$0xff]  }
 0x6cb   :  { %21361 = vst [vmem:[#allocation95_spill] sm:$0xff] %v20485_v54  ;;  %v7225_v31 = vmax.f32 %v21366_v7, %v6985_v41  ;;  %v7226_v10 = vmax.f32 %v21368_v1, %v6986_v18  ;;  %v6709_v32 = vadd.f32 %v19974_v4, %v6172_v56  ;;  %v6710_v16 = vadd.f32 %v19988_v9, %v6174_v45  ;;  %v21369_v7 = vld [vmem:[#allocation50_spill] sm:$0xff]  ;;  %v21373_v45 = vld [vmem:[#allocation35_spill] sm:$0xff]  ;;  %v6069_v19 = vpop.f32.mrb[124].mxu0  ;;  %v21407_v54 = vld [vmem:[#allocation73_spill] sm:$0xff] }
 0x6cc   :  { %v7092_v42 = vmax.f32 %v6804_v33, 0.0  ;;  %v7103_v41 = vmax.f32 %v6815_v39, 0.0  ;;  %v6816_v15 = vadd.f32 %v19716_v51, %v6065_v11  ;;  %14854 = vmatpush3.bf16.msra.mxu0 %v17005_v29  ;;  %v21370_v18 = vmax.f32 %v21369_v7, 0.0  ;;  %v17009_v1 = vld [vmem:[#allocation6 + $0x98] sm:$0xff]   ;;  %14878 = vmatpush3.bf16.msra.mxu1 %v17010_v25 }
 0x6cd   :  { %v20504_v40 = vmax.f32 %v7219_v34, %v7225_v31  ;;  %v6997_v43 = vmax.f32 %v6709_v32, 0.0  ;;  %v21372_v56 = vmax.f32 %v21371_v21, 0.0  ;;  %v6721_v34 = vadd.f32 %v19974_v4, %v6176_v44  ;;  %v6178_v31 = vpop.f32.mrb[123].mxu1  ;;  %v21374_v11 = vld [vmem:[#allocation54_spill] sm:$0xff]  ;;  %14855 = vmatprep.subr.bf16.mxu0 %v17007_v37  ;;  %v17014_v44 = vld [vmem:[#allocation6 + $0x120] sm:$0xff]   ;;  %14879 = vmatprep.subr.bf16.mxu1 %v17012_v26 }
 0x6ce   :  { %v7277_v13 = vmax.f32 %v21370_v18, %v7091_v12  ;;  %v20517_v39 = vadd.f32 %v21151_v63, %v21373_v45  ;;  %v6998_v6 = vmax.f32 %v6710_v16, 0.0  ;;  %v21375_v22 = vmax.f32 %v21374_v11, 0.0  ;;  %v17011_v12 = vld [vmem:[#allocation6 + $0xe0] sm:$0xff]   ;;  %v21376_v32 = vld [vmem:[#allocation74_spill] sm:$0xff] }
 0x6cf   :  { %v20512_v33 = vmax.f32 %v21372_v56, %v7092_v42  ;;  %v7104_v7 = vmax.f32 %v6816_v15, 0.0  ;;  %v21377_v18 = vmax.f32 %v21376_v32, 0.0  ;;  %v7009_v42 = vmax.f32 %v6721_v34, 0.0  ;;  %v17016_v34 = vld [vmem:[#allocation6 + $0x168] sm:$0xff]  }
 0x6d0   :  { %v7283_v29 = vmax.f32 %v21375_v22, %v7103_v41  ;;  %v6722_v56 = vadd.f32 %v19988_v9, %v6178_v31  ;;  %v20524_v55 = vmax.f32 %v7220_v57, %v7226_v10  ;;  %v21378_v45 = vmax.f32 %v20233_v59, 0.0  ;;  %v21380_v22 = vld [vmem:[#allocation56_spill] sm:$0xff]  ;;  %14856 = vmatpush3.bf16.msra.mxu0 %v17009_v1  ;;  %14880 = vmatpush3.bf16.msra.mxu1 %v17014_v44  ;;  %v21387_v31 = vld [vmem:[#allocation39_spill] sm:$0xff] }
 0x6d1   :  { %v7231_v21 = vmax.f32 %v21377_v18, %v6997_v43  ;;  %v21381_v37 = vmax.f32 %v21380_v22, 0.0  ;;  %v6827_v15 = vadd.f32 %v19702_v14, %v6069_v19  ;;  %v6071_v43 = vpop.f32.mrb[125].mxu0  ;;  %v21382_v25 = vmax.f32 %v20252_v30, 0.0  ;;  %v17013_v10 = vld [vmem:[#allocation6 + $0xa0] sm:$0xff]   ;;  %14857 = vmatprep.subr.bf16.mxu0 %v17011_v12  ;;  %v17015_v18 = vld [vmem:[#allocation6 + $0xe8] sm:$0xff]   ;;  %14881 = vmatprep.subr.bf16.mxu1 %v17016_v34 }
 0x6d2   :  { %v7232_v16 = vmax.f32 %v21378_v45, %v6998_v6  ;;  %v20528_v50 = vmax.f32 %v7277_v13, %v7283_v29  ;;  %v7010_v57 = vmax.f32 %v6722_v56, 0.0  ;;  %v6828_v59 = vadd.f32 %v19716_v51, %v6071_v43  ;;  %v6073_v13 = vpop.f32.mrb[126].mxu0  ;;  %v21383_v29 = vld [vmem:[#allocation37_spill] sm:$0xff] }
 0x6d3   :  { %v7284_v41 = vmax.f32 %v21381_v37, %v7104_v7  ;;  %v7237_v11 = vmax.f32 %v21382_v25, %v7009_v42  ;;  %v20540_v26 = vadd.f32 %v21149_v36, %v21383_v29  ;;  %v7115_v19 = vmax.f32 %v6827_v15, 0.0  ;;  %v6182_v7 = vpop.f32.mrb[124].mxu1  ;;  %v6075_v30 = vpop.f32.mrb[127].mxu0  ;;  %v17018_v43 = vld [vmem:[#allocation6 + $0x128] sm:$0xff]   ;;  %v21385_v25 = vld [vmem:[#allocation58_spill] sm:$0xff] }
 0x6d4   :  { %21379 = vst [vmem:[#allocation82_spill] sm:$0xff] %v20528_v50  ;;  %v6839_v32 = vadd.f32 %v19702_v14, %v6073_v13  ;;  %v21384_v1 = vmax.f32 %v20307_v35, 0.0  ;;  %v6733_v45 = vadd.f32 %v19974_v4, %v6182_v7  ;;  %v7116_v22 = vmax.f32 %v6828_v59, 0.0  ;;  %v6184_v37 = vpop.f32.mrb[125].mxu1  ;;  %14858 = vmatpush3.bf16.msra.mxu0 %v17013_v10  ;;  %14882 = vmatpush3.bf16.msra.mxu1 %v17018_v43 }
 0x6d5   :  { %v20543_v42 = vmax.f32 %v7231_v21, %v7237_v11  ;;  %v21386_v29 = vmax.f32 %v21385_v25, 0.0  ;;  %v6734_v15 = vadd.f32 %v19988_v9, %v6184_v37  ;;  %v6186_v13 = vpop.f32.mrb[126].mxu1  ;;  %v6840_v21 = vadd.f32 %v19716_v51, %v6075_v30  ;;  %v17020_v11 = vld [vmem:[#allocation6 + $0x170] sm:$0xff]   ;;  %v17017_v37 = vld [vmem:[#allocation6 + $0xa8] sm:$0xff]   ;;  %v21390_v25 = vld [vmem:[#allocation63_spill] sm:$0xff]  ;;  %14859 = vmatprep.subr.bf16.mxu0 %v17015_v18 }
 0x6d6   :  { %v7238_v56 = vmax.f32 %v21384_v1, %v7010_v57  ;;  %v7127_v6 = vmax.f32 %v6839_v32, 0.0  ;;  %v20554_v35 = vadd.f32 %v21151_v63, %v21387_v31  ;;  %v7021_v44 = vmax.f32 %v6733_v45, 0.0  ;;  %v21388_v57 = vld [vmem:[#allocation61_spill] sm:$0xff]  ;;  %v6188_v1 = vpop.f32.mrb[127].mxu1  ;;  %14883 = vmatprep.subr.bf16.mxu1 %v17020_v11 }
 0x6d7   :  { %v7289_v12 = vmax.f32 %v21386_v29, %v7115_v19  ;;  %v21389_v59 = vmax.f32 %v21388_v57, 0.0  ;;  %v6745_v19 = vadd.f32 %v19974_v4, %v6186_v13  ;;  %v7022_v32 = vmax.f32 %v6734_v15, 0.0  ;;  %v17019_v31 = vld [vmem:[#allocation6 + $0xf0] sm:$0xff]   ;;  %v6079_v57 = vpop.f32.mrb[128].mxu0 }
 0x6d8   :  { %v21391_v34 = vmax.f32 %v21390_v25, 0.0  ;;  %v7128_v30 = vmax.f32 %v6840_v21, 0.0  ;;  %v6746_v38 = vadd.f32 %v19988_v9, %v6188_v1  ;;  %v21392_v10 = vmax.f32 %v20318_v8, 0.0  ;;  %v21396_v21 = vld [vmem:[#allocation65_spill] sm:$0xff]  ;;  %v6081_v8 = vpop.f32.mrb[129].mxu0  ;;  %14860 = vmatpush3.bf16.msra.mxu0 %v17017_v37  ;;  %v17023_v37 = vld [vmem:[#allocation6 + $0xf8] sm:$0xff]  }
 0x6d9   :  { %v20558_v7 = vmax.f32 %v21389_v59, %v7116_v22  ;;  %v7033_v50 = vmax.f32 %v6745_v19, 0.0  ;;  %v17022_v22 = vld [vmem:[#allocation6 + $0x130] sm:$0xff]   ;;  %v20566_v59 = vmax.f32 %v7232_v16, %v7238_v56  ;;  %v20569_v13 = vmax.f32 %v20512_v33, %v7284_v41  ;;  %14861 = vmatprep.subr.bf16.mxu0 %v17019_v31 }
 0x6da   :  { %v7295_v29 = vmax.f32 %v21391_v34, %v7127_v6  ;;  %v7243_v45 = vmax.f32 %v21392_v10, %v7021_v44  ;;  %v21394_v15 = vmax.f32 %v20345_v53, 0.0  ;;  %v21397_v1 = vmax.f32 %v21396_v21, 0.0  ;;  %v17024_v44 = vld [vmem:[#allocation6 + $0x178] sm:$0xff]   ;;  %v17021_v33 = vld [vmem:[#allocation6 + $0xb0] sm:$0xff]   ;;  %14884 = vmatpush3.bf16.msra.mxu1 %v17022_v22 }
 0x6db   :  { %21393 = vst [vmem:[#allocation84_spill] sm:$0xff] %v20569_v13  ;;  %v7034_v34 = vmax.f32 %v6746_v38, 0.0  ;;  %v21398_v16 = vmax.f32 %v20359_v48, 0.0  ;;  %v6851_v41 = vadd.f32 %v19702_v14, %v6079_v57  ;;  %v6852_v53 = vadd.f32 %v19716_v51, %v6081_v8  ;;  %v21399_v19 = vld [vmem:[#allocation105_spill] sm:$0xff]  ;;  %v21400_v38 = vld [vmem:[#allocation40_spill] sm:$0xff]  ;;  %14885 = vmatprep.subr.bf16.mxu1 %v17024_v44 }
 0x6dc   :  { %v7244_v6 = vmax.f32 %v21394_v15, %v7022_v32  ;;  %v20573_v18 = vmax.f32 %v7289_v12, %v7295_v29  ;;  %v7296_v25 = vmax.f32 %v21397_v1, %v7128_v30  ;;  %v6083_v12 = vpop.f32.mrb[130].mxu0  ;;  %v20584_v32 = vadd.f32 %v21149_v36, %v21399_v19  ;;  %14862 = vmatpush3.bf16.msra.mxu0 %v17021_v33 }
 0x6dd   :  { %v7249_v56 = vmax.f32 %v21398_v16, %v7033_v50  ;;  %v20588_v11 = vadd.f32 %v21151_v63, %v21400_v38  ;;  %v21401_v29 = vmax.f32 %v20377_v46, 0.0  ;;  %v6192_v50 = vpop.f32.mrb[128].mxu1  ;;  %v6863_v48 = vadd.f32 %v19702_v14, %v6083_v12  ;;  %v6085_v10 = vpop.f32.mrb[131].mxu0  ;;  %v17026_v16 = vld [vmem:[#allocation6 + $0x138] sm:$0xff]   ;;  %14863 = vmatprep.subr.bf16.mxu0 %v17023_v37 }
 0x6de   :  { %21395 = vst [vmem:[#allocation86_spill] sm:$0xff] %v20573_v18  ;;  %v7139_v15 = vmax.f32 %v6851_v41, 0.0  ;;  %v6757_v21 = vadd.f32 %v19974_v4, %v6192_v50  ;;  %v7140_v1 = vmax.f32 %v6852_v53, 0.0  ;;  %v6194_v8 = vpop.f32.mrb[129].mxu1  ;;  %v6864_v31 = vadd.f32 %v19716_v51, %v6085_v10  ;;  %v17025_v18 = vld [vmem:[#allocation6 + $0xb8] sm:$0xff]   ;;  %14886 = vmatpush3.bf16.msra.mxu1 %v17026_v16 }
 0x6df   :  { %v7250_v30 = vmax.f32 %v21401_v29, %v7034_v34  ;;  %v20593_v57 = vmax.f32 %v7243_v45, %v7249_v56  ;;  %v6758_v19 = vadd.f32 %v19988_v9, %v6194_v8  ;;  %v7151_v38 = vmax.f32 %v6863_v48, 0.0  ;;  %v6196_v46 = vpop.f32.mrb[130].mxu1  ;;  %v17028_v34 = vld [vmem:[#allocation6 + $0x3c0] sm:$0xff]   ;;  %v21402_v45 = vld [vmem:[#allocation69_spill] sm:$0xff] }
 0x6e0   :  { %v21403_v56 = vmax.f32 %v21402_v45, 0.0  ;;  %v7045_v41 = vmax.f32 %v6757_v21, 0.0  ;;  %v21404_v29 = vld [vmem:[#allocation72_spill] sm:$0xff]  ;;  %v6198_v43 = vpop.f32.mrb[131].mxu1  ;;  %v21406_v8 = vld [vmem:[#allocation41_spill] sm:$0xff]  ;;  %v21408_v10 = vmax.f32 %v21407_v54, 0.0  ;;  %14915 = vmatprep.subr.bf16.mxu1 %v17028_v34  ;;  %14864 = vmatpush3.bf16.msra.mxu0 %v17025_v18  ;;  %v8365_v16 = vpack.c.bf16 %v20303_v60, %v20303_v60 }
 0x6e1   :  { %v20598_v12 = vmax.f32 %v7244_v6, %v7250_v30  ;;  %v21405_v50 = vmax.f32 %v21404_v29, 0.0  ;;  %v8363_v48 = vpack.c.bf16 %v21406_v8, %v21406_v8  ;;  %v7046_v44 = vmax.f32 %v6758_v19, 0.0  ;;  %v17027_v30 = vld [vmem:[#allocation6 + $0x340] sm:$0xff]   ;;  %v6089_v29 = vpop.f32.mrb[132].mxu0  ;;  %v6202_v18 = vpop.f32.mrb[132].mxu1 }
 0x6e2   :  { %v7301_v22 = vmax.f32 %v21403_v56, %v7139_v15  ;;  %v7307_v13 = vmax.f32 %v21408_v10, %v7151_v38  ;;  %v6769_v6 = vadd.f32 %v19974_v4, %v6196_v46  ;;  %v7152_v33 = vmax.f32 %v6864_v31, 0.0  ;;  %v17030_v56 = vld [vmem:[#allocation6 + $0x380] sm:$0xff]   ;;  %14893 = vmatprep.subr.bf16.mxu0 %v17027_v30 }
 0x6e3   :  { %v20604_v53 = vmax.f32 %v21405_v50, %v7140_v1  ;;  %v7333_v15 = vpack.c.bf16 %v20387_v61, %v20387_v61  ;;  %v21409_v21 = vmax.f32 %v20419_v20, 0.0  ;;  %v6770_v45 = vadd.f32 %v19988_v9, %v6198_v43  ;;  %v21411_v31 = vld [vmem:[#allocation75_spill] sm:$0xff]  ;;  %v6091_v20 = vpop.f32.mrb[133].mxu0 }
 0x6e4   :  { %v20617_v19 = vmax.f32 %v20558_v7, %v7296_v25  ;;  %v21410_v54 = vmax.f32 %v20467_v49, 0.0  ;;  %v20621_v37 = vmax.f32 %v7301_v22, %v7307_v13  ;;  %v7057_v46 = vmax.f32 %v6769_v6, 0.0  ;;  %v17029_v43 = vld [vmem:[#allocation6 + $0x300] sm:$0xff]   ;;  %v6093_v25 = vpop.f32.mrb[134].mxu0 }
 0x6e5   :  { %v7255_v1 = vmax.f32 %v21409_v21, %v7045_v41  ;;  %v21412_v50 = vmax.f32 %v21411_v31, 0.0  ;;  %v17032_v41 = vld [vmem:[#allocation6 + $0x3c8] sm:$0xff]   ;;  %v7058_v8 = vmax.f32 %v6770_v45, 0.0  ;;  %v6875_v7 = vadd.f32 %v19702_v14, %v6089_v29  ;;  %8349 = vmatmul.mubr.bf16.vlgmr.msra.gmra.mrb[160].mxu1 %v7333_v15  ;;  %v6095_v60 = vpop.f32.mrb[135].mxu0  ;;  %v6204_v31 = vpop.f32.mrb[133].mxu1 }
 0x6e6   :  { %v7256_v38 = vmax.f32 %v21410_v54, %v7046_v44  ;;  %v6876_v49 = vadd.f32 %v19716_v51, %v6091_v20  ;;  %v7064_v13 = vmax.f32 %v20554_v35, 0.0  ;;  %v21413_v22 = vld [vmem:[#allocation20_spill] sm:$0xff]  ;;  %v21414_v34 = vmax.f32 %v20491_v28, 0.0  ;;  %14916 = vmatpush3.bf16.msra.mxu1 %v17030_v56  ;;  %8825 = vmatprep.mubr.bf16.mxu1 %v8365_v16  ;;  %v21416_v56 = vld [vmem:[#allocation117_spill] sm:$0xff] }
 0x6e7   :  { %v7308_v61 = vmax.f32 %v21412_v50, %v7152_v33  ;;  %v7331_v44 = vpack.c.bf16 %v21413_v22, %v21413_v22  ;;  %v6887_v6 = vadd.f32 %v19702_v14, %v6093_v25  ;;  %v17031_v33 = vld [vmem:[#allocation6 + $0x348] sm:$0xff]   ;;  %v21415_v21 = vmax.f32 %v20517_v39, 0.0  ;;  %v6206_v14 = vpop.f32.mrb[134].mxu1  ;;  %14917 = vmatprep.subr.bf16.mxu1 %v17032_v41  ;;  %v17036_v39 = vld [vmem:[#allocation6 + $0x3d0] sm:$0xff]  }
 0x6e8   :  { %v7261_v10 = vmax.f32 %v21414_v34, %v7057_v46  ;;  %v7163_v29 = vmax.f32 %v6875_v7, 0.0  ;;  %v6781_v35 = vadd.f32 %v19974_v4, %v6202_v18  ;;  %v7164_v54 = vmax.f32 %v6876_v49, 0.0  ;;  %v17034_v50 = vld [vmem:[#allocation6 + $0x388] sm:$0xff]   ;;  %v6208_v22 = vpop.f32.mrb[135].mxu1 }
 0x6e9   :  { %v7262_v45 = vmax.f32 %v21415_v21, %v7058_v8  ;;  %8309 = vmatmul.mubr.bf16.vlgmr.msra.gmra.mrb[152].mxu0 %v7331_v44  ;;  %v6782_v30 = vadd.f32 %v19988_v9, %v6204_v31  ;;  %v7175_v15 = vmax.f32 %v6887_v6, 0.0  ;;  %v6888_v46 = vadd.f32 %v19716_v51, %v6095_v60  ;;  %v21418_v7 = vld [vmem:[#allocation16_spill] sm:$0xff]  ;;  %v21420_v41 = vld [vmem:[#allocation85_spill] sm:$0xff] }
 0x6ea   :  { %v20638_v28 = vmax.f32 %v7255_v1, %v7261_v10  ;;  %14894 = vmatpush3.bf16.msra.mxu0 %v17029_v43  ;;  %8785 = vmatprep.mubr.bf16.mxu0 %v8363_v48  ;;  %v21417_v20 = vmax.f32 %v21416_v56, 0.0  ;;  %v7069_v16 = vmax.f32 %v6781_v35, 0.0  ;;  %v21419_v49 = vmax.f32 %v21418_v7, 0.0  ;;  %v17033_v44 = vld [vmem:[#allocation6 + $0x308] sm:$0xff]   ;;  %v17035_v48 = vld [vmem:[#allocation6 + $0x350] sm:$0xff]   ;;  %v17039_v7 = vld [vmem:[#allocation6 + $0x358] sm:$0xff]  }
 0x6eb   :  { %v6793_v1 = vadd.f32 %v19974_v4, %v6206_v14  ;;  %v7075_v34 = vmax.f32 %v20584_v32, 0.0  ;;  %v7070_v10 = vmax.f32 %v6782_v30, 0.0  ;;  %v21421_v18 = vmax.f32 %v21420_v41, 0.0  ;;  %14895 = vmatprep.subr.bf16.mxu0 %v17031_v33  ;;  %14918 = vmatpush3.bf16.msra.mxu1 %v17034_v50  ;;  %v17038_v35 = vld [vmem:[#allocation6 + $0x390] sm:$0xff]   ;;  %v21423_v32 = vld [vmem:[#allocation88_spill] sm:$0xff]  ;;  %v17040_v33 = vld [vmem:[#allocation6 + $0x3d8] sm:$0xff]  }
 0x6ec   :  { %v7313_v8 = vmax.f32 %v21417_v20, %v7163_v29  ;;  %v7314_v25 = vmax.f32 %v21419_v49, %v7164_v54  ;;  %v7176_v43 = vmax.f32 %v6888_v46, 0.0  ;;  %v21422_v6 = vmax.f32 %v20540_v26, 0.0  ;;  %14919 = vmatprep.subr.bf16.mxu1 %v17036_v39  ;;  %v21425_v46 = vld [vmem:[#allocation46_spill] sm:$0xff]  ;;  %v21427_v49 = vld [vmem:[#allocation108_spill] sm:$0xff] }
 0x6ed   :  { %v7319_v51 = vmax.f32 %v21421_v18, %v7175_v15  ;;  %v7081_v21 = vmax.f32 %v6793_v1, 0.0  ;;  %v6794_v29 = vadd.f32 %v19988_v9, %v6208_v22  ;;  %v20653_v54 = vmax.f32 %v7256_v38, %v7262_v45  ;;  %v17037_v38 = vld [vmem:[#allocation6 + $0x310] sm:$0xff]  }
 0x6ee   :  { %v7267_v60 = vmax.f32 %v21422_v6, %v7069_v16  ;;  %v7268_v31 = vmax.f32 %v7064_v13, %v7070_v10  ;;  %v21424_v30 = vmax.f32 %v21423_v32, 0.0  ;;  %v20660_v15 = vmax.f32 %v20604_v53, %v7308_v61  ;;  %14896 = vmatpush3.bf16.msra.mxu0 %v17033_v44  ;;  %v21426_v13 = vld [vmem:[#allocation45_spill] sm:$0xff]  ;;  %v17042_v44 = vld [vmem:[#allocation6 + $0x398] sm:$0xff]  }
 0x6ef   :  { %v20655_v14 = vmax.f32 %v7313_v8, %v7319_v51  ;;  %v7076_v26 = vmax.f32 %v20588_v11, 0.0  ;;  %v6799_v20 = vadd.f32 %v21149_v36, %v21425_v46  ;;  %v7273_v50 = vmax.f32 %v7075_v34, %v7081_v21  ;;  %14897 = vmatprep.subr.bf16.mxu0 %v17035_v48  ;;  %v6212_v8 = vpop.f32.mrb[136].mxu1  ;;  %14920 = vmatpush3.bf16.msra.mxu1 %v17038_v35  ;;  %v21428_v34 = vld [vmem:[#allocation109_spill] sm:$0xff] }
 0x6f0   :  { %v7320_v56 = vmax.f32 %v21424_v30, %v7176_v43  ;;  %v7082_v16 = vmax.f32 %v6794_v29, 0.0  ;;  %v6800_v45 = vadd.f32 %v21151_v63, %v21426_v13  ;;  %v6811_v53 = vadd.f32 %v21149_v36, %v21427_v49  ;;  %v6214_v22 = vpop.f32.mrb[137].mxu1  ;;  %14921 = vmatprep.subr.bf16.mxu1 %v17040_v33  ;;  %v17043_v30 = vld [vmem:[#allocation6 + $0x360] sm:$0xff]   ;;  %v21429_v13 = vld [vmem:[#allocation66_spill] sm:$0xff] }
 0x6f1   :  { %v20671_v61 = vmax.f32 %v7267_v60, %v7273_v50  ;;  %v6805_v1 = vadd.f32 %v19974_v4, %v6212_v8  ;;  %v6812_v10 = vadd.f32 %v21151_v63, %v21428_v34  ;;  %v6806_v41 = vadd.f32 %v19988_v9, %v6214_v22  ;;  %v6216_v18 = vpop.f32.mrb[138].mxu1  ;;  %v17041_v60 = vld [vmem:[#allocation6 + $0x318] sm:$0xff]   ;;  %v17046_v33 = vld [vmem:[#allocation6 + $0x3a0] sm:$0xff]  }
 0x6f2   :  { %v20667_v39 = vmax.f32 %v7314_v25, %v7320_v56  ;;  %v7274_v11 = vmax.f32 %v7076_v26, %v7082_v16  ;;  %v17044_v25 = vld [vmem:[#allocation6 + $0x3e0] sm:$0xff]   ;;  %v7087_v51 = vmax.f32 %v6799_v20, 0.0  ;;  %14898 = vmatpush3.bf16.msra.mxu0 %v17037_v38  ;;  %v6817_v48 = vadd.f32 %v19974_v4, %v6216_v18  ;;  %v6218_v6 = vpop.f32.mrb[139].mxu1  ;;  %v17048_v38 = vld [vmem:[#allocation6 + $0x3e8] sm:$0xff]  }
 0x6f3   :  { %v7093_v43 = vmax.f32 %v6805_v1, 0.0  ;;  %v7088_v29 = vmax.f32 %v6800_v45, 0.0  ;;  %v7094_v35 = vmax.f32 %v6806_v41, 0.0  ;;  %14899 = vmatprep.subr.bf16.mxu0 %v17039_v7  ;;  %v6818_v32 = vadd.f32 %v19988_v9, %v6218_v6  ;;  %14922 = vmatpush3.bf16.msra.mxu1 %v17042_v44  ;;  %v17045_v45 = vld [vmem:[#allocation6 + $0x320] sm:$0xff]   ;;  %v17047_v1 = vld [vmem:[#allocation6 + $0x368] sm:$0xff]   ;;  %v17052_v6 = vld [vmem:[#allocation6 + $0x3f0] sm:$0xff]  }
 0x6f4   :  { %v20678_v21 = vmax.f32 %v7268_v31, %v7274_v11  ;;  %v7099_v56 = vmax.f32 %v6811_v53, 0.0  ;;  %v7105_v46 = vmax.f32 %v6817_v48, 0.0  ;;  %v7100_v20 = vmax.f32 %v6812_v10, 0.0  ;;  %14923 = vmatprep.subr.bf16.mxu1 %v17044_v25  ;;  %v21430_v7 = vld [vmem:[#allocation51_spill] sm:$0xff]  ;;  %v6222_v53 = vpop.f32.mrb[140].mxu1  ;;  %v17050_v18 = vld [vmem:[#allocation6 + $0x3a8] sm:$0xff]  }
 0x6f5   :  { %v7279_v26 = vmax.f32 %v7087_v51, %v7093_v43  ;;  %v7280_v50 = vmax.f32 %v7088_v29, %v7094_v35  ;;  %v7106_v16 = vmax.f32 %v6818_v32, 0.0  ;;  %v6823_v31 = vadd.f32 %v21149_v36, %v21429_v13  ;;  %v21431_v22 = vld [vmem:[#allocation67_spill] sm:$0xff]  ;;  %v6224_v41 = vpop.f32.mrb[141].mxu1  ;;  %v21432_v25 = vld [vmem:[#allocation53_spill] sm:$0xff] }
 0x6f6   :  { %v7285_v8 = vmax.f32 %v7099_v56, %v7105_v46  ;;  %14900 = vmatpush3.bf16.msra.mxu0 %v17041_v60  ;;  %v6824_v49 = vadd.f32 %v21151_v63, %v21430_v7  ;;  %v6835_v44 = vadd.f32 %v21149_v36, %v21431_v22  ;;  %v6829_v10 = vadd.f32 %v19974_v4, %v6222_v53  ;;  %v6226_v48 = vpop.f32.mrb[142].mxu1  ;;  %v17049_v56 = vld [vmem:[#allocation6 + $0x328] sm:$0xff]  }
 0x6f7   :  { %v7286_v11 = vmax.f32 %v7100_v20, %v7106_v16  ;;  %14901 = vmatprep.subr.bf16.mxu0 %v17043_v30  ;;  %14924 = vmatpush3.bf16.msra.mxu1 %v17046_v33  ;;  %v6836_v51 = vadd.f32 %v21151_v63, %v21432_v25  ;;  %v6830_v43 = vadd.f32 %v19988_v9, %v6224_v41  ;;  %v7111_v29 = vmax.f32 %v6823_v31, 0.0  ;;  %v6228_v30 = vpop.f32.mrb[143].mxu1  ;;  %v17051_v20 = vld [vmem:[#allocation6 + $0x370] sm:$0xff]   ;;  %v17055_v25 = vld [vmem:[#allocation6 + $0x378] sm:$0xff]  }
 0x6f8   :  { %v20687_v34 = vmax.f32 %v7279_v26, %v7285_v8  ;;  %14925 = vmatprep.subr.bf16.mxu1 %v17048_v38  ;;  %v7117_v35 = vmax.f32 %v6829_v10, 0.0  ;;  %v6841_v32 = vadd.f32 %v19974_v4, %v6226_v48  ;;  %v7112_v26 = vmax.f32 %v6824_v49, 0.0  ;;  %v17054_v38 = vld [vmem:[#allocation6 + $0x3b0] sm:$0xff]  }
 0x6f9   :  { %v20693_v60 = vmax.f32 %v7280_v50, %v7286_v11  ;;  %v7118_v46 = vmax.f32 %v6830_v43, 0.0  ;;  %v6842_v33 = vadd.f32 %v19988_v9, %v6228_v30  ;;  %v7123_v16 = vmax.f32 %v6835_v44, 0.0  ;;  %v21433_v11 = vld [vmem:[#allocation59_spill] sm:$0xff]  ;;  %v17053_v49 = vld [vmem:[#allocation6 + $0x330] sm:$0xff]   ;;  %v6232_v44 = vpop.f32.mrb[144].mxu1 }
 0x6fa   :  { %14902 = vmatpush3.bf16.msra.mxu0 %v17045_v45  ;;  %v7291_v13 = vmax.f32 %v7111_v29, %v7117_v35  ;;  %v7129_v8 = vmax.f32 %v6841_v32, 0.0  ;;  %v7124_v50 = vmax.f32 %v6836_v51, 0.0  ;;  %v17056_v45 = vld [vmem:[#allocation6 + $0x3f8] sm:$0xff]   ;;  %v6847_v53 = vadd.f32 %v21149_v36, %v21433_v11  ;;  %v21436_v35 = vld [vmem:[#allocation64_spill] sm:$0xff] }
 0x6fb   :  { %14903 = vmatprep.subr.bf16.mxu0 %v17047_v1  ;;  %14926 = vmatpush3.bf16.msra.mxu1 %v17050_v18  ;;  %v7292_v7 = vmax.f32 %v7112_v26, %v7118_v46  ;;  %v7130_v31 = vmax.f32 %v6842_v33, 0.0  ;;  %v21434_v1 = vld [vmem:[#allocation60_spill] sm:$0xff]  ;;  %v21435_v18 = vld [vmem:[#allocation62_spill] sm:$0xff]  ;;  %v6853_v48 = vadd.f32 %v19974_v4, %v6232_v44  ;;  %v6860_v32 = vadd.f32 %v21151_v63, %v21436_v35 }
 0x6fc   :  { %14927 = vmatprep.subr.bf16.mxu1 %v17052_v6  ;;  %v7297_v22 = vmax.f32 %v7123_v16, %v7129_v8  ;;  %v6848_v10 = vadd.f32 %v21151_v63, %v21434_v1  ;;  %v6859_v51 = vadd.f32 %v21149_v36, %v21435_v18  ;;  %v6234_v6 = vpop.f32.mrb[145].mxu1  ;;  %v17058_v29 = vld [vmem:[#allocation6 + $0x3b8] sm:$0xff]   ;;  %v17060_v26 = vld [vmem:[#allocation6 + $0x4c0] sm:$0xff]   ;;  %v7135_v33 = vmax.f32 %v6847_v53, 0.0  ;;  %v17064_v18 = vld [vmem:[#allocation6 + $0x4c8] sm:$0xff]  }
 0x6fd   :  { %v7298_v41 = vmax.f32 %v7124_v50, %v7130_v31  ;;  %v6854_v30 = vadd.f32 %v19988_v9, %v6234_v6  ;;  %v17057_v8 = vld [vmem:[#allocation6 + $0x338] sm:$0xff]   ;;  %v17059_v11 = vld [vmem:[#allocation6 + $0x440] sm:$0xff]   ;;  %v8364_v53 = vpack.c.bf16 %v20282_v47, %v20282_v47  ;;  %v21441_v47 = vld [vmem:[#allocation113_spill] sm:$0xff] }
 0x6fe   :  { %14904 = vmatpush3.bf16.msra.mxu0 %v17049_v56  ;;  %v20703_v43 = vmax.f32 %v7291_v13, %v7297_v22  ;;  %v6236_v56 = vpop.f32.mrb[146].mxu1  ;;  %v7147_v22 = vmax.f32 %v6859_v51, 0.0  ;;  %v17061_v51 = vld [vmem:[#allocation6 + $0x400] sm:$0xff]  }
 0x6ff   :  { %14905 = vmatprep.subr.bf16.mxu0 %v17051_v20  ;;  %14928 = vmatpush3.bf16.msra.mxu1 %v17054_v38  ;;  %v20709_v46 = vmax.f32 %v7292_v7, %v7298_v41  ;;  %v7141_v20 = vmax.f32 %v6853_v48, 0.0  ;;  %v6865_v16 = vadd.f32 %v19974_v4, %v6236_v56  ;;  %v6238_v13 = vpop.f32.mrb[147].mxu1  ;;  %v7136_v38 = vmax.f32 %v6848_v10, 0.0  ;;  %v21437_v48 = vld [vmem:[#allocation107_spill] sm:$0xff] }
 0x700   :  { %14929 = vmatprep.subr.bf16.mxu1 %v17056_v45  ;;  %v7142_v50 = vmax.f32 %v6854_v30, 0.0  ;;  %v6866_v31 = vadd.f32 %v19988_v9, %v6238_v13  ;;  %v17062_v45 = vld [vmem:[#allocation6 + $0x480] sm:$0xff]   ;;  %v7148_v7 = vmax.f32 %v6860_v32, 0.0  ;;  %v8362_v10 = vpack.c.bf16 %v21437_v48, %v21437_v48  ;;  %v21439_v30 = vld [vmem:[#allocation110_spill] sm:$0xff]  ;;  %v17065_v48 = vld [vmem:[#allocation6 + $0x408] sm:$0xff]  }
 0x701   :  { %v7303_v1 = vmax.f32 %v7135_v33, %v7141_v20  ;;  %v7153_v44 = vmax.f32 %v6865_v16, 0.0  ;;  %v21440_v32 = vld [vmem:[#allocation112_spill] sm:$0xff]  ;;  %v6883_v33 = vadd.f32 %v21149_v36, %v21441_v47  ;;  %v6242_v20 = vpop.f32.mrb[148].mxu1  ;;  %v17072_v47 = vld [vmem:[#allocation6 + $0x4d8] sm:$0xff]  }
 0x702   :  { %14906 = vmatpush3.bf16.msra.mxu0 %v17053_v49  ;;  %v7304_v49 = vmax.f32 %v7136_v38, %v7142_v50  ;;  %v7154_v41 = vmax.f32 %v6866_v31, 0.0  ;;  %v6872_v56 = vadd.f32 %v21151_v63, %v21440_v32  ;;  %v17063_v16 = vld [vmem:[#allocation6 + $0x448] sm:$0xff]   ;;  %v6877_v38 = vadd.f32 %v19974_v4, %v6242_v20  ;;  %v6244_v50 = vpop.f32.mrb[149].mxu1 }
 0x703   :  { %14907 = vmatprep.subr.bf16.mxu0 %v17055_v25  ;;  %14930 = vmatpush3.bf16.msra.mxu1 %v17058_v29  ;;  %v21438_v25 = vld [vmem:[#allocation71_spill] sm:$0xff]  ;;  %v7309_v35 = vmax.f32 %v7147_v22, %v7153_v44  ;;  %v8881_v29 = vpack.c.bf16 %v21439_v30, %v21439_v30  ;;  %v17066_v31 = vld [vmem:[#allocation6 + $0x488] sm:$0xff]   ;;  %v21442_v22 = vld [vmem:[#allocation114_spill] sm:$0xff]  ;;  %v7171_v30 = vmax.f32 %v6883_v33, 0.0 }
 0x704   :  { %14959 = vmatprep.subr.bf16.mxu1 %v17060_v26  ;;  %v6871_v6 = vadd.f32 %v21149_v36, %v21438_v25  ;;  %v7310_v26 = vmax.f32 %v7148_v7, %v7154_v41  ;;  %v6884_v44 = vadd.f32 %v21151_v63, %v21442_v22  ;;  %v6878_v36 = vadd.f32 %v19988_v9, %v6244_v50  ;;  %v17068_v7 = vld [vmem:[#allocation6 + $0x4d0] sm:$0xff]   ;;  %v17076_v33 = vld [vmem:[#allocation6 + $0x4e0] sm:$0xff]   ;;  %v17080_v22 = vld [vmem:[#allocation6 + $0x4e8] sm:$0xff]  }
 0x705   :  { %v20725_v13 = vmax.f32 %v7303_v1, %v7309_v35  ;;  %v7160_v25 = vmax.f32 %v6872_v56, 0.0  ;;  %v17071_v56 = vld [vmem:[#allocation6 + $0x458] sm:$0xff]   ;;  %v17075_v50 = vld [vmem:[#allocation6 + $0x460] sm:$0xff]  }
 0x706   :  { %14908 = vmatpush3.bf16.msra.mxu0 %v17057_v8  ;;  %8826 = vmatmul.mubr.bf16.vlgmr.msra.gmra.mrb[164].mxu1 %v8364_v53  ;;  %v8367_v8 = vpack.c.bf16 %v20463_v52, %v20463_v52  ;;  %v20733_v1 = vmax.f32 %v7304_v49, %v7310_v26  ;;  %v7159_v53 = vmax.f32 %v6871_v6, 0.0  ;;  %v7165_v52 = vmax.f32 %v6877_v38, 0.0  ;;  %v17070_v49 = vld [vmem:[#allocation6 + $0x490] sm:$0xff]   ;;  %v17073_v38 = vld [vmem:[#allocation6 + $0x418] sm:$0xff]  }
 0x707   :  { %14937 = vmatprep.subr.bf16.mxu0 %v17059_v11  ;;  %14960 = vmatpush3.bf16.msra.mxu1 %v17062_v45  ;;  %v6246_v11 = vpop.f32.mrb[150].mxu1  ;;  %v7166_v35 = vmax.f32 %v6878_v36, 0.0  ;;  %v7172_v32 = vmax.f32 %v6884_v44, 0.0  ;;  %v17077_v44 = vld [vmem:[#allocation6 + $0x420] sm:$0xff]   ;;  %v17079_v36 = vld [vmem:[#allocation6 + $0x468] sm:$0xff]  }
 0x708   :  { %9303 = vmatprep.mubr.bf16.mxu1 %v8881_v29  ;;  %14961 = vmatprep.subr.bf16.mxu1 %v17064_v18  ;;  %v6889_v45 = vadd.f32 %v19974_v4, %v6246_v11  ;;  %v6248_v41 = vpop.f32.mrb[151].mxu1  ;;  %v7315_v29 = vmax.f32 %v7159_v53, %v7165_v52  ;;  %v17069_v4 = vld [vmem:[#allocation6 + $0x410] sm:$0xff]   ;;  %v17082_v11 = vld [vmem:[#allocation6 + $0x4a8] sm:$0xff]  }
 0x709   :  { %8786 = vmatmul.mubr.bf16.vlgmr.msra.gmra.mrb[156].mxu0 %v8362_v10  ;;  %v6890_v63 = vadd.f32 %v19988_v9, %v6248_v41  ;;  %v17067_v10 = vld [vmem:[#allocation6 + $0x450] sm:$0xff]   ;;  %v7316_v6 = vmax.f32 %v7160_v25, %v7166_v35  ;;  %v17074_v9 = vld [vmem:[#allocation6 + $0x498] sm:$0xff]   ;;  %v17081_v53 = vld [vmem:[#allocation6 + $0x428] sm:$0xff]  }
 0x70a   :  { %14938 = vmatpush3.bf16.msra.mxu0 %v17061_v51  ;;  %8865 = vmatprep.mubr.bf16.mxu0 %v8367_v8  ;;  %v7177_v18 = vmax.f32 %v6889_v45, 0.0  ;;  %v17083_v52 = vld [vmem:[#allocation6 + $0x470] sm:$0xff]   ;;  %v17088_v41 = vld [vmem:[#allocation6 + $0x4f8] sm:$0xff]  }
 0x70b   :  { %14939 = vmatprep.subr.bf16.mxu0 %v17063_v16  ;;  %14962 = vmatpush3.bf16.msra.mxu1 %v17066_v31  ;;  %v7178_v51 = vmax.f32 %v6890_v63, 0.0  ;;  %v17078_v31 = vld [vmem:[#allocation6 + $0x4a0] sm:$0xff]   ;;  %v17086_v45 = vld [vmem:[#allocation6 + $0x4b0] sm:$0xff]   ;;  %v17087_v25 = vld [vmem:[#allocation6 + $0x478] sm:$0xff]  }
 0x70c   :  { %14963 = vmatprep.subr.bf16.mxu1 %v17068_v7  ;;  %v7321_v26 = vmax.f32 %v7171_v30, %v7177_v18  ;;  %v17084_v7 = vld [vmem:[#allocation6 + $0x4f0] sm:$0xff]   ;;  %v17090_v35 = vld [vmem:[#allocation6 + $0x4b8] sm:$0xff]   ;;  %v17092_v63 = vld [vmem:[#allocation6 + $0x5c0] sm:$0xff]  }
 0x70d   :  { %v7322_v20 = vmax.f32 %v7172_v32, %v7178_v51  ;;  %v17091_v30 = vld [vmem:[#allocation6 + $0x540] sm:$0xff]   ;;  %v17096_v32 = vld [vmem:[#allocation6 + $0x5c8] sm:$0xff]   ;;  %v8885_v51 = vpack.c.bf16 %v20524_v55, %v20524_v55  ;;  %v17099_v55 = vld [vmem:[#allocation6 + $0x550] sm:$0xff]  }
 0x70e   :  { %14940 = vmatpush3.bf16.msra.mxu0 %v17065_v48  ;;  %v20737_v16 = vmax.f32 %v7315_v29, %v7321_v26  ;;  %v17085_v48 = vld [vmem:[#allocation6 + $0x430] sm:$0xff]   ;;  %v17094_v29 = vld [vmem:[#allocation6 + $0x580] sm:$0xff]   ;;  %v17095_v26 = vld [vmem:[#allocation6 + $0x548] sm:$0xff]  }
 0x70f   :  { %14941 = vmatprep.subr.bf16.mxu0 %v17067_v10  ;;  %14964 = vmatpush3.bf16.msra.mxu1 %v17070_v49  ;;  %v20739_v8 = vmax.f32 %v7316_v6, %v7322_v20  ;;  %v17089_v10 = vld [vmem:[#allocation6 + $0x438] sm:$0xff]   ;;  %v17093_v6 = vld [vmem:[#allocation6 + $0x500] sm:$0xff]   ;;  %v17098_v20 = vld [vmem:[#allocation6 + $0x588] sm:$0xff]  }
 0x710   :  { %14965 = vmatprep.subr.bf16.mxu1 %v17072_v47  ;;  %v21443_v18 = vld [vmem:[#allocation47_spill] sm:$0xff]  ;;  %v8366_v47 = vpack.c.bf16 %v20458_v5, %v20458_v5 }
 0x711   :  { %v8880_v49 = vpack.c.bf16 %v21443_v18, %v21443_v18  ;;  %v17104_v5 = vld [vmem:[#allocation6 + $0x5d8] sm:$0xff]  }
 0x712   :  { %14942 = vmatpush3.bf16.msra.mxu0 %v17069_v4  ;;  %v8883_v4 = vpack.c.bf16 %v20338_v62, %v20338_v62  ;;  %v17106_v62 = vld [vmem:[#allocation6 + $0x598] sm:$0xff]  }
 0x713   :  { %14943 = vmatprep.subr.bf16.mxu0 %v17071_v56  ;;  %14966 = vmatpush3.bf16.msra.mxu1 %v17074_v9  ;;  %v17100_v56 = vld [vmem:[#allocation6 + $0x5d0] sm:$0xff]   ;;  %v17097_v9 = vld [vmem:[#allocation6 + $0x508] sm:$0xff]   ;;  %v17120_v18 = vld [vmem:[#allocation6 + $0x5f8] sm:$0xff]  }
 0x714   :  { %14967 = vmatprep.subr.bf16.mxu1 %v17076_v33  ;;  %v17102_v33 = vld [vmem:[#allocation6 + $0x590] sm:$0xff]  }
 0x716   :  { %14944 = vmatpush3.bf16.msra.mxu0 %v17073_v38  ;;  %v17101_v38 = vld [vmem:[#allocation6 + $0x510] sm:$0xff]  }
 0x717   :  { %14945 = vmatprep.subr.bf16.mxu0 %v17075_v50  ;;  %14968 = vmatpush3.bf16.msra.mxu1 %v17078_v31  ;;  %v17103_v50 = vld [vmem:[#allocation6 + $0x558] sm:$0xff]   ;;  %v17108_v31 = vld [vmem:[#allocation6 + $0x5e0] sm:$0xff]  }
 0x718   :  { %14969 = vmatprep.subr.bf16.mxu1 %v17080_v22  ;;  %v17105_v22 = vld [vmem:[#allocation6 + $0x518] sm:$0xff]  }
 0x71a   :  { %14946 = vmatpush3.bf16.msra.mxu0 %v17077_v44  ;;  %v17107_v44 = vld [vmem:[#allocation6 + $0x560] sm:$0xff]  }
 0x71b   :  { %14947 = vmatprep.subr.bf16.mxu0 %v17079_v36  ;;  %14970 = vmatpush3.bf16.msra.mxu1 %v17082_v11  ;;  %v17110_v36 = vld [vmem:[#allocation6 + $0x5a0] sm:$0xff]   ;;  %v17112_v11 = vld [vmem:[#allocation6 + $0x5e8] sm:$0xff]  }
 0x71c   :  { %14971 = vmatprep.subr.bf16.mxu1 %v17084_v7  ;;  %v17109_v7 = vld [vmem:[#allocation6 + $0x520] sm:$0xff]  }
 0x71e   :  { %14948 = vmatpush3.bf16.msra.mxu0 %v17081_v53  ;;  %v17111_v53 = vld [vmem:[#allocation6 + $0x568] sm:$0xff]  }
 0x71f   :  { %14949 = vmatprep.subr.bf16.mxu0 %v17083_v52  ;;  %14972 = vmatpush3.bf16.msra.mxu1 %v17086_v45  ;;  %v17114_v52 = vld [vmem:[#allocation6 + $0x5a8] sm:$0xff]  }
 0x720   :  { %14973 = vmatprep.subr.bf16.mxu1 %v17088_v41  ;;  %v17116_v41 = vld [vmem:[#allocation6 + $0x5f0] sm:$0xff]  }
 0x722   :  { %14950 = vmatpush3.bf16.msra.mxu0 %v17085_v48 }
 0x723   :  { %14951 = vmatprep.subr.bf16.mxu0 %v17087_v25  ;;  %14974 = vmatpush3.bf16.msra.mxu1 %v17090_v35  ;;  %v17113_v25 = vld [vmem:[#allocation6 + $0x528] sm:$0xff]  }
 0x724   :  { %15003 = vmatprep.subr.bf16.mxu1 %v17092_v63 }
 0x726   :  { %14952 = vmatpush3.bf16.msra.mxu0 %v17089_v10  ;;  %9304 = vmatmul.mubr.bf16.vlgmr.msra.gmra.mrb[168].mxu1 %v8880_v49  ;;  %v17115_v10 = vld [vmem:[#allocation6 + $0x570] sm:$0xff]  }
 0x727   :  { %14981 = vmatprep.subr.bf16.mxu0 %v17091_v30  ;;  %15004 = vmatpush3.bf16.msra.mxu1 %v17094_v29  ;;  %v14777_v45 = vpop.f32.mrb[144].mxu0  ;;  %v17118_v29 = vld [vmem:[#allocation6 + $0x5b0] sm:$0xff]  }
 0x728   :  { %9383 = vmatprep.mubr.bf16.mxu1 %v8885_v51  ;;  %15005 = vmatprep.subr.bf16.mxu1 %v17096_v32  ;;  %v14778_v48 = vpop.f32.mrb[145].mxu0  ;;  %v17117_v49 = vld [vmem:[#allocation6 + $0x530] sm:$0xff]   ;;  %v17119_v32 = vld [vmem:[#allocation6 + $0x578] sm:$0xff]   ;;  %v17124_v51 = vld [vmem:[#allocation6 + $0x6c0] sm:$0xff]  }
 0x729   :  { %8866 = vmatmul.mubr.bf16.vlgmr.msra.gmra.mrb[160].mxu0 %v8366_v47  ;;  %v20749_v35 = vadd.f32 %v14778_v48, %v14777_v45  ;;  %v14780_v63 = vpop.f32.mrb[146].mxu0  ;;  %v17121_v47 = vld [vmem:[#allocation6 + $0x538] sm:$0xff]   ;;  %v17142_v45 = vld [vmem:[#allocation6 + $0x6a0] sm:$0xff]  }
 0x72a   :  { %14982 = vmatpush3.bf16.msra.mxu0 %v17093_v6  ;;  %9343 = vmatprep.mubr.bf16.mxu0 %v8883_v4  ;;  %v14781_v30 = vpop.f32.mrb[147].mxu0  ;;  %v17122_v6 = vld [vmem:[#allocation6 + $0x5b8] sm:$0xff]   ;;  %v17126_v4 = vld [vmem:[#allocation6 + $0x680] sm:$0xff]   ;;  %v17146_v63 = vld [vmem:[#allocation6 + $0x6a8] sm:$0xff]  }
 0x72b   :  { %14983 = vmatprep.subr.bf16.mxu0 %v17095_v26  ;;  %15006 = vmatpush3.bf16.msra.mxu1 %v17098_v20  ;;  %v17123_v26 = vld [vmem:[#allocation6 + $0x640] sm:$0xff]   ;;  %v8884_v20 = vpack.c.bf16 %v20504_v40, %v20504_v40  ;;  %v17132_v40 = vld [vmem:[#allocation6 + $0x6d0] sm:$0xff]   ;;  %v17145_v30 = vld [vmem:[#allocation6 + $0x628] sm:$0xff]  }
 0x72c   :  { %15007 = vmatprep.subr.bf16.mxu1 %v17100_v56  ;;  %v17128_v56 = vld [vmem:[#allocation6 + $0x6c8] sm:$0xff]   ;;  %v17141_v48 = vld [vmem:[#allocation6 + $0x620] sm:$0xff]  }
 0x72e   :  { %14984 = vmatpush3.bf16.msra.mxu0 %v17097_v9  ;;  %v17125_v9 = vld [vmem:[#allocation6 + $0x600] sm:$0xff]  }
 0x72f   :  { %14985 = vmatprep.subr.bf16.mxu0 %v17099_v55  ;;  %15008 = vmatpush3.bf16.msra.mxu1 %v17102_v33  ;;  %v9401_v55 = vpack.c.bf16 %v20382_v23, %v20382_v23  ;;  %v8882_v33 = vpack.c.bf16 %v20324_v27, %v20324_v27  ;;  %v17131_v23 = vld [vmem:[#allocation6 + $0x650] sm:$0xff]   ;;  %v17136_v27 = vld [vmem:[#allocation6 + $0x6d8] sm:$0xff]  }
 0x730   :  { %15009 = vmatprep.subr.bf16.mxu1 %v17104_v5  ;;  %v17127_v5 = vld [vmem:[#allocation6 + $0x648] sm:$0xff]  }
 0x732   :  { %14986 = vmatpush3.bf16.msra.mxu0 %v17101_v38  ;;  %v21444_v38 = vld [vmem:[#allocation57_spill] sm:$0xff] }
 0x733   :  { %14987 = vmatprep.subr.bf16.mxu0 %v17103_v50  ;;  %15010 = vmatpush3.bf16.msra.mxu1 %v17106_v62  ;;  %v9399_v50 = vpack.c.bf16 %v21444_v38, %v21444_v38  ;;  %v17130_v62 = vld [vmem:[#allocation6 + $0x688] sm:$0xff]   ;;  %v21446_v38 = vld [vmem:[#allocation55_spill] sm:$0xff] }
 0x734   :  { %15011 = vmatprep.subr.bf16.mxu1 %v17108_v31  ;;  %v17129_v31 = vld [vmem:[#allocation6 + $0x608] sm:$0xff]  }
 0x736   :  { %14988 = vmatpush3.bf16.msra.mxu0 %v17105_v22  ;;  %v17134_v22 = vld [vmem:[#allocation6 + $0x690] sm:$0xff]  }
 0x737   :  { %14989 = vmatprep.subr.bf16.mxu0 %v17107_v44  ;;  %15012 = vmatpush3.bf16.msra.mxu1 %v17110_v36  ;;  %v17133_v44 = vld [vmem:[#allocation6 + $0x610] sm:$0xff]   ;;  %v17135_v36 = vld [vmem:[#allocation6 + $0x658] sm:$0xff]  }
 0x738   :  { %15013 = vmatprep.subr.bf16.mxu1 %v17112_v11  ;;  %v17138_v11 = vld [vmem:[#allocation6 + $0x698] sm:$0xff]  }
 0x73a   :  { %14990 = vmatpush3.bf16.msra.mxu0 %v17109_v7  ;;  %v17140_v7 = vld [vmem:[#allocation6 + $0x6e0] sm:$0xff]  }
 0x73b   :  { %14991 = vmatprep.subr.bf16.mxu0 %v17111_v53  ;;  %15014 = vmatpush3.bf16.msra.mxu1 %v17114_v52  ;;  %v17137_v53 = vld [vmem:[#allocation6 + $0x618] sm:$0xff]   ;;  %v17139_v52 = vld [vmem:[#allocation6 + $0x660] sm:$0xff]  }
 0x73c   :  { %15015 = vmatprep.subr.bf16.mxu1 %v17116_v41  ;;  %v17144_v41 = vld [vmem:[#allocation6 + $0x6e8] sm:$0xff]  }
 0x73e   :  { %14992 = vmatpush3.bf16.msra.mxu0 %v17113_v25  ;;  %v17143_v25 = vld [vmem:[#allocation6 + $0x668] sm:$0xff]  }
 0x73f   :  { %14993 = vmatprep.subr.bf16.mxu0 %v17115_v10  ;;  %15016 = vmatpush3.bf16.msra.mxu1 %v17118_v29  ;;  %v17148_v10 = vld [vmem:[#allocation6 + $0x6f0] sm:$0xff]  }
 0x740   :  { %15017 = vmatprep.subr.bf16.mxu1 %v17120_v18  ;;  %v17147_v29 = vld [vmem:[#allocation6 + $0x670] sm:$0xff]  }
 0x741   :  { %v17150_v18 = vld [vmem:[#allocation6 + $0x6b0] sm:$0xff]  }
 0x742   :  { %14994 = vmatpush3.bf16.msra.mxu0 %v17117_v49  ;;  %v17152_v49 = vld [vmem:[#allocation6 + $0x6f8] sm:$0xff]  }
 0x743   :  { %14995 = vmatprep.subr.bf16.mxu0 %v17119_v32  ;;  %15018 = vmatpush3.bf16.msra.mxu1 %v17122_v6  ;;  %v17149_v32 = vld [vmem:[#allocation6 + $0x630] sm:$0xff]   ;;  %v17151_v6 = vld [vmem:[#allocation6 + $0x678] sm:$0xff]  }
 0x744   :  { %15047 = vmatprep.subr.bf16.mxu1 %v17124_v51  ;;  %v17154_v51 = vld [vmem:[#allocation6 + $0x6b8] sm:$0xff]  }
 0x746   :  { %14996 = vmatpush3.bf16.msra.mxu0 %v17121_v47  ;;  %9384 = vmatmul.mubr.bf16.vlgmr.msra.gmra.mrb[172].mxu1 %v8884_v20  ;;  %v17156_v47 = vld [vmem:[#allocation6 + $0x7c0] sm:$0xff]  }
 0x747   :  { %15025 = vmatprep.subr.bf16.mxu0 %v17123_v26  ;;  %15048 = vmatpush3.bf16.msra.mxu1 %v17126_v4  ;;  %v17153_v26 = vld [vmem:[#allocation6 + $0x638] sm:$0xff]   ;;  %v17155_v4 = vld [vmem:[#allocation6 + $0x740] sm:$0xff]  }
 0x748   :  { %9861 = vmatprep.mubr.bf16.mxu1 %v9401_v55  ;;  %15049 = vmatprep.subr.bf16.mxu1 %v17128_v56  ;;  %v17158_v20 = vld [vmem:[#allocation6 + $0x780] sm:$0xff]   ;;  %v9400_v56 = vpack.c.bf16 %v20368_v24, %v20368_v24  ;;  %v17164_v24 = vld [vmem:[#allocation6 + $0x7d0] sm:$0xff]  }
 0x749   :  { %9344 = vmatmul.mubr.bf16.vlgmr.msra.gmra.mrb[164].mxu0 %v8882_v33  ;;  %v17157_v55 = vld [vmem:[#allocation6 + $0x700] sm:$0xff]  }
 0x74a   :  { %15026 = vmatpush3.bf16.msra.mxu0 %v17125_v9  ;;  %9821 = vmatprep.mubr.bf16.mxu0 %v9399_v50  ;;  %v17160_v9 = vld [vmem:[#allocation6 + $0x7c8] sm:$0xff]   ;;  %v9398_v50 = vpack.c.bf16 %v21446_v38, %v21446_v38  ;;  %v17190_v38 = vld [vmem:[#allocation6 + $0x880] sm:$0xff]  }
 0x74b   :  { %15027 = vmatprep.subr.bf16.mxu0 %v17127_v5  ;;  %15050 = vmatpush3.bf16.msra.mxu1 %v17130_v62  ;;  %v21445_v33 = vld [vmem:[#allocation68_spill] sm:$0xff] }
 0x74c   :  { %15051 = vmatprep.subr.bf16.mxu1 %v17132_v40  ;;  %v9917_v5 = vpack.c.bf16 %v21445_v33, %v21445_v33  ;;  %v17159_v62 = vld [vmem:[#allocation6 + $0x748] sm:$0xff]   ;;  %v9403_v40 = vpack.c.bf16 %v20566_v59, %v20566_v59  ;;  %v17170_v59 = vld [vmem:[#allocation6 + $0x798] sm:$0xff]  }
 0x74d   :  { %v17185_v33 = vld [vmem:[#allocation6 + $0x738] sm:$0xff]  }
 0x74e   :  { %15028 = vmatpush3.bf16.msra.mxu0 %v17129_v31  ;;  %v17162_v31 = vld [vmem:[#allocation6 + $0x788] sm:$0xff]  }
 0x74f   :  { %15029 = vmatprep.subr.bf16.mxu0 %v17131_v23  ;;  %15052 = vmatpush3.bf16.msra.mxu1 %v17134_v22  ;;  %v17161_v23 = vld [vmem:[#allocation6 + $0x708] sm:$0xff]   ;;  %v17163_v22 = vld [vmem:[#allocation6 + $0x750] sm:$0xff]  }
 0x750   :  { %15053 = vmatprep.subr.bf16.mxu1 %v17136_v27  ;;  %v17166_v27 = vld [vmem:[#allocation6 + $0x790] sm:$0xff]  }
 0x752   :  { %15030 = vmatpush3.bf16.msra.mxu0 %v17133_v44  ;;  %v17168_v44 = vld [vmem:[#allocation6 + $0x7d8] sm:$0xff]  }
 0x753   :  { %15031 = vmatprep.subr.bf16.mxu0 %v17135_v36  ;;  %15054 = vmatpush3.bf16.msra.mxu1 %v17138_v11  ;;  %v17165_v36 = vld [vmem:[#allocation6 + $0x710] sm:$0xff]   ;;  %v17167_v11 = vld [vmem:[#allocation6 + $0x758] sm:$0xff]  }
 0x754   :  { %15055 = vmatprep.subr.bf16.mxu1 %v17140_v7  ;;  %v17172_v7 = vld [vmem:[#allocation6 + $0x7e0] sm:$0xff]  }
 0x756   :  { %15032 = vmatpush3.bf16.msra.mxu0 %v17137_v53  ;;  %v17169_v53 = vld [vmem:[#allocation6 + $0x718] sm:$0xff]  }
 0x757   :  { %15033 = vmatprep.subr.bf16.mxu0 %v17139_v52  ;;  %15056 = vmatpush3.bf16.msra.mxu1 %v17142_v45  ;;  %v17171_v52 = vld [vmem:[#allocation6 + $0x760] sm:$0xff]  }
 0x758   :  { %15057 = vmatprep.subr.bf16.mxu1 %v17144_v41  ;;  %v17174_v45 = vld [vmem:[#allocation6 + $0x7a0] sm:$0xff]   ;;  %v17176_v41 = vld [vmem:[#allocation6 + $0x7e8] sm:$0xff]  }
 0x75a   :  { %15034 = vmatpush3.bf16.msra.mxu0 %v17141_v48  ;;  %v17173_v48 = vld [vmem:[#allocation6 + $0x720] sm:$0xff]  }
 0x75b   :  { %15035 = vmatprep.subr.bf16.mxu0 %v17143_v25  ;;  %15058 = vmatpush3.bf16.msra.mxu1 %v17146_v63  ;;  %v17175_v25 = vld [vmem:[#allocation6 + $0x768] sm:$0xff]  }
 0x75c   :  { %15059 = vmatprep.subr.bf16.mxu1 %v17148_v10  ;;  %v17178_v63 = vld [vmem:[#allocation6 + $0x7a8] sm:$0xff]   ;;  %v17180_v10 = vld [vmem:[#allocation6 + $0x7f0] sm:$0xff]  }
 0x75e   :  { %15036 = vmatpush3.bf16.msra.mxu0 %v17145_v30 }
 0x75f   :  { %15037 = vmatprep.subr.bf16.mxu0 %v17147_v29  ;;  %15060 = vmatpush3.bf16.msra.mxu1 %v17150_v18  ;;  %v17177_v29 = vld [vmem:[#allocation6 + $0x728] sm:$0xff]  }
 0x760   :  { %15061 = vmatprep.subr.bf16.mxu1 %v17152_v49  ;;  %v17179_v49 = vld [vmem:[#allocation6 + $0x770] sm:$0xff]  }
 0x762   :  { %15038 = vmatpush3.bf16.msra.mxu0 %v17149_v32 }
 0x763   :  { %15039 = vmatprep.subr.bf16.mxu0 %v17151_v6  ;;  %15062 = vmatpush3.bf16.msra.mxu1 %v17154_v51  ;;  %v17182_v51 = vld [vmem:[#allocation6 + $0x7b0] sm:$0xff]  }
 0x764   :  { %15091 = vmatprep.subr.bf16.mxu1 %v17156_v47 }
 0x766   :  { %15040 = vmatpush3.bf16.msra.mxu0 %v17153_v26  ;;  %9862 = vmatmul.mubr.bf16.vlgmr.msra.gmra.mrb[176].mxu1 %v9400_v56  ;;  %v17184_v26 = vld [vmem:[#allocation6 + $0x7f8] sm:$0xff]  }
 0x767   :  { %15069 = vmatprep.subr.bf16.mxu0 %v17155_v4  ;;  %15092 = vmatpush3.bf16.msra.mxu1 %v17158_v20  ;;  %v17181_v20 = vld [vmem:[#allocation6 + $0x730] sm:$0xff]   ;;  %v17183_v56 = vld [vmem:[#allocation6 + $0x778] sm:$0xff]  }
 0x768   :  { %10339 = vmatprep.mubr.bf16.mxu1 %v9917_v5  ;;  %15093 = vmatprep.subr.bf16.mxu1 %v17160_v9  ;;  %v17186_v9 = vld [vmem:[#allocation6 + $0x7b8] sm:$0xff]   ;;  %v17187_v5 = vld [vmem:[#allocation6 + $0x840] sm:$0xff]  }
 0x769   :  { %9822 = vmatmul.mubr.bf16.vlgmr.msra.gmra.mrb[168].mxu0 %v9398_v50  ;;  %v21447_v50 = vld [vmem:[#allocation111_spill] sm:$0xff] }
 0x76a   :  { %15070 = vmatpush3.bf16.msra.mxu0 %v17157_v55  ;;  %9901 = vmatprep.mubr.bf16.mxu0 %v9403_v40  ;;  %v17188_v55 = vld [vmem:[#allocation6 + $0x8c0] sm:$0xff]  }
 0x76b   :  { %15071 = vmatprep.subr.bf16.mxu0 %v17159_v62  ;;  %15094 = vmatpush3.bf16.msra.mxu1 %v17162_v31  ;;  %v9916_v62 = vpack.c.bf16 %v21447_v50, %v21447_v50  ;;  %v17189_v40 = vld [vmem:[#allocation6 + $0x800] sm:$0xff]   ;;  %v9921_v31 = vpack.c.bf16 %v20598_v12, %v20598_v12  ;;  %v17195_v12 = vld [vmem:[#allocation6 + $0x850] sm:$0xff]   ;;  %v17215_v50 = vld [vmem:[#allocation6 + $0x878] sm:$0xff]  }
 0x76c   :  { %15095 = vmatprep.subr.bf16.mxu1 %v17164_v24  ;;  %v14799_v30 = vpop.f32.mrb[152].mxu1  ;;  %v9402_v24 = vpack.c.bf16 %v20543_v42, %v20543_v42  ;;  %v17200_v42 = vld [vmem:[#allocation6 + $0x8d8] sm:$0xff]  }
 0x76d   :  { %v14800_v18 = vpop.f32.mrb[153].mxu1 }
 0x76e   :  { %15072 = vmatpush3.bf16.msra.mxu0 %v17161_v23  ;;  %v14801_v32 = vadd.f32 %v14800_v18, %v14799_v30  ;;  %v14802_v6 = vpop.f32.mrb[154].mxu1  ;;  %v17191_v23 = vld [vmem:[#allocation6 + $0x848] sm:$0xff]   ;;  %v17212_v30 = vld [vmem:[#allocation6 + $0x8f0] sm:$0xff]  }
 0x76f   :  { %15073 = vmatprep.subr.bf16.mxu0 %v17163_v22  ;;  %15096 = vmatpush3.bf16.msra.mxu1 %v17166_v27  ;;  %v14803_v47 = vpop.f32.mrb[155].mxu1  ;;  %v9919_v22 = vpack.c.bf16 %v20441_v58, %v20441_v58  ;;  %v17194_v27 = vld [vmem:[#allocation6 + $0x888] sm:$0xff]   ;;  %v17202_v58 = vld [vmem:[#allocation6 + $0x898] sm:$0xff]  }
 0x770   :  { %15097 = vmatprep.subr.bf16.mxu1 %v17168_v44  ;;  %v20768_v4 = vadd.f32 %v14801_v32, %v20749_v35  ;;  %v17192_v35 = vld [vmem:[#allocation6 + $0x8c8] sm:$0xff]   ;;  %v17196_v44 = vld [vmem:[#allocation6 + $0x8d0] sm:$0xff]  }
 0x771   :  { %v17209_v18 = vld [vmem:[#allocation6 + $0x828] sm:$0xff]   ;;  %v17211_v32 = vld [vmem:[#allocation6 + $0x870] sm:$0xff]  }
 0x772   :  { %15074 = vmatpush3.bf16.msra.mxu0 %v17165_v36  ;;  %v17193_v36 = vld [vmem:[#allocation6 + $0x808] sm:$0xff]  }
 0x773   :  { %15075 = vmatprep.subr.bf16.mxu0 %v17167_v11  ;;  %15098 = vmatpush3.bf16.msra.mxu1 %v17170_v59  ;;  %v17198_v11 = vld [vmem:[#allocation6 + $0x890] sm:$0xff]  }
 0x774   :  { %15099 = vmatprep.subr.bf16.mxu1 %v17172_v7  ;;  %v17197_v59 = vld [vmem:[#allocation6 + $0x810] sm:$0xff]   ;;  %v17199_v7 = vld [vmem:[#allocation6 + $0x858] sm:$0xff]  }
 0x776   :  { %15076 = vmatpush3.bf16.msra.mxu0 %v17169_v53  ;;  %v17204_v53 = vld [vmem:[#allocation6 + $0x8e0] sm:$0xff]  }
 0x777   :  { %15077 = vmatprep.subr.bf16.mxu0 %v17171_v52  ;;  %15100 = vmatpush3.bf16.msra.mxu1 %v17174_v45  ;;  %v17201_v52 = vld [vmem:[#allocation6 + $0x818] sm:$0xff]   ;;  %v17203_v45 = vld [vmem:[#allocation6 + $0x860] sm:$0xff]  }
 0x778   :  { %15101 = vmatprep.subr.bf16.mxu1 %v17176_v41  ;;  %v17206_v41 = vld [vmem:[#allocation6 + $0x8a0] sm:$0xff]  }
 0x77a   :  { %15078 = vmatpush3.bf16.msra.mxu0 %v17173_v48  ;;  %v17208_v48 = vld [vmem:[#allocation6 + $0x8e8] sm:$0xff]  }
 0x77b   :  { %15079 = vmatprep.subr.bf16.mxu0 %v17175_v25  ;;  %15102 = vmatpush3.bf16.msra.mxu1 %v17178_v63  ;;  %v17205_v25 = vld [vmem:[#allocation6 + $0x820] sm:$0xff]   ;;  %v17207_v63 = vld [vmem:[#allocation6 + $0x868] sm:$0xff]  }
 0x77c   :  { %15103 = vmatprep.subr.bf16.mxu1 %v17180_v10  ;;  %v17210_v10 = vld [vmem:[#allocation6 + $0x8a8] sm:$0xff]  }
 0x77e   :  { %15080 = vmatpush3.bf16.msra.mxu0 %v17177_v29 }
 0x77f   :  { %15081 = vmatprep.subr.bf16.mxu0 %v17179_v49  ;;  %15104 = vmatpush3.bf16.msra.mxu1 %v17182_v51 }
 0x780   :  { %15105 = vmatprep.subr.bf16.mxu1 %v17184_v26  ;;  %v17214_v26 = vld [vmem:[#allocation6 + $0x8b0] sm:$0xff]  }
 0x782   :  { %15082 = vmatpush3.bf16.msra.mxu0 %v17181_v20 }
 0x783   :  { %15083 = vmatprep.subr.bf16.mxu0 %v17183_v56  ;;  %15106 = vmatpush3.bf16.msra.mxu1 %v17186_v9  ;;  %v17216_v9 = vld [vmem:[#allocation6 + $0x8f8] sm:$0xff]  }
 0x784   :  { %15135 = vmatprep.subr.bf16.mxu1 %v17188_v55 }
 0x786   :  { %15084 = vmatpush3.bf16.msra.mxu0 %v17185_v33  ;;  %10340 = vmatmul.mubr.bf16.vlgmr.msra.gmra.mrb[180].mxu1 %v9916_v62 }
 0x787   :  { %15113 = vmatprep.subr.bf16.mxu0 %v17187_v5  ;;  %15136 = vmatpush3.bf16.msra.mxu1 %v17190_v38  ;;  %v17213_v5 = vld [vmem:[#allocation6 + $0x830] sm:$0xff]  }
 0x788   :  { %10419 = vmatprep.mubr.bf16.mxu1 %v9921_v31  ;;  %15137 = vmatprep.subr.bf16.mxu1 %v17192_v35  ;;  %v17218_v35 = vld [vmem:[#allocation6 + $0x8b8] sm:$0xff]  }
 0x789   :  { %9902 = vmatmul.mubr.bf16.vlgmr.msra.gmra.mrb[172].mxu0 %v9402_v24  ;;  %v17217_v31 = vld [vmem:[#allocation6 + $0x838] sm:$0xff]  }
 0x78a   :  { %15114 = vmatpush3.bf16.msra.mxu0 %v17189_v40  ;;  %10379 = vmatprep.mubr.bf16.mxu0 %v9919_v22  ;;  %v17220_v40 = vld [vmem:[#allocation6 + $0x9c0] sm:$0xff]  }
 0x78b   :  { %15115 = vmatprep.subr.bf16.mxu0 %v17191_v23  ;;  %15138 = vmatpush3.bf16.msra.mxu1 %v17194_v27  ;;  %v17219_v23 = vld [vmem:[#allocation6 + $0x940] sm:$0xff]   ;;  %v9920_v27 = vpack.c.bf16 %v20593_v57, %v20593_v57  ;;  %v17228_v57 = vld [vmem:[#allocation6 + $0x9d0] sm:$0xff]  }
 0x78c   :  { %15139 = vmatprep.subr.bf16.mxu1 %v17196_v44  ;;  %v14843_v29 = vpop.f32.mrb[156].mxu1  ;;  %v17222_v22 = vld [vmem:[#allocation6 + $0x980] sm:$0xff]   ;;  %v17224_v44 = vld [vmem:[#allocation6 + $0x9c8] sm:$0xff]  }
 0x78d   :  { %v14844_v49 = vpop.f32.mrb[157].mxu1 }
 0x78e   :  { %15116 = vmatpush3.bf16.msra.mxu0 %v17193_v36  ;;  %v14845_v51 = vadd.f32 %v14844_v49, %v14843_v29  ;;  %v14846_v47 = vpop.f32.mrb[158].mxu1  ;;  %v17221_v36 = vld [vmem:[#allocation6 + $0x900] sm:$0xff]   ;;  %v17242_v49 = vld [vmem:[#allocation6 + $0x9a8] sm:$0xff]  }
 0x78f   :  { %15117 = vmatprep.subr.bf16.mxu0 %v17195_v12  ;;  %15140 = vmatpush3.bf16.msra.mxu1 %v17198_v11  ;;  %v14847_v56 = vpop.f32.mrb[159].mxu1  ;;  %v9918_v12 = vpack.c.bf16 %v20406_v17, %v20406_v17  ;;  %v17223_v11 = vld [vmem:[#allocation6 + $0x948] sm:$0xff]   ;;  %v17232_v17 = vld [vmem:[#allocation6 + $0x9d8] sm:$0xff]   ;;  %v17237_v29 = vld [vmem:[#allocation6 + $0x920] sm:$0xff]  }
 0x790   :  { %15141 = vmatprep.subr.bf16.mxu1 %v17200_v42  ;;  %v21448_v42 = vld [vmem:[#allocation116_spill] sm:$0xff] }
 0x792   :  { %15118 = vmatpush3.bf16.msra.mxu0 %v17197_v59  ;;  %v10435_v59 = vpack.c.bf16 %v21448_v42, %v21448_v42  ;;  %v17256_v42 = vld [vmem:[#allocation6 + $0xac8] sm:$0xff]  }
 0x793   :  { %15119 = vmatprep.subr.bf16.mxu0 %v17199_v7  ;;  %15142 = vmatpush3.bf16.msra.mxu1 %v17202_v58  ;;  %v17226_v7 = vld [vmem:[#allocation6 + $0x988] sm:$0xff]  }
 0x794   :  { %15143 = vmatprep.subr.bf16.mxu1 %v17204_v53  ;;  %v17225_v58 = vld [vmem:[#allocation6 + $0x908] sm:$0xff]   ;;  %v17230_v53 = vld [vmem:[#allocation6 + $0x990] sm:$0xff]  }
 0x795   :  { %v14821_v6 = vpop.f32.mrb[148].mxu0 }
 0x796   :  { %15120 = vmatpush3.bf16.msra.mxu0 %v17201_v52  ;;  %v14822_v20 = vpop.f32.mrb[149].mxu0  ;;  %v17229_v52 = vld [vmem:[#allocation6 + $0x910] sm:$0xff]  }
 0x797   :  { %15121 = vmatprep.subr.bf16.mxu0 %v17203_v45  ;;  %15144 = vmatpush3.bf16.msra.mxu1 %v17206_v41  ;;  %v14823_v55 = vadd.f32 %v14822_v20, %v14821_v6  ;;  %v14824_v33 = vpop.f32.mrb[150].mxu0  ;;  %v17231_v45 = vld [vmem:[#allocation6 + $0x958] sm:$0xff]  }
 0x798   :  { %15145 = vmatprep.subr.bf16.mxu1 %v17208_v48  ;;  %v14825_v38 = vpop.f32.mrb[151].mxu0  ;;  %v17234_v41 = vld [vmem:[#allocation6 + $0x998] sm:$0xff]   ;;  %v17236_v48 = vld [vmem:[#allocation6 + $0x9e0] sm:$0xff]  }
 0x799   :  { %v7943_v62 = vadd.f32 %v14823_v55, %v20768_v4  ;;  %v10437_v4 = vpack.c.bf16 %v20481_v2, %v20481_v2  ;;  %v17227_v2 = vld [vmem:[#allocation6 + $0x950] sm:$0xff]   ;;  %v17248_v38 = vld [vmem:[#allocation6 + $0x9f8] sm:$0xff]  }
 0x79a   :  { %15122 = vmatpush3.bf16.msra.mxu0 %v17205_v25  ;;  %v17233_v25 = vld [vmem:[#allocation6 + $0x918] sm:$0xff]   ;;  %v17246_v55 = vld [vmem:[#allocation6 + $0x9b0] sm:$0xff]  }
 0x79b   :  { %15123 = vmatprep.subr.bf16.mxu0 %v17207_v63  ;;  %15146 = vmatpush3.bf16.msra.mxu1 %v17210_v10  ;;  %v20779_v24 = vadd.f32 %v14845_v51, %v7943_v62  ;;  %v17235_v63 = vld [vmem:[#allocation6 + $0x960] sm:$0xff]   ;;  %v17241_v51 = vld [vmem:[#allocation6 + $0x928] sm:$0xff]  }
 0x79c   :  { %15147 = vmatprep.subr.bf16.mxu1 %v17212_v30  ;;  %v17238_v10 = vld [vmem:[#allocation6 + $0x9a0] sm:$0xff]   ;;  %v17240_v30 = vld [vmem:[#allocation6 + $0x9e8] sm:$0xff]  }
 0x79e   :  { %15124 = vmatpush3.bf16.msra.mxu0 %v17209_v18  ;;  %v17239_v18 = vld [vmem:[#allocation6 + $0x968] sm:$0xff]  }
 0x79f   :  { %15125 = vmatprep.subr.bf16.mxu0 %v17211_v32  ;;  %15148 = vmatpush3.bf16.msra.mxu1 %v17214_v26  ;;  %v17244_v32 = vld [vmem:[#allocation6 + $0x9f0] sm:$0xff]  }
 0x7a0   :  { %15149 = vmatprep.subr.bf16.mxu1 %v17216_v9  ;;  %v17243_v26 = vld [vmem:[#allocation6 + $0x970] sm:$0xff]  }
 0x7a2   :  { %15126 = vmatpush3.bf16.msra.mxu0 %v17213_v5 }
 0x7a3   :  { %15127 = vmatprep.subr.bf16.mxu0 %v17215_v50  ;;  %15150 = vmatpush3.bf16.msra.mxu1 %v17218_v35  ;;  %v17245_v35 = vld [vmem:[#allocation6 + $0x930] sm:$0xff]  }
 0x7a4   :  { %15179 = vmatprep.subr.bf16.mxu1 %v17220_v40 }
 0x7a6   :  { %15128 = vmatpush3.bf16.msra.mxu0 %v17217_v31  ;;  %10420 = vmatmul.mubr.bf16.vlgmr.msra.gmra.mrb[184].mxu1 %v9920_v27  ;;  %v17247_v31 = vld [vmem:[#allocation6 + $0x978] sm:$0xff]   ;;  %v17252_v27 = vld [vmem:[#allocation6 + $0xac0] sm:$0xff]  }
 0x7a7   :  { %15157 = vmatprep.subr.bf16.mxu0 %v17219_v23  ;;  %15180 = vmatpush3.bf16.msra.mxu1 %v17222_v22  ;;  %v17250_v22 = vld [vmem:[#allocation6 + $0x9b8] sm:$0xff]  }
 0x7a8   :  { %10897 = vmatprep.mubr.bf16.mxu1 %v10437_v4  ;;  %15181 = vmatprep.subr.bf16.mxu1 %v17224_v44  ;;  %v17251_v4 = vld [vmem:[#allocation6 + $0xa40] sm:$0xff]  }
 0x7a9   :  { %10380 = vmatmul.mubr.bf16.vlgmr.msra.gmra.mrb[176].mxu0 %v9918_v12  ;;  %v17254_v12 = vld [vmem:[#allocation6 + $0xa80] sm:$0xff]  }
 0x7aa   :  { %15158 = vmatpush3.bf16.msra.mxu0 %v17221_v36  ;;  %10857 = vmatprep.mubr.bf16.mxu0 %v10435_v59  ;;  %v17249_v36 = vld [vmem:[#allocation6 + $0x938] sm:$0xff]   ;;  %v17253_v59 = vld [vmem:[#allocation6 + $0xa00] sm:$0xff]  }
 0x7ab   :  { %15159 = vmatprep.subr.bf16.mxu0 %v17223_v11  ;;  %15182 = vmatpush3.bf16.msra.mxu1 %v17226_v7  ;;  %v10436_v11 = vpack.c.bf16 %v20445_v0, %v20445_v0  ;;  %v17260_v0 = vld [vmem:[#allocation6 + $0xad0] sm:$0xff]  }
 0x7ac   :  { %15183 = vmatprep.subr.bf16.mxu1 %v17228_v57  ;;  %v21450_v57 = vld [vmem:[#allocation115_spill] sm:$0xff] }
 0x7ae   :  { %15160 = vmatpush3.bf16.msra.mxu0 %v17225_v58  ;;  %v10434_v58 = vpack.c.bf16 %v21450_v57, %v21450_v57  ;;  %v17288_v57 = vld [vmem:[#allocation6 + $0xbc8] sm:$0xff]  }
 0x7af   :  { %15161 = vmatprep.subr.bf16.mxu0 %v17227_v2  ;;  %15184 = vmatpush3.bf16.msra.mxu1 %v17230_v53  ;;  %v17255_v2 = vld [vmem:[#allocation6 + $0xa48] sm:$0xff]   ;;  %v10439_v53 = vpack.c.bf16 %v20653_v54, %v20653_v54  ;;  %v17266_v54 = vld [vmem:[#allocation6 + $0xa98] sm:$0xff]  }
 0x7b0   :  { %15185 = vmatprep.subr.bf16.mxu1 %v17232_v17  ;;  %v17258_v17 = vld [vmem:[#allocation6 + $0xa88] sm:$0xff]  }
 0x7b2   :  { %15162 = vmatpush3.bf16.msra.mxu0 %v17229_v52  ;;  %v17257_v52 = vld [vmem:[#allocation6 + $0xa08] sm:$0xff]  }
 0x7b3   :  { %15163 = vmatprep.subr.bf16.mxu0 %v17231_v45  ;;  %15186 = vmatpush3.bf16.msra.mxu1 %v17234_v41  ;;  %v17259_v45 = vld [vmem:[#allocation6 + $0xa50] sm:$0xff]  }
 0x7b4   :  { %15187 = vmatprep.subr.bf16.mxu1 %v17236_v48  ;;  %v17262_v41 = vld [vmem:[#allocation6 + $0xa90] sm:$0xff]   ;;  %v17264_v48 = vld [vmem:[#allocation6 + $0xad8] sm:$0xff]  }
 0x7b6   :  { %15164 = vmatpush3.bf16.msra.mxu0 %v17233_v25  ;;  %v17261_v25 = vld [vmem:[#allocation6 + $0xa10] sm:$0xff]  }
 0x7b7   :  { %15165 = vmatprep.subr.bf16.mxu0 %v17235_v63  ;;  %15188 = vmatpush3.bf16.msra.mxu1 %v17238_v10  ;;  %v17263_v63 = vld [vmem:[#allocation6 + $0xa58] sm:$0xff]   ;;  %v17268_v10 = vld [vmem:[#allocation6 + $0xae0] sm:$0xff]  }
 0x7b8   :  { %15189 = vmatprep.subr.bf16.mxu1 %v17240_v30  ;;  %v14887_v6 = vpop.f32.mrb[160].mxu1  ;;  %v17265_v30 = vld [vmem:[#allocation6 + $0xa18] sm:$0xff]  }
 0x7b9   :  { %v14888_v47 = vpop.f32.mrb[161].mxu1 }
 0x7ba   :  { %15166 = vmatpush3.bf16.msra.mxu0 %v17237_v29  ;;  %v14889_v56 = vadd.f32 %v14888_v47, %v14887_v6  ;;  %v14890_v9 = vpop.f32.mrb[162].mxu1  ;;  %v17267_v29 = vld [vmem:[#allocation6 + $0xa60] sm:$0xff]   ;;  %v17271_v6 = vld [vmem:[#allocation6 + $0xa68] sm:$0xff]   ;;  %v17276_v47 = vld [vmem:[#allocation6 + $0xaf0] sm:$0xff]  }
 0x7bb   :  { %15167 = vmatprep.subr.bf16.mxu0 %v17239_v18  ;;  %15190 = vmatpush3.bf16.msra.mxu1 %v17242_v49  ;;  %v14891_v5 = vpop.f32.mrb[163].mxu1  ;;  %v17270_v18 = vld [vmem:[#allocation6 + $0xaa0] sm:$0xff]   ;;  %v17272_v49 = vld [vmem:[#allocation6 + $0xae8] sm:$0xff]   ;;  %v17275_v9 = vld [vmem:[#allocation6 + $0xa70] sm:$0xff]  }
 0x7bc   :  { %v14865_v20 = vpop.f32.mrb[152].mxu0  ;;  %15191 = vmatprep.subr.bf16.mxu1 %v17244_v32  ;;  %v17269_v32 = vld [vmem:[#allocation6 + $0xa20] sm:$0xff]  }
 0x7bd   :  { %v14866_v33 = vpop.f32.mrb[153].mxu0 }
 0x7be   :  { %v14867_v50 = vadd.f32 %v14866_v33, %v14865_v20  ;;  %v14868_v62 = vpop.f32.mrb[154].mxu0  ;;  %15168 = vmatpush3.bf16.msra.mxu0 %v17241_v51  ;;  %v17274_v51 = vld [vmem:[#allocation6 + $0xaa8] sm:$0xff]  }
 0x7bf   :  { %v14869_v40 = vpop.f32.mrb[155].mxu0  ;;  %15169 = vmatprep.subr.bf16.mxu0 %v17243_v26  ;;  %15192 = vmatpush3.bf16.msra.mxu1 %v17246_v55  ;;  %v17273_v20 = vld [vmem:[#allocation6 + $0xa28] sm:$0xff]  }
 0x7c0   :  { %v8311_v23 = vadd.f32 %v14867_v50, %v20779_v24  ;;  %15193 = vmatprep.subr.bf16.mxu1 %v17248_v38  ;;  %v21449_v24 = vld [vmem:[#allocation18_spill] sm:$0xff] }
 0x7c1   :  { %v10953_v7 = vpack.c.bf16 %v21449_v24, %v21449_v24  ;;  %v17278_v38 = vld [vmem:[#allocation6 + $0xab0] sm:$0xff]  }
 0x7c2   :  { %v20790_v44 = vadd.f32 %v14889_v56, %v8311_v23  ;;  %15170 = vmatpush3.bf16.msra.mxu0 %v17245_v35  ;;  %v17280_v35 = vld [vmem:[#allocation6 + $0xaf8] sm:$0xff]   ;;  %v17277_v23 = vld [vmem:[#allocation6 + $0xa30] sm:$0xff]  }
 0x7c3   :  { %15171 = vmatprep.subr.bf16.mxu0 %v17247_v31  ;;  %15194 = vmatpush3.bf16.msra.mxu1 %v17250_v22  ;;  %v21451_v24 = vld [vmem:[#allocation17_spill] sm:$0xff] }
 0x7c4   :  { %15223 = vmatprep.subr.bf16.mxu1 %v17252_v27  ;;  %v17279_v27 = vld [vmem:[#allocation6 + $0xa78] sm:$0xff]  }
 0x7c6   :  { %15172 = vmatpush3.bf16.msra.mxu0 %v17249_v36  ;;  %10898 = vmatmul.mubr.bf16.vlgmr.msra.gmra.mrb[188].mxu1 %v10436_v11  ;;  %v17281_v11 = vld [vmem:[#allocation6 + $0xa38] sm:$0xff]  }
 0x7c7   :  { %15201 = vmatprep.subr.bf16.mxu0 %v17251_v4  ;;  %15224 = vmatpush3.bf16.msra.mxu1 %v17254_v12  ;;  %v17282_v4 = vld [vmem:[#allocation6 + $0xab8] sm:$0xff]   ;;  %v17284_v12 = vld [vmem:[#allocation6 + $0xbc0] sm:$0xff]  }
 0x7c8   :  { %11375 = vmatprep.mubr.bf16.mxu1 %v10953_v7  ;;  %15225 = vmatprep.subr.bf16.mxu1 %v17256_v42  ;;  %v17283_v42 = vld [vmem:[#allocation6 + $0xb40] sm:$0xff]   ;;  %v10952_v7 = vpack.c.bf16 %v21451_v24, %v21451_v24 }
 0x7c9   :  { %10858 = vmatmul.mubr.bf16.vlgmr.msra.gmra.mrb[180].mxu0 %v10434_v58  ;;  %v17285_v58 = vld [vmem:[#allocation6 + $0xb00] sm:$0xff]  }
 0x7ca   :  { %15202 = vmatpush3.bf16.msra.mxu0 %v17253_v59  ;;  %10937 = vmatprep.mubr.bf16.mxu0 %v10439_v53  ;;  %v17286_v59 = vld [vmem:[#allocation6 + $0xb80] sm:$0xff]   ;;  %v10438_v53 = vpack.c.bf16 %v20638_v28, %v20638_v28  ;;  %v17296_v28 = vld [vmem:[#allocation6 + $0xbd8] sm:$0xff]  }
 0x7cb   :  { %15203 = vmatprep.subr.bf16.mxu0 %v17255_v2  ;;  %15226 = vmatpush3.bf16.msra.mxu1 %v17258_v17  ;;  %v10957_v2 = vpack.c.bf16 %v20678_v21, %v20678_v21  ;;  %v17287_v17 = vld [vmem:[#allocation6 + $0xb48] sm:$0xff]   ;;  %v17291_v21 = vld [vmem:[#allocation6 + $0xb50] sm:$0xff]   ;;  %v17318_v24 = vld [vmem:[#allocation6 + $0xc80] sm:$0xff]  }
 0x7cc   :  { %15227 = vmatprep.subr.bf16.mxu1 %v17260_v0  ;;  %v10955_v0 = vpack.c.bf16 %v20499_v3, %v20499_v3  ;;  %v17298_v3 = vld [vmem:[#allocation6 + $0xb98] sm:$0xff]  }
 0x7ce   :  { %15204 = vmatpush3.bf16.msra.mxu0 %v17257_v52  ;;  %v17290_v52 = vld [vmem:[#allocation6 + $0xb88] sm:$0xff]  }
 0x7cf   :  { %15205 = vmatprep.subr.bf16.mxu0 %v17259_v45  ;;  %15228 = vmatpush3.bf16.msra.mxu1 %v17262_v41  ;;  %v17292_v45 = vld [vmem:[#allocation6 + $0xbd0] sm:$0xff]   ;;  %v17289_v41 = vld [vmem:[#allocation6 + $0xb08] sm:$0xff]  }
 0x7d0   :  { %15229 = vmatprep.subr.bf16.mxu1 %v17264_v48  ;;  %v17294_v48 = vld [vmem:[#allocation6 + $0xb90] sm:$0xff]  }
 0x7d2   :  { %15206 = vmatpush3.bf16.msra.mxu0 %v17261_v25  ;;  %v17293_v25 = vld [vmem:[#allocation6 + $0xb10] sm:$0xff]  }
 0x7d3   :  { %15207 = vmatprep.subr.bf16.mxu0 %v17263_v63  ;;  %15230 = vmatpush3.bf16.msra.mxu1 %v17266_v54  ;;  %v17295_v63 = vld [vmem:[#allocation6 + $0xb58] sm:$0xff]   ;;  %v17300_v54 = vld [vmem:[#allocation6 + $0xbe0] sm:$0xff]  }
 0x7d4   :  { %15231 = vmatprep.subr.bf16.mxu1 %v17268_v10  ;;  %v17297_v10 = vld [vmem:[#allocation6 + $0xb18] sm:$0xff]  }
 0x7d6   :  { %15208 = vmatpush3.bf16.msra.mxu0 %v17265_v30  ;;  %v17299_v30 = vld [vmem:[#allocation6 + $0xb60] sm:$0xff]  }
 0x7d7   :  { %15209 = vmatprep.subr.bf16.mxu0 %v17267_v29  ;;  %15232 = vmatpush3.bf16.msra.mxu1 %v17270_v18  ;;  %v17302_v29 = vld [vmem:[#allocation6 + $0xba0] sm:$0xff]   ;;  %v17304_v18 = vld [vmem:[#allocation6 + $0xbe8] sm:$0xff]  }
 0x7d8   :  { %15233 = vmatprep.subr.bf16.mxu1 %v17272_v49  ;;  %v17301_v49 = vld [vmem:[#allocation6 + $0xb20] sm:$0xff]  }
 0x7d9   :  { %v14931_v26 = vpop.f32.mrb[164].mxu1 }
 0x7da   :  { %15210 = vmatpush3.bf16.msra.mxu0 %v17269_v32  ;;  %v14932_v56 = vpop.f32.mrb[165].mxu1  ;;  %v17303_v32 = vld [vmem:[#allocation6 + $0xb68] sm:$0xff]  }
 0x7db   :  { %15211 = vmatprep.subr.bf16.mxu0 %v17271_v6  ;;  %v14933_v33 = vadd.f32 %v14932_v56, %v14931_v26  ;;  %v14934_v5 = vpop.f32.mrb[166].mxu1  ;;  %15234 = vmatpush3.bf16.msra.mxu1 %v17274_v51  ;;  %v17306_v6 = vld [vmem:[#allocation6 + $0xba8] sm:$0xff]   ;;  %v17308_v51 = vld [vmem:[#allocation6 + $0xbf0] sm:$0xff]  }
 0x7dc   :  { %v14909_v55 = vpop.f32.mrb[156].mxu0  ;;  %v14935_v62 = vpop.f32.mrb[167].mxu1  ;;  %15235 = vmatprep.subr.bf16.mxu1 %v17276_v47  ;;  %v17305_v26 = vld [vmem:[#allocation6 + $0xb28] sm:$0xff]   ;;  %v17307_v56 = vld [vmem:[#allocation6 + $0xb70] sm:$0xff]  }
 0x7dd   :  { %v14910_v50 = vpop.f32.mrb[157].mxu0  ;;  %v17310_v5 = vld [vmem:[#allocation6 + $0xbb0] sm:$0xff]   ;;  %v17312_v62 = vld [vmem:[#allocation6 + $0xbf8] sm:$0xff]  }
 0x7de   :  { %v14911_v40 = vadd.f32 %v14910_v50, %v14909_v55  ;;  %v14912_v31 = vpop.f32.mrb[158].mxu0  ;;  %15212 = vmatpush3.bf16.msra.mxu0 %v17273_v20 }
 0x7df   :  { %v14913_v22 = vpop.f32.mrb[159].mxu0  ;;  %15213 = vmatprep.subr.bf16.mxu0 %v17275_v9  ;;  %15236 = vmatpush3.bf16.msra.mxu1 %v17278_v38  ;;  %v17309_v31 = vld [vmem:[#allocation6 + $0xb30] sm:$0xff]  }
 0x7e0   :  { %v20800_v36 = vadd.f32 %v14933_v33, %v14911_v40  ;;  %15237 = vmatprep.subr.bf16.mxu1 %v17280_v35  ;;  %v17311_v22 = vld [vmem:[#allocation6 + $0xb78] sm:$0xff]  }
 0x7e2   :  { %15214 = vmatpush3.bf16.msra.mxu0 %v17277_v23 }
 0x7e3   :  { %15215 = vmatprep.subr.bf16.mxu0 %v17279_v27  ;;  %15238 = vmatpush3.bf16.msra.mxu1 %v17282_v4  ;;  %v17314_v4 = vld [vmem:[#allocation6 + $0xbb8] sm:$0xff]  }
 0x7e4   :  { %15267 = vmatprep.subr.bf16.mxu1 %v17284_v12  ;;  %v17316_v12 = vld [vmem:[#allocation6 + $0xcc0] sm:$0xff]  }
 0x7e6   :  { %15216 = vmatpush3.bf16.msra.mxu0 %v17281_v11  ;;  %11376 = vmatmul.mubr.bf16.vlgmr.msra.gmra.mrb[192].mxu1 %v10952_v7  ;;  %v10956_v7 = vpack.c.bf16 %v20671_v61, %v20671_v61  ;;  %v17324_v61 = vld [vmem:[#allocation6 + $0xcd0] sm:$0xff]  }
 0x7e7   :  { %15245 = vmatprep.subr.bf16.mxu0 %v17283_v42  ;;  %15268 = vmatpush3.bf16.msra.mxu1 %v17286_v59  ;;  %v17313_v42 = vld [vmem:[#allocation6 + $0xb38] sm:$0xff]   ;;  %v17315_v59 = vld [vmem:[#allocation6 + $0xc40] sm:$0xff]  }
 0x7e8   :  { %11455 = vmatprep.mubr.bf16.mxu1 %v10957_v2  ;;  %15269 = vmatprep.subr.bf16.mxu1 %v17288_v57  ;;  %v17320_v57 = vld [vmem:[#allocation6 + $0xcc8] sm:$0xff]  }
 0x7e9   :  { %10938 = vmatmul.mubr.bf16.vlgmr.msra.gmra.mrb[184].mxu0 %v10438_v53  ;;  %v21453_v53 = vld [vmem:[#allocation95_spill] sm:$0xff] }
 0x7ea   :  { %15246 = vmatpush3.bf16.msra.mxu0 %v17285_v58  ;;  %11415 = vmatprep.mubr.bf16.mxu0 %v10955_v0  ;;  %v21452_v58 = vld [vmem:[#allocation84_spill] sm:$0xff]  ;;  %v21454_v0 = vld [vmem:[#allocation77_spill] sm:$0xff] }
 0x7eb   :  { %15247 = vmatprep.subr.bf16.mxu0 %v17287_v17  ;;  %15270 = vmatpush3.bf16.msra.mxu1 %v17290_v52  ;;  %v11473_v2 = vpack.c.bf16 %v21452_v58, %v21452_v58  ;;  %v17319_v17 = vld [vmem:[#allocation6 + $0xc48] sm:$0xff]   ;;  %v11471_v52 = vpack.c.bf16 %v21454_v0, %v21454_v0  ;;  %v21455_v58 = vld [vmem:[#allocation82_spill] sm:$0xff] }
 0x7ec   :  { %15271 = vmatprep.subr.bf16.mxu1 %v17292_v45  ;;  %v17322_v45 = vld [vmem:[#allocation6 + $0xc88] sm:$0xff]  }
 0x7ed   :  { %v21457_v0 = vld [vmem:[#allocation76_spill] sm:$0xff] }
 0x7ee   :  { %15248 = vmatpush3.bf16.msra.mxu0 %v17289_v41  ;;  %v17321_v41 = vld [vmem:[#allocation6 + $0xc08] sm:$0xff]  }
 0x7ef   :  { %15249 = vmatprep.subr.bf16.mxu0 %v17291_v21  ;;  %15272 = vmatpush3.bf16.msra.mxu1 %v17294_v48  ;;  %v17323_v21 = vld [vmem:[#allocation6 + $0xc50] sm:$0xff]  }
 0x7f0   :  { %15273 = vmatprep.subr.bf16.mxu1 %v17296_v28  ;;  %v17326_v48 = vld [vmem:[#allocation6 + $0xc90] sm:$0xff]   ;;  %v17328_v28 = vld [vmem:[#allocation6 + $0xcd8] sm:$0xff]  }
 0x7f2   :  { %15250 = vmatpush3.bf16.msra.mxu0 %v17293_v25  ;;  %v17325_v25 = vld [vmem:[#allocation6 + $0xc10] sm:$0xff]  }
 0x7f3   :  { %15251 = vmatprep.subr.bf16.mxu0 %v17295_v63  ;;  %15274 = vmatpush3.bf16.msra.mxu1 %v17298_v3  ;;  %v17327_v63 = vld [vmem:[#allocation6 + $0xc58] sm:$0xff]  }
 0x7f4   :  { %15275 = vmatprep.subr.bf16.mxu1 %v17300_v54  ;;  %v17330_v3 = vld [vmem:[#allocation6 + $0xc98] sm:$0xff]   ;;  %v17332_v54 = vld [vmem:[#allocation6 + $0xce0] sm:$0xff]  }
 0x7f6   :  { %15252 = vmatpush3.bf16.msra.mxu0 %v17297_v10  ;;  %v17329_v10 = vld [vmem:[#allocation6 + $0xc18] sm:$0xff]  }
 0x7f7   :  { %15253 = vmatprep.subr.bf16.mxu0 %v17299_v30  ;;  %15276 = vmatpush3.bf16.msra.mxu1 %v17302_v29  ;;  %v17331_v30 = vld [vmem:[#allocation6 + $0xc60] sm:$0xff]  }
 0x7f8   :  { %15277 = vmatprep.subr.bf16.mxu1 %v17304_v18  ;;  %v17334_v29 = vld [vmem:[#allocation6 + $0xca0] sm:$0xff]   ;;  %v17336_v18 = vld [vmem:[#allocation6 + $0xce8] sm:$0xff]  }
 0x7f9   :  { %v14975_v47 = vpop.f32.mrb[168].mxu1 }
 0x7fa   :  { %15254 = vmatpush3.bf16.msra.mxu0 %v17301_v49  ;;  %v14976_v20 = vpop.f32.mrb[169].mxu1  ;;  %v17333_v49 = vld [vmem:[#allocation6 + $0xc20] sm:$0xff]  }
 0x7fb   :  { %15255 = vmatprep.subr.bf16.mxu0 %v17303_v32  ;;  %v20810_v55 = vadd.f32 %v14976_v20, %v14975_v47  ;;  %v14978_v33 = vpop.f32.mrb[170].mxu1  ;;  %15278 = vmatpush3.bf16.msra.mxu1 %v17306_v6  ;;  %v17335_v32 = vld [vmem:[#allocation6 + $0xc68] sm:$0xff]  }
 0x7fc   :  { %v14953_v9 = vpop.f32.mrb[160].mxu0  ;;  %v14979_v50 = vpop.f32.mrb[171].mxu1  ;;  %15279 = vmatprep.subr.bf16.mxu1 %v17308_v51  ;;  %v17338_v6 = vld [vmem:[#allocation6 + $0xca8] sm:$0xff]   ;;  %v17340_v51 = vld [vmem:[#allocation6 + $0xcf0] sm:$0xff]  }
 0x7fd   :  { %v14954_v38 = vpop.f32.mrb[161].mxu0 }
 0x7fe   :  { %v14955_v35 = vadd.f32 %v14954_v38, %v14953_v9  ;;  %v14956_v40 = vpop.f32.mrb[162].mxu0  ;;  %15256 = vmatpush3.bf16.msra.mxu0 %v17305_v26  ;;  %v17337_v26 = vld [vmem:[#allocation6 + $0xc28] sm:$0xff]   ;;  %v17342_v38 = vld [vmem:[#allocation6 + $0xcb0] sm:$0xff]  }
 0x7ff   :  { %v14957_v23 = vpop.f32.mrb[163].mxu0  ;;  %15257 = vmatprep.subr.bf16.mxu0 %v17307_v56  ;;  %15280 = vmatpush3.bf16.msra.mxu1 %v17310_v5  ;;  %v17339_v56 = vld [vmem:[#allocation6 + $0xc70] sm:$0xff]  }
 0x800   :  { %v8868_v27 = vadd.f32 %v14955_v35, %v20800_v36  ;;  %15281 = vmatprep.subr.bf16.mxu1 %v17312_v62  ;;  %v17317_v36 = vld [vmem:[#allocation6 + $0xc00] sm:$0xff]   ;;  %v17344_v35 = vld [vmem:[#allocation6 + $0xcf8] sm:$0xff]   ;;  %v17341_v23 = vld [vmem:[#allocation6 + $0xc30] sm:$0xff]  }
 0x802   :  { %v20814_v11 = vadd.f32 %v8868_v27, %v20790_v44  ;;  %15258 = vmatpush3.bf16.msra.mxu0 %v17309_v31  ;;  %v10954_v44 = vpack.c.bf16 %v21453_v53, %v21453_v53  ;;  %v17343_v27 = vld [vmem:[#allocation6 + $0xc78] sm:$0xff]   ;;  %v17352_v53 = vld [vmem:[#allocation6 + $0xdc8] sm:$0xff]  }
 0x803   :  { %15259 = vmatprep.subr.bf16.mxu0 %v17311_v22  ;;  %15282 = vmatpush3.bf16.msra.mxu1 %v17314_v4 }
 0x804   :  { %15311 = vmatprep.subr.bf16.mxu1 %v17316_v12  ;;  %v17346_v12 = vld [vmem:[#allocation6 + $0xcb8] sm:$0xff]  }
 0x806   :  { %15260 = vmatpush3.bf16.msra.mxu0 %v17313_v42  ;;  %11456 = vmatmul.mubr.bf16.vlgmr.msra.gmra.mrb[196].mxu1 %v10956_v7  ;;  %v17348_v42 = vld [vmem:[#allocation6 + $0xdc0] sm:$0xff]  }
 0x807   :  { %15289 = vmatprep.subr.bf16.mxu0 %v17315_v59  ;;  %15312 = vmatpush3.bf16.msra.mxu1 %v17318_v24  ;;  %v17345_v24 = vld [vmem:[#allocation6 + $0xc38] sm:$0xff]   ;;  %v17347_v7 = vld [vmem:[#allocation6 + $0xd40] sm:$0xff]  }
 0x808   :  { %11933 = vmatprep.mubr.bf16.mxu1 %v11473_v2  ;;  %15313 = vmatprep.subr.bf16.mxu1 %v17320_v57  ;;  %v11472_v2 = vpack.c.bf16 %v21455_v58, %v21455_v58 }
 0x809   :  { %11416 = vmatmul.mubr.bf16.vlgmr.msra.gmra.mrb[188].mxu0 %v10954_v44  ;;  %v21456_v44 = vld [vmem:[#allocation98_spill] sm:$0xff] }
 0x80a   :  { %15290 = vmatpush3.bf16.msra.mxu0 %v17317_v36  ;;  %11893 = vmatprep.mubr.bf16.mxu0 %v11471_v52  ;;  %v17350_v36 = vld [vmem:[#allocation6 + $0xd80] sm:$0xff]   ;;  %v11470_v52 = vpack.c.bf16 %v21457_v0, %v21457_v0  ;;  %v11991_v0 = vpack.c.bf16 %v20617_v19, %v20617_v19  ;;  %v17394_v19 = vld [vmem:[#allocation6 + $0xe98] sm:$0xff]  }
 0x80b   :  { %15291 = vmatprep.subr.bf16.mxu0 %v17319_v17  ;;  %15314 = vmatpush3.bf16.msra.mxu1 %v17322_v45  ;;  %v11989_v17 = vpack.c.bf16 %v21456_v44, %v21456_v44  ;;  %v17351_v45 = vld [vmem:[#allocation6 + $0xd48] sm:$0xff]   ;;  %v11474_v44 = vpack.c.bf16 %v20687_v34, %v20687_v34  ;;  %v17392_v34 = vld [vmem:[#allocation6 + $0xed8] sm:$0xff]  }
 0x80c   :  { %15315 = vmatprep.subr.bf16.mxu1 %v17324_v61  ;;  %v17354_v61 = vld [vmem:[#allocation6 + $0xd88] sm:$0xff]  }
 0x80e   :  { %15292 = vmatpush3.bf16.msra.mxu0 %v17321_v41  ;;  %v17356_v41 = vld [vmem:[#allocation6 + $0xdd0] sm:$0xff]  }
 0x80f   :  { %15293 = vmatprep.subr.bf16.mxu0 %v17323_v21  ;;  %15316 = vmatpush3.bf16.msra.mxu1 %v17326_v48  ;;  %v17353_v21 = vld [vmem:[#allocation6 + $0xd08] sm:$0xff]   ;;  %v17355_v48 = vld [vmem:[#allocation6 + $0xd50] sm:$0xff]  }
 0x810   :  { %15317 = vmatprep.subr.bf16.mxu1 %v17328_v28  ;;  %v17358_v28 = vld [vmem:[#allocation6 + $0xd90] sm:$0xff]  }
 0x812   :  { %15294 = vmatpush3.bf16.msra.mxu0 %v17325_v25  ;;  %v17360_v25 = vld [vmem:[#allocation6 + $0xdd8] sm:$0xff]  }
 0x813   :  { %15295 = vmatprep.subr.bf16.mxu0 %v17327_v63  ;;  %15318 = vmatpush3.bf16.msra.mxu1 %v17330_v3  ;;  %v17357_v63 = vld [vmem:[#allocation6 + $0xd10] sm:$0xff]   ;;  %v17359_v3 = vld [vmem:[#allocation6 + $0xd58] sm:$0xff]  }
 0x814   :  { %15319 = vmatprep.subr.bf16.mxu1 %v17332_v54  ;;  %v17364_v54 = vld [vmem:[#allocation6 + $0xde0] sm:$0xff]  }
 0x816   :  { %15296 = vmatpush3.bf16.msra.mxu0 %v17329_v10  ;;  %v17361_v10 = vld [vmem:[#allocation6 + $0xd18] sm:$0xff]  }
 0x817   :  { %15297 = vmatprep.subr.bf16.mxu0 %v17331_v30  ;;  %15320 = vmatpush3.bf16.msra.mxu1 %v17334_v29  ;;  %v17363_v30 = vld [vmem:[#allocation6 + $0xd60] sm:$0xff]  }
 0x818   :  { %15321 = vmatprep.subr.bf16.mxu1 %v17336_v18  ;;  %v17366_v29 = vld [vmem:[#allocation6 + $0xda0] sm:$0xff]   ;;  %v17368_v18 = vld [vmem:[#allocation6 + $0xde8] sm:$0xff]  }
 0x819   :  { %v15019_v47 = vpop.f32.mrb[172].mxu1 }
 0x81a   :  { %15298 = vmatpush3.bf16.msra.mxu0 %v17333_v49  ;;  %v15020_v20 = vpop.f32.mrb[173].mxu1  ;;  %v17365_v49 = vld [vmem:[#allocation6 + $0xd20] sm:$0xff]  }
 0x81b   :  { %15299 = vmatprep.subr.bf16.mxu0 %v17335_v32  ;;  %v15021_v33 = vadd.f32 %v15020_v20, %v15019_v47  ;;  %v15022_v5 = vpop.f32.mrb[174].mxu1  ;;  %15322 = vmatpush3.bf16.msra.mxu1 %v17338_v6  ;;  %v17367_v32 = vld [vmem:[#allocation6 + $0xd68] sm:$0xff]  }
 0x81c   :  { %v14997_v9 = vpop.f32.mrb[164].mxu0  ;;  %v15023_v62 = vpop.f32.mrb[175].mxu1  ;;  %15323 = vmatprep.subr.bf16.mxu1 %v17340_v51  ;;  %v17370_v6 = vld [vmem:[#allocation6 + $0xda8] sm:$0xff]   ;;  %v17372_v51 = vld [vmem:[#allocation6 + $0xdf0] sm:$0xff]  }
 0x81d   :  { %v14998_v50 = vpop.f32.mrb[165].mxu0 }
 0x81e   :  { %v14999_v40 = vadd.f32 %v14998_v50, %v14997_v9  ;;  %v15000_v31 = vpop.f32.mrb[166].mxu0  ;;  %15300 = vmatpush3.bf16.msra.mxu0 %v17337_v26  ;;  %v17369_v26 = vld [vmem:[#allocation6 + $0xd28] sm:$0xff]  }
 0x81f   :  { %v15001_v22 = vpop.f32.mrb[167].mxu0  ;;  %15301 = vmatprep.subr.bf16.mxu0 %v17339_v56  ;;  %15324 = vmatpush3.bf16.msra.mxu1 %v17342_v38  ;;  %v17371_v56 = vld [vmem:[#allocation6 + $0xd70] sm:$0xff]  }
 0x820   :  { %v9346_v4 = vadd.f32 %v14999_v40, %v20810_v55  ;;  %15325 = vmatprep.subr.bf16.mxu1 %v17344_v35  ;;  %v17349_v55 = vld [vmem:[#allocation6 + $0xd00] sm:$0xff]   ;;  %v17374_v38 = vld [vmem:[#allocation6 + $0xdb0] sm:$0xff]   ;;  %v17376_v35 = vld [vmem:[#allocation6 + $0xdf8] sm:$0xff]  }
 0x822   :  { %v9386_v59 = vadd.f32 %v15021_v33, %v9346_v4  ;;  %15302 = vmatpush3.bf16.msra.mxu0 %v17341_v23  ;;  %v17373_v23 = vld [vmem:[#allocation6 + $0xd30] sm:$0xff]  }
 0x823   :  { %15303 = vmatprep.subr.bf16.mxu0 %v17343_v27  ;;  %15326 = vmatpush3.bf16.msra.mxu1 %v17346_v12  ;;  %v17375_v27 = vld [vmem:[#allocation6 + $0xd78] sm:$0xff]  }
 0x824   :  { %v20826_v57 = vadd.f32 %v9386_v59, %v20814_v11  ;;  %15355 = vmatprep.subr.bf16.mxu1 %v17348_v42  ;;  %v11475_v11 = vpack.c.bf16 %v20693_v60, %v20693_v60  ;;  %v17362_v60 = vld [vmem:[#allocation6 + $0xd98] sm:$0xff]   ;;  %v17380_v42 = vld [vmem:[#allocation6 + $0xec0] sm:$0xff]  }
 0x825   :  { %v17378_v12 = vld [vmem:[#allocation6 + $0xdb8] sm:$0xff]  }
 0x826   :  { %15304 = vmatpush3.bf16.msra.mxu0 %v17345_v24  ;;  %11934 = vmatmul.mubr.bf16.vlgmr.msra.gmra.mrb[200].mxu1 %v11472_v2  ;;  %v17377_v59 = vld [vmem:[#allocation6 + $0xd38] sm:$0xff]   ;;  %v17379_v24 = vld [vmem:[#allocation6 + $0xe40] sm:$0xff]   ;;  %v17384_v2 = vld [vmem:[#allocation6 + $0xec8] sm:$0xff]  }
 0x827   :  { %15333 = vmatprep.subr.bf16.mxu0 %v17347_v7  ;;  %15356 = vmatpush3.bf16.msra.mxu1 %v17350_v36  ;;  %v17382_v7 = vld [vmem:[#allocation6 + $0xe80] sm:$0xff]   ;;  %v21458_v36 = vld [vmem:[#allocation90_spill] sm:$0xff] }
 0x828   :  { %12411 = vmatprep.mubr.bf16.mxu1 %v11989_v17  ;;  %15357 = vmatprep.subr.bf16.mxu1 %v17352_v53  ;;  %v11988_v58 = vpack.c.bf16 %v21458_v36, %v21458_v36  ;;  %v17381_v53 = vld [vmem:[#allocation6 + $0xe00] sm:$0xff]   ;;  %v17383_v17 = vld [vmem:[#allocation6 + $0xe48] sm:$0xff]  }
 0x829   :  { %11894 = vmatmul.mubr.bf16.vlgmr.msra.gmra.mrb[192].mxu0 %v11470_v52  ;;  %v17386_v52 = vld [vmem:[#allocation6 + $0xe88] sm:$0xff]  }
 0x82a   :  { %15334 = vmatpush3.bf16.msra.mxu0 %v17349_v55  ;;  %11973 = vmatprep.mubr.bf16.mxu0 %v11475_v11  ;;  %v11993_v55 = vpack.c.bf16 %v20709_v46, %v20709_v46  ;;  %v17385_v11 = vld [vmem:[#allocation6 + $0xe08] sm:$0xff]   ;;  %v17387_v46 = vld [vmem:[#allocation6 + $0xe50] sm:$0xff]  }
 0x82b   :  { %15335 = vmatprep.subr.bf16.mxu0 %v17351_v45  ;;  %15358 = vmatpush3.bf16.msra.mxu1 %v17354_v61  ;;  %v17388_v45 = vld [vmem:[#allocation6 + $0xed0] sm:$0xff]   ;;  %v17415_v36 = vld [vmem:[#allocation6 + $0xf48] sm:$0xff]  }
 0x82c   :  { %15359 = vmatprep.subr.bf16.mxu1 %v17356_v41  ;;  %v17390_v61 = vld [vmem:[#allocation6 + $0xe90] sm:$0xff]  }
 0x82d   :  { %v17389_v41 = vld [vmem:[#allocation6 + $0xe10] sm:$0xff]  }
 0x82e   :  { %15336 = vmatpush3.bf16.msra.mxu0 %v17353_v21  ;;  %v17391_v21 = vld [vmem:[#allocation6 + $0xe58] sm:$0xff]  }
 0x82f   :  { %15337 = vmatprep.subr.bf16.mxu0 %v17355_v48  ;;  %15360 = vmatpush3.bf16.msra.mxu1 %v17358_v28  ;;  %v17396_v48 = vld [vmem:[#allocation6 + $0xee0] sm:$0xff]   ;;  %v17393_v28 = vld [vmem:[#allocation6 + $0xe18] sm:$0xff]  }
 0x830   :  { %15361 = vmatprep.subr.bf16.mxu1 %v17360_v25  ;;  %v17395_v25 = vld [vmem:[#allocation6 + $0xe60] sm:$0xff]  }
 0x832   :  { %15338 = vmatpush3.bf16.msra.mxu0 %v17357_v63  ;;  %v17398_v63 = vld [vmem:[#allocation6 + $0xea0] sm:$0xff]  }
 0x833   :  { %15339 = vmatprep.subr.bf16.mxu0 %v17359_v3  ;;  %15362 = vmatpush3.bf16.msra.mxu1 %v17362_v60  ;;  %v17400_v3 = vld [vmem:[#allocation6 + $0xee8] sm:$0xff]   ;;  %v17397_v60 = vld [vmem:[#allocation6 + $0xe20] sm:$0xff]  }
 0x834   :  { %15363 = vmatprep.subr.bf16.mxu1 %v17364_v54  ;;  %v17399_v54 = vld [vmem:[#allocation6 + $0xe68] sm:$0xff]  }
 0x836   :  { %15340 = vmatpush3.bf16.msra.mxu0 %v17361_v10  ;;  %v17402_v10 = vld [vmem:[#allocation6 + $0xea8] sm:$0xff]  }
 0x837   :  { %15341 = vmatprep.subr.bf16.mxu0 %v17363_v30  ;;  %15364 = vmatpush3.bf16.msra.mxu1 %v17366_v29  ;;  %v17404_v30 = vld [vmem:[#allocation6 + $0xef0] sm:$0xff]  }
 0x838   :  { %15365 = vmatprep.subr.bf16.mxu1 %v17368_v18  ;;  %v17401_v18 = vld [vmem:[#allocation6 + $0xe28] sm:$0xff]  }
 0x839   :  { %v15063_v47 = vpop.f32.mrb[176].mxu1 }
 0x83a   :  { %15342 = vmatpush3.bf16.msra.mxu0 %v17365_v49  ;;  %v15064_v20 = vpop.f32.mrb[177].mxu1 }
 0x83b   :  { %15343 = vmatprep.subr.bf16.mxu0 %v17367_v32  ;;  %v15065_v33 = vadd.f32 %v15064_v20, %v15063_v47  ;;  %v15066_v5 = vpop.f32.mrb[178].mxu1  ;;  %15366 = vmatpush3.bf16.msra.mxu1 %v17370_v6  ;;  %v17403_v32 = vld [vmem:[#allocation6 + $0xe70] sm:$0xff]  }
 0x83c   :  { %v15041_v9 = vpop.f32.mrb[168].mxu0  ;;  %v15067_v62 = vpop.f32.mrb[179].mxu1  ;;  %15367 = vmatprep.subr.bf16.mxu1 %v17372_v51 }
 0x83d   :  { %v15042_v50 = vpop.f32.mrb[169].mxu0  ;;  %v17407_v62 = vld [vmem:[#allocation6 + $0xe78] sm:$0xff]  }
 0x83e   :  { %v15043_v40 = vadd.f32 %v15042_v50, %v15041_v9  ;;  %v15044_v31 = vpop.f32.mrb[170].mxu0  ;;  %15344 = vmatpush3.bf16.msra.mxu0 %v17369_v26  ;;  %v17406_v26 = vld [vmem:[#allocation6 + $0xeb0] sm:$0xff]   ;;  %v17408_v9 = vld [vmem:[#allocation6 + $0xef8] sm:$0xff]  }
 0x83f   :  { %v15045_v22 = vpop.f32.mrb[171].mxu0  ;;  %15345 = vmatprep.subr.bf16.mxu0 %v17371_v56  ;;  %15368 = vmatpush3.bf16.msra.mxu1 %v17374_v38  ;;  %v17405_v38 = vld [vmem:[#allocation6 + $0xe30] sm:$0xff]   ;;  %v17412_v31 = vld [vmem:[#allocation6 + $0xfc0] sm:$0xff]  }
 0x840   :  { %v20836_v4 = vadd.f32 %v15065_v33, %v15043_v40  ;;  %15369 = vmatprep.subr.bf16.mxu1 %v17376_v35  ;;  %v17410_v40 = vld [vmem:[#allocation6 + $0xeb8] sm:$0xff]  }
 0x841   :  { %v17409_v22 = vld [vmem:[#allocation6 + $0xe38] sm:$0xff]  }
 0x842   :  { %15346 = vmatpush3.bf16.msra.mxu0 %v17373_v23 }
 0x843   :  { %15347 = vmatprep.subr.bf16.mxu0 %v17375_v27  ;;  %15370 = vmatpush3.bf16.msra.mxu1 %v17378_v12  ;;  %v17411_v27 = vld [vmem:[#allocation6 + $0xf40] sm:$0xff]  }
 0x844   :  { %15399 = vmatprep.subr.bf16.mxu1 %v17380_v42  ;;  %v17414_v12 = vld [vmem:[#allocation6 + $0xf80] sm:$0xff]   ;;  %v11992_v42 = vpack.c.bf16 %v20703_v43, %v20703_v43  ;;  %v17420_v43 = vld [vmem:[#allocation6 + $0xfd0] sm:$0xff]  }
 0x846   :  { %15348 = vmatpush3.bf16.msra.mxu0 %v17377_v59  ;;  %12412 = vmatmul.mubr.bf16.vlgmr.msra.gmra.mrb[204].mxu1 %v11988_v58  ;;  %v17416_v59 = vld [vmem:[#allocation6 + $0xfc8] sm:$0xff]   ;;  %v21460_v58 = vld [vmem:[#allocation78_spill] sm:$0xff] }
 0x847   :  { %15377 = vmatprep.subr.bf16.mxu0 %v17379_v24  ;;  %15400 = vmatpush3.bf16.msra.mxu1 %v17382_v7  ;;  %v12509_v24 = vpack.c.bf16 %v20660_v15, %v20660_v15  ;;  %v21459_v7 = vld [vmem:[#allocation86_spill] sm:$0xff] }
 0x848   :  { %12491 = vmatprep.mubr.bf16.mxu1 %v11993_v55  ;;  %15401 = vmatprep.subr.bf16.mxu1 %v17384_v2  ;;  %v12507_v2 = vpack.c.bf16 %v21460_v58, %v21460_v58  ;;  %v17417_v55 = vld [vmem:[#allocation6 + $0xf08] sm:$0xff]   ;;  %v17419_v15 = vld [vmem:[#allocation6 + $0xf50] sm:$0xff]   ;;  %v17456_v58 = vld [vmem:[#allocation6 + $0x10d8] sm:$0xff]  }
 0x849   :  { %11974 = vmatmul.mubr.bf16.vlgmr.msra.gmra.mrb[196].mxu0 %v11474_v44  ;;  %v17422_v44 = vld [vmem:[#allocation6 + $0xf90] sm:$0xff]  }
 0x84a   :  { %15378 = vmatpush3.bf16.msra.mxu0 %v17381_v53  ;;  %12451 = vmatprep.mubr.bf16.mxu0 %v11991_v0  ;;  %v17418_v53 = vld [vmem:[#allocation6 + $0xf88] sm:$0xff]   ;;  %v17421_v0 = vld [vmem:[#allocation6 + $0xf10] sm:$0xff]  }
 0x84b   :  { %15379 = vmatprep.subr.bf16.mxu0 %v17383_v17  ;;  %15402 = vmatpush3.bf16.msra.mxu1 %v17386_v52  ;;  %v17424_v17 = vld [vmem:[#allocation6 + $0xfd8] sm:$0xff]  }
 0x84c   :  { %15403 = vmatprep.subr.bf16.mxu1 %v17388_v45  ;;  %v17423_v52 = vld [vmem:[#allocation6 + $0xf58] sm:$0xff]  }
 0x84d   :  { %v17426_v45 = vld [vmem:[#allocation6 + $0xf98] sm:$0xff]  }
 0x84e   :  { %15380 = vmatpush3.bf16.msra.mxu0 %v17385_v11  ;;  %v17428_v11 = vld [vmem:[#allocation6 + $0xfe0] sm:$0xff]  }
 0x84f   :  { %15381 = vmatprep.subr.bf16.mxu0 %v17387_v46  ;;  %15404 = vmatpush3.bf16.msra.mxu1 %v17390_v61  ;;  %v17425_v46 = vld [vmem:[#allocation6 + $0xf18] sm:$0xff]   ;;  %v17427_v61 = vld [vmem:[#allocation6 + $0xf60] sm:$0xff]  }
 0x850   :  { %15405 = vmatprep.subr.bf16.mxu1 %v17392_v34  ;;  %v17430_v34 = vld [vmem:[#allocation6 + $0xfa0] sm:$0xff]  }
 0x852   :  { %15382 = vmatpush3.bf16.msra.mxu0 %v17389_v41  ;;  %v17432_v41 = vld [vmem:[#allocation6 + $0xfe8] sm:$0xff]  }
 0x853   :  { %15383 = vmatprep.subr.bf16.mxu0 %v17391_v21  ;;  %15406 = vmatpush3.bf16.msra.mxu1 %v17394_v19  ;;  %v17429_v21 = vld [vmem:[#allocation6 + $0xf20] sm:$0xff]   ;;  %v17431_v19 = vld [vmem:[#allocation6 + $0xf68] sm:$0xff]  }
 0x854   :  { %15407 = vmatprep.subr.bf16.mxu1 %v17396_v48  ;;  %v17434_v48 = vld [vmem:[#allocation6 + $0xfa8] sm:$0xff]  }
 0x856   :  { %15384 = vmatpush3.bf16.msra.mxu0 %v17393_v28  ;;  %v17436_v28 = vld [vmem:[#allocation6 + $0xff0] sm:$0xff]  }
 0x857   :  { %15385 = vmatprep.subr.bf16.mxu0 %v17395_v25  ;;  %15408 = vmatpush3.bf16.msra.mxu1 %v17398_v63  ;;  %v17433_v63 = vld [vmem:[#allocation6 + $0xf28] sm:$0xff]  }
 0x858   :  { %15409 = vmatprep.subr.bf16.mxu1 %v17400_v3 }
 0x859   :  { %v15107_v29 = vpop.f32.mrb[180].mxu1 }
 0x85a   :  { %15386 = vmatpush3.bf16.msra.mxu0 %v17397_v60  ;;  %v15108_v49 = vpop.f32.mrb[181].mxu1  ;;  %v17435_v60 = vld [vmem:[#allocation6 + $0xf70] sm:$0xff]  }
 0x85b   :  { %15387 = vmatprep.subr.bf16.mxu0 %v17399_v54  ;;  %v20846_v51 = vadd.f32 %v15108_v49, %v15107_v29  ;;  %v15110_v47 = vpop.f32.mrb[182].mxu1  ;;  %15410 = vmatpush3.bf16.msra.mxu1 %v17402_v10  ;;  %v17438_v29 = vld [vmem:[#allocation6 + $0xfb0] sm:$0xff]  }
 0x85c   :  { %v15085_v6 = vpop.f32.mrb[172].mxu0  ;;  %v15111_v56 = vpop.f32.mrb[183].mxu1  ;;  %15411 = vmatprep.subr.bf16.mxu1 %v17404_v30 }
 0x85d   :  { %v15086_v20 = vpop.f32.mrb[173].mxu0  ;;  %v17439_v56 = vld [vmem:[#allocation6 + $0xf78] sm:$0xff]  }
 0x85e   :  { %v15087_v33 = vadd.f32 %v15086_v20, %v15085_v6  ;;  %v15088_v5 = vpop.f32.mrb[174].mxu0  ;;  %15388 = vmatpush3.bf16.msra.mxu0 %v17401_v18 }
 0x85f   :  { %v15089_v50 = vpop.f32.mrb[175].mxu0  ;;  %15389 = vmatprep.subr.bf16.mxu0 %v17403_v32  ;;  %15412 = vmatpush3.bf16.msra.mxu1 %v17406_v26  ;;  %v17440_v32 = vld [vmem:[#allocation6 + $0xff8] sm:$0xff]   ;;  %v17437_v26 = vld [vmem:[#allocation6 + $0xf30] sm:$0xff]   ;;  %v17444_v5 = vld [vmem:[#allocation6 + $0x10c0] sm:$0xff]  }
 0x860   :  { %v9904_v35 = vadd.f32 %v15087_v33, %v20836_v4  ;;  %15413 = vmatprep.subr.bf16.mxu1 %v17408_v9  ;;  %v17413_v4 = vld [vmem:[#allocation6 + $0xf00] sm:$0xff]   ;;  %v17442_v33 = vld [vmem:[#allocation6 + $0xfb8] sm:$0xff]  }
 0x861   :  { %v17441_v50 = vld [vmem:[#allocation6 + $0xf38] sm:$0xff]  }
 0x862   :  { %v20850_v23 = vadd.f32 %v9904_v35, %v20826_v57  ;;  %15390 = vmatpush3.bf16.msra.mxu0 %v17405_v38  ;;  %v11990_v57 = vpack.c.bf16 %v21459_v7, %v21459_v7  ;;  %v17449_v7 = vld [vmem:[#allocation6 + $0x1008] sm:$0xff]  }
 0x863   :  { %15391 = vmatprep.subr.bf16.mxu0 %v17407_v62  ;;  %15414 = vmatpush3.bf16.msra.mxu1 %v17410_v40  ;;  %v17443_v62 = vld [vmem:[#allocation6 + $0x1040] sm:$0xff]  }
 0x864   :  { %15443 = vmatprep.subr.bf16.mxu1 %v17412_v31  ;;  %v17446_v40 = vld [vmem:[#allocation6 + $0x1080] sm:$0xff]   ;;  %v12508_v31 = vpack.c.bf16 %v20621_v37, %v20621_v37  ;;  %v17452_v37 = vld [vmem:[#allocation6 + $0x10d0] sm:$0xff]  }
 0x866   :  { %15392 = vmatpush3.bf16.msra.mxu0 %v17409_v22  ;;  %12492 = vmatmul.mubr.bf16.vlgmr.msra.gmra.mrb[208].mxu1 %v11992_v42  ;;  %v17448_v22 = vld [vmem:[#allocation6 + $0x10c8] sm:$0xff]  }
 0x867   :  { %15421 = vmatprep.subr.bf16.mxu0 %v17411_v27  ;;  %15444 = vmatpush3.bf16.msra.mxu1 %v17414_v12  ;;  %v21461_v27 = vld [vmem:[#allocation94_spill] sm:$0xff]  ;;  %v21462_v42 = vld [vmem:[#allocation24_spill] sm:$0xff] }
 0x868   :  { %12969 = vmatprep.mubr.bf16.mxu1 %v12509_v24  ;;  %15445 = vmatprep.subr.bf16.mxu1 %v17416_v59  ;;  %v13025_v12 = vpack.c.bf16 %v21461_v27, %v21461_v27  ;;  %v12506_v59 = vpack.c.bf16 %v21462_v42, %v21462_v42  ;;  %v17450_v24 = vld [vmem:[#allocation6 + $0x1088] sm:$0xff]   ;;  %v17485_v27 = vld [vmem:[#allocation6 + $0x1110] sm:$0xff]   ;;  %v17492_v42 = vld [vmem:[#allocation6 + $0x11e0] sm:$0xff]  }
 0x869   :  { %12452 = vmatmul.mubr.bf16.vlgmr.msra.gmra.mrb[200].mxu0 %v11990_v57  ;;  %v17451_v57 = vld [vmem:[#allocation6 + $0x1050] sm:$0xff]  }
 0x86a   :  { %15422 = vmatpush3.bf16.msra.mxu0 %v17413_v4  ;;  %12929 = vmatprep.mubr.bf16.mxu0 %v12507_v2  ;;  %v17447_v4 = vld [vmem:[#allocation6 + $0x1048] sm:$0xff]   ;;  %v17453_v2 = vld [vmem:[#allocation6 + $0x1010] sm:$0xff]  }
 0x86b   :  { %15423 = vmatprep.subr.bf16.mxu0 %v17415_v36  ;;  %15446 = vmatpush3.bf16.msra.mxu1 %v17418_v53  ;;  %v17454_v36 = vld [vmem:[#allocation6 + $0x1090] sm:$0xff]   ;;  %v17455_v53 = vld [vmem:[#allocation6 + $0x1058] sm:$0xff]  }
 0x86c   :  { %15447 = vmatprep.subr.bf16.mxu1 %v17420_v43  ;;  %v17460_v43 = vld [vmem:[#allocation6 + $0x10e0] sm:$0xff]  }
 0x86e   :  { %15424 = vmatpush3.bf16.msra.mxu0 %v17417_v55  ;;  %v17457_v55 = vld [vmem:[#allocation6 + $0x1018] sm:$0xff]  }
 0x86f   :  { %15425 = vmatprep.subr.bf16.mxu0 %v17419_v15  ;;  %15448 = vmatpush3.bf16.msra.mxu1 %v17422_v44  ;;  %v17459_v15 = vld [vmem:[#allocation6 + $0x1060] sm:$0xff]  }
 0x870   :  { %15449 = vmatprep.subr.bf16.mxu1 %v17424_v17  ;;  %v17462_v44 = vld [vmem:[#allocation6 + $0x10a0] sm:$0xff]   ;;  %v17464_v17 = vld [vmem:[#allocation6 + $0x10e8] sm:$0xff]  }
 0x872   :  { %15426 = vmatpush3.bf16.msra.mxu0 %v17421_v0  ;;  %v17461_v0 = vld [vmem:[#allocation6 + $0x1020] sm:$0xff]  }
 0x873   :  { %15427 = vmatprep.subr.bf16.mxu0 %v17423_v52  ;;  %15450 = vmatpush3.bf16.msra.mxu1 %v17426_v45  ;;  %v17463_v52 = vld [vmem:[#allocation6 + $0x1068] sm:$0xff]  }
 0x874   :  { %15451 = vmatprep.subr.bf16.mxu1 %v17428_v11  ;;  %v17466_v45 = vld [vmem:[#allocation6 + $0x10a8] sm:$0xff]   ;;  %v17468_v11 = vld [vmem:[#allocation6 + $0x10f0] sm:$0xff]  }
 0x876   :  { %15428 = vmatpush3.bf16.msra.mxu0 %v17425_v46 }
 0x877   :  { %15429 = vmatprep.subr.bf16.mxu0 %v17427_v61  ;;  %15452 = vmatpush3.bf16.msra.mxu1 %v17430_v34  ;;  %v17465_v61 = vld [vmem:[#allocation6 + $0x1028] sm:$0xff]  }
 0x878   :  { %15453 = vmatprep.subr.bf16.mxu1 %v17432_v41  ;;  %v17467_v41 = vld [vmem:[#allocation6 + $0x1070] sm:$0xff]  }
 0x879   :  { %v15151_v25 = vpop.f32.mrb[184].mxu1 }
 0x87a   :  { %15430 = vmatpush3.bf16.msra.mxu0 %v17429_v21  ;;  %v15152_v3 = vpop.f32.mrb[185].mxu1 }
 0x87b   :  { %15431 = vmatprep.subr.bf16.mxu0 %v17431_v19  ;;  %v15153_v10 = vadd.f32 %v15152_v3, %v15151_v25  ;;  %v15154_v30 = vpop.f32.mrb[186].mxu1  ;;  %15454 = vmatpush3.bf16.msra.mxu1 %v17434_v48  ;;  %v17472_v3 = vld [vmem:[#allocation6 + $0x10f8] sm:$0xff]  }
 0x87c   :  { %v15129_v54 = vpop.f32.mrb[176].mxu0  ;;  %v15155_v49 = vpop.f32.mrb[187].mxu1  ;;  %15455 = vmatprep.subr.bf16.mxu1 %v17436_v28  ;;  %v17470_v28 = vld [vmem:[#allocation6 + $0x10b0] sm:$0xff]  }
 0x87d   :  { %v15130_v18 = vpop.f32.mrb[177].mxu0  ;;  %v17474_v49 = vld [vmem:[#allocation6 + $0x10b8] sm:$0xff]  }
 0x87e   :  { %v15131_v6 = vadd.f32 %v15130_v18, %v15129_v54  ;;  %v15132_v47 = vpop.f32.mrb[178].mxu0  ;;  %15432 = vmatpush3.bf16.msra.mxu0 %v17433_v63 }
 0x87f   :  { %v15133_v20 = vpop.f32.mrb[179].mxu0  ;;  %15433 = vmatprep.subr.bf16.mxu0 %v17435_v60  ;;  %15456 = vmatpush3.bf16.msra.mxu1 %v17438_v29  ;;  %v17471_v29 = vld [vmem:[#allocation6 + $0x1078] sm:$0xff]   ;;  %v17475_v47 = vld [vmem:[#allocation6 + $0x1140] sm:$0xff]  }
 0x880   :  { %v10382_v9 = vadd.f32 %v15131_v6, %v20846_v51  ;;  %15457 = vmatprep.subr.bf16.mxu1 %v17440_v32  ;;  %v17445_v51 = vld [vmem:[#allocation6 + $0x1000] sm:$0xff]   ;;  %v17473_v6 = vld [vmem:[#allocation6 + $0x1038] sm:$0xff]   ;;  %v21463_v20 = vld [vmem:[#allocation25_spill] sm:$0xff] }
 0x881   :  { %v17476_v32 = vld [vmem:[#allocation6 + $0x11c0] sm:$0xff]  }
 0x882   :  { %v10422_v38 = vadd.f32 %v15153_v10, %v10382_v9  ;;  %15434 = vmatpush3.bf16.msra.mxu0 %v17437_v26  ;;  %v17469_v10 = vld [vmem:[#allocation6 + $0x1030] sm:$0xff]   ;;  %v17478_v26 = vld [vmem:[#allocation6 + $0x1180] sm:$0xff]   ;;  %v17480_v9 = vld [vmem:[#allocation6 + $0x11c8] sm:$0xff]  }
 0x883   :  { %15435 = vmatprep.subr.bf16.mxu0 %v17439_v56  ;;  %15458 = vmatpush3.bf16.msra.mxu1 %v17442_v33  ;;  %v13024_v56 = vpack.c.bf16 %v21463_v20, %v21463_v20  ;;  %v17477_v33 = vld [vmem:[#allocation6 + $0x1100] sm:$0xff]  }
 0x884   :  { %v20862_v35 = vadd.f32 %v10422_v38, %v20850_v23  ;;  %15487 = vmatprep.subr.bf16.mxu1 %v17444_v5  ;;  %v12511_v23 = vpack.c.bf16 %v20733_v1, %v20733_v1  ;;  %v17458_v1 = vld [vmem:[#allocation6 + $0x1098] sm:$0xff]   ;;  %v13029_v5 = vpack.c.bf16 %v20739_v8, %v20739_v8  ;;  %v12510_v38 = vpack.c.bf16 %v20725_v13, %v20725_v13  ;;  %v17483_v8 = vld [vmem:[#allocation6 + $0x1150] sm:$0xff]  }
 0x885   :  { %v17488_v13 = vld [vmem:[#allocation6 + $0x11d8] sm:$0xff]  }
 0x886   :  { %15436 = vmatpush3.bf16.msra.mxu0 %v17441_v50  ;;  %12970 = vmatmul.mubr.bf16.vlgmr.msra.gmra.mrb[212].mxu1 %v12508_v31  ;;  %v17479_v50 = vld [vmem:[#allocation6 + $0x1148] sm:$0xff]   ;;  %v17484_v31 = vld [vmem:[#allocation6 + $0x11d0] sm:$0xff]  }
 0x887   :  { %15465 = vmatprep.subr.bf16.mxu0 %v17443_v62  ;;  %15488 = vmatpush3.bf16.msra.mxu1 %v17446_v40  ;;  %v13027_v62 = vpack.c.bf16 %v20667_v39, %v20667_v39  ;;  %v17482_v40 = vld [vmem:[#allocation6 + $0x1188] sm:$0xff]   ;;  %v17490_v39 = vld [vmem:[#allocation6 + $0x1198] sm:$0xff]  }
 0x888   :  { %13447 = vmatprep.mubr.bf16.mxu1 %v13025_v12  ;;  %15489 = vmatprep.subr.bf16.mxu1 %v17448_v22  ;;  %v17481_v22 = vld [vmem:[#allocation6 + $0x1108] sm:$0xff]   ;;  %v17487_v12 = vld [vmem:[#allocation6 + $0x1158] sm:$0xff]  }
 0x889   :  { %12930 = vmatmul.mubr.bf16.vlgmr.msra.gmra.mrb[204].mxu0 %v12506_v59  ;;  %v17489_v59 = vld [vmem:[#allocation6 + $0x1118] sm:$0xff]  }
 0x88a   :  { %15466 = vmatpush3.bf16.msra.mxu0 %v17445_v51  ;;  %13009 = vmatprep.mubr.bf16.mxu0 %v12511_v23  ;;  %v17486_v51 = vld [vmem:[#allocation6 + $0x1190] sm:$0xff]   ;;  %v17494_v23 = vld [vmem:[#allocation6 + $0x11a0] sm:$0xff]  }
 0x88b   :  { %15467 = vmatprep.subr.bf16.mxu0 %v17447_v4  ;;  %15490 = vmatpush3.bf16.msra.mxu1 %v17450_v24  ;;  %v17491_v4 = vld [vmem:[#allocation6 + $0x1160] sm:$0xff]   ;;  %v17496_v24 = vld [vmem:[#allocation6 + $0x11e8] sm:$0xff]  }
 0x88c   :  { %15491 = vmatprep.subr.bf16.mxu1 %v17452_v37  ;;  %v17493_v37 = vld [vmem:[#allocation6 + $0x1120] sm:$0xff]  }
 0x88e   :  { %15468 = vmatpush3.bf16.msra.mxu0 %v17449_v7  ;;  %v17495_v7 = vld [vmem:[#allocation6 + $0x1168] sm:$0xff]  }
 0x88f   :  { %15469 = vmatprep.subr.bf16.mxu0 %v17451_v57  ;;  %15492 = vmatpush3.bf16.msra.mxu1 %v17454_v36  ;;  %v17498_v57 = vld [vmem:[#allocation6 + $0x11a8] sm:$0xff]   ;;  %v17500_v36 = vld [vmem:[#allocation6 + $0x11f0] sm:$0xff]  }
 0x890   :  { %15493 = vmatprep.subr.bf16.mxu1 %v17456_v58 }
 0x892   :  { %15470 = vmatpush3.bf16.msra.mxu0 %v17453_v2  ;;  %v17497_v2 = vld [vmem:[#allocation6 + $0x1128] sm:$0xff]  }
 0x893   :  { %15471 = vmatprep.subr.bf16.mxu0 %v17455_v53  ;;  %15494 = vmatpush3.bf16.msra.mxu1 %v17458_v1  ;;  %v17499_v1 = vld [vmem:[#allocation6 + $0x1170] sm:$0xff]  }
 0x894   :  { %15495 = vmatprep.subr.bf16.mxu1 %v17460_v43 }
 0x896   :  { %15472 = vmatpush3.bf16.msra.mxu0 %v17457_v55 }
 0x897   :  { %15473 = vmatprep.subr.bf16.mxu0 %v17459_v15  ;;  %15496 = vmatpush3.bf16.msra.mxu1 %v17462_v44  ;;  %v17502_v44 = vld [vmem:[#allocation6 + $0x11b0] sm:$0xff]  }
 0x898   :  { %15497 = vmatprep.subr.bf16.mxu1 %v17464_v17 }
 0x899   :  { %v15195_v46 = vpop.f32.mrb[188].mxu1 }
 0x89a   :  { %15474 = vmatpush3.bf16.msra.mxu0 %v17461_v0  ;;  %v15196_v34 = vpop.f32.mrb[189].mxu1 }
 0x89b   :  { %15475 = vmatprep.subr.bf16.mxu0 %v17463_v52  ;;  %v15197_v19 = vadd.f32 %v15196_v34, %v15195_v46  ;;  %v15198_v48 = vpop.f32.mrb[190].mxu1  ;;  %15498 = vmatpush3.bf16.msra.mxu1 %v17466_v45  ;;  %v17504_v52 = vld [vmem:[#allocation6 + $0x11f8] sm:$0xff]   ;;  %v17501_v46 = vld [vmem:[#allocation6 + $0x1130] sm:$0xff]  }
 0x89c   :  { %v15173_v21 = vpop.f32.mrb[180].mxu0  ;;  %v15199_v63 = vpop.f32.mrb[191].mxu1  ;;  %15499 = vmatprep.subr.bf16.mxu1 %v17468_v11  ;;  %v17503_v34 = vld [vmem:[#allocation6 + $0x1178] sm:$0xff]  }
 0x89d   :  { %v15174_v25 = vpop.f32.mrb[181].mxu0  ;;  %v17505_v48 = vld [vmem:[#allocation6 + $0x1138] sm:$0xff]  }
 0x89e   :  { %v15175_v60 = vadd.f32 %v15174_v25, %v15173_v21  ;;  %v15176_v54 = vpop.f32.mrb[182].mxu0  ;;  %15476 = vmatpush3.bf16.msra.mxu0 %v17465_v61  ;;  %v17506_v21 = vld [vmem:[#allocation6 + $0x11b8] sm:$0xff]   ;;  %v13026_v25 = vpack.c.bf16 %v20655_v14, %v20655_v14 }
 0x89f   :  { %v15177_v30 = vpop.f32.mrb[183].mxu0  ;;  %15477 = vmatprep.subr.bf16.mxu0 %v17467_v41  ;;  %15500 = vmatpush3.bf16.msra.mxu1 %v17470_v28  ;;  %v13028_v28 = vpack.c.bf16 %v20737_v16, %v20737_v16 }
 0x8a0   :  { %v20872_v18 = vadd.f32 %v15197_v19, %v15175_v60  ;;  %15501 = vmatprep.subr.bf16.mxu1 %v17472_v3 }
 0x8a2   :  { %15478 = vmatpush3.bf16.msra.mxu0 %v17469_v10 }
 0x8a3   :  { %15479 = vmatprep.subr.bf16.mxu0 %v17471_v29  ;;  %15502 = vmatpush3.bf16.msra.mxu1 %v17474_v49 }
 0x8a4   :  { %15531 = vmatprep.subr.bf16.mxu1 %v17476_v32 }
 0x8a6   :  { %15480 = vmatpush3.bf16.msra.mxu0 %v17473_v6  ;;  %13448 = vmatmul.mubr.bf16.vlgmr.msra.gmra.mrb[216].mxu1 %v13024_v56 }
 0x8a7   :  { %15509 = vmatprep.subr.bf16.mxu0 %v17475_v47  ;;  %15532 = vmatpush3.bf16.msra.mxu1 %v17478_v26 }
 0x8a8   :  { %13527 = vmatprep.mubr.bf16.mxu1 %v13029_v5  ;;  %15533 = vmatprep.subr.bf16.mxu1 %v17480_v9 }
 0x8a9   :  { %13010 = vmatmul.mubr.bf16.vlgmr.msra.gmra.mrb[208].mxu0 %v12510_v38 }
 0x8aa   :  { %15510 = vmatpush3.bf16.msra.mxu0 %v17477_v33  ;;  %13487 = vmatprep.mubr.bf16.mxu0 %v13027_v62 }
 0x8ab   :  { %15511 = vmatprep.subr.bf16.mxu0 %v17479_v50  ;;  %15534 = vmatpush3.bf16.msra.mxu1 %v17482_v40  ;;  %v17507_v40 = vld [vmem:[#allocation9] sm:$0xff]  }
 0x8ac   :  { %15535 = vmatprep.subr.bf16.mxu1 %v17484_v31  ;;  %v17668_v31 = vmov 0.0  }
 0x8ae   :  { %15512 = vmatpush3.bf16.msra.mxu0 %v17481_v22  ;;  %v17508_v22 = vld [vmem:[#allocation9 + $0x8] sm:$0xff]  }
 0x8af   :  { %15513 = vmatprep.subr.bf16.mxu0 %v17483_v8  ;;  %15536 = vmatpush3.bf16.msra.mxu1 %v17486_v51  ;;  %v17509_v8 = vld [vmem:[#allocation9 + $0x10] sm:$0xff]   ;;  %v17510_v51 = vld [vmem:[#allocation9 + $0x18] sm:$0xff]  }
 0x8b0   :  { %15537 = vmatprep.subr.bf16.mxu1 %v17488_v13  ;;  %v17511_v13 = vld [vmem:[#allocation9 + $0x20] sm:$0xff]  }
 0x8b2   :  { %15514 = vmatpush3.bf16.msra.mxu0 %v17485_v27 }
 0x8b3   :  { %15515 = vmatprep.subr.bf16.mxu0 %v17487_v12  ;;  %15538 = vmatpush3.bf16.msra.mxu1 %v17490_v39 }
 0x8b4   :  { %15539 = vmatprep.subr.bf16.mxu1 %v17492_v42 }
 0x8b6   :  { %15516 = vmatpush3.bf16.msra.mxu0 %v17489_v59 }
 0x8b7   :  { %15517 = vmatprep.subr.bf16.mxu0 %v17491_v4  ;;  %15540 = vmatpush3.bf16.msra.mxu1 %v17494_v23 }
 0x8b8   :  { %15541 = vmatprep.subr.bf16.mxu1 %v17496_v24 }
 0x8b9   :  { %v15239_v58 = vpop.f32.mrb[192].mxu1 }
 0x8ba   :  { %15518 = vmatpush3.bf16.msra.mxu0 %v17493_v37  ;;  %v15240_v53 = vpop.f32.mrb[193].mxu1 }
 0x8bb   :  { %15519 = vmatprep.subr.bf16.mxu0 %v17495_v7  ;;  %v15241_v55 = vadd.f32 %v15240_v53, %v15239_v58  ;;  %v15242_v15 = vpop.f32.mrb[194].mxu1  ;;  %15542 = vmatpush3.bf16.msra.mxu1 %v17498_v57  ;;  %v17512_v58 = vld [vmem:[#allocation9 + $0x28] sm:$0xff]   ;;  %v17514_v53 = vld [vmem:[#allocation9 + $0x38] sm:$0xff]  }
 0x8bc   :  { %v15217_v43 = vpop.f32.mrb[184].mxu0  ;;  %v15243_v0 = vpop.f32.mrb[195].mxu1  ;;  %15543 = vmatprep.subr.bf16.mxu1 %v17500_v36 }
 0x8bd   :  { %v15218_v17 = vpop.f32.mrb[185].mxu0 }
 0x8be   :  { %v15219_v45 = vadd.f32 %v15218_v17, %v15217_v43  ;;  %v15220_v11 = vpop.f32.mrb[186].mxu0  ;;  %15520 = vmatpush3.bf16.msra.mxu0 %v17497_v2  ;;  %v17513_v2 = vld [vmem:[#allocation9 + $0x30] sm:$0xff]  }
 0x8bf   :  { %v15221_v61 = vpop.f32.mrb[187].mxu0  ;;  %15521 = vmatprep.subr.bf16.mxu0 %v17499_v1  ;;  %15544 = vmatpush3.bf16.msra.mxu1 %v17502_v44 }
 0x8c0   :  { %v10940_v41 = vadd.f32 %v15219_v45, %v20872_v18  ;;  %15545 = vmatprep.subr.bf16.mxu1 %v17504_v52 }
 0x8c2   :  { %v10945_v19 = vadd.f32 %v10940_v41, %v20862_v35  ;;  %15522 = vmatpush3.bf16.msra.mxu0 %v17501_v46 }
 0x8c3   :  { %15523 = vmatprep.subr.bf16.mxu0 %v17503_v34  ;;  %15546 = vmatpush3.bf16.msra.mxu1 %v17506_v21 }
 0x8c6   :  { %15524 = vmatpush3.bf16.msra.mxu0 %v17505_v48  ;;  %13528 = vmatmul.mubr.bf16.vlgmr.msra.gmra.mrb[220].mxu1 %v13028_v28 }
 0x8c7   :  { %15562 = vmatprep.subr.bf16.mxu0 %v17668_v31 }
 0x8c9   :  { %13488 = vmatmul.mubr.bf16.vlgmr.msra.gmra.mrb[212].mxu0 %v13026_v25 }
 0x8ca   :  { %15563 = vmatpush3.bf16.msra.mxu0 %v17507_v40  ;;  %15578 = vmatprep.mubr.msk.bf16.mxu0 %vm17669_vm2, %v17668_v31 }
 0x8cb   :  { %15564 = vmatprep.subr.bf16.mxu0 %v17668_v31 }
 0x8ce   :  { %15565 = vmatpush3.bf16.msra.mxu0 %v17508_v22 }
 0x8cf   :  { %15566 = vmatprep.subr.bf16.mxu0 %v17668_v31 }
 0x8d2   :  { %15567 = vmatpush3.bf16.msra.mxu0 %v17509_v8 }
 0x8d3   :  { %15568 = vmatprep.subr.bf16.mxu0 %v17668_v31 }
 0x8d6   :  { %15569 = vmatpush3.bf16.msra.mxu0 %v17510_v51 }
 0x8d7   :  { %15570 = vmatprep.subr.bf16.mxu0 %v17668_v31 }
 0x8d9   :  { %v15283_v63 = vpop.f32.mrb[196].mxu1 }
 0x8da   :  { %v15284_v3 = vpop.f32.mrb[197].mxu1  ;;  %15571 = vmatpush3.bf16.msra.mxu0 %v17511_v13  ;;  %v14751_v13 = vld [vmem:[#allocation7] ss:$0 sm:$0xff] }
 0x8db   :  { %v15285_v54 = vadd.f32 %v15284_v3, %v15283_v63  ;;  %v15286_v10 = vpop.f32.mrb[198].mxu1  ;;  %15572 = vmatprep.subr.bf16.mxu0 %v17668_v31 }
 0x8dc   :  { %v15261_v60 = vpop.f32.mrb[188].mxu0  ;;  %v15287_v35 = vpop.f32.mrb[199].mxu1 }
 0x8dd   :  { %v15262_v30 = vpop.f32.mrb[189].mxu0 }
 0x8de   :  { %v15263_v29 = vadd.f32 %v15262_v30, %v15261_v60  ;;  %v15264_v18 = vpop.f32.mrb[190].mxu0  ;;  %15573 = vmatpush3.bf16.msra.mxu0 %v17512_v58 }
 0x8df   :  { %v15265_v49 = vpop.f32.mrb[191].mxu0  ;;  %15574 = vmatprep.subr.bf16.mxu0 %v17668_v31 }
 0x8e0   :  { %v11418_v32 = vadd.f32 %v15263_v29, %v15241_v55 }
 0x8e2   :  { %v11458_v6 = vadd.f32 %v15285_v54, %v11418_v32  ;;  %15575 = vmatpush3.bf16.msra.mxu0 %v17513_v2 }
 0x8e3   :  { %15576 = vmatprep.subr.bf16.mxu0 %v17668_v31 }
 0x8e4   :  { %v11463_v47 = vadd.f32 %v11458_v6, %v10945_v19 }
 0x8e6   :  { %15577 = vmatpush3.bf16.msra.mxu0 %v17514_v53 }
 0x8f9   :  { %v15327_v16 = vpop.f32.mrb[200].mxu1 }
 0x8fa   :  { %v15328_v26 = vpop.f32.mrb[201].mxu1 }
 0x8fb   :  { %v15329_v56 = vadd.f32 %v15328_v26, %v15327_v16  ;;  %v15330_v14 = vpop.f32.mrb[202].mxu1 }
 0x8fc   :  { %v15305_v20 = vpop.f32.mrb[192].mxu0  ;;  %v15331_v33 = vpop.f32.mrb[203].mxu1 }
 0x8fd   :  { %v15306_v9 = vpop.f32.mrb[193].mxu0 }
 0x8fe   :  { %v15307_v5 = vadd.f32 %v15306_v9, %v15305_v20  ;;  %v15308_v38 = vpop.f32.mrb[194].mxu0 }
 0x8ff   :  { %v15309_v50 = vpop.f32.mrb[195].mxu0 }
 0x900   :  { %v11936_v62 = vadd.f32 %v15329_v56, %v15307_v5 }
 0x919   :  { %v15371_v27 = vpop.f32.mrb[204].mxu1 }
 0x91a   :  { %v15372_v12 = vpop.f32.mrb[205].mxu1 }
 0x91b   :  { %v15373_v42 = vadd.f32 %v15372_v12, %v15371_v27  ;;  %v15374_v59 = vpop.f32.mrb[206].mxu1 }
 0x91c   :  { %v15349_v39 = vpop.f32.mrb[196].mxu0  ;;  %v15375_v23 = vpop.f32.mrb[207].mxu1 }
 0x91d   :  { %v15350_v4 = vpop.f32.mrb[197].mxu0 }
 0x91e   :  { %v15351_v24 = vadd.f32 %v15350_v4, %v15349_v39  ;;  %v15352_v37 = vpop.f32.mrb[198].mxu0 }
 0x91f   :  { %v15353_v7 = vpop.f32.mrb[199].mxu0 }
 0x920   :  { %v11976_v57 = vadd.f32 %v15351_v24, %v11936_v62 }
 0x922   :  { %v11981_v36 = vadd.f32 %v11976_v57, %v11463_v47 }
 0x939   :  { %v15415_v1 = vpop.f32.mrb[208].mxu1 }
 0x93a   :  { %v15416_v43 = vpop.f32.mrb[209].mxu1 }
 0x93b   :  { %v15417_v15 = vadd.f32 %v15416_v43, %v15415_v1  ;;  %v15418_v44 = vpop.f32.mrb[210].mxu1 }
 0x93c   :  { %v15393_v55 = vpop.f32.mrb[200].mxu0  ;;  %v15419_v0 = vpop.f32.mrb[211].mxu1 }
 0x93d   :  { %v15394_v17 = vpop.f32.mrb[201].mxu0 }
 0x93e   :  { %v15395_v52 = vadd.f32 %v15394_v17, %v15393_v55  ;;  %v15396_v45 = vpop.f32.mrb[202].mxu0 }
 0x93f   :  { %v15397_v11 = vpop.f32.mrb[203].mxu0 }
 0x940   :  { %v12454_v46 = vadd.f32 %v15395_v52, %v15373_v42  ;;  %v14752_v42 = vld [vmem:[#allocation10] ss:$0 sm:$0xff] }
 0x942   :  { %v12494_v61 = vadd.f32 %v15417_v15, %v12454_v46 }
 0x944   :  { %v12499_v34 = vadd.f32 %v12494_v61, %v11981_v36 }
 0x959   :  { %v15459_v41 = vpop.f32.mrb[212].mxu1 }
 0x95a   :  { %v15460_v21 = vpop.f32.mrb[213].mxu1 }
 0x95b   :  { %v15461_v48 = vadd.f32 %v15460_v21, %v15459_v41  ;;  %v15462_v28 = vpop.f32.mrb[214].mxu1 }
 0x95c   :  { %v15437_v19 = vpop.f32.mrb[204].mxu0  ;;  %v15463_v63 = vpop.f32.mrb[215].mxu1 }
 0x95d   :  { %v15438_v25 = vpop.f32.mrb[205].mxu0 }
 0x95e   :  { %v15439_v3 = vadd.f32 %v15438_v25, %v15437_v19  ;;  %v15440_v60 = vpop.f32.mrb[206].mxu0 }
 0x95f   :  { %v15441_v54 = vpop.f32.mrb[207].mxu0 }
 0x960   :  { %v12972_v10 = vadd.f32 %v15461_v48, %v15439_v3 }
 0x979   :  { %v15503_v30 = vpop.f32.mrb[216].mxu1 }
 0x97a   :  { %v15504_v35 = vpop.f32.mrb[217].mxu1 }
 0x97b   :  { %v15505_v18 = vadd.f32 %v15504_v35, %v15503_v30  ;;  %v15506_v49 = vpop.f32.mrb[218].mxu1 }
 0x97c   :  { %v15481_v29 = vpop.f32.mrb[208].mxu0  ;;  %v15507_v6 = vpop.f32.mrb[219].mxu1 }
 0x97d   :  { %v15482_v32 = vpop.f32.mrb[209].mxu0 }
 0x97e   :  { %v15483_v47 = vadd.f32 %v15482_v32, %v15481_v29  ;;  %v15484_v16 = vpop.f32.mrb[210].mxu0 }
 0x97f   :  { %v15485_v26 = vpop.f32.mrb[211].mxu0 }
 0x980   :  { %v13012_v20 = vadd.f32 %v15483_v47, %v12972_v10 }
 0x982   :  { %v13017_v56 = vadd.f32 %v13012_v20, %v12499_v34 }
 0x999   :  { %v15547_v14 = vpop.f32.mrb[220].mxu1 }
 0x99a   :  { %v15548_v9 = vpop.f32.mrb[221].mxu1 }
 0x99b   :  { %v15549_v5 = vadd.f32 %v15548_v9, %v15547_v14  ;;  %v15550_v38 = vpop.f32.mrb[222].mxu1 }
 0x99c   :  { %v15525_v33 = vpop.f32.mrb[212].mxu0  ;;  %v15551_v62 = vpop.f32.mrb[223].mxu1 }
 0x99d   :  { %v15526_v50 = vpop.f32.mrb[213].mxu0 }
 0x99e   :  { %v15527_v40 = vadd.f32 %v15526_v50, %v15525_v33  ;;  %v15528_v31 = vpop.f32.mrb[214].mxu0 }
 0x99f   :  { %v15529_v22 = vpop.f32.mrb[215].mxu0 }
 0x9a0   :  { %v13490_v8 = vadd.f32 %v15527_v40, %v15505_v18 }
 0x9a2   :  { %v13530_v51 = vadd.f32 %v15549_v5, %v13490_v8 }
 0x9a4   :  { %v13535_v27 = vadd.f32 %v13530_v51, %v13017_v56 }
 0x9a6   :  { %v13543_v12 = vadd.f32 %v14751_v13, %v13535_v27 }
 0x9a8   :  { %v13544_v39 = vpack.c.bf16 %v13543_v12, %v13543_v12 }
 0x9aa   :  { %15579 = vmatmul.mubr.bf16.vlgmr.msra.gmra.mrb[216].mxu0 %v13544_v39 }
 0xa7d   :  { %v13650_v59 = vpop.f32.mrb[216].mxu0 }
 0xa7e   :  { %v13651_v4 = vadd.f32 %v14752_v42, %v13650_v59  ;;  %v15580_v23 = vpop.f32.mrb[217].mxu0 }
 0xa7f   :  { %v13653_v24 = vpop.f32.mrb[218].mxu0 }
 0xa80   :  { %13656 = vst [vmem:[%s20898_s7] sm:$0xff] %v13651_v4  ;;  %v15581_v37 = vpop.f32.mrb[219].mxu0 }
 0xa81   :  { %13661 = vsyncpa [#allocation3], 1 }
 0xa82   :  { %13662 = vsyncpa [#allocation5], 1 }
 0xa83   :  { %13663 = vsyncpa [#allocation8], 1 }
 0xa84   :  { %13664 = vsyncpa [#allocation11], 1 }

</bundles_post_ra>
